<compile_context>
chip_gen: v6e
topology: v6e:2x2x1
jax: 0.10.0
libtpu: 0.0.40
codegen_flags: <defaults>
</compile_context>

<pallas_src>
import math

import numpy as np
import jax
import jax.numpy as jnp
from jax import lax
from jax.experimental import pallas as pl
from jax.experimental.pallas import tpu as pltpu  # noqa: F401  (no-grid kernel; kept for completeness)

# ---------------- config (small, consistent with the module's defaults) ----------------
D_MODEL = 32
N_SEMANTIC = 16
N_STAFF = 4
D_POSITION = 8
ANGLE_CYCLE = 1000.0
D_INNER = 64
N_LAYERS = 2
N_HEAD = 4
D_K = 8
D_V = 8
VOCAB = 32

TG_PAD = 0
TG_EOS = 1
SUMMARY_ID = 2

B = 2                  # batch
S_G = 16               # graph (tg_*) sequence length
S_W = 16               # word (input_ids) sequence length
M_G = B * S_G          # batch-folded graph rows
M_W = B * S_W          # batch-folded word rows

CAT_DIM = N_SEMANTIC + N_STAFF + 1 + 4 * D_POSITION   # 53
CAT_DIM_PAD = 64                                       # zero-padded feature dim for the MXU
LANES = 128
STAT_LANES = 128
NEG_INF = -1e30
LN_EPS = 1e-5                                          # matches nn.LayerNorm default

# ---------------- data slab layout (one lane-dense per-call input) ----------------------
FEAT_OFF = 0                    # rows [0, M_G)        lanes 0:CAT_DIM_PAD   : graph features
DEC_OFF = FEAT_OFF + M_G        # rows [M_G, M_G+M_W)  lanes 0:D_MODEL dec base, lane 32 tgt, lane 33 bmask
SEL_OFF = DEC_OFF + M_W         # rows next M_W        lanes 0:M_G           : latent-broadcast selector
KEY_OFF = SEL_OFF + M_W         # next 8 rows, row 0   lanes 0:M_G           : key (pad) mask
DATA_ROWS = KEY_OFF + 8
TGT_LANE = D_MODEL
BMASK_LANE = D_MODEL + 1


# ---------------- weight slab layout (one lane-dense weight input) ----------------------
def _build_weight_layout():
    layout = {}
    off = 0

    def add(name, rows, cols):
        nonlocal off
        layout[name] = (off, rows, cols)
        off += rows                      # every block's row count is a multiple of 8

    add('w_emb', CAT_DIM_PAD, D_MODEL)
    for stack in ('enc', 'dec'):
        for l in range(N_LAYERS):
            p = f'{stack}{l}_'
            add(p + 'wqkv', D_MODEL, 3 * N_HEAD * D_K)   # fused QKV projection
            add(p + 'wo', N_HEAD * D_V, D_MODEL)
            add(p + 'w1', D_MODEL, D_INNER)
            add(p + 'w2', D_INNER, D_MODEL)
            add(p + 'vec', 8, LANES)                      # b1,b2,ln1_g,ln1_b,ln2_g,ln2_b
    add('w_out', D_MODEL, VOCAB)
    add('b_out', 8, VOCAB)
    add('enc_bias', M_G, M_G)                             # block-diagonal causal bias (const)
    add('dec_bias', M_W, M_W)
    return layout, off


W_LAYOUT, W_ROWS = _build_weight_layout()


def _block_causal(bsz, s):
    """Block-diagonal (per batch row) causal additive bias, built once at pack time."""
    idx = np.arange(bsz * s)
    seg = idx // s
    ok = (seg[None, :] == seg[:, None]) & (idx[None, :] <= idx[:, None])
    return np.where(ok, 0.0, NEG_INF).astype(np.float32)


# ------------------------- in-kernel building blocks (jnp values) -----------------------
def _get(w_ref, name):
    off, r, c = W_LAYOUT[name]
    return w_ref[off:off + r, 0:c]


def _layer_norm(x, g, b):
    mu = jnp.mean(x, axis=-1, keepdims=True)
    var = jnp.mean((x - mu) * (x - mu), axis=-1, keepdims=True)
    return (x - mu) * lax.rsqrt(var + LN_EPS) * g + b


def _mha(h, wqkv, wo, bias):
    """Fused-QKV multi-head attention; head contexts concatenated -> single wo matmul."""
    hk = N_HEAD * D_K
    scale = 1.0 / math.sqrt(D_K)
    qkv = jnp.dot(h, wqkv, preferred_element_type=jnp.float32)          # (M, 3*H*dk)
    ctxs = []
    for hh in range(N_HEAD):
        q = qkv[:, hh * D_K:(hh + 1) * D_K]
        k = qkv[:, hk + hh * D_K: hk + (hh + 1) * D_K]
        v = qkv[:, 2 * hk + hh * D_V: 2 * hk + (hh + 1) * D_V]
        sc = lax.dot_general(q, k, (((1,), (1,)), ((), ())),
                             preferred_element_type=jnp.float32) * scale + bias
        sc = sc - jnp.max(sc, axis=-1, keepdims=True)
        p = jnp.exp(sc)
        p = p / jnp.sum(p, axis=-1, keepdims=True)                      # exact softmax
        ctxs.append(jnp.dot(p, v, preferred_element_type=jnp.float32))  # (M, dv)
    ctx = jnp.concatenate(ctxs, axis=-1)                                # (M, H*dv)
    return jnp.dot(ctx, wo, preferred_element_type=jnp.float32)


def _transformer_layer(w_ref, prefix, h, bias):
    """Post-LN encoder layer (MHA + FFN); dropout = identity (eval mode)."""
    wqkv = _get(w_ref, prefix + 'wqkv')
    wo = _get(w_ref, prefix + 'wo')
    w1 = _get(w_ref, prefix + 'w1')
    w2 = _get(w_ref, prefix + 'w2')
    vec = _get(w_ref, prefix + 'vec')
    b1 = vec[0:1, 0:D_INNER]
    b2 = vec[1:2, 0:D_MODEL]
    g1, gb1 = vec[2:3, 0:D_MODEL], vec[3:4, 0:D_MODEL]
    g2, gb2 = vec[4:5, 0:D_MODEL], vec[5:6, 0:D_MODEL]

    a = _mha(h, wqkv, wo, bias)
    x = _layer_norm(h + a, g1, gb1)
    f = jnp.maximum(jnp.dot(x, w1, preferred_element_type=jnp.float32) + b1, 0.0)
    f = jnp.dot(f, w2, preferred_element_type=jnp.float32) + b2
    return _layer_norm(x + f, g2, gb2)


# ------------------------------- fused forward kernel ----------------------------------
def _fused_forward_kernel(data_ref, w_ref, stats_ref):
    # ---- graph encoder (deducer): embedding + (block-causal & pad)-masked attention ----
    feats = data_ref[FEAT_OFF:FEAT_OFF + M_G, 0:CAT_DIM_PAD]            # (M_G, 64)
    h = jnp.dot(feats, _get(w_ref, 'w_emb'),
                preferred_element_type=jnp.float32)                     # (M_G, D)
    keymask = data_ref[KEY_OFF:KEY_OFF + 1, 0:M_G]                      # (1, M_G)
    enc_bias = _get(w_ref, 'enc_bias') + jnp.where(keymask > 0.0, 0.0, NEG_INF)
    for l in range(N_LAYERS):
        h = _transformer_layer(w_ref, f'enc{l}_', h, enc_bias)

    # latent = graph_code[tg_eos], broadcast to each row's decoder segment via the
    # precomputed (M_W, M_G) selection matrix (exactly one EOS per batch row assumed).
    sel = data_ref[SEL_OFF:SEL_OFF + M_W, 0:M_G]
    latent = jnp.dot(sel, h, preferred_element_type=jnp.float32)        # (M_W, D)

    # ---- word decoder: (token emb + pos enc) + latent, block-causal attention stack ----
    x = data_ref[DEC_OFF:DEC_OFF + M_W, 0:D_MODEL] + latent
    dec_bias = _get(w_ref, 'dec_bias')
    for l in range(N_LAYERS):
        x = _transformer_layer(w_ref, f'dec{l}_', x, dec_bias)
    logits = (jnp.dot(x, _get(w_ref, 'w_out'), preferred_element_type=jnp.float32)
              + _get(w_ref, 'b_out')[0:1, :])                           # (M_W, V)

    # ---- masked cross-entropy + accuracy (global sums over the folded batch) ----
    tgt = data_ref[DEC_OFF:DEC_OFF + M_W, TGT_LANE:TGT_LANE + 1].astype(jnp.int32)
    bmask = data_ref[DEC_OFF:DEC_OFF + M_W, BMASK_LANE:BMASK_LANE + 1]  # (M_W, 1) f32
    mx = jnp.max(logits, axis=-1, keepdims=True)
    lse = jnp.log(jnp.sum(jnp.exp(logits - mx), axis=-1, keepdims=True)) + mx
    iota = lax.broadcasted_iota(jnp.int32, (M_W, VOCAB), 1)
    onehot = (iota == tgt).astype(jnp.float32)
    tgt_logit = jnp.sum(logits * onehot, axis=-1, keepdims=True)
    ce = lse - tgt_logit                                                # (M_W, 1)
    # argmax (first occurrence) via min-of-matching-index
    pred = jnp.min(jnp.where(logits == mx, iota, VOCAB), axis=-1, keepdims=True)
    correct = (pred == tgt).astype(jnp.float32)

    ce_sum = jnp.sum(ce * bmask, keepdims=True)                         # (1, 1)
    cor_sum = jnp.sum(correct * bmask, keepdims=True)
    cnt = jnp.sum(bmask, keepdims=True)
    lane = lax.broadcasted_iota(jnp.int32, (1, STAT_LANES), 1)
    stats_ref[...] = (jnp.where(lane == 0, ce_sum, 0.0)
                      + jnp.where(lane == 1, cor_sum, 0.0)
                      + jnp.where(lane == 2, cnt, 0.0))


def fused_forward(data_slab, weight_slab):
    # No grid: single invocation, whole slabs resident in VMEM (< 0.5 MiB total),
    # no per-step pipeline/double-buffering, single lane-dense output store.
    return pl.pallas_call(
        _fused_forward_kernel,
        out_shape=jax.ShapeDtypeStruct((1, STAT_LANES), jnp.float32),
    )(data_slab, weight_slab)


# ------------------------------- plain-JAX glue -----------------------------------------
def sinusoid_encode(v, d, cycle):
    """v: (...,) float -> (..., d) sin/cos features with base `cycle`."""
    i = jnp.arange(d // 2, dtype=jnp.float32)
    freq = 1.0 / (cycle ** (2.0 * i / d))
    ang = v[..., None] * freq
    return jnp.concatenate([jnp.sin(ang), jnp.cos(ang)], axis=-1)


def loss_forward(weight_slab, tok_emb, batch):
    """GraphParaffEncoderLoss.forward (training path): returns (loss, {'acc': acc})."""
    tg_id = batch['tg_id']

    # TODO(synk): TimewiseGraphEncoder source not provided; using one-hot(id/staff) +
    #             confidence + sinusoid(x,y,sy1,sy2) concat, matching its output_dim role.
    id_oh = jax.nn.one_hot(tg_id, N_SEMANTIC, dtype=jnp.float32)
    st_oh = jax.nn.one_hot(batch['tg_staff'], N_STAFF, dtype=jnp.float32)
    conf = batch['tg_confidence'][..., None].astype(jnp.float32)
    pos_feats = [sinusoid_encode(batch[k].astype(jnp.float32), D_POSITION, ANGLE_CYCLE)
                 for k in ('tg_x', 'tg_y', 'tg_sy1', 'tg_sy2')]
    feats = jnp.concatenate([id_oh, st_oh, conf] + pos_feats, axis=-1)        # (B,S_G,53)
    feats = jnp.pad(feats, ((0, 0), (0, 0), (0, CAT_DIM_PAD - CAT_DIM)))
    feats2d = feats.reshape(M_G, CAT_DIM_PAD)

    keymask_row = (tg_id != TG_PAD).astype(jnp.float32).reshape(1, M_G)

    # eos selector: sel[b*S_W+i, b*S_G+j] = (tg_id[b,j] == EOS)
    eosf = (tg_id == TG_EOS).astype(jnp.float32)                              # (B, S_G)
    eye = jnp.eye(B, dtype=jnp.float32)
    sel = eye[:, None, :, None] * eosf[None, None, :, :]                      # (B,1,B,S_G)
    sel = jnp.broadcast_to(sel, (B, S_W, B, S_G)).reshape(M_W, M_G)

    # TODO(synk): SeqShareVAE decoder source not provided; token emb + sinusoid(position),
    #             latent is broadcast-added per sequence inside the kernel.
    dec_base = (tok_emb[batch['input_ids']]
                + sinusoid_encode(batch['position'].astype(jnp.float32), D_MODEL, 10000.0))
    dec_base2d = dec_base.reshape(M_W, D_MODEL)

    tgt_f = batch['output_ids'].astype(jnp.float32).reshape(M_W, 1)
    bm_f = batch['body_mask'].astype(jnp.float32).reshape(M_W, 1)

    # pack ONE lane-dense (DATA_ROWS, 128) data slab -> single input DMA descriptor
    feat_blk = jnp.pad(feats2d, ((0, 0), (0, LANES - CAT_DIM_PAD)))
    dec_blk = jnp.concatenate(
        [dec_base2d, tgt_f, bm_f, jnp.zeros((M_W, LANES - D_MODEL - 2), jnp.float32)], axis=1)
    sel_blk = jnp.pad(sel, ((0, 0), (0, LANES - M_G)))
    key_blk = jnp.pad(keymask_row, ((0, 7), (0, LANES - M_G)))
    data_slab = jnp.concatenate([feat_blk, dec_blk, sel_blk, key_blk], axis=0)

    stats = fused_forward(data_slab, weight_slab)
    cnt = jnp.maximum(stats[0, 2], 1.0)      # guard against all-false body_mask
    return stats[0, 0] / cnt, {'acc': stats[0, 1] / cnt}


# ------------------------------- parameter init & packing --------------------------------
def xavier(key, shape, gain):
    a = gain * math.sqrt(6.0 / (shape[0] + shape[1]))
    return jax.random.uniform(key, shape, jnp.float32, -a, a)


def init_layer_stack(key, n_layers, gain):
    wqkv, wo, w1, w2 = [], [], [], []
    for k in jax.random.split(key, n_layers):
        ks = jax.random.split(k, 6)
        wq = xavier(ks[0], (D_MODEL, N_HEAD * D_K), gain)
        wk = xavier(ks[1], (D_MODEL, N_HEAD * D_K), gain)
        wv = xavier(ks[2], (D_MODEL, N_HEAD * D_V), gain)
        wqkv.append(jnp.concatenate([wq, wk, wv], axis=1))   # fused QKV projection
        wo.append(xavier(ks[3], (N_HEAD * D_V, D_MODEL), gain))
        w1.append(xavier(ks[4], (D_MODEL, D_INNER), gain))
        w2.append(xavier(ks[5], (D_INNER, D_MODEL), gain))
    return {
        'wqkv': jnp.stack(wqkv), 'wo': jnp.stack(wo),
        'w1': jnp.stack(w1), 'b1': jnp.zeros((n_layers, D_INNER), jnp.float32),
        'w2': jnp.stack(w2), 'b2': jnp.zeros((n_layers, D_MODEL), jnp.float32),
        'ln1_g': jnp.ones((n_layers, D_MODEL), jnp.float32),
        'ln1_b': jnp.zeros((n_layers, D_MODEL), jnp.float32),
        'ln2_g': jnp.ones((n_layers, D_MODEL), jnp.float32),
        'ln2_b': jnp.zeros((n_layers, D_MODEL), jnp.float32),
    }


def init_params(key):
    gain_enc = (N_LAYERS * 2) ** (-0.5)       # matches the xavier gain used on the deducer
    k0, k1, k2, k3, k4 = jax.random.split(key, 5)
    return {
        'w_emb': xavier(k0, (CAT_DIM_PAD, D_MODEL), gain_enc),
        'enc': init_layer_stack(k1, N_LAYERS, gain_enc),
        'tok_emb': 0.02 * jax.random.normal(k2, (VOCAB, D_MODEL), jnp.float32),
        'dec': init_layer_stack(k3, N_LAYERS, 1.0),
        'w_out': xavier(k4, (D_MODEL, VOCAB), 1.0),
        'b_out': jnp.zeros((VOCAB,), jnp.float32),
    }


def pack_params(params):
    """Pack all weights + constant biases into one lane-dense (W_ROWS, 128) slab (done once)."""
    W = np.zeros((W_ROWS, LANES), np.float32)

    def put(name, arr):
        arr = np.asarray(arr, np.float32)
        off, r, c = W_LAYOUT[name]
        W[off:off + arr.shape[0], :arr.shape[1]] = arr

    put('w_emb', params['w_emb'])
    for stack in ('enc', 'dec'):
        sp = params[stack]
        for l in range(N_LAYERS):
            p = f'{stack}{l}_'
            put(p + 'wqkv', sp['wqkv'][l])
            put(p + 'wo', sp['wo'][l])
            put(p + 'w1', sp['w1'][l])
            put(p + 'w2', sp['w2'][l])
            vec = np.zeros((8, LANES), np.float32)
            vec[0, :D_INNER] = np.asarray(sp['b1'][l])
            vec[1, :D_MODEL] = np.asarray(sp['b2'][l])
            vec[2, :D_MODEL] = np.asarray(sp['ln1_g'][l])
            vec[3, :D_MODEL] = np.asarray(sp['ln1_b'][l])
            vec[4, :D_MODEL] = np.asarray(sp['ln2_g'][l])
            vec[5, :D_MODEL] = np.asarray(sp['ln2_b'][l])
            put(p + 'vec', vec)
    put('w_out', params['w_out'])
    b_out = np.zeros((8, VOCAB), np.float32)
    b_out[0] = np.asarray(params['b_out'])
    put('b_out', b_out)
    put('enc_bias', _block_causal(B, S_G))     # trace-time constant causal masks
    put('dec_bias', _block_causal(B, S_W))
    return jnp.asarray(W)


# ------------------------------------- main ----------------------------------------------
if __name__ == "__main__":
    key = jax.random.PRNGKey(0)
    k_par, k_in = jax.random.split(key)
    params = init_params(k_par)
    weight_slab = pack_params(params)
    tok_emb = params['tok_emb']

    ks = jax.random.split(k_in, 10)
    tg_id = jax.random.randint(ks[0], (B, S_G), 2, N_SEMANTIC).astype(jnp.int32)
    tg_id = tg_id.at[:, -2].set(TG_EOS).at[:, -1].set(TG_PAD)   # one EOS per row, one pad
    tg_staff = jax.random.randint(ks[1], (B, S_G), 0, N_STAFF).astype(jnp.int32)
    tg_confidence = jax.random.uniform(ks[2], (B, S_G), jnp.float32)
    tg_x = jax.random.uniform(ks[3], (B, S_G), jnp.float32) * 100.0
    tg_y = jax.random.uniform(ks[4], (B, S_G), jnp.float32) * 100.0
    tg_sy1 = jax.random.uniform(ks[5], (B, S_G), jnp.float32) * 10.0
    tg_sy2 = jax.random.uniform(ks[6], (B, S_G), jnp.float32) * 10.0

    input_ids = jax.random.randint(ks[7], (B, S_W), 3, VOCAB).astype(jnp.int32)
    input_ids = input_ids.at[:, 0].set(SUMMARY_ID)
    output_ids = jax.random.randint(ks[8], (B, S_W), 3, VOCAB).astype(jnp.int32)
    position = jnp.broadcast_to(jnp.arange(S_W, dtype=jnp.float32), (B, S_W))
    body_mask = jnp.broadcast_to(jnp.arange(S_W) >= 2, (B, S_W))

    batch = {
        'tg_id': tg_id, 'tg_staff': tg_staff, 'tg_confidence': tg_confidence,
        'tg_x': tg_x, 'tg_y': tg_y, 'tg_sy1': tg_sy1, 'tg_sy2': tg_sy2,
        'input_ids': input_ids, 'output_ids': output_ids,
        'position': position, 'body_mask': body_mask,
    }

    loss, metric = jax.jit(loss_forward)(weight_slab, tok_emb, batch)
    jax.block_until_ready((loss, metric['acc']))
    assert jnp.isfinite(loss) and jnp.isfinite(metric['acc'])
    print("KERNEL_OK")
</pallas_src>

<mosaic_0001>
module attributes {stable_mosaic.version = 11 : i64} {
  func.func @_fused_forward_kernel(%arg0: memref<104x128xf32, #tpu.memory_space<vmem>>, %arg1: memref<840x128xf32, #tpu.memory_space<vmem>>, %arg2: memref<1x128xf32, #tpu.memory_space<vmem>>) attributes {dimension_semantics = [], scalar_prefetch = 0 : i64, scratch_operands = 0 : i64, tpu.core_type = #tpu.core_type<tc>} {
    %c0 = arith.constant 0 : index
    %c0_0 = arith.constant 0 : index
    %0 = vector.load %arg0[%c0, %c0_0] : memref<104x128xf32, #tpu.memory_space<vmem>>, vector<32x64xf32>
    %c0_1 = arith.constant 0 : index
    %c0_2 = arith.constant 0 : index
    %1 = vector.load %arg1[%c0_1, %c0_2] : memref<840x128xf32, #tpu.memory_space<vmem>>, vector<64x32xf32>
    %cst = arith.constant dense<0.000000e+00> : vector<32x32xf32>
    %2 = tpu.matmul %0, %1, %cst {dimension_numbers = #tpu.dot_dimension_numbers<[1], [0], [0], [1], [0, 0, 1, 1], [], []>} : vector<32x64xf32>, vector<64x32xf32>, vector<32x32xf32> -> vector<32x32xf32>
    %c96 = arith.constant 96 : index
    %c0_3 = arith.constant 0 : index
    %3 = vector.load %arg0[%c96, %c0_3] : memref<104x128xf32, #tpu.memory_space<vmem>>, vector<1x32xf32>
    %c776 = arith.constant 776 : index
    %c0_4 = arith.constant 0 : index
    %4 = vector.load %arg1[%c776, %c0_4] : memref<840x128xf32, #tpu.memory_space<vmem>>, vector<32x32xf32>
    %cst_5 = arith.constant 0.000000e+00 : f32
    %5 = vector.broadcast %cst_5 : f32 to vector<1x32xf32>
    %6 = arith.cmpf ogt, %3, %5 : vector<1x32xf32>
    %cst_6 = arith.constant 0.000000e+00 : f32
    %cst_7 = arith.constant -1.000000e+30 : f32
    %7 = vector.broadcast %cst_6 : f32 to vector<1x32xf32>
    %8 = vector.broadcast %cst_7 : f32 to vector<1x32xf32>
    %9 = arith.select %6, %7, %8 : vector<1x32xi1>, vector<1x32xf32>
    %10 = vector.broadcast %9 : vector<1x32xf32> to vector<32x32xf32>
    %11 = arith.addf %4, %10 : vector<32x32xf32>
    %c64 = arith.constant 64 : index
    %c0_8 = arith.constant 0 : index
    %12 = vector.load %arg1[%c64, %c0_8] : memref<840x128xf32, #tpu.memory_space<vmem>>, vector<32x96xf32>
    %c96_9 = arith.constant 96 : index
    %c0_10 = arith.constant 0 : index
    %13 = vector.load %arg1[%c96_9, %c0_10] : memref<840x128xf32, #tpu.memory_space<vmem>>, vector<32x32xf32>
    %c128 = arith.constant 128 : index
    %c0_11 = arith.constant 0 : index
    %14 = vector.load %arg1[%c128, %c0_11] : memref<840x128xf32, #tpu.memory_space<vmem>>, vector<32x64xf32>
    %c160 = arith.constant 160 : index
    %c0_12 = arith.constant 0 : index
    %15 = vector.load %arg1[%c160, %c0_12] : memref<840x128xf32, #tpu.memory_space<vmem>>, vector<64x32xf32>
    %c224 = arith.constant 224 : index
    %c0_13 = arith.constant 0 : index
    %16 = vector.load %arg1[%c224, %c0_13] : memref<840x128xf32, #tpu.memory_space<vmem>>, vector<8x128xf32>
    %17 = vector.extract_strided_slice %16 {offsets = [0, 0], sizes = [1, 64], strides = [1, 1]} : vector<8x128xf32> to vector<1x64xf32>
    %18 = vector.extract_strided_slice %16 {offsets = [1, 0], sizes = [1, 32], strides = [1, 1]} : vector<8x128xf32> to vector<1x32xf32>
    %19 = vector.extract_strided_slice %16 {offsets = [2, 0], sizes = [1, 32], strides = [1, 1]} : vector<8x128xf32> to vector<1x32xf32>
    %20 = vector.extract_strided_slice %16 {offsets = [3, 0], sizes = [1, 32], strides = [1, 1]} : vector<8x128xf32> to vector<1x32xf32>
    %21 = vector.extract_strided_slice %16 {offsets = [4, 0], sizes = [1, 32], strides = [1, 1]} : vector<8x128xf32> to vector<1x32xf32>
    %22 = vector.extract_strided_slice %16 {offsets = [5, 0], sizes = [1, 32], strides = [1, 1]} : vector<8x128xf32> to vector<1x32xf32>
    %cst_14 = arith.constant dense<0.000000e+00> : vector<32x96xf32>
    %23 = tpu.matmul %2, %12, %cst_14 {dimension_numbers = #tpu.dot_dimension_numbers<[1], [0], [0], [1], [0, 0, 1, 1], [], []>} : vector<32x32xf32>, vector<32x96xf32>, vector<32x96xf32> -> vector<32x96xf32>
    %24 = vector.extract_strided_slice %23 {offsets = [0, 0], sizes = [32, 8], strides = [1, 1]} : vector<32x96xf32> to vector<32x8xf32>
    %25 = vector.extract_strided_slice %23 {offsets = [0, 32], sizes = [32, 8], strides = [1, 1]} : vector<32x96xf32> to vector<32x8xf32>
    %26 = vector.extract_strided_slice %23 {offsets = [0, 64], sizes = [32, 8], strides = [1, 1]} : vector<32x96xf32> to vector<32x8xf32>
    %cst_15 = arith.constant dense<0.000000e+00> : vector<32x32xf32>
    %27 = tpu.matmul %24, %25, %cst_15 {dimension_numbers = #tpu.dot_dimension_numbers<[1], [1], [0], [0], [0, 0, 1, 0], [], []>} : vector<32x8xf32>, vector<32x8xf32>, vector<32x32xf32> -> vector<32x32xf32>
    %cst_16 = arith.constant 0.353553385 : f32
    %28 = vector.broadcast %cst_16 : f32 to vector<32x32xf32>
    %29 = arith.mulf %27, %28 : vector<32x32xf32>
    %30 = arith.addf %29, %11 : vector<32x32xf32>
    %cst_17 = arith.constant dense<0xFF800000> : vector<32xf32>
    %31 = vector.multi_reduction <maximumf>, %30, %cst_17 [1] : vector<32x32xf32> to vector<32xf32>
    %32 = vector.shape_cast %31 : vector<32xf32> to vector<32x1xf32>
    %33 = vector.broadcast %32 : vector<32x1xf32> to vector<32x32xf32>
    %34 = arith.subf %30, %33 : vector<32x32xf32>
    %35 = math.exp %34 : vector<32x32xf32>
    %cst_18 = arith.constant dense<0.000000e+00> : vector<32xf32>
    %36 = vector.multi_reduction <add>, %35, %cst_18 [1] : vector<32x32xf32> to vector<32xf32>
    %37 = vector.shape_cast %36 : vector<32xf32> to vector<32x1xf32>
    %38 = vector.broadcast %37 : vector<32x1xf32> to vector<32x32xf32>
    %39 = arith.divf %35, %38 : vector<32x32xf32>
    %cst_19 = arith.constant dense<0.000000e+00> : vector<32x8xf32>
    %40 = tpu.matmul %39, %26, %cst_19 {dimension_numbers = #tpu.dot_dimension_numbers<[1], [0], [0], [1], [0, 0, 1, 1], [], []>} : vector<32x32xf32>, vector<32x8xf32>, vector<32x8xf32> -> vector<32x8xf32>
    %41 = vector.extract_strided_slice %23 {offsets = [0, 8], sizes = [32, 8], strides = [1, 1]} : vector<32x96xf32> to vector<32x8xf32>
    %42 = vector.extract_strided_slice %23 {offsets = [0, 40], sizes = [32, 8], strides = [1, 1]} : vector<32x96xf32> to vector<32x8xf32>
    %43 = vector.extract_strided_slice %23 {offsets = [0, 72], sizes = [32, 8], strides = [1, 1]} : vector<32x96xf32> to vector<32x8xf32>
    %cst_20 = arith.constant dense<0.000000e+00> : vector<32x32xf32>
    %44 = tpu.matmul %41, %42, %cst_20 {dimension_numbers = #tpu.dot_dimension_numbers<[1], [1], [0], [0], [0, 0, 1, 0], [], []>} : vector<32x8xf32>, vector<32x8xf32>, vector<32x32xf32> -> vector<32x32xf32>
    %cst_21 = arith.constant 0.353553385 : f32
    %45 = vector.broadcast %cst_21 : f32 to vector<32x32xf32>
    %46 = arith.mulf %44, %45 : vector<32x32xf32>
    %47 = arith.addf %46, %11 : vector<32x32xf32>
    %cst_22 = arith.constant dense<0xFF800000> : vector<32xf32>
    %48 = vector.multi_reduction <maximumf>, %47, %cst_22 [1] : vector<32x32xf32> to vector<32xf32>
    %49 = vector.shape_cast %48 : vector<32xf32> to vector<32x1xf32>
    %50 = vector.broadcast %49 : vector<32x1xf32> to vector<32x32xf32>
    %51 = arith.subf %47, %50 : vector<32x32xf32>
    %52 = math.exp %51 : vector<32x32xf32>
    %cst_23 = arith.constant dense<0.000000e+00> : vector<32xf32>
    %53 = vector.multi_reduction <add>, %52, %cst_23 [1] : vector<32x32xf32> to vector<32xf32>
    %54 = vector.shape_cast %53 : vector<32xf32> to vector<32x1xf32>
    %55 = vector.broadcast %54 : vector<32x1xf32> to vector<32x32xf32>
    %56 = arith.divf %52, %55 : vector<32x32xf32>
    %cst_24 = arith.constant dense<0.000000e+00> : vector<32x8xf32>
    %57 = tpu.matmul %56, %43, %cst_24 {dimension_numbers = #tpu.dot_dimension_numbers<[1], [0], [0], [1], [0, 0, 1, 1], [], []>} : vector<32x32xf32>, vector<32x8xf32>, vector<32x8xf32> -> vector<32x8xf32>
    %58 = vector.extract_strided_slice %23 {offsets = [0, 16], sizes = [32, 8], strides = [1, 1]} : vector<32x96xf32> to vector<32x8xf32>
    %59 = vector.extract_strided_slice %23 {offsets = [0, 48], sizes = [32, 8], strides = [1, 1]} : vector<32x96xf32> to vector<32x8xf32>
    %60 = vector.extract_strided_slice %23 {offsets = [0, 80], sizes = [32, 8], strides = [1, 1]} : vector<32x96xf32> to vector<32x8xf32>
    %cst_25 = arith.constant dense<0.000000e+00> : vector<32x32xf32>
    %61 = tpu.matmul %58, %59, %cst_25 {dimension_numbers = #tpu.dot_dimension_numbers<[1], [1], [0], [0], [0, 0, 1, 0], [], []>} : vector<32x8xf32>, vector<32x8xf32>, vector<32x32xf32> -> vector<32x32xf32>
    %cst_26 = arith.constant 0.353553385 : f32
    %62 = vector.broadcast %cst_26 : f32 to vector<32x32xf32>
    %63 = arith.mulf %61, %62 : vector<32x32xf32>
    %64 = arith.addf %63, %11 : vector<32x32xf32>
    %cst_27 = arith.constant dense<0xFF800000> : vector<32xf32>
    %65 = vector.multi_reduction <maximumf>, %64, %cst_27 [1] : vector<32x32xf32> to vector<32xf32>
    %66 = vector.shape_cast %65 : vector<32xf32> to vector<32x1xf32>
    %67 = vector.broadcast %66 : vector<32x1xf32> to vector<32x32xf32>
    %68 = arith.subf %64, %67 : vector<32x32xf32>
    %69 = math.exp %68 : vector<32x32xf32>
    %cst_28 = arith.constant dense<0.000000e+00> : vector<32xf32>
    %70 = vector.multi_reduction <add>, %69, %cst_28 [1] : vector<32x32xf32> to vector<32xf32>
    %71 = vector.shape_cast %70 : vector<32xf32> to vector<32x1xf32>
    %72 = vector.broadcast %71 : vector<32x1xf32> to vector<32x32xf32>
    %73 = arith.divf %69, %72 : vector<32x32xf32>
    %cst_29 = arith.constant dense<0.000000e+00> : vector<32x8xf32>
    %74 = tpu.matmul %73, %60, %cst_29 {dimension_numbers = #tpu.dot_dimension_numbers<[1], [0], [0], [1], [0, 0, 1, 1], [], []>} : vector<32x32xf32>, vector<32x8xf32>, vector<32x8xf32> -> vector<32x8xf32>
    %75 = vector.extract_strided_slice %23 {offsets = [0, 24], sizes = [32, 8], strides = [1, 1]} : vector<32x96xf32> to vector<32x8xf32>
    %76 = vector.extract_strided_slice %23 {offsets = [0, 56], sizes = [32, 8], strides = [1, 1]} : vector<32x96xf32> to vector<32x8xf32>
    %77 = vector.extract_strided_slice %23 {offsets = [0, 88], sizes = [32, 8], strides = [1, 1]} : vector<32x96xf32> to vector<32x8xf32>
    %cst_30 = arith.constant dense<0.000000e+00> : vector<32x32xf32>
    %78 = tpu.matmul %75, %76, %cst_30 {dimension_numbers = #tpu.dot_dimension_numbers<[1], [1], [0], [0], [0, 0, 1, 0], [], []>} : vector<32x8xf32>, vector<32x8xf32>, vector<32x32xf32> -> vector<32x32xf32>
    %cst_31 = arith.constant 0.353553385 : f32
    %79 = vector.broadcast %cst_31 : f32 to vector<32x32xf32>
    %80 = arith.mulf %78, %79 : vector<32x32xf32>
    %81 = arith.addf %80, %11 : vector<32x32xf32>
    %cst_32 = arith.constant dense<0xFF800000> : vector<32xf32>
    %82 = vector.multi_reduction <maximumf>, %81, %cst_32 [1] : vector<32x32xf32> to vector<32xf32>
    %83 = vector.shape_cast %82 : vector<32xf32> to vector<32x1xf32>
    %84 = vector.broadcast %83 : vector<32x1xf32> to vector<32x32xf32>
    %85 = arith.subf %81, %84 : vector<32x32xf32>
    %86 = math.exp %85 : vector<32x32xf32>
    %cst_33 = arith.constant dense<0.000000e+00> : vector<32xf32>
    %87 = vector.multi_reduction <add>, %86, %cst_33 [1] : vector<32x32xf32> to vector<32xf32>
    %88 = vector.shape_cast %87 : vector<32xf32> to vector<32x1xf32>
    %89 = vector.broadcast %88 : vector<32x1xf32> to vector<32x32xf32>
    %90 = arith.divf %86, %89 : vector<32x32xf32>
    %cst_34 = arith.constant dense<0.000000e+00> : vector<32x8xf32>
    %91 = tpu.matmul %90, %77, %cst_34 {dimension_numbers = #tpu.dot_dimension_numbers<[1], [0], [0], [1], [0, 0, 1, 1], [], []>} : vector<32x32xf32>, vector<32x8xf32>, vector<32x8xf32> -> vector<32x8xf32>
    %92 = tpu.concatenate %40, %57, %74, %91 in 1 : vector<32x8xf32>, vector<32x8xf32>, vector<32x8xf32>, vector<32x8xf32> -> vector<32x32xf32>
    %cst_35 = arith.constant dense<0.000000e+00> : vector<32x32xf32>
    %93 = tpu.matmul %92, %13, %cst_35 {dimension_numbers = #tpu.dot_dimension_numbers<[1], [0], [0], [1], [0, 0, 1, 1], [], []>} : vector<32x32xf32>, vector<32x32xf32>, vector<32x32xf32> -> vector<32x32xf32>
    %94 = arith.addf %2, %93 : vector<32x32xf32>
    %cst_36 = arith.constant dense<0.000000e+00> : vector<32xf32>
    %95 = vector.multi_reduction <add>, %94, %cst_36 [1] : vector<32x32xf32> to vector<32xf32>
    %96 = vector.shape_cast %95 : vector<32xf32> to vector<32x1xf32>
    %cst_37 = arith.constant 3.200000e+01 : f32
    %97 = vector.broadcast %cst_37 : f32 to vector<32x1xf32>
    %98 = arith.divf %96, %97 : vector<32x1xf32>
    %99 = vector.broadcast %98 : vector<32x1xf32> to vector<32x32xf32>
    %100 = arith.subf %94, %99 : vector<32x32xf32>
    %101 = vector.broadcast %98 : vector<32x1xf32> to vector<32x32xf32>
    %102 = arith.subf %94, %101 : vector<32x32xf32>
    %103 = arith.mulf %100, %102 : vector<32x32xf32>
    %cst_38 = arith.constant dense<0.000000e+00> : vector<32xf32>
    %104 = vector.multi_reduction <add>, %103, %cst_38 [1] : vector<32x32xf32> to vector<32xf32>
    %105 = vector.shape_cast %104 : vector<32xf32> to vector<32x1xf32>
    %cst_39 = arith.constant 3.200000e+01 : f32
    %106 = vector.broadcast %cst_39 : f32 to vector<32x1xf32>
    %107 = arith.divf %105, %106 : vector<32x1xf32>
    %108 = vector.broadcast %98 : vector<32x1xf32> to vector<32x32xf32>
    %109 = arith.subf %94, %108 : vector<32x32xf32>
    %cst_40 = arith.constant 9.99999974E-6 : f32
    %110 = vector.broadcast %cst_40 : f32 to vector<32x1xf32>
    %111 = arith.addf %107, %110 : vector<32x1xf32>
    %112 = math.rsqrt %111 : vector<32x1xf32>
    %113 = vector.broadcast %112 : vector<32x1xf32> to vector<32x32xf32>
    %114 = arith.mulf %109, %113 : vector<32x32xf32>
    %115 = vector.broadcast %19 : vector<1x32xf32> to vector<32x32xf32>
    %116 = arith.mulf %114, %115 : vector<32x32xf32>
    %117 = vector.broadcast %20 : vector<1x32xf32> to vector<32x32xf32>
    %118 = arith.addf %116, %117 : vector<32x32xf32>
    %cst_41 = arith.constant dense<0.000000e+00> : vector<32x64xf32>
    %119 = tpu.matmul %118, %14, %cst_41 {dimension_numbers = #tpu.dot_dimension_numbers<[1], [0], [0], [1], [0, 0, 1, 1], [], []>} : vector<32x32xf32>, vector<32x64xf32>, vector<32x64xf32> -> vector<32x64xf32>
    %120 = vector.broadcast %17 : vector<1x64xf32> to vector<32x64xf32>
    %121 = arith.addf %119, %120 : vector<32x64xf32>
    %cst_42 = arith.constant 0.000000e+00 : f32
    %122 = vector.broadcast %cst_42 : f32 to vector<32x64xf32>
    %123 = arith.maximumf %121, %122 : vector<32x64xf32>
    %cst_43 = arith.constant dense<0.000000e+00> : vector<32x32xf32>
    %124 = tpu.matmul %123, %15, %cst_43 {dimension_numbers = #tpu.dot_dimension_numbers<[1], [0], [0], [1], [0, 0, 1, 1], [], []>} : vector<32x64xf32>, vector<64x32xf32>, vector<32x32xf32> -> vector<32x32xf32>
    %125 = vector.broadcast %18 : vector<1x32xf32> to vector<32x32xf32>
    %126 = arith.addf %124, %125 : vector<32x32xf32>
    %127 = arith.addf %118, %126 : vector<32x32xf32>
    %cst_44 = arith.constant dense<0.000000e+00> : vector<32xf32>
    %128 = vector.multi_reduction <add>, %127, %cst_44 [1] : vector<32x32xf32> to vector<32xf32>
    %129 = vector.shape_cast %128 : vector<32xf32> to vector<32x1xf32>
    %cst_45 = arith.constant 3.200000e+01 : f32
    %130 = vector.broadcast %cst_45 : f32 to vector<32x1xf32>
    %131 = arith.divf %129, %130 : vector<32x1xf32>
    %132 = vector.broadcast %131 : vector<32x1xf32> to vector<32x32xf32>
    %133 = arith.subf %127, %132 : vector<32x32xf32>
    %134 = vector.broadcast %131 : vector<32x1xf32> to vector<32x32xf32>
    %135 = arith.subf %127, %134 : vector<32x32xf32>
    %136 = arith.mulf %133, %135 : vector<32x32xf32>
    %cst_46 = arith.constant dense<0.000000e+00> : vector<32xf32>
    %137 = vector.multi_reduction <add>, %136, %cst_46 [1] : vector<32x32xf32> to vector<32xf32>
    %138 = vector.shape_cast %137 : vector<32xf32> to vector<32x1xf32>
    %cst_47 = arith.constant 3.200000e+01 : f32
    %139 = vector.broadcast %cst_47 : f32 to vector<32x1xf32>
    %140 = arith.divf %138, %139 : vector<32x1xf32>
    %141 = vector.broadcast %131 : vector<32x1xf32> to vector<32x32xf32>
    %142 = arith.subf %127, %141 : vector<32x32xf32>
    %cst_48 = arith.constant 9.99999974E-6 : f32
    %143 = vector.broadcast %cst_48 : f32 to vector<32x1xf32>
    %144 = arith.addf %140, %143 : vector<32x1xf32>
    %145 = math.rsqrt %144 : vector<32x1xf32>
    %146 = vector.broadcast %145 : vector<32x1xf32> to vector<32x32xf32>
    %147 = arith.mulf %142, %146 : vector<32x32xf32>
    %148 = vector.broadcast %21 : vector<1x32xf32> to vector<32x32xf32>
    %149 = arith.mulf %147, %148 : vector<32x32xf32>
    %150 = vector.broadcast %22 : vector<1x32xf32> to vector<32x32xf32>
    %151 = arith.addf %149, %150 : vector<32x32xf32>
    %c232 = arith.constant 232 : index
    %c0_49 = arith.constant 0 : index
    %152 = vector.load %arg1[%c232, %c0_49] : memref<840x128xf32, #tpu.memory_space<vmem>>, vector<32x96xf32>
    %c264 = arith.constant 264 : index
    %c0_50 = arith.constant 0 : index
    %153 = vector.load %arg1[%c264, %c0_50] : memref<840x128xf32, #tpu.memory_space<vmem>>, vector<32x32xf32>
    %c296 = arith.constant 296 : index
    %c0_51 = arith.constant 0 : index
    %154 = vector.load %arg1[%c296, %c0_51] : memref<840x128xf32, #tpu.memory_space<vmem>>, vector<32x64xf32>
    %c328 = arith.constant 328 : index
    %c0_52 = arith.constant 0 : index
    %155 = vector.load %arg1[%c328, %c0_52] : memref<840x128xf32, #tpu.memory_space<vmem>>, vector<64x32xf32>
    %c392 = arith.constant 392 : index
    %c0_53 = arith.constant 0 : index
    %156 = vector.load %arg1[%c392, %c0_53] : memref<840x128xf32, #tpu.memory_space<vmem>>, vector<8x128xf32>
    %157 = vector.extract_strided_slice %156 {offsets = [0, 0], sizes = [1, 64], strides = [1, 1]} : vector<8x128xf32> to vector<1x64xf32>
    %158 = vector.extract_strided_slice %156 {offsets = [1, 0], sizes = [1, 32], strides = [1, 1]} : vector<8x128xf32> to vector<1x32xf32>
    %159 = vector.extract_strided_slice %156 {offsets = [2, 0], sizes = [1, 32], strides = [1, 1]} : vector<8x128xf32> to vector<1x32xf32>
    %160 = vector.extract_strided_slice %156 {offsets = [3, 0], sizes = [1, 32], strides = [1, 1]} : vector<8x128xf32> to vector<1x32xf32>
    %161 = vector.extract_strided_slice %156 {offsets = [4, 0], sizes = [1, 32], strides = [1, 1]} : vector<8x128xf32> to vector<1x32xf32>
    %162 = vector.extract_strided_slice %156 {offsets = [5, 0], sizes = [1, 32], strides = [1, 1]} : vector<8x128xf32> to vector<1x32xf32>
    %cst_54 = arith.constant dense<0.000000e+00> : vector<32x96xf32>
    %163 = tpu.matmul %151, %152, %cst_54 {dimension_numbers = #tpu.dot_dimension_numbers<[1], [0], [0], [1], [0, 0, 1, 1], [], []>} : vector<32x32xf32>, vector<32x96xf32>, vector<32x96xf32> -> vector<32x96xf32>
    %164 = vector.extract_strided_slice %163 {offsets = [0, 0], sizes = [32, 8], strides = [1, 1]} : vector<32x96xf32> to vector<32x8xf32>
    %165 = vector.extract_strided_slice %163 {offsets = [0, 32], sizes = [32, 8], strides = [1, 1]} : vector<32x96xf32> to vector<32x8xf32>
    %166 = vector.extract_strided_slice %163 {offsets = [0, 64], sizes = [32, 8], strides = [1, 1]} : vector<32x96xf32> to vector<32x8xf32>
    %cst_55 = arith.constant dense<0.000000e+00> : vector<32x32xf32>
    %167 = tpu.matmul %164, %165, %cst_55 {dimension_numbers = #tpu.dot_dimension_numbers<[1], [1], [0], [0], [0, 0, 1, 0], [], []>} : vector<32x8xf32>, vector<32x8xf32>, vector<32x32xf32> -> vector<32x32xf32>
    %cst_56 = arith.constant 0.353553385 : f32
    %168 = vector.broadcast %cst_56 : f32 to vector<32x32xf32>
    %169 = arith.mulf %167, %168 : vector<32x32xf32>
    %170 = arith.addf %169, %11 : vector<32x32xf32>
    %cst_57 = arith.constant dense<0xFF800000> : vector<32xf32>
    %171 = vector.multi_reduction <maximumf>, %170, %cst_57 [1] : vector<32x32xf32> to vector<32xf32>
    %172 = vector.shape_cast %171 : vector<32xf32> to vector<32x1xf32>
    %173 = vector.broadcast %172 : vector<32x1xf32> to vector<32x32xf32>
    %174 = arith.subf %170, %173 : vector<32x32xf32>
    %175 = math.exp %174 : vector<32x32xf32>
    %cst_58 = arith.constant dense<0.000000e+00> : vector<32xf32>
    %176 = vector.multi_reduction <add>, %175, %cst_58 [1] : vector<32x32xf32> to vector<32xf32>
    %177 = vector.shape_cast %176 : vector<32xf32> to vector<32x1xf32>
    %178 = vector.broadcast %177 : vector<32x1xf32> to vector<32x32xf32>
    %179 = arith.divf %175, %178 : vector<32x32xf32>
    %cst_59 = arith.constant dense<0.000000e+00> : vector<32x8xf32>
    %180 = tpu.matmul %179, %166, %cst_59 {dimension_numbers = #tpu.dot_dimension_numbers<[1], [0], [0], [1], [0, 0, 1, 1], [], []>} : vector<32x32xf32>, vector<32x8xf32>, vector<32x8xf32> -> vector<32x8xf32>
    %181 = vector.extract_strided_slice %163 {offsets = [0, 8], sizes = [32, 8], strides = [1, 1]} : vector<32x96xf32> to vector<32x8xf32>
    %182 = vector.extract_strided_slice %163 {offsets = [0, 40], sizes = [32, 8], strides = [1, 1]} : vector<32x96xf32> to vector<32x8xf32>
    %183 = vector.extract_strided_slice %163 {offsets = [0, 72], sizes = [32, 8], strides = [1, 1]} : vector<32x96xf32> to vector<32x8xf32>
    %cst_60 = arith.constant dense<0.000000e+00> : vector<32x32xf32>
    %184 = tpu.matmul %181, %182, %cst_60 {dimension_numbers = #tpu.dot_dimension_numbers<[1], [1], [0], [0], [0, 0, 1, 0], [], []>} : vector<32x8xf32>, vector<32x8xf32>, vector<32x32xf32> -> vector<32x32xf32>
    %cst_61 = arith.constant 0.353553385 : f32
    %185 = vector.broadcast %cst_61 : f32 to vector<32x32xf32>
    %186 = arith.mulf %184, %185 : vector<32x32xf32>
    %187 = arith.addf %186, %11 : vector<32x32xf32>
    %cst_62 = arith.constant dense<0xFF800000> : vector<32xf32>
    %188 = vector.multi_reduction <maximumf>, %187, %cst_62 [1] : vector<32x32xf32> to vector<32xf32>
    %189 = vector.shape_cast %188 : vector<32xf32> to vector<32x1xf32>
    %190 = vector.broadcast %189 : vector<32x1xf32> to vector<32x32xf32>
    %191 = arith.subf %187, %190 : vector<32x32xf32>
    %192 = math.exp %191 : vector<32x32xf32>
    %cst_63 = arith.constant dense<0.000000e+00> : vector<32xf32>
    %193 = vector.multi_reduction <add>, %192, %cst_63 [1] : vector<32x32xf32> to vector<32xf32>
    %194 = vector.shape_cast %193 : vector<32xf32> to vector<32x1xf32>
    %195 = vector.broadcast %194 : vector<32x1xf32> to vector<32x32xf32>
    %196 = arith.divf %192, %195 : vector<32x32xf32>
    %cst_64 = arith.constant dense<0.000000e+00> : vector<32x8xf32>
    %197 = tpu.matmul %196, %183, %cst_64 {dimension_numbers = #tpu.dot_dimension_numbers<[1], [0], [0], [1], [0, 0, 1, 1], [], []>} : vector<32x32xf32>, vector<32x8xf32>, vector<32x8xf32> -> vector<32x8xf32>
    %198 = vector.extract_strided_slice %163 {offsets = [0, 16], sizes = [32, 8], strides = [1, 1]} : vector<32x96xf32> to vector<32x8xf32>
    %199 = vector.extract_strided_slice %163 {offsets = [0, 48], sizes = [32, 8], strides = [1, 1]} : vector<32x96xf32> to vector<32x8xf32>
    %200 = vector.extract_strided_slice %163 {offsets = [0, 80], sizes = [32, 8], strides = [1, 1]} : vector<32x96xf32> to vector<32x8xf32>
    %cst_65 = arith.constant dense<0.000000e+00> : vector<32x32xf32>
    %201 = tpu.matmul %198, %199, %cst_65 {dimension_numbers = #tpu.dot_dimension_numbers<[1], [1], [0], [0], [0, 0, 1, 0], [], []>} : vector<32x8xf32>, vector<32x8xf32>, vector<32x32xf32> -> vector<32x32xf32>
    %cst_66 = arith.constant 0.353553385 : f32
    %202 = vector.broadcast %cst_66 : f32 to vector<32x32xf32>
    %203 = arith.mulf %201, %202 : vector<32x32xf32>
    %204 = arith.addf %203, %11 : vector<32x32xf32>
    %cst_67 = arith.constant dense<0xFF800000> : vector<32xf32>
    %205 = vector.multi_reduction <maximumf>, %204, %cst_67 [1] : vector<32x32xf32> to vector<32xf32>
    %206 = vector.shape_cast %205 : vector<32xf32> to vector<32x1xf32>
    %207 = vector.broadcast %206 : vector<32x1xf32> to vector<32x32xf32>
    %208 = arith.subf %204, %207 : vector<32x32xf32>
    %209 = math.exp %208 : vector<32x32xf32>
    %cst_68 = arith.constant dense<0.000000e+00> : vector<32xf32>
    %210 = vector.multi_reduction <add>, %209, %cst_68 [1] : vector<32x32xf32> to vector<32xf32>
    %211 = vector.shape_cast %210 : vector<32xf32> to vector<32x1xf32>
    %212 = vector.broadcast %211 : vector<32x1xf32> to vector<32x32xf32>
    %213 = arith.divf %209, %212 : vector<32x32xf32>
    %cst_69 = arith.constant dense<0.000000e+00> : vector<32x8xf32>
    %214 = tpu.matmul %213, %200, %cst_69 {dimension_numbers = #tpu.dot_dimension_numbers<[1], [0], [0], [1], [0, 0, 1, 1], [], []>} : vector<32x32xf32>, vector<32x8xf32>, vector<32x8xf32> -> vector<32x8xf32>
    %215 = vector.extract_strided_slice %163 {offsets = [0, 24], sizes = [32, 8], strides = [1, 1]} : vector<32x96xf32> to vector<32x8xf32>
    %216 = vector.extract_strided_slice %163 {offsets = [0, 56], sizes = [32, 8], strides = [1, 1]} : vector<32x96xf32> to vector<32x8xf32>
    %217 = vector.extract_strided_slice %163 {offsets = [0, 88], sizes = [32, 8], strides = [1, 1]} : vector<32x96xf32> to vector<32x8xf32>
    %cst_70 = arith.constant dense<0.000000e+00> : vector<32x32xf32>
    %218 = tpu.matmul %215, %216, %cst_70 {dimension_numbers = #tpu.dot_dimension_numbers<[1], [1], [0], [0], [0, 0, 1, 0], [], []>} : vector<32x8xf32>, vector<32x8xf32>, vector<32x32xf32> -> vector<32x32xf32>
    %cst_71 = arith.constant 0.353553385 : f32
    %219 = vector.broadcast %cst_71 : f32 to vector<32x32xf32>
    %220 = arith.mulf %218, %219 : vector<32x32xf32>
    %221 = arith.addf %220, %11 : vector<32x32xf32>
    %cst_72 = arith.constant dense<0xFF800000> : vector<32xf32>
    %222 = vector.multi_reduction <maximumf>, %221, %cst_72 [1] : vector<32x32xf32> to vector<32xf32>
    %223 = vector.shape_cast %222 : vector<32xf32> to vector<32x1xf32>
    %224 = vector.broadcast %223 : vector<32x1xf32> to vector<32x32xf32>
    %225 = arith.subf %221, %224 : vector<32x32xf32>
    %226 = math.exp %225 : vector<32x32xf32>
    %cst_73 = arith.constant dense<0.000000e+00> : vector<32xf32>
    %227 = vector.multi_reduction <add>, %226, %cst_73 [1] : vector<32x32xf32> to vector<32xf32>
    %228 = vector.shape_cast %227 : vector<32xf32> to vector<32x1xf32>
    %229 = vector.broadcast %228 : vector<32x1xf32> to vector<32x32xf32>
    %230 = arith.divf %226, %229 : vector<32x32xf32>
    %cst_74 = arith.constant dense<0.000000e+00> : vector<32x8xf32>
    %231 = tpu.matmul %230, %217, %cst_74 {dimension_numbers = #tpu.dot_dimension_numbers<[1], [0], [0], [1], [0, 0, 1, 1], [], []>} : vector<32x32xf32>, vector<32x8xf32>, vector<32x8xf32> -> vector<32x8xf32>
    %232 = tpu.concatenate %180, %197, %214, %231 in 1 : vector<32x8xf32>, vector<32x8xf32>, vector<32x8xf32>, vector<32x8xf32> -> vector<32x32xf32>
    %cst_75 = arith.constant dense<0.000000e+00> : vector<32x32xf32>
    %233 = tpu.matmul %232, %153, %cst_75 {dimension_numbers = #tpu.dot_dimension_numbers<[1], [0], [0], [1], [0, 0, 1, 1], [], []>} : vector<32x32xf32>, vector<32x32xf32>, vector<32x32xf32> -> vector<32x32xf32>
    %234 = arith.addf %151, %233 : vector<32x32xf32>
    %cst_76 = arith.constant dense<0.000000e+00> : vector<32xf32>
    %235 = vector.multi_reduction <add>, %234, %cst_76 [1] : vector<32x32xf32> to vector<32xf32>
    %236 = vector.shape_cast %235 : vector<32xf32> to vector<32x1xf32>
    %cst_77 = arith.constant 3.200000e+01 : f32
    %237 = vector.broadcast %cst_77 : f32 to vector<32x1xf32>
    %238 = arith.divf %236, %237 : vector<32x1xf32>
    %239 = vector.broadcast %238 : vector<32x1xf32> to vector<32x32xf32>
    %240 = arith.subf %234, %239 : vector<32x32xf32>
    %241 = vector.broadcast %238 : vector<32x1xf32> to vector<32x32xf32>
    %242 = arith.subf %234, %241 : vector<32x32xf32>
    %243 = arith.mulf %240, %242 : vector<32x32xf32>
    %cst_78 = arith.constant dense<0.000000e+00> : vector<32xf32>
    %244 = vector.multi_reduction <add>, %243, %cst_78 [1] : vector<32x32xf32> to vector<32xf32>
    %245 = vector.shape_cast %244 : vector<32xf32> to vector<32x1xf32>
    %cst_79 = arith.constant 3.200000e+01 : f32
    %246 = vector.broadcast %cst_79 : f32 to vector<32x1xf32>
    %247 = arith.divf %245, %246 : vector<32x1xf32>
    %248 = vector.broadcast %238 : vector<32x1xf32> to vector<32x32xf32>
    %249 = arith.subf %234, %248 : vector<32x32xf32>
    %cst_80 = arith.constant 9.99999974E-6 : f32
    %250 = vector.broadcast %cst_80 : f32 to vector<32x1xf32>
    %251 = arith.addf %247, %250 : vector<32x1xf32>
    %252 = math.rsqrt %251 : vector<32x1xf32>
    %253 = vector.broadcast %252 : vector<32x1xf32> to vector<32x32xf32>
    %254 = arith.mulf %249, %253 : vector<32x32xf32>
    %255 = vector.broadcast %159 : vector<1x32xf32> to vector<32x32xf32>
    %256 = arith.mulf %254, %255 : vector<32x32xf32>
    %257 = vector.broadcast %160 : vector<1x32xf32> to vector<32x32xf32>
    %258 = arith.addf %256, %257 : vector<32x32xf32>
    %cst_81 = arith.constant dense<0.000000e+00> : vector<32x64xf32>
    %259 = tpu.matmul %258, %154, %cst_81 {dimension_numbers = #tpu.dot_dimension_numbers<[1], [0], [0], [1], [0, 0, 1, 1], [], []>} : vector<32x32xf32>, vector<32x64xf32>, vector<32x64xf32> -> vector<32x64xf32>
    %260 = vector.broadcast %157 : vector<1x64xf32> to vector<32x64xf32>
    %261 = arith.addf %259, %260 : vector<32x64xf32>
    %cst_82 = arith.constant 0.000000e+00 : f32
    %262 = vector.broadcast %cst_82 : f32 to vector<32x64xf32>
    %263 = arith.maximumf %261, %262 : vector<32x64xf32>
    %cst_83 = arith.constant dense<0.000000e+00> : vector<32x32xf32>
    %264 = tpu.matmul %263, %155, %cst_83 {dimension_numbers = #tpu.dot_dimension_numbers<[1], [0], [0], [1], [0, 0, 1, 1], [], []>} : vector<32x64xf32>, vector<64x32xf32>, vector<32x32xf32> -> vector<32x32xf32>
    %265 = vector.broadcast %158 : vector<1x32xf32> to vector<32x32xf32>
    %266 = arith.addf %264, %265 : vector<32x32xf32>
    %267 = arith.addf %258, %266 : vector<32x32xf32>
    %cst_84 = arith.constant dense<0.000000e+00> : vector<32xf32>
    %268 = vector.multi_reduction <add>, %267, %cst_84 [1] : vector<32x32xf32> to vector<32xf32>
    %269 = vector.shape_cast %268 : vector<32xf32> to vector<32x1xf32>
    %cst_85 = arith.constant 3.200000e+01 : f32
    %270 = vector.broadcast %cst_85 : f32 to vector<32x1xf32>
    %271 = arith.divf %269, %270 : vector<32x1xf32>
    %272 = vector.broadcast %271 : vector<32x1xf32> to vector<32x32xf32>
    %273 = arith.subf %267, %272 : vector<32x32xf32>
    %274 = vector.broadcast %271 : vector<32x1xf32> to vector<32x32xf32>
    %275 = arith.subf %267, %274 : vector<32x32xf32>
    %276 = arith.mulf %273, %275 : vector<32x32xf32>
    %cst_86 = arith.constant dense<0.000000e+00> : vector<32xf32>
    %277 = vector.multi_reduction <add>, %276, %cst_86 [1] : vector<32x32xf32> to vector<32xf32>
    %278 = vector.shape_cast %277 : vector<32xf32> to vector<32x1xf32>
    %cst_87 = arith.constant 3.200000e+01 : f32
    %279 = vector.broadcast %cst_87 : f32 to vector<32x1xf32>
    %280 = arith.divf %278, %279 : vector<32x1xf32>
    %281 = vector.broadcast %271 : vector<32x1xf32> to vector<32x32xf32>
    %282 = arith.subf %267, %281 : vector<32x32xf32>
    %cst_88 = arith.constant 9.99999974E-6 : f32
    %283 = vector.broadcast %cst_88 : f32 to vector<32x1xf32>
    %284 = arith.addf %280, %283 : vector<32x1xf32>
    %285 = math.rsqrt %284 : vector<32x1xf32>
    %286 = vector.broadcast %285 : vector<32x1xf32> to vector<32x32xf32>
    %287 = arith.mulf %282, %286 : vector<32x32xf32>
    %288 = vector.broadcast %161 : vector<1x32xf32> to vector<32x32xf32>
    %289 = arith.mulf %287, %288 : vector<32x32xf32>
    %290 = vector.broadcast %162 : vector<1x32xf32> to vector<32x32xf32>
    %291 = arith.addf %289, %290 : vector<32x32xf32>
    %c64_89 = arith.constant 64 : index
    %c0_90 = arith.constant 0 : index
    %292 = vector.load %arg0[%c64_89, %c0_90] : memref<104x128xf32, #tpu.memory_space<vmem>>, vector<32x32xf32>
    %cst_91 = arith.constant dense<0.000000e+00> : vector<32x32xf32>
    %293 = tpu.matmul %292, %291, %cst_91 {dimension_numbers = #tpu.dot_dimension_numbers<[1], [0], [0], [1], [0, 0, 1, 1], [], []>} : vector<32x32xf32>, vector<32x32xf32>, vector<32x32xf32> -> vector<32x32xf32>
    %c32 = arith.constant 32 : index
    %c0_92 = arith.constant 0 : index
    %294 = vector.load %arg0[%c32, %c0_92] : memref<104x128xf32, #tpu.memory_space<vmem>>, vector<32x32xf32>
    %295 = arith.addf %294, %293 : vector<32x32xf32>
    %c808 = arith.constant 808 : index
    %c0_93 = arith.constant 0 : index
    %296 = vector.load %arg1[%c808, %c0_93] : memref<840x128xf32, #tpu.memory_space<vmem>>, vector<32x32xf32>
    %c400 = arith.constant 400 : index
    %c0_94 = arith.constant 0 : index
    %297 = vector.load %arg1[%c400, %c0_94] : memref<840x128xf32, #tpu.memory_space<vmem>>, vector<32x96xf32>
    %c432 = arith.constant 432 : index
    %c0_95 = arith.constant 0 : index
    %298 = vector.load %arg1[%c432, %c0_95] : memref<840x128xf32, #tpu.memory_space<vmem>>, vector<32x32xf32>
    %c464 = arith.constant 464 : index
    %c0_96 = arith.constant 0 : index
    %299 = vector.load %arg1[%c464, %c0_96] : memref<840x128xf32, #tpu.memory_space<vmem>>, vector<32x64xf32>
    %c496 = arith.constant 496 : index
    %c0_97 = arith.constant 0 : index
    %300 = vector.load %arg1[%c496, %c0_97] : memref<840x128xf32, #tpu.memory_space<vmem>>, vector<64x32xf32>
    %c560 = arith.constant 560 : index
    %c0_98 = arith.constant 0 : index
    %301 = vector.load %arg1[%c560, %c0_98] : memref<840x128xf32, #tpu.memory_space<vmem>>, vector<8x128xf32>
    %302 = vector.extract_strided_slice %301 {offsets = [0, 0], sizes = [1, 64], strides = [1, 1]} : vector<8x128xf32> to vector<1x64xf32>
    %303 = vector.extract_strided_slice %301 {offsets = [1, 0], sizes = [1, 32], strides = [1, 1]} : vector<8x128xf32> to vector<1x32xf32>
    %304 = vector.extract_strided_slice %301 {offsets = [2, 0], sizes = [1, 32], strides = [1, 1]} : vector<8x128xf32> to vector<1x32xf32>
    %305 = vector.extract_strided_slice %301 {offsets = [3, 0], sizes = [1, 32], strides = [1, 1]} : vector<8x128xf32> to vector<1x32xf32>
    %306 = vector.extract_strided_slice %301 {offsets = [4, 0], sizes = [1, 32], strides = [1, 1]} : vector<8x128xf32> to vector<1x32xf32>
    %307 = vector.extract_strided_slice %301 {offsets = [5, 0], sizes = [1, 32], strides = [1, 1]} : vector<8x128xf32> to vector<1x32xf32>
    %cst_99 = arith.constant dense<0.000000e+00> : vector<32x96xf32>
    %308 = tpu.matmul %295, %297, %cst_99 {dimension_numbers = #tpu.dot_dimension_numbers<[1], [0], [0], [1], [0, 0, 1, 1], [], []>} : vector<32x32xf32>, vector<32x96xf32>, vector<32x96xf32> -> vector<32x96xf32>
    %309 = vector.extract_strided_slice %308 {offsets = [0, 0], sizes = [32, 8], strides = [1, 1]} : vector<32x96xf32> to vector<32x8xf32>
    %310 = vector.extract_strided_slice %308 {offsets = [0, 32], sizes = [32, 8], strides = [1, 1]} : vector<32x96xf32> to vector<32x8xf32>
    %311 = vector.extract_strided_slice %308 {offsets = [0, 64], sizes = [32, 8], strides = [1, 1]} : vector<32x96xf32> to vector<32x8xf32>
    %cst_100 = arith.constant dense<0.000000e+00> : vector<32x32xf32>
    %312 = tpu.matmul %309, %310, %cst_100 {dimension_numbers = #tpu.dot_dimension_numbers<[1], [1], [0], [0], [0, 0, 1, 0], [], []>} : vector<32x8xf32>, vector<32x8xf32>, vector<32x32xf32> -> vector<32x32xf32>
    %cst_101 = arith.constant 0.353553385 : f32
    %313 = vector.broadcast %cst_101 : f32 to vector<32x32xf32>
    %314 = arith.mulf %312, %313 : vector<32x32xf32>
    %315 = arith.addf %314, %296 : vector<32x32xf32>
    %cst_102 = arith.constant dense<0xFF800000> : vector<32xf32>
    %316 = vector.multi_reduction <maximumf>, %315, %cst_102 [1] : vector<32x32xf32> to vector<32xf32>
    %317 = vector.shape_cast %316 : vector<32xf32> to vector<32x1xf32>
    %318 = vector.broadcast %317 : vector<32x1xf32> to vector<32x32xf32>
    %319 = arith.subf %315, %318 : vector<32x32xf32>
    %320 = math.exp %319 : vector<32x32xf32>
    %cst_103 = arith.constant dense<0.000000e+00> : vector<32xf32>
    %321 = vector.multi_reduction <add>, %320, %cst_103 [1] : vector<32x32xf32> to vector<32xf32>
    %322 = vector.shape_cast %321 : vector<32xf32> to vector<32x1xf32>
    %323 = vector.broadcast %322 : vector<32x1xf32> to vector<32x32xf32>
    %324 = arith.divf %320, %323 : vector<32x32xf32>
    %cst_104 = arith.constant dense<0.000000e+00> : vector<32x8xf32>
    %325 = tpu.matmul %324, %311, %cst_104 {dimension_numbers = #tpu.dot_dimension_numbers<[1], [0], [0], [1], [0, 0, 1, 1], [], []>} : vector<32x32xf32>, vector<32x8xf32>, vector<32x8xf32> -> vector<32x8xf32>
    %326 = vector.extract_strided_slice %308 {offsets = [0, 8], sizes = [32, 8], strides = [1, 1]} : vector<32x96xf32> to vector<32x8xf32>
    %327 = vector.extract_strided_slice %308 {offsets = [0, 40], sizes = [32, 8], strides = [1, 1]} : vector<32x96xf32> to vector<32x8xf32>
    %328 = vector.extract_strided_slice %308 {offsets = [0, 72], sizes = [32, 8], strides = [1, 1]} : vector<32x96xf32> to vector<32x8xf32>
    %cst_105 = arith.constant dense<0.000000e+00> : vector<32x32xf32>
    %329 = tpu.matmul %326, %327, %cst_105 {dimension_numbers = #tpu.dot_dimension_numbers<[1], [1], [0], [0], [0, 0, 1, 0], [], []>} : vector<32x8xf32>, vector<32x8xf32>, vector<32x32xf32> -> vector<32x32xf32>
    %cst_106 = arith.constant 0.353553385 : f32
    %330 = vector.broadcast %cst_106 : f32 to vector<32x32xf32>
    %331 = arith.mulf %329, %330 : vector<32x32xf32>
    %332 = arith.addf %331, %296 : vector<32x32xf32>
    %cst_107 = arith.constant dense<0xFF800000> : vector<32xf32>
    %333 = vector.multi_reduction <maximumf>, %332, %cst_107 [1] : vector<32x32xf32> to vector<32xf32>
    %334 = vector.shape_cast %333 : vector<32xf32> to vector<32x1xf32>
    %335 = vector.broadcast %334 : vector<32x1xf32> to vector<32x32xf32>
    %336 = arith.subf %332, %335 : vector<32x32xf32>
    %337 = math.exp %336 : vector<32x32xf32>
    %cst_108 = arith.constant dense<0.000000e+00> : vector<32xf32>
    %338 = vector.multi_reduction <add>, %337, %cst_108 [1] : vector<32x32xf32> to vector<32xf32>
    %339 = vector.shape_cast %338 : vector<32xf32> to vector<32x1xf32>
    %340 = vector.broadcast %339 : vector<32x1xf32> to vector<32x32xf32>
    %341 = arith.divf %337, %340 : vector<32x32xf32>
    %cst_109 = arith.constant dense<0.000000e+00> : vector<32x8xf32>
    %342 = tpu.matmul %341, %328, %cst_109 {dimension_numbers = #tpu.dot_dimension_numbers<[1], [0], [0], [1], [0, 0, 1, 1], [], []>} : vector<32x32xf32>, vector<32x8xf32>, vector<32x8xf32> -> vector<32x8xf32>
    %343 = vector.extract_strided_slice %308 {offsets = [0, 16], sizes = [32, 8], strides = [1, 1]} : vector<32x96xf32> to vector<32x8xf32>
    %344 = vector.extract_strided_slice %308 {offsets = [0, 48], sizes = [32, 8], strides = [1, 1]} : vector<32x96xf32> to vector<32x8xf32>
    %345 = vector.extract_strided_slice %308 {offsets = [0, 80], sizes = [32, 8], strides = [1, 1]} : vector<32x96xf32> to vector<32x8xf32>
    %cst_110 = arith.constant dense<0.000000e+00> : vector<32x32xf32>
    %346 = tpu.matmul %343, %344, %cst_110 {dimension_numbers = #tpu.dot_dimension_numbers<[1], [1], [0], [0], [0, 0, 1, 0], [], []>} : vector<32x8xf32>, vector<32x8xf32>, vector<32x32xf32> -> vector<32x32xf32>
    %cst_111 = arith.constant 0.353553385 : f32
    %347 = vector.broadcast %cst_111 : f32 to vector<32x32xf32>
    %348 = arith.mulf %346, %347 : vector<32x32xf32>
    %349 = arith.addf %348, %296 : vector<32x32xf32>
    %cst_112 = arith.constant dense<0xFF800000> : vector<32xf32>
    %350 = vector.multi_reduction <maximumf>, %349, %cst_112 [1] : vector<32x32xf32> to vector<32xf32>
    %351 = vector.shape_cast %350 : vector<32xf32> to vector<32x1xf32>
    %352 = vector.broadcast %351 : vector<32x1xf32> to vector<32x32xf32>
    %353 = arith.subf %349, %352 : vector<32x32xf32>
    %354 = math.exp %353 : vector<32x32xf32>
    %cst_113 = arith.constant dense<0.000000e+00> : vector<32xf32>
    %355 = vector.multi_reduction <add>, %354, %cst_113 [1] : vector<32x32xf32> to vector<32xf32>
    %356 = vector.shape_cast %355 : vector<32xf32> to vector<32x1xf32>
    %357 = vector.broadcast %356 : vector<32x1xf32> to vector<32x32xf32>
    %358 = arith.divf %354, %357 : vector<32x32xf32>
    %cst_114 = arith.constant dense<0.000000e+00> : vector<32x8xf32>
    %359 = tpu.matmul %358, %345, %cst_114 {dimension_numbers = #tpu.dot_dimension_numbers<[1], [0], [0], [1], [0, 0, 1, 1], [], []>} : vector<32x32xf32>, vector<32x8xf32>, vector<32x8xf32> -> vector<32x8xf32>
    %360 = vector.extract_strided_slice %308 {offsets = [0, 24], sizes = [32, 8], strides = [1, 1]} : vector<32x96xf32> to vector<32x8xf32>
    %361 = vector.extract_strided_slice %308 {offsets = [0, 56], sizes = [32, 8], strides = [1, 1]} : vector<32x96xf32> to vector<32x8xf32>
    %362 = vector.extract_strided_slice %308 {offsets = [0, 88], sizes = [32, 8], strides = [1, 1]} : vector<32x96xf32> to vector<32x8xf32>
    %cst_115 = arith.constant dense<0.000000e+00> : vector<32x32xf32>
    %363 = tpu.matmul %360, %361, %cst_115 {dimension_numbers = #tpu.dot_dimension_numbers<[1], [1], [0], [0], [0, 0, 1, 0], [], []>} : vector<32x8xf32>, vector<32x8xf32>, vector<32x32xf32> -> vector<32x32xf32>
    %cst_116 = arith.constant 0.353553385 : f32
    %364 = vector.broadcast %cst_116 : f32 to vector<32x32xf32>
    %365 = arith.mulf %363, %364 : vector<32x32xf32>
    %366 = arith.addf %365, %296 : vector<32x32xf32>
    %cst_117 = arith.constant dense<0xFF800000> : vector<32xf32>
    %367 = vector.multi_reduction <maximumf>, %366, %cst_117 [1] : vector<32x32xf32> to vector<32xf32>
    %368 = vector.shape_cast %367 : vector<32xf32> to vector<32x1xf32>
    %369 = vector.broadcast %368 : vector<32x1xf32> to vector<32x32xf32>
    %370 = arith.subf %366, %369 : vector<32x32xf32>
    %371 = math.exp %370 : vector<32x32xf32>
    %cst_118 = arith.constant dense<0.000000e+00> : vector<32xf32>
    %372 = vector.multi_reduction <add>, %371, %cst_118 [1] : vector<32x32xf32> to vector<32xf32>
    %373 = vector.shape_cast %372 : vector<32xf32> to vector<32x1xf32>
    %374 = vector.broadcast %373 : vector<32x1xf32> to vector<32x32xf32>
    %375 = arith.divf %371, %374 : vector<32x32xf32>
    %cst_119 = arith.constant dense<0.000000e+00> : vector<32x8xf32>
    %376 = tpu.matmul %375, %362, %cst_119 {dimension_numbers = #tpu.dot_dimension_numbers<[1], [0], [0], [1], [0, 0, 1, 1], [], []>} : vector<32x32xf32>, vector<32x8xf32>, vector<32x8xf32> -> vector<32x8xf32>
    %377 = tpu.concatenate %325, %342, %359, %376 in 1 : vector<32x8xf32>, vector<32x8xf32>, vector<32x8xf32>, vector<32x8xf32> -> vector<32x32xf32>
    %cst_120 = arith.constant dense<0.000000e+00> : vector<32x32xf32>
    %378 = tpu.matmul %377, %298, %cst_120 {dimension_numbers = #tpu.dot_dimension_numbers<[1], [0], [0], [1], [0, 0, 1, 1], [], []>} : vector<32x32xf32>, vector<32x32xf32>, vector<32x32xf32> -> vector<32x32xf32>
    %379 = arith.addf %295, %378 : vector<32x32xf32>
    %cst_121 = arith.constant dense<0.000000e+00> : vector<32xf32>
    %380 = vector.multi_reduction <add>, %379, %cst_121 [1] : vector<32x32xf32> to vector<32xf32>
    %381 = vector.shape_cast %380 : vector<32xf32> to vector<32x1xf32>
    %cst_122 = arith.constant 3.200000e+01 : f32
    %382 = vector.broadcast %cst_122 : f32 to vector<32x1xf32>
    %383 = arith.divf %381, %382 : vector<32x1xf32>
    %384 = vector.broadcast %383 : vector<32x1xf32> to vector<32x32xf32>
    %385 = arith.subf %379, %384 : vector<32x32xf32>
    %386 = vector.broadcast %383 : vector<32x1xf32> to vector<32x32xf32>
    %387 = arith.subf %379, %386 : vector<32x32xf32>
    %388 = arith.mulf %385, %387 : vector<32x32xf32>
    %cst_123 = arith.constant dense<0.000000e+00> : vector<32xf32>
    %389 = vector.multi_reduction <add>, %388, %cst_123 [1] : vector<32x32xf32> to vector<32xf32>
    %390 = vector.shape_cast %389 : vector<32xf32> to vector<32x1xf32>
    %cst_124 = arith.constant 3.200000e+01 : f32
    %391 = vector.broadcast %cst_124 : f32 to vector<32x1xf32>
    %392 = arith.divf %390, %391 : vector<32x1xf32>
    %393 = vector.broadcast %383 : vector<32x1xf32> to vector<32x32xf32>
    %394 = arith.subf %379, %393 : vector<32x32xf32>
    %cst_125 = arith.constant 9.99999974E-6 : f32
    %395 = vector.broadcast %cst_125 : f32 to vector<32x1xf32>
    %396 = arith.addf %392, %395 : vector<32x1xf32>
    %397 = math.rsqrt %396 : vector<32x1xf32>
    %398 = vector.broadcast %397 : vector<32x1xf32> to vector<32x32xf32>
    %399 = arith.mulf %394, %398 : vector<32x32xf32>
    %400 = vector.broadcast %304 : vector<1x32xf32> to vector<32x32xf32>
    %401 = arith.mulf %399, %400 : vector<32x32xf32>
    %402 = vector.broadcast %305 : vector<1x32xf32> to vector<32x32xf32>
    %403 = arith.addf %401, %402 : vector<32x32xf32>
    %cst_126 = arith.constant dense<0.000000e+00> : vector<32x64xf32>
    %404 = tpu.matmul %403, %299, %cst_126 {dimension_numbers = #tpu.dot_dimension_numbers<[1], [0], [0], [1], [0, 0, 1, 1], [], []>} : vector<32x32xf32>, vector<32x64xf32>, vector<32x64xf32> -> vector<32x64xf32>
    %405 = vector.broadcast %302 : vector<1x64xf32> to vector<32x64xf32>
    %406 = arith.addf %404, %405 : vector<32x64xf32>
    %cst_127 = arith.constant 0.000000e+00 : f32
    %407 = vector.broadcast %cst_127 : f32 to vector<32x64xf32>
    %408 = arith.maximumf %406, %407 : vector<32x64xf32>
    %cst_128 = arith.constant dense<0.000000e+00> : vector<32x32xf32>
    %409 = tpu.matmul %408, %300, %cst_128 {dimension_numbers = #tpu.dot_dimension_numbers<[1], [0], [0], [1], [0, 0, 1, 1], [], []>} : vector<32x64xf32>, vector<64x32xf32>, vector<32x32xf32> -> vector<32x32xf32>
    %410 = vector.broadcast %303 : vector<1x32xf32> to vector<32x32xf32>
    %411 = arith.addf %409, %410 : vector<32x32xf32>
    %412 = arith.addf %403, %411 : vector<32x32xf32>
    %cst_129 = arith.constant dense<0.000000e+00> : vector<32xf32>
    %413 = vector.multi_reduction <add>, %412, %cst_129 [1] : vector<32x32xf32> to vector<32xf32>
    %414 = vector.shape_cast %413 : vector<32xf32> to vector<32x1xf32>
    %cst_130 = arith.constant 3.200000e+01 : f32
    %415 = vector.broadcast %cst_130 : f32 to vector<32x1xf32>
    %416 = arith.divf %414, %415 : vector<32x1xf32>
    %417 = vector.broadcast %416 : vector<32x1xf32> to vector<32x32xf32>
    %418 = arith.subf %412, %417 : vector<32x32xf32>
    %419 = vector.broadcast %416 : vector<32x1xf32> to vector<32x32xf32>
    %420 = arith.subf %412, %419 : vector<32x32xf32>
    %421 = arith.mulf %418, %420 : vector<32x32xf32>
    %cst_131 = arith.constant dense<0.000000e+00> : vector<32xf32>
    %422 = vector.multi_reduction <add>, %421, %cst_131 [1] : vector<32x32xf32> to vector<32xf32>
    %423 = vector.shape_cast %422 : vector<32xf32> to vector<32x1xf32>
    %cst_132 = arith.constant 3.200000e+01 : f32
    %424 = vector.broadcast %cst_132 : f32 to vector<32x1xf32>
    %425 = arith.divf %423, %424 : vector<32x1xf32>
    %426 = vector.broadcast %416 : vector<32x1xf32> to vector<32x32xf32>
    %427 = arith.subf %412, %426 : vector<32x32xf32>
    %cst_133 = arith.constant 9.99999974E-6 : f32
    %428 = vector.broadcast %cst_133 : f32 to vector<32x1xf32>
    %429 = arith.addf %425, %428 : vector<32x1xf32>
    %430 = math.rsqrt %429 : vector<32x1xf32>
    %431 = vector.broadcast %430 : vector<32x1xf32> to vector<32x32xf32>
    %432 = arith.mulf %427, %431 : vector<32x32xf32>
    %433 = vector.broadcast %306 : vector<1x32xf32> to vector<32x32xf32>
    %434 = arith.mulf %432, %433 : vector<32x32xf32>
    %435 = vector.broadcast %307 : vector<1x32xf32> to vector<32x32xf32>
    %436 = arith.addf %434, %435 : vector<32x32xf32>
    %c568 = arith.constant 568 : index
    %c0_134 = arith.constant 0 : index
    %437 = vector.load %arg1[%c568, %c0_134] : memref<840x128xf32, #tpu.memory_space<vmem>>, vector<32x96xf32>
    %c600 = arith.constant 600 : index
    %c0_135 = arith.constant 0 : index
    %438 = vector.load %arg1[%c600, %c0_135] : memref<840x128xf32, #tpu.memory_space<vmem>>, vector<32x32xf32>
    %c632 = arith.constant 632 : index
    %c0_136 = arith.constant 0 : index
    %439 = vector.load %arg1[%c632, %c0_136] : memref<840x128xf32, #tpu.memory_space<vmem>>, vector<32x64xf32>
    %c664 = arith.constant 664 : index
    %c0_137 = arith.constant 0 : index
    %440 = vector.load %arg1[%c664, %c0_137] : memref<840x128xf32, #tpu.memory_space<vmem>>, vector<64x32xf32>
    %c728 = arith.constant 728 : index
    %c0_138 = arith.constant 0 : index
    %441 = vector.load %arg1[%c728, %c0_138] : memref<840x128xf32, #tpu.memory_space<vmem>>, vector<8x128xf32>
    %442 = vector.extract_strided_slice %441 {offsets = [0, 0], sizes = [1, 64], strides = [1, 1]} : vector<8x128xf32> to vector<1x64xf32>
    %443 = vector.extract_strided_slice %441 {offsets = [1, 0], sizes = [1, 32], strides = [1, 1]} : vector<8x128xf32> to vector<1x32xf32>
    %444 = vector.extract_strided_slice %441 {offsets = [2, 0], sizes = [1, 32], strides = [1, 1]} : vector<8x128xf32> to vector<1x32xf32>
    %445 = vector.extract_strided_slice %441 {offsets = [3, 0], sizes = [1, 32], strides = [1, 1]} : vector<8x128xf32> to vector<1x32xf32>
    %446 = vector.extract_strided_slice %441 {offsets = [4, 0], sizes = [1, 32], strides = [1, 1]} : vector<8x128xf32> to vector<1x32xf32>
    %447 = vector.extract_strided_slice %441 {offsets = [5, 0], sizes = [1, 32], strides = [1, 1]} : vector<8x128xf32> to vector<1x32xf32>
    %cst_139 = arith.constant dense<0.000000e+00> : vector<32x96xf32>
    %448 = tpu.matmul %436, %437, %cst_139 {dimension_numbers = #tpu.dot_dimension_numbers<[1], [0], [0], [1], [0, 0, 1, 1], [], []>} : vector<32x32xf32>, vector<32x96xf32>, vector<32x96xf32> -> vector<32x96xf32>
    %449 = vector.extract_strided_slice %448 {offsets = [0, 0], sizes = [32, 8], strides = [1, 1]} : vector<32x96xf32> to vector<32x8xf32>
    %450 = vector.extract_strided_slice %448 {offsets = [0, 32], sizes = [32, 8], strides = [1, 1]} : vector<32x96xf32> to vector<32x8xf32>
    %451 = vector.extract_strided_slice %448 {offsets = [0, 64], sizes = [32, 8], strides = [1, 1]} : vector<32x96xf32> to vector<32x8xf32>
    %cst_140 = arith.constant dense<0.000000e+00> : vector<32x32xf32>
    %452 = tpu.matmul %449, %450, %cst_140 {dimension_numbers = #tpu.dot_dimension_numbers<[1], [1], [0], [0], [0, 0, 1, 0], [], []>} : vector<32x8xf32>, vector<32x8xf32>, vector<32x32xf32> -> vector<32x32xf32>
    %cst_141 = arith.constant 0.353553385 : f32
    %453 = vector.broadcast %cst_141 : f32 to vector<32x32xf32>
    %454 = arith.mulf %452, %453 : vector<32x32xf32>
    %455 = arith.addf %454, %296 : vector<32x32xf32>
    %cst_142 = arith.constant dense<0xFF800000> : vector<32xf32>
    %456 = vector.multi_reduction <maximumf>, %455, %cst_142 [1] : vector<32x32xf32> to vector<32xf32>
    %457 = vector.shape_cast %456 : vector<32xf32> to vector<32x1xf32>
    %458 = vector.broadcast %457 : vector<32x1xf32> to vector<32x32xf32>
    %459 = arith.subf %455, %458 : vector<32x32xf32>
    %460 = math.exp %459 : vector<32x32xf32>
    %cst_143 = arith.constant dense<0.000000e+00> : vector<32xf32>
    %461 = vector.multi_reduction <add>, %460, %cst_143 [1] : vector<32x32xf32> to vector<32xf32>
    %462 = vector.shape_cast %461 : vector<32xf32> to vector<32x1xf32>
    %463 = vector.broadcast %462 : vector<32x1xf32> to vector<32x32xf32>
    %464 = arith.divf %460, %463 : vector<32x32xf32>
    %cst_144 = arith.constant dense<0.000000e+00> : vector<32x8xf32>
    %465 = tpu.matmul %464, %451, %cst_144 {dimension_numbers = #tpu.dot_dimension_numbers<[1], [0], [0], [1], [0, 0, 1, 1], [], []>} : vector<32x32xf32>, vector<32x8xf32>, vector<32x8xf32> -> vector<32x8xf32>
    %466 = vector.extract_strided_slice %448 {offsets = [0, 8], sizes = [32, 8], strides = [1, 1]} : vector<32x96xf32> to vector<32x8xf32>
    %467 = vector.extract_strided_slice %448 {offsets = [0, 40], sizes = [32, 8], strides = [1, 1]} : vector<32x96xf32> to vector<32x8xf32>
    %468 = vector.extract_strided_slice %448 {offsets = [0, 72], sizes = [32, 8], strides = [1, 1]} : vector<32x96xf32> to vector<32x8xf32>
    %cst_145 = arith.constant dense<0.000000e+00> : vector<32x32xf32>
    %469 = tpu.matmul %466, %467, %cst_145 {dimension_numbers = #tpu.dot_dimension_numbers<[1], [1], [0], [0], [0, 0, 1, 0], [], []>} : vector<32x8xf32>, vector<32x8xf32>, vector<32x32xf32> -> vector<32x32xf32>
    %cst_146 = arith.constant 0.353553385 : f32
    %470 = vector.broadcast %cst_146 : f32 to vector<32x32xf32>
    %471 = arith.mulf %469, %470 : vector<32x32xf32>
    %472 = arith.addf %471, %296 : vector<32x32xf32>
    %cst_147 = arith.constant dense<0xFF800000> : vector<32xf32>
    %473 = vector.multi_reduction <maximumf>, %472, %cst_147 [1] : vector<32x32xf32> to vector<32xf32>
    %474 = vector.shape_cast %473 : vector<32xf32> to vector<32x1xf32>
    %475 = vector.broadcast %474 : vector<32x1xf32> to vector<32x32xf32>
    %476 = arith.subf %472, %475 : vector<32x32xf32>
    %477 = math.exp %476 : vector<32x32xf32>
    %cst_148 = arith.constant dense<0.000000e+00> : vector<32xf32>
    %478 = vector.multi_reduction <add>, %477, %cst_148 [1] : vector<32x32xf32> to vector<32xf32>
    %479 = vector.shape_cast %478 : vector<32xf32> to vector<32x1xf32>
    %480 = vector.broadcast %479 : vector<32x1xf32> to vector<32x32xf32>
    %481 = arith.divf %477, %480 : vector<32x32xf32>
    %cst_149 = arith.constant dense<0.000000e+00> : vector<32x8xf32>
    %482 = tpu.matmul %481, %468, %cst_149 {dimension_numbers = #tpu.dot_dimension_numbers<[1], [0], [0], [1], [0, 0, 1, 1], [], []>} : vector<32x32xf32>, vector<32x8xf32>, vector<32x8xf32> -> vector<32x8xf32>
    %483 = vector.extract_strided_slice %448 {offsets = [0, 16], sizes = [32, 8], strides = [1, 1]} : vector<32x96xf32> to vector<32x8xf32>
    %484 = vector.extract_strided_slice %448 {offsets = [0, 48], sizes = [32, 8], strides = [1, 1]} : vector<32x96xf32> to vector<32x8xf32>
    %485 = vector.extract_strided_slice %448 {offsets = [0, 80], sizes = [32, 8], strides = [1, 1]} : vector<32x96xf32> to vector<32x8xf32>
    %cst_150 = arith.constant dense<0.000000e+00> : vector<32x32xf32>
    %486 = tpu.matmul %483, %484, %cst_150 {dimension_numbers = #tpu.dot_dimension_numbers<[1], [1], [0], [0], [0, 0, 1, 0], [], []>} : vector<32x8xf32>, vector<32x8xf32>, vector<32x32xf32> -> vector<32x32xf32>
    %cst_151 = arith.constant 0.353553385 : f32
    %487 = vector.broadcast %cst_151 : f32 to vector<32x32xf32>
    %488 = arith.mulf %486, %487 : vector<32x32xf32>
    %489 = arith.addf %488, %296 : vector<32x32xf32>
    %cst_152 = arith.constant dense<0xFF800000> : vector<32xf32>
    %490 = vector.multi_reduction <maximumf>, %489, %cst_152 [1] : vector<32x32xf32> to vector<32xf32>
    %491 = vector.shape_cast %490 : vector<32xf32> to vector<32x1xf32>
    %492 = vector.broadcast %491 : vector<32x1xf32> to vector<32x32xf32>
    %493 = arith.subf %489, %492 : vector<32x32xf32>
    %494 = math.exp %493 : vector<32x32xf32>
    %cst_153 = arith.constant dense<0.000000e+00> : vector<32xf32>
    %495 = vector.multi_reduction <add>, %494, %cst_153 [1] : vector<32x32xf32> to vector<32xf32>
    %496 = vector.shape_cast %495 : vector<32xf32> to vector<32x1xf32>
    %497 = vector.broadcast %496 : vector<32x1xf32> to vector<32x32xf32>
    %498 = arith.divf %494, %497 : vector<32x32xf32>
    %cst_154 = arith.constant dense<0.000000e+00> : vector<32x8xf32>
    %499 = tpu.matmul %498, %485, %cst_154 {dimension_numbers = #tpu.dot_dimension_numbers<[1], [0], [0], [1], [0, 0, 1, 1], [], []>} : vector<32x32xf32>, vector<32x8xf32>, vector<32x8xf32> -> vector<32x8xf32>
    %500 = vector.extract_strided_slice %448 {offsets = [0, 24], sizes = [32, 8], strides = [1, 1]} : vector<32x96xf32> to vector<32x8xf32>
    %501 = vector.extract_strided_slice %448 {offsets = [0, 56], sizes = [32, 8], strides = [1, 1]} : vector<32x96xf32> to vector<32x8xf32>
    %502 = vector.extract_strided_slice %448 {offsets = [0, 88], sizes = [32, 8], strides = [1, 1]} : vector<32x96xf32> to vector<32x8xf32>
    %cst_155 = arith.constant dense<0.000000e+00> : vector<32x32xf32>
    %503 = tpu.matmul %500, %501, %cst_155 {dimension_numbers = #tpu.dot_dimension_numbers<[1], [1], [0], [0], [0, 0, 1, 0], [], []>} : vector<32x8xf32>, vector<32x8xf32>, vector<32x32xf32> -> vector<32x32xf32>
    %cst_156 = arith.constant 0.353553385 : f32
    %504 = vector.broadcast %cst_156 : f32 to vector<32x32xf32>
    %505 = arith.mulf %503, %504 : vector<32x32xf32>
    %506 = arith.addf %505, %296 : vector<32x32xf32>
    %cst_157 = arith.constant dense<0xFF800000> : vector<32xf32>
    %507 = vector.multi_reduction <maximumf>, %506, %cst_157 [1] : vector<32x32xf32> to vector<32xf32>
    %508 = vector.shape_cast %507 : vector<32xf32> to vector<32x1xf32>
    %509 = vector.broadcast %508 : vector<32x1xf32> to vector<32x32xf32>
    %510 = arith.subf %506, %509 : vector<32x32xf32>
    %511 = math.exp %510 : vector<32x32xf32>
    %cst_158 = arith.constant dense<0.000000e+00> : vector<32xf32>
    %512 = vector.multi_reduction <add>, %511, %cst_158 [1] : vector<32x32xf32> to vector<32xf32>
    %513 = vector.shape_cast %512 : vector<32xf32> to vector<32x1xf32>
    %514 = vector.broadcast %513 : vector<32x1xf32> to vector<32x32xf32>
    %515 = arith.divf %511, %514 : vector<32x32xf32>
    %cst_159 = arith.constant dense<0.000000e+00> : vector<32x8xf32>
    %516 = tpu.matmul %515, %502, %cst_159 {dimension_numbers = #tpu.dot_dimension_numbers<[1], [0], [0], [1], [0, 0, 1, 1], [], []>} : vector<32x32xf32>, vector<32x8xf32>, vector<32x8xf32> -> vector<32x8xf32>
    %517 = tpu.concatenate %465, %482, %499, %516 in 1 : vector<32x8xf32>, vector<32x8xf32>, vector<32x8xf32>, vector<32x8xf32> -> vector<32x32xf32>
    %cst_160 = arith.constant dense<0.000000e+00> : vector<32x32xf32>
    %518 = tpu.matmul %517, %438, %cst_160 {dimension_numbers = #tpu.dot_dimension_numbers<[1], [0], [0], [1], [0, 0, 1, 1], [], []>} : vector<32x32xf32>, vector<32x32xf32>, vector<32x32xf32> -> vector<32x32xf32>
    %519 = arith.addf %436, %518 : vector<32x32xf32>
    %cst_161 = arith.constant dense<0.000000e+00> : vector<32xf32>
    %520 = vector.multi_reduction <add>, %519, %cst_161 [1] : vector<32x32xf32> to vector<32xf32>
    %521 = vector.shape_cast %520 : vector<32xf32> to vector<32x1xf32>
    %cst_162 = arith.constant 3.200000e+01 : f32
    %522 = vector.broadcast %cst_162 : f32 to vector<32x1xf32>
    %523 = arith.divf %521, %522 : vector<32x1xf32>
    %524 = vector.broadcast %523 : vector<32x1xf32> to vector<32x32xf32>
    %525 = arith.subf %519, %524 : vector<32x32xf32>
    %526 = vector.broadcast %523 : vector<32x1xf32> to vector<32x32xf32>
    %527 = arith.subf %519, %526 : vector<32x32xf32>
    %528 = arith.mulf %525, %527 : vector<32x32xf32>
    %cst_163 = arith.constant dense<0.000000e+00> : vector<32xf32>
    %529 = vector.multi_reduction <add>, %528, %cst_163 [1] : vector<32x32xf32> to vector<32xf32>
    %530 = vector.shape_cast %529 : vector<32xf32> to vector<32x1xf32>
    %cst_164 = arith.constant 3.200000e+01 : f32
    %531 = vector.broadcast %cst_164 : f32 to vector<32x1xf32>
    %532 = arith.divf %530, %531 : vector<32x1xf32>
    %533 = vector.broadcast %523 : vector<32x1xf32> to vector<32x32xf32>
    %534 = arith.subf %519, %533 : vector<32x32xf32>
    %cst_165 = arith.constant 9.99999974E-6 : f32
    %535 = vector.broadcast %cst_165 : f32 to vector<32x1xf32>
    %536 = arith.addf %532, %535 : vector<32x1xf32>
    %537 = math.rsqrt %536 : vector<32x1xf32>
    %538 = vector.broadcast %537 : vector<32x1xf32> to vector<32x32xf32>
    %539 = arith.mulf %534, %538 : vector<32x32xf32>
    %540 = vector.broadcast %444 : vector<1x32xf32> to vector<32x32xf32>
    %541 = arith.mulf %539, %540 : vector<32x32xf32>
    %542 = vector.broadcast %445 : vector<1x32xf32> to vector<32x32xf32>
    %543 = arith.addf %541, %542 : vector<32x32xf32>
    %cst_166 = arith.constant dense<0.000000e+00> : vector<32x64xf32>
    %544 = tpu.matmul %543, %439, %cst_166 {dimension_numbers = #tpu.dot_dimension_numbers<[1], [0], [0], [1], [0, 0, 1, 1], [], []>} : vector<32x32xf32>, vector<32x64xf32>, vector<32x64xf32> -> vector<32x64xf32>
    %545 = vector.broadcast %442 : vector<1x64xf32> to vector<32x64xf32>
    %546 = arith.addf %544, %545 : vector<32x64xf32>
    %cst_167 = arith.constant 0.000000e+00 : f32
    %547 = vector.broadcast %cst_167 : f32 to vector<32x64xf32>
    %548 = arith.maximumf %546, %547 : vector<32x64xf32>
    %cst_168 = arith.constant dense<0.000000e+00> : vector<32x32xf32>
    %549 = tpu.matmul %548, %440, %cst_168 {dimension_numbers = #tpu.dot_dimension_numbers<[1], [0], [0], [1], [0, 0, 1, 1], [], []>} : vector<32x64xf32>, vector<64x32xf32>, vector<32x32xf32> -> vector<32x32xf32>
    %550 = vector.broadcast %443 : vector<1x32xf32> to vector<32x32xf32>
    %551 = arith.addf %549, %550 : vector<32x32xf32>
    %552 = arith.addf %543, %551 : vector<32x32xf32>
    %cst_169 = arith.constant dense<0.000000e+00> : vector<32xf32>
    %553 = vector.multi_reduction <add>, %552, %cst_169 [1] : vector<32x32xf32> to vector<32xf32>
    %554 = vector.shape_cast %553 : vector<32xf32> to vector<32x1xf32>
    %cst_170 = arith.constant 3.200000e+01 : f32
    %555 = vector.broadcast %cst_170 : f32 to vector<32x1xf32>
    %556 = arith.divf %554, %555 : vector<32x1xf32>
    %557 = vector.broadcast %556 : vector<32x1xf32> to vector<32x32xf32>
    %558 = arith.subf %552, %557 : vector<32x32xf32>
    %559 = vector.broadcast %556 : vector<32x1xf32> to vector<32x32xf32>
    %560 = arith.subf %552, %559 : vector<32x32xf32>
    %561 = arith.mulf %558, %560 : vector<32x32xf32>
    %cst_171 = arith.constant dense<0.000000e+00> : vector<32xf32>
    %562 = vector.multi_reduction <add>, %561, %cst_171 [1] : vector<32x32xf32> to vector<32xf32>
    %563 = vector.shape_cast %562 : vector<32xf32> to vector<32x1xf32>
    %cst_172 = arith.constant 3.200000e+01 : f32
    %564 = vector.broadcast %cst_172 : f32 to vector<32x1xf32>
    %565 = arith.divf %563, %564 : vector<32x1xf32>
    %566 = vector.broadcast %556 : vector<32x1xf32> to vector<32x32xf32>
    %567 = arith.subf %552, %566 : vector<32x32xf32>
    %cst_173 = arith.constant 9.99999974E-6 : f32
    %568 = vector.broadcast %cst_173 : f32 to vector<32x1xf32>
    %569 = arith.addf %565, %568 : vector<32x1xf32>
    %570 = math.rsqrt %569 : vector<32x1xf32>
    %571 = vector.broadcast %570 : vector<32x1xf32> to vector<32x32xf32>
    %572 = arith.mulf %567, %571 : vector<32x32xf32>
    %573 = vector.broadcast %446 : vector<1x32xf32> to vector<32x32xf32>
    %574 = arith.mulf %572, %573 : vector<32x32xf32>
    %575 = vector.broadcast %447 : vector<1x32xf32> to vector<32x32xf32>
    %576 = arith.addf %574, %575 : vector<32x32xf32>
    %c736 = arith.constant 736 : index
    %c0_174 = arith.constant 0 : index
    %577 = vector.load %arg1[%c736, %c0_174] : memref<840x128xf32, #tpu.memory_space<vmem>>, vector<32x32xf32>
    %cst_175 = arith.constant dense<0.000000e+00> : vector<32x32xf32>
    %578 = tpu.matmul %576, %577, %cst_175 {dimension_numbers = #tpu.dot_dimension_numbers<[1], [0], [0], [1], [0, 0, 1, 1], [], []>} : vector<32x32xf32>, vector<32x32xf32>, vector<32x32xf32> -> vector<32x32xf32>
    %c768 = arith.constant 768 : index
    %c0_176 = arith.constant 0 : index
    %579 = vector.load %arg1[%c768, %c0_176] : memref<840x128xf32, #tpu.memory_space<vmem>>, vector<8x32xf32>
    %580 = vector.extract_strided_slice %579 {offsets = [0, 0], sizes = [1, 32], strides = [1, 1]} : vector<8x32xf32> to vector<1x32xf32>
    %581 = vector.broadcast %580 : vector<1x32xf32> to vector<32x32xf32>
    %582 = arith.addf %578, %581 : vector<32x32xf32>
    %c32_177 = arith.constant 32 : index
    %c32_178 = arith.constant 32 : index
    %583 = vector.load %arg0[%c32_177, %c32_178] : memref<104x128xf32, #tpu.memory_space<vmem>>, vector<32x1xf32>
    %584 = arith.fptosi %583 : vector<32x1xf32> to vector<32x1xi32>
    %c32_179 = arith.constant 32 : index
    %c33 = arith.constant 33 : index
    %585 = vector.load %arg0[%c32_179, %c33] : memref<104x128xf32, #tpu.memory_space<vmem>>, vector<32x1xf32>
    %cst_180 = arith.constant dense<0xFF800000> : vector<32xf32>
    %586 = vector.multi_reduction <maximumf>, %582, %cst_180 [1] : vector<32x32xf32> to vector<32xf32>
    %587 = vector.shape_cast %586 : vector<32xf32> to vector<32x1xf32>
    %588 = vector.broadcast %587 : vector<32x1xf32> to vector<32x32xf32>
    %589 = arith.subf %582, %588 : vector<32x32xf32>
    %590 = math.exp %589 : vector<32x32xf32>
    %cst_181 = arith.constant dense<0.000000e+00> : vector<32xf32>
    %591 = vector.multi_reduction <add>, %590, %cst_181 [1] : vector<32x32xf32> to vector<32xf32>
    %592 = vector.shape_cast %591 : vector<32xf32> to vector<32x1xf32>
    %593 = math.log %592 : vector<32x1xf32>
    %594 = arith.addf %593, %587 : vector<32x1xf32>
    %595 = tpu.iota {dimensions = array<i32: 1>} : vector<32x32xi32>
    %596 = vector.broadcast %584 : vector<32x1xi32> to vector<32x32xi32>
    %597 = arith.cmpi eq, %595, %596 : vector<32x32xi32>
    %598 = arith.extui %597 : vector<32x32xi1> to vector<32x32xi32>
    %599 = arith.sitofp %598 : vector<32x32xi32> to vector<32x32xf32>
    %600 = arith.mulf %582, %599 : vector<32x32xf32>
    %cst_182 = arith.constant dense<0.000000e+00> : vector<32xf32>
    %601 = vector.multi_reduction <add>, %600, %cst_182 [1] : vector<32x32xf32> to vector<32xf32>
    %602 = vector.shape_cast %601 : vector<32xf32> to vector<32x1xf32>
    %603 = arith.subf %594, %602 : vector<32x1xf32>
    %604 = vector.broadcast %587 : vector<32x1xf32> to vector<32x32xf32>
    %605 = arith.cmpf oeq, %582, %604 : vector<32x32xf32>
    %c32_i32 = arith.constant 32 : i32
    %606 = vector.broadcast %c32_i32 : i32 to vector<32x32xi32>
    %607 = arith.select %605, %595, %606 : vector<32x32xi1>, vector<32x32xi32>
    %cst_183 = arith.constant dense<2147483647> : vector<32xi32>
    %608 = vector.multi_reduction <minsi>, %607, %cst_183 [1] : vector<32x32xi32> to vector<32xi32>
    %609 = vector.shape_cast %608 : vector<32xi32> to vector<32x1xi32>
    %610 = arith.cmpi eq, %609, %584 : vector<32x1xi32>
    %611 = arith.extui %610 : vector<32x1xi1> to vector<32x1xi32>
    %612 = arith.sitofp %611 : vector<32x1xi32> to vector<32x1xf32>
    %613 = arith.mulf %603, %585 : vector<32x1xf32>
    %614 = vector.shape_cast %613 : vector<32x1xf32> to vector<1x32x1xf32>
    %cst_184 = arith.constant dense<0.000000e+00> : vector<1xf32>
    %615 = vector.multi_reduction <add>, %614, %cst_184 [1, 2] : vector<1x32x1xf32> to vector<1xf32>
    %616 = vector.shape_cast %615 : vector<1xf32> to vector<1x1x1xf32>
    %617 = vector.extract %616[0, 0, 0] : f32 from vector<1x1x1xf32>
    %618 = vector.broadcast %617 : f32 to vector<1x1xf32>
    %619 = arith.mulf %612, %585 : vector<32x1xf32>
    %620 = vector.shape_cast %619 : vector<32x1xf32> to vector<1x32x1xf32>
    %cst_185 = arith.constant dense<0.000000e+00> : vector<1xf32>
    %621 = vector.multi_reduction <add>, %620, %cst_185 [1, 2] : vector<1x32x1xf32> to vector<1xf32>
    %622 = vector.shape_cast %621 : vector<1xf32> to vector<1x1x1xf32>
    %623 = vector.extract %622[0, 0, 0] : f32 from vector<1x1x1xf32>
    %624 = vector.broadcast %623 : f32 to vector<1x1xf32>
    %625 = vector.shape_cast %585 : vector<32x1xf32> to vector<1x32x1xf32>
    %cst_186 = arith.constant dense<0.000000e+00> : vector<1xf32>
    %626 = vector.multi_reduction <add>, %625, %cst_186 [1, 2] : vector<1x32x1xf32> to vector<1xf32>
    %627 = vector.shape_cast %626 : vector<1xf32> to vector<1x1x1xf32>
    %628 = vector.extract %627[0, 0, 0] : f32 from vector<1x1x1xf32>
    %629 = vector.broadcast %628 : f32 to vector<1x1xf32>
    %630 = tpu.iota {dimensions = array<i32: 1>} : vector<1x128xi32>
    %c0_i32 = arith.constant 0 : i32
    %631 = vector.broadcast %c0_i32 : i32 to vector<1x128xi32>
    %632 = arith.cmpi eq, %630, %631 : vector<1x128xi32>
    %cst_187 = arith.constant 0.000000e+00 : f32
    %633 = vector.shape_cast %618 : vector<1x1xf32> to vector<1x1xf32>
    %634 = vector.broadcast %633 : vector<1x1xf32> to vector<1x128xf32>
    %635 = vector.broadcast %cst_187 : f32 to vector<1x128xf32>
    %636 = arith.select %632, %634, %635 : vector<1x128xi1>, vector<1x128xf32>
    %c1_i32 = arith.constant 1 : i32
    %637 = vector.broadcast %c1_i32 : i32 to vector<1x128xi32>
    %638 = arith.cmpi eq, %630, %637 : vector<1x128xi32>
    %cst_188 = arith.constant 0.000000e+00 : f32
    %639 = vector.shape_cast %624 : vector<1x1xf32> to vector<1x1xf32>
    %640 = vector.broadcast %639 : vector<1x1xf32> to vector<1x128xf32>
    %641 = vector.broadcast %cst_188 : f32 to vector<1x128xf32>
    %642 = arith.select %638, %640, %641 : vector<1x128xi1>, vector<1x128xf32>
    %643 = arith.addf %636, %642 : vector<1x128xf32>
    %c2_i32 = arith.constant 2 : i32
    %644 = vector.broadcast %c2_i32 : i32 to vector<1x128xi32>
    %645 = arith.cmpi eq, %630, %644 : vector<1x128xi32>
    %cst_189 = arith.constant 0.000000e+00 : f32
    %646 = vector.shape_cast %629 : vector<1x1xf32> to vector<1x1xf32>
    %647 = vector.broadcast %646 : vector<1x1xf32> to vector<1x128xf32>
    %648 = vector.broadcast %cst_189 : f32 to vector<1x128xf32>
    %649 = arith.select %645, %647, %648 : vector<1x128xi1>, vector<1x128xf32>
    %650 = arith.addf %643, %649 : vector<1x128xf32>
    %c0_190 = arith.constant 0 : index
    %c0_191 = arith.constant 0 : index
    %651 = vector.load %arg2[%c0_190, %c0_191] : memref<1x128xf32, #tpu.memory_space<vmem>>, vector<1x128xf32>
    tpu.vector_store %arg2[%c0_190, %c0_191], %650 {strides = array<i32>} : memref<1x128xf32, #tpu.memory_space<vmem>>, vector<1x128xf32>,
    return
  }
}

</mosaic_0001>

<bundles_post_ra>
// kernel: loss_forward.1
= control target key start
LH: loop header
LB: loop body
LE: loop exit
PB: predicated region body
PF: predicated region fallthrough
CT: control target
= control target key end

     0   :  { %vm23_vm0 = vcmask 523264   ;;  %vm157_vm1 = vcmask 261120   ;;  %vm267_vm2 = vcmask 64512   ;;  %s9440_s13 = smov 96   ;;  %s9441_s14 = smov 64   ;;  %v128_v32 = vlaneseq  ;;  %s11452_s1 = inlined_call_operand.vmem [shape: f32[840,128], index: 1, kind: input, shape index: {}]   ;;  %s11453_s0 = inlined_call_operand.vmem [shape: f32[104,128], index: 0, kind: input, shape index: {}]   ;;  %s11454_s2 = inlined_call_operand.vmem [shape: f32[1,128], index: 2, kind: output, shape index: {}]  }
   0x1   :  { %v22_v0 = vld [vmem:[%s11452_s1 + $0x38] sm:$0xff]  ;;  %v21_v1 = vld [vmem:[%s11452_s1 + $0x30] sm:$0xff]  ;;  %v20_v2 = vld [vmem:[%s11452_s1 + $0x28] sm:$0xff]  ;;  %v9442_v36 = vmov -1e+30   ;;  %s9443_s25 = smov 88  }
   0x2   :  { %8307 = vmatprep.subr.mxu0 %v22_v0  ;;  %v11_v3 = vld [vmem:[%s11453_s0] sm:$0xff]  ;;  %v139_v5 = vld [vmem:[%s11452_s1 + $0x58] sm:$0xff]  ;;  %v138_v6 = vld [vmem:[%s11452_s1 + $0x50] sm:$0xff]  ;;  %v9586_v34 = vshrl.u32 %v128_v32, 7  ;;  %s9444_s26 = smov 120   ;;  %s9445_s27 = smov 56  }
   0x3   :  { %8308 = vmatpush3.msra.mxu0 %v22_v0  ;;  %8323 = vmatprep.mubr.msk.f32.mxu0 %vm23_vm0, %v11_v3  ;;  %v19_v4 = vld [vmem:[%s11452_s1 + $0x20] sm:$0xff]  ;;  %v18_v7 = vld [vmem:[%s11452_s1 + $0x18] sm:$0xff]  ;;  %v17_v8 = vld [vmem:[%s11452_s1 + $0x10] sm:$0xff]  ;;  %s9446_s28 = smov 80   ;;  %s9447_s29 = smov 112   ;;  %vm1416_vm4 = vcmask 130048  }
   0x4   :  { %8309 = vmatprep.subr.mxu0 %v21_v1  ;;  %8329 = vmatprep.subr.mxu1 %v139_v5  ;;  %v16_v9 = vld [vmem:[%s11452_s1 + $0x8] sm:$0xff]  ;;  %v15_v10 = vld [vmem:[%s11452_s1] sm:$0xff]  ;;  %v13_v12 = vld [vmem:[%s11453_s0 + $0x10] sm:$0xff]  ;;  %v9589_v35 = vsub.s32 0, %v9586_v34  ;;  %s9448_s30 = smov 48   ;;  %s9449_s3 = smov 72  }
   0x5   :  { %8310 = vmatpush3.msra.mxu0 %v21_v1  ;;  %8330 = vmatpush3.msra.mxu1 %v139_v5  ;;  %v12_v11 = vld [vmem:[%s11453_s0 + $0x8] sm:$0xff]  ;;  %v14_v13 = vld [vmem:[%s11453_s0 + $0x18] sm:$0xff]  ;;  %v136_v15 = vld [vmem:[%s11452_s1 + $0x40] sm:$0xff]  ;;  %s9450_s4 = smov 104   ;;  %s9451_s5 = smov 40   ;;  %vm1421_vm5 = vcmask 195584  }
   0x6   :  { %8311 = vmatprep.subr.mxu0 %v20_v2  ;;  %8331 = vmatprep.subr.mxu1 %v138_v6  ;;  %v137_v14 = vld [vmem:[%s11452_s1 + $0x48] sm:$0xff]  ;;  %v121_v33 = vld [vmem:[%s11453_s0 + $0x60] sm:$0x1]  ;;  %v123_v39 = vld [vmem:[%s11452_s1 + $0x310] sm:$0xff]  ;;  %s9452_s6 = smov 8   ;;  %s9453_s7 = smov 16  }
   0x7   :  { %8312 = vmatpush3.msra.mxu0 %v20_v2  ;;  %8332 = vmatpush3.msra.mxu1 %v138_v6  ;;  %vm126_vm3 = vcmp.gt.f32.partialorder %v121_v33, 0.0  ;;  %v122_v40 = vld [vmem:[%s11452_s1 + $0x308] sm:$0xff]  ;;  %v125_v43 = vld [vmem:[%s11452_s1 + $0x320] sm:$0xff]  ;;  %v124_v51 = vld [vmem:[%s11452_s1 + $0x318] sm:$0xff]  ;;  %s9454_s18 = smov 24   ;;  %s9458_s8 = smov 95  }
   0x8   :  { %8313 = vmatprep.subr.mxu0 %v19_v4  ;;  %8333 = vmatprep.subr.mxu1 %v137_v14  ;;  %v127_v37 = vsel %vm126_vm3, 0.0, %v9442_v36 }
   0x9   :  { %8314 = vmatpush3.msra.mxu0 %v19_v4  ;;  %8334 = vmatpush3.msra.mxu1 %v137_v14  ;;  %v131_v38 = vrot.slane %v127_v37, %v9589_v35 }
   0xa   :  { %8315 = vmatprep.subr.mxu0 %v18_v7  ;;  %8335 = vmatprep.subr.mxu1 %v136_v15 }
   0xb   :  { %8316 = vmatpush3.msra.mxu0 %v18_v7  ;;  %8336 = vmatpush3.msra.mxu1 %v136_v15  ;;  %v9598_v41 = vadd.f32 %v131_v38, %v123_v39  ;;  %v9603_v45 = vadd.f32 %v131_v38, %v122_v40  ;;  %v9606_v49 = vadd.f32 %v131_v38, %v125_v43 }
   0xc   :  { %8317 = vmatprep.subr.mxu0 %v17_v8  ;;  %v9615_v59 = vadd.f32 %v131_v38, %v124_v51 }
   0xd   :  { %8318 = vmatpush3.msra.mxu0 %v17_v8 }
   0xe   :  { %8319 = vmatprep.subr.mxu0 %v16_v9 }
   0xf   :  { %8320 = vmatpush3.msra.mxu0 %v16_v9 }
  0x10   :  { %8321 = vmatprep.subr.mxu0 %v15_v10 }
  0x11   :  { %8322 = vmatpush3.msra.mxu0 %v15_v10 }
  0x12   :  { %8324 = vmatmul.mubr.msk.f32.vlgmr.msra.gmra.mxu0 %vm23_vm0, %v12_v11 }
  0x13   :  { %8326 = vmatprep.mubr.msk.f32.mxu0 %vm23_vm0, %v13_v12 }
  0x16   :  { %8327 = vmatmul.mubr.msk.f32.gmra.mxu0 %vm23_vm0, %v14_v13 }
  0xd2   :  { %v9526_v16 = vpop.f32.mrf.mxu0 }
  0xd4   :  { %v9528_v17 = vpop.f32.mrf.mxu0 }
  0xd5   :  { %8337 = vmatprep.mubr.msk.f32.mxu1 %vm157_vm1, %v9528_v17 }
  0xd6   :  { %v9532_v18 = vpop.f32.mrf.mxu0  ;;  %8338 = vmatmul.mubr.msk.f32.vlgmr.msra.gmra.mxu1 %vm157_vm1, %v9526_v16 }
  0xd8   :  { %v9536_v19 = vpop.f32.mrf.mxu0 }
  0xd9   :  { %8340 = vmatprep.mubr.msk.f32.mxu1 %vm157_vm1, %v9536_v19 }
  0xda   :  { %8341 = vmatmul.mubr.msk.f32.gmra.mxu1 %vm157_vm1, %v9532_v18 }
 0x196   :  { %v9542_v20 = vpop.f32.mrf.mxu1 }
 0x197   :  { %261 = vrot.lane.b32.xlu1 %v9542_v20, %s9440_s13 }
 0x198   :  { %v9546_v21 = vpop.f32.mrf.mxu1 }
 0x199   :  { %8351 = vmatprep.mubr.msk.f32.mxu1 %vm267_vm2, %v9546_v21 }
 0x19a   :  { %v9550_v22 = vpop.f32.mrf.mxu1 }
 0x19b   :  { %259 = vrot.lane.b32.xlu1 %v9546_v21, %s9440_s13  ;;  %265 = vrot.lane.b32.xlu0 %v9550_v22, %s9440_s13 }
 0x19c   :  { %v9556_v23 = vpop.f32.mrf.mxu1 }
 0x19f   :  { %427 = vrot.lane.b32.xlu1 %v9550_v22, %s9441_s14  ;;  %263 = vrot.lane.b32.xlu0 %v9556_v23, %s9440_s13 }
 0x1a3   :  { %423 = vrot.lane.b32.xlu1 %v9542_v20, %s9441_s14  ;;  %425 = vrot.lane.b32.xlu0 %v9556_v23, %s9441_s14 }
 0x1a7   :  { %421 = vrot.lane.b32.xlu1 %v9546_v21, %s9441_s14 }
 0x209   :  { %v262_v24 = vpop.permute.xlu1 %261 }
 0x20d   :  { %v260_v25 = vpop.permute.xlu1 %259  ;;  %v266_v26 = vpop.permute.xlu0 %265 }
 0x20e   :  { %8343 = vmatprep.subr.msk.mxu1 %vm267_vm2, %v266_v26 }
 0x20f   :  { %8344 = vmatpush3.xpose.msk.msra.mxu1 %vm267_vm2, %v266_v26 }
 0x211   :  { %v428_v27 = vpop.permute.xlu1 %427  ;;  %v264_v28 = vpop.permute.xlu0 %263 }
 0x212   :  { %8345 = vmatprep.subr.msk.mxu1 %vm267_vm2, %v264_v28  ;;  %8357 = vmatprep.subr.mxu0 %v428_v27 }
 0x213   :  { %8346 = vmatpush3.xpose.msk.msra.mxu1 %vm267_vm2, %v264_v28  ;;  %8358 = vmatpush3.msra.mxu0 %v428_v27 }
 0x214   :  { %8347 = vmatprep.subr.msk.mxu1 %vm267_vm2, %v262_v24 }
 0x215   :  { %v424_v29 = vpop.permute.xlu1 %423  ;;  %v426_v30 = vpop.permute.xlu0 %425 }
 0x216   :  { %8359 = vmatprep.subr.mxu0 %v426_v30 }
 0x217   :  { %8348 = vmatpush3.xpose.msk.msra.mxu1 %vm267_vm2, %v262_v24  ;;  %8360 = vmatpush3.msra.mxu0 %v426_v30 }
 0x218   :  { %8349 = vmatprep.subr.msk.mxu1 %vm267_vm2, %v260_v25  ;;  %8361 = vmatprep.subr.mxu0 %v424_v29 }
 0x219   :  { %v422_v31 = vpop.permute.xlu1 %421  ;;  %8362 = vmatpush3.msra.mxu0 %v424_v29 }
 0x21a   :  { %8363 = vmatprep.subr.mxu0 %v422_v31 }
 0x21b   :  { %8350 = vmatpush3.xpose.msk.msra.mxu1 %vm267_vm2, %v260_v25  ;;  %8364 = vmatpush3.msra.mxu0 %v422_v31 }
 0x21e   :  { %8352 = vmatmul.mubr.msk.f32.vlgmr.msra.gmra.mxu1 %vm267_vm2, %v9542_v20 }
 0x21f   :  { %8354 = vmatprep.mubr.msk.f32.mxu1 %vm267_vm2, %v9556_v23 }
 0x222   :  { %8355 = vmatmul.mubr.msk.f32.gmra.mxu1 %vm267_vm2, %v9550_v22 }
 0x2de   :  { %v8353_v42 = vpop.f32.mrf.mxu1 }
 0x2df   :  { %v370_v44 = vmul.f32 0.35355338, %v8353_v42 }
 0x2e0   :  { %v350_v46 = vpop.f32.mrf.mxu1 }
 0x2e1   :  { %v369_v47 = vmul.f32 0.35355338, %v350_v46  ;;  %v374_v48 = vadd.f32 %v370_v44, %v9598_v41 }
 0x2e2   :  { %v8356_v50 = vpop.f32.mrf.mxu1 }
 0x2e3   :  { %v372_v52 = vmul.f32 0.35355338, %v8356_v50  ;;  %v380_v53 = vsel %vm157_vm1, %v374_v48, -inf  ;;  %v373_v54 = vadd.f32 %v369_v47, %v9603_v45 }
 0x2e4   :  { %381 = vmax.xlane.f32.xlu1 %v380_v53  ;;  %v360_v55 = vpop.f32.mrf.mxu1 }
 0x2e5   :  { %v371_v56 = vmul.f32 0.35355338, %v360_v55  ;;  %v377_v57 = vsel %vm157_vm1, %v373_v54, -inf  ;;  %v376_v58 = vadd.f32 %v372_v52, %v9606_v49 }
 0x2e6   :  { %378 = vmax.xlane.f32.xlu0 %v377_v57 }
 0x2e7   :  { %v386_v60 = vsel %vm157_vm1, %v376_v58, -inf  ;;  %v375_v61 = vadd.f32 %v371_v56, %v9615_v59 }
 0x2e9   :  { %v383_v62 = vsel %vm157_vm1, %v375_v61, -inf }
 0x2ea   :  { %387 = vmax.xlane.f32.xlu0 %v386_v60 }
 0x2ee   :  { %384 = vmax.xlane.f32.xlu0 %v383_v62 }
 0x2f5   :  { %542 = vrot.lane.b32.xlu1 %v9556_v23, %s9443_s25 }
 0x304   :  { %544 = vrot.lane.b32.xlu0 %v9550_v22, %s9443_s25 }
 0x36d   :  { %v382_v63 = vpop.xlane.xlu1 %381 }
 0x36e   :  { %v390_v0 = vsub.f32 %v374_v48, %v382_v63 }
 0x36f   :  { %v379_v1 = vpop.xlane.xlu0 %378 }
 0x370   :  { %v395_v2 = vmul.f32 1.442695, %v390_v0  ;;  %v389_v3 = vsub.f32 %v373_v54, %v379_v1 }
 0x371   :  { %v543_v28 = vpop.permute.xlu1 %542 }
 0x372   :  { %9096 = vpow2.f32 %v395_v2  ;;  %v393_v4 = vmul.f32 1.442695, %v389_v3 }
 0x373   :  { %v388_v5 = vpop.xlane.xlu0 %387 }
 0x374   :  { %9098 = vpow2.f32 %v393_v4  ;;  %v392_v12 = vsub.f32 %v376_v58, %v388_v5 }
 0x376   :  { %v399_v14 = vmul.f32 1.442695, %v392_v12 }
 0x377   :  { %v385_v6 = vpop.xlane.xlu0 %384 }
 0x378   :  { %v391_v13 = vsub.f32 %v375_v61, %v385_v6  ;;  %9100 = vpow2.f32 %v399_v14 }
 0x37a   :  { %v397_v15 = vmul.f32 1.442695, %v391_v13 }
 0x37b   :  { %v545_v7 = vpop.permute.xlu0 %544 }
 0x37c   :  { %8371 = vmatprep.subr.msk.mxu0 %vm267_vm2, %v545_v7  ;;  %9102 = vpow2.f32 %v397_v15 }
 0x37f   :  { %v9097_v8 = vpop.eup %9096 }
 0x380   :  { %v404_v9 = vsel %vm157_vm1, %v9097_v8, 0.0 }
 0x381   :  { %v9099_v10 = vpop.eup %9098  ;;  %405 = vadd.xlane.f32.xlu0 %v404_v9 }
 0x382   :  { %v401_v11 = vsel %vm157_vm1, %v9099_v10, 0.0 }
 0x383   :  { %402 = vadd.xlane.f32.xlu1 %v401_v11 }
 0x385   :  { %v9101_v24 = vpop.eup %9100 }
 0x386   :  { %v410_v26 = vsel %vm157_vm1, %v9101_v24, 0.0 }
 0x389   :  { %v9103_v25 = vpop.eup %9102 }
 0x38a   :  { %v407_v27 = vsel %vm157_vm1, %v9103_v25, 0.0 }
 0x394   :  { %538 = vrot.lane.b32.xlu1 %v9546_v21, %s9443_s25 }
 0x397   :  { %540 = vrot.lane.b32.xlu0 %v9542_v20, %s9443_s25 }
 0x3b6   :  { %411 = vadd.xlane.f32.xlu0 %v410_v26 }
 0x3b8   :  { %408 = vadd.xlane.f32.xlu1 %v407_v27 }
 0x3c9   :  { %532 = vrot.lane.b32.xlu1 %v9542_v20, %s9444_s26 }
 0x3cc   :  { %530 = vrot.lane.b32.xlu0 %v9546_v21, %s9444_s26 }
 0x3cd   :  { %536 = vrot.lane.b32.xlu1 %v9550_v22, %s9444_s26 }
 0x3d0   :  { %534 = vrot.lane.b32.xlu0 %v9556_v23, %s9444_s26 }
 0x3d1   :  { %705 = vrot.lane.b32.xlu1 %v9550_v22, %s9445_s27 }
 0x3d4   :  { %703 = vrot.lane.b32.xlu0 %v9556_v23, %s9445_s27 }
 0x3d5   :  { %701 = vrot.lane.b32.xlu1 %v9542_v20, %s9445_s27 }
 0x3d9   :  { %699 = vrot.lane.b32.xlu1 %v9546_v21, %s9445_s27 }
 0x40a   :  { %v406_v29 = vpop.xlane.xlu0 %405 }
 0x40b   :  { %9104 = vrcp.f32 %v406_v29 }
 0x40c   :  { %v403_v30 = vpop.xlane.xlu1 %402 }
 0x40d   :  { %9106 = vrcp.f32 %v403_v30 }
 0x40e   :  { %v541_v38 = vpop.permute.xlu0 %540 }
 0x410   :  { %v539_v39 = vpop.permute.xlu1 %538 }
 0x418   :  { %v9105_v31 = vpop.eup %9104 }
 0x419   :  { %v416_v37 = vmul.f32 %v9105_v31, %v9097_v8 }
 0x41a   :  { %v9107_v33 = vpop.eup %9106 }
 0x41b   :  { %v414_v36 = vmul.f32 %v9107_v33, %v9099_v10 }
 0x41d   :  { %8365 = vmatprep.mubr.msk.f32.mxu0 %vm157_vm1, %v414_v36 }
 0x41e   :  { %8366 = vmatmul.mubr.msk.f32.vlgmr.msra.gmra.mxu0 %vm157_vm1, %v416_v37 }
 0x41f   :  { %8372 = vmatpush3.xpose.msk.msra.mxu0 %vm267_vm2, %v545_v7 }
 0x420   :  { %8373 = vmatprep.subr.msk.mxu0 %vm267_vm2, %v543_v28 }
 0x423   :  { %8374 = vmatpush3.xpose.msk.msra.mxu0 %vm267_vm2, %v543_v28 }
 0x424   :  { %8375 = vmatprep.subr.msk.mxu0 %vm267_vm2, %v541_v38 }
 0x427   :  { %8376 = vmatpush3.xpose.msk.msra.mxu0 %vm267_vm2, %v541_v38 }
 0x428   :  { %8377 = vmatprep.subr.msk.mxu0 %vm267_vm2, %v539_v39 }
 0x42b   :  { %8378 = vmatpush3.xpose.msk.msra.mxu0 %vm267_vm2, %v539_v39 }
 0x43f   :  { %v412_v40 = vpop.xlane.xlu0 %411 }
 0x440   :  { %9108 = vrcp.f32 %v412_v40 }
 0x441   :  { %v409_v42 = vpop.xlane.xlu1 %408 }
 0x442   :  { %9110 = vrcp.f32 %v409_v42 }
 0x443   :  { %v531_v43 = vpop.permute.xlu0 %530 }
 0x445   :  { %v533_v44 = vpop.permute.xlu1 %532 }
 0x447   :  { %v535_v46 = vpop.permute.xlu0 %534 }
 0x449   :  { %v537_v47 = vpop.permute.xlu1 %536 }
 0x44b   :  { %v704_v52 = vpop.permute.xlu0 %703 }
 0x44d   :  { %v706_v48 = vpop.permute.xlu1 %705  ;;  %v9109_v50 = vpop.eup %9108 }
 0x44e   :  { %8385 = vmatprep.subr.mxu1 %v706_v48  ;;  %v420_v55 = vmul.f32 %v9109_v50, %v9101_v24 }
 0x44f   :  { %v9111_v51 = vpop.eup %9110  ;;  %8386 = vmatpush3.msra.mxu1 %v706_v48 }
 0x450   :  { %8387 = vmatprep.subr.mxu1 %v704_v52  ;;  %v418_v53 = vmul.f32 %v9111_v51, %v9103_v25 }
 0x451   :  { %v702_v54 = vpop.permute.xlu1 %701  ;;  %8388 = vmatpush3.msra.mxu1 %v704_v52 }
 0x452   :  { %8368 = vmatprep.mubr.msk.f32.mxu0 %vm157_vm1, %v418_v53  ;;  %8389 = vmatprep.subr.mxu1 %v702_v54 }
 0x453   :  { %8369 = vmatmul.mubr.msk.f32.gmra.mxu0 %vm157_vm1, %v420_v55  ;;  %8390 = vmatpush3.msra.mxu1 %v702_v54 }
 0x454   :  { %8379 = vmatprep.mubr.msk.f32.mxu0 %vm267_vm2, %v531_v43 }
 0x455   :  { %v700_v56 = vpop.permute.xlu1 %699 }
 0x456   :  { %8391 = vmatprep.subr.mxu1 %v700_v56 }
 0x457   :  { %8380 = vmatmul.mubr.msk.f32.vlgmr.msra.gmra.mxu0 %vm267_vm2, %v533_v44  ;;  %8392 = vmatpush3.msra.mxu1 %v700_v56 }
 0x458   :  { %8382 = vmatprep.mubr.msk.f32.mxu0 %vm267_vm2, %v535_v46 }
 0x45b   :  { %8383 = vmatmul.mubr.msk.f32.gmra.mxu0 %vm267_vm2, %v537_v47 }
 0x4de   :  { %v9664_v57 = vpop.f32.mrf.mxu0 }
 0x4e0   :  { %v9666_v58 = vpop.f32.mrf.mxu0 }
 0x513   :  { %v9668_v60 = vpop.f32.mrf.mxu0 }
 0x515   :  { %v9670_v61 = vpop.f32.mrf.mxu0 }
 0x517   :  { %v8381_v62 = vpop.f32.mrf.mxu0 }
 0x518   :  { %v648_v63 = vmul.f32 0.35355338, %v8381_v62 }
 0x519   :  { %v628_v0 = vpop.f32.mrf.mxu0 }
 0x51a   :  { %v647_v1 = vmul.f32 0.35355338, %v628_v0  ;;  %v652_v2 = vadd.f32 %v648_v63, %v9598_v41 }
 0x51b   :  { %v8384_v3 = vpop.f32.mrf.mxu0 }
 0x51c   :  { %v650_v4 = vmul.f32 0.35355338, %v8384_v3  ;;  %v658_v5 = vsel %vm157_vm1, %v652_v2, -inf  ;;  %v651_v6 = vadd.f32 %v647_v1, %v9603_v45 }
 0x51d   :  { %659 = vmax.xlane.f32.xlu1 %v658_v5  ;;  %v638_v7 = vpop.f32.mrf.mxu0 }
 0x51e   :  { %v649_v8 = vmul.f32 0.35355338, %v638_v7  ;;  %v655_v9 = vsel %vm157_vm1, %v651_v6, -inf  ;;  %v654_v10 = vadd.f32 %v650_v4, %v9606_v49 }
 0x51f   :  { %656 = vmax.xlane.f32.xlu0 %v655_v9 }
 0x520   :  { %v664_v11 = vsel %vm157_vm1, %v654_v10, -inf  ;;  %v653_v12 = vadd.f32 %v649_v8, %v9615_v59 }
 0x522   :  { %v661_v13 = vsel %vm157_vm1, %v653_v12, -inf }
 0x523   :  { %665 = vmax.xlane.f32.xlu0 %v664_v11 }
 0x527   :  { %662 = vmax.xlane.f32.xlu0 %v661_v13 }
 0x52e   :  { %820 = vrot.lane.b32.xlu1 %v9556_v23, %s9446_s28 }
 0x53d   :  { %822 = vrot.lane.b32.xlu0 %v9550_v22, %s9446_s28 }
 0x5a6   :  { %v660_v14 = vpop.xlane.xlu1 %659 }
 0x5a7   :  { %v668_v15 = vsub.f32 %v652_v2, %v660_v14 }
 0x5a8   :  { %v657_v24 = vpop.xlane.xlu0 %656 }
 0x5a9   :  { %v673_v25 = vmul.f32 1.442695, %v668_v15  ;;  %v667_v26 = vsub.f32 %v651_v6, %v657_v24 }
 0x5aa   :  { %v821_v48 = vpop.permute.xlu1 %820 }
 0x5ab   :  { %9112 = vpow2.f32 %v673_v25  ;;  %v671_v27 = vmul.f32 1.442695, %v667_v26 }
 0x5ac   :  { %v666_v28 = vpop.xlane.xlu0 %665 }
 0x5ad   :  { %9114 = vpow2.f32 %v671_v27  ;;  %v670_v38 = vsub.f32 %v654_v10, %v666_v28 }
 0x5af   :  { %v677_v40 = vmul.f32 1.442695, %v670_v38 }
 0x5b0   :  { %v663_v29 = vpop.xlane.xlu0 %662 }
 0x5b1   :  { %v669_v39 = vsub.f32 %v653_v12, %v663_v29  ;;  %9116 = vpow2.f32 %v677_v40 }
 0x5b3   :  { %v675_v42 = vmul.f32 1.442695, %v669_v39 }
 0x5b4   :  { %v823_v30 = vpop.permute.xlu0 %822 }
 0x5b5   :  { %8399 = vmatprep.subr.msk.mxu1 %vm267_vm2, %v823_v30  ;;  %9118 = vpow2.f32 %v675_v42 }
 0x5b8   :  { %v9113_v31 = vpop.eup %9112 }
 0x5b9   :  { %v682_v33 = vsel %vm157_vm1, %v9113_v31, 0.0 }
 0x5ba   :  { %v9115_v36 = vpop.eup %9114  ;;  %683 = vadd.xlane.f32.xlu0 %v682_v33 }
 0x5bb   :  { %v679_v37 = vsel %vm157_vm1, %v9115_v36, 0.0 }
 0x5bc   :  { %680 = vadd.xlane.f32.xlu1 %v679_v37 }
 0x5be   :  { %v9117_v43 = vpop.eup %9116 }
 0x5bf   :  { %v688_v46 = vsel %vm157_vm1, %v9117_v43, 0.0 }
 0x5c2   :  { %v9119_v44 = vpop.eup %9118 }
 0x5c3   :  { %v685_v47 = vsel %vm157_vm1, %v9119_v44, 0.0 }
 0x5cd   :  { %816 = vrot.lane.b32.xlu1 %v9546_v21, %s9446_s28 }
 0x5d0   :  { %818 = vrot.lane.b32.xlu0 %v9542_v20, %s9446_s28 }
 0x5ef   :  { %689 = vadd.xlane.f32.xlu0 %v688_v46 }
 0x5f1   :  { %686 = vadd.xlane.f32.xlu1 %v685_v47 }
 0x602   :  { %810 = vrot.lane.b32.xlu1 %v9542_v20, %s9447_s29 }
 0x605   :  { %808 = vrot.lane.b32.xlu0 %v9546_v21, %s9447_s29 }
 0x606   :  { %814 = vrot.lane.b32.xlu1 %v9550_v22, %s9447_s29 }
 0x609   :  { %812 = vrot.lane.b32.xlu0 %v9556_v23, %s9447_s29 }
 0x60a   :  { %983 = vrot.lane.b32.xlu1 %v9550_v22, %s9448_s30 }
 0x60d   :  { %981 = vrot.lane.b32.xlu0 %v9556_v23, %s9448_s30 }
 0x60e   :  { %979 = vrot.lane.b32.xlu1 %v9542_v20, %s9448_s30 }
 0x612   :  { %977 = vrot.lane.b32.xlu1 %v9546_v21, %s9448_s30 }
 0x643   :  { %v684_v50 = vpop.xlane.xlu0 %683 }
 0x644   :  { %9120 = vrcp.f32 %v684_v50 }
 0x645   :  { %v681_v51 = vpop.xlane.xlu1 %680 }
 0x646   :  { %9122 = vrcp.f32 %v681_v51 }
 0x647   :  { %v819_v56 = vpop.permute.xlu0 %818 }
 0x649   :  { %v817_v62 = vpop.permute.xlu1 %816 }
 0x651   :  { %v9121_v52 = vpop.eup %9120 }
 0x652   :  { %v694_v55 = vmul.f32 %v9121_v52, %v9113_v31 }
 0x653   :  { %v9123_v53 = vpop.eup %9122 }
 0x654   :  { %v692_v54 = vmul.f32 %v9123_v53, %v9115_v36 }
 0x656   :  { %8393 = vmatprep.mubr.msk.f32.mxu1 %vm157_vm1, %v692_v54 }
 0x657   :  { %8394 = vmatmul.mubr.msk.f32.vlgmr.msra.gmra.mxu1 %vm157_vm1, %v694_v55 }
 0x658   :  { %8400 = vmatpush3.xpose.msk.msra.mxu1 %vm267_vm2, %v823_v30 }
 0x659   :  { %8401 = vmatprep.subr.msk.mxu1 %vm267_vm2, %v821_v48 }
 0x65c   :  { %8402 = vmatpush3.xpose.msk.msra.mxu1 %vm267_vm2, %v821_v48 }
 0x65d   :  { %8403 = vmatprep.subr.msk.mxu1 %vm267_vm2, %v819_v56 }
 0x660   :  { %8404 = vmatpush3.xpose.msk.msra.mxu1 %vm267_vm2, %v819_v56 }
 0x661   :  { %8405 = vmatprep.subr.msk.mxu1 %vm267_vm2, %v817_v62 }
 0x664   :  { %8406 = vmatpush3.xpose.msk.msra.mxu1 %vm267_vm2, %v817_v62 }
 0x678   :  { %v690_v63 = vpop.xlane.xlu0 %689 }
 0x679   :  { %9124 = vrcp.f32 %v690_v63 }
 0x67a   :  { %v687_v0 = vpop.xlane.xlu1 %686 }
 0x67b   :  { %9126 = vrcp.f32 %v687_v0 }
 0x67c   :  { %v809_v1 = vpop.permute.xlu0 %808 }
 0x67e   :  { %v811_v2 = vpop.permute.xlu1 %810 }
 0x680   :  { %v813_v3 = vpop.permute.xlu0 %812 }
 0x682   :  { %v815_v4 = vpop.permute.xlu1 %814 }
 0x684   :  { %v982_v8 = vpop.permute.xlu0 %981 }
 0x686   :  { %v984_v5 = vpop.permute.xlu1 %983  ;;  %v9125_v6 = vpop.eup %9124 }
 0x687   :  { %8413 = vmatprep.subr.mxu0 %v984_v5  ;;  %v698_v11 = vmul.f32 %v9125_v6, %v9117_v43 }
 0x688   :  { %v9127_v7 = vpop.eup %9126  ;;  %8414 = vmatpush3.msra.mxu0 %v984_v5 }
 0x689   :  { %8415 = vmatprep.subr.mxu0 %v982_v8  ;;  %v696_v9 = vmul.f32 %v9127_v7, %v9119_v44 }
 0x68a   :  { %v980_v10 = vpop.permute.xlu1 %979  ;;  %8416 = vmatpush3.msra.mxu0 %v982_v8 }
 0x68b   :  { %8396 = vmatprep.mubr.msk.f32.mxu1 %vm157_vm1, %v696_v9  ;;  %8417 = vmatprep.subr.mxu0 %v980_v10 }
 0x68c   :  { %8397 = vmatmul.mubr.msk.f32.gmra.mxu1 %vm157_vm1, %v698_v11  ;;  %8418 = vmatpush3.msra.mxu0 %v980_v10 }
 0x68d   :  { %8407 = vmatprep.mubr.msk.f32.mxu1 %vm267_vm2, %v809_v1 }
 0x68e   :  { %v978_v12 = vpop.permute.xlu1 %977 }
 0x68f   :  { %8419 = vmatprep.subr.mxu0 %v978_v12 }
 0x690   :  { %8408 = vmatmul.mubr.msk.f32.vlgmr.msra.gmra.mxu1 %vm267_vm2, %v811_v2  ;;  %8420 = vmatpush3.msra.mxu0 %v978_v12 }
 0x691   :  { %8410 = vmatprep.mubr.msk.f32.mxu1 %vm267_vm2, %v813_v3 }
 0x694   :  { %8411 = vmatmul.mubr.msk.f32.gmra.mxu1 %vm267_vm2, %v815_v4 }
 0x717   :  { %v9724_v13 = vpop.f32.mrf.mxu1 }
 0x719   :  { %v9726_v14 = vpop.f32.mrf.mxu1 }
 0x74c   :  { %v9728_v15 = vpop.f32.mrf.mxu1 }
 0x74e   :  { %v9730_v24 = vpop.f32.mrf.mxu1 }
 0x750   :  { %v8409_v25 = vpop.f32.mrf.mxu1 }
 0x751   :  { %v926_v26 = vmul.f32 0.35355338, %v8409_v25 }
 0x752   :  { %v906_v27 = vpop.f32.mrf.mxu1 }
 0x753   :  { %v925_v28 = vmul.f32 0.35355338, %v906_v27  ;;  %v930_v29 = vadd.f32 %v926_v26, %v9598_v41 }
 0x754   :  { %v8412_v30 = vpop.f32.mrf.mxu1 }
 0x755   :  { %v928_v31 = vmul.f32 0.35355338, %v8412_v30  ;;  %v936_v33 = vsel %vm157_vm1, %v930_v29, -inf  ;;  %v929_v36 = vadd.f32 %v925_v28, %v9603_v45 }
 0x756   :  { %937 = vmax.xlane.f32.xlu1 %v936_v33  ;;  %v916_v37 = vpop.f32.mrf.mxu1 }
 0x757   :  { %v927_v38 = vmul.f32 0.35355338, %v916_v37  ;;  %v933_v39 = vsel %vm157_vm1, %v929_v36, -inf  ;;  %v932_v40 = vadd.f32 %v928_v31, %v9606_v49 }
 0x758   :  { %934 = vmax.xlane.f32.xlu0 %v933_v39 }
 0x759   :  { %v942_v42 = vsel %vm157_vm1, %v932_v40, -inf  ;;  %v931_v43 = vadd.f32 %v927_v38, %v9615_v59 }
 0x75b   :  { %v939_v44 = vsel %vm157_vm1, %v931_v43, -inf }
 0x75c   :  { %943 = vmax.xlane.f32.xlu0 %v942_v42 }
 0x760   :  { %940 = vmax.xlane.f32.xlu0 %v939_v44 }
 0x767   :  { %1098 = vrot.lane.b32.xlu1 %v9556_v23, %s9449_s3 }
 0x776   :  { %1100 = vrot.lane.b32.xlu0 %v9550_v22, %s9449_s3 }
 0x7df   :  { %v938_v46 = vpop.xlane.xlu1 %937 }
 0x7e0   :  { %v946_v47 = vsub.f32 %v930_v29, %v938_v46 }
 0x7e1   :  { %v935_v48 = vpop.xlane.xlu0 %934 }
 0x7e2   :  { %v951_v50 = vmul.f32 1.442695, %v946_v47  ;;  %v945_v51 = vsub.f32 %v929_v36, %v935_v48 }
 0x7e3   :  { %v1099_v9 = vpop.permute.xlu1 %1098 }
 0x7e4   :  { %9128 = vpow2.f32 %v951_v50  ;;  %v949_v52 = vmul.f32 1.442695, %v945_v51 }
 0x7e5   :  { %v944_v53 = vpop.xlane.xlu0 %943 }
 0x7e6   :  { %9130 = vpow2.f32 %v949_v52  ;;  %v948_v1 = vsub.f32 %v932_v40, %v944_v53 }
 0x7e8   :  { %v955_v3 = vmul.f32 1.442695, %v948_v1 }
 0x7e9   :  { %v941_v54 = vpop.xlane.xlu0 %940 }
 0x7ea   :  { %v947_v2 = vsub.f32 %v931_v43, %v941_v54  ;;  %9132 = vpow2.f32 %v955_v3 }
 0x7ec   :  { %v953_v4 = vmul.f32 1.442695, %v947_v2 }
 0x7ed   :  { %v1101_v55 = vpop.permute.xlu0 %1100 }
 0x7ee   :  { %8427 = vmatprep.subr.msk.mxu0 %vm267_vm2, %v1101_v55  ;;  %9134 = vpow2.f32 %v953_v4 }
 0x7f1   :  { %v9129_v56 = vpop.eup %9128 }
 0x7f2   :  { %v960_v62 = vsel %vm157_vm1, %v9129_v56, 0.0 }
 0x7f3   :  { %v9131_v63 = vpop.eup %9130  ;;  %961 = vadd.xlane.f32.xlu0 %v960_v62 }
 0x7f4   :  { %v957_v0 = vsel %vm157_vm1, %v9131_v63, 0.0 }
 0x7f5   :  { %958 = vadd.xlane.f32.xlu1 %v957_v0 }
 0x7f7   :  { %v9133_v5 = vpop.eup %9132 }
 0x7f8   :  { %v966_v7 = vsel %vm157_vm1, %v9133_v5, 0.0 }
 0x7fb   :  { %v9135_v6 = vpop.eup %9134 }
 0x7fc   :  { %v963_v8 = vsel %vm157_vm1, %v9135_v6, 0.0 }
 0x806   :  { %1094 = vrot.lane.b32.xlu1 %v9546_v21, %s9449_s3 }
 0x809   :  { %1096 = vrot.lane.b32.xlu0 %v9542_v20, %s9449_s3 }
 0x828   :  { %967 = vadd.xlane.f32.xlu0 %v966_v7 }
 0x82a   :  { %964 = vadd.xlane.f32.xlu1 %v963_v8 }
 0x83b   :  { %1088 = vrot.lane.b32.xlu1 %v9542_v20, %s9450_s4 }
 0x83e   :  { %1086 = vrot.lane.b32.xlu0 %v9546_v21, %s9450_s4 }
 0x83f   :  { %1092 = vrot.lane.b32.xlu1 %v9550_v22, %s9450_s4 }
 0x842   :  { %1090 = vrot.lane.b32.xlu0 %v9556_v23, %s9450_s4 }
 0x87c   :  { %v962_v10 = vpop.xlane.xlu0 %961 }
 0x87d   :  { %9136 = vrcp.f32 %v962_v10 }
 0x87e   :  { %v959_v11 = vpop.xlane.xlu1 %958 }
 0x87f   :  { %9138 = vrcp.f32 %v959_v11 }
 0x880   :  { %v1097_v28 = vpop.permute.xlu0 %1096 }
 0x882   :  { %v1095_v29 = vpop.permute.xlu1 %1094 }
 0x88a   :  { %v9137_v12 = vpop.eup %9136 }
 0x88b   :  { %v972_v27 = vmul.f32 %v9137_v12, %v9129_v56 }
 0x88c   :  { %v9139_v25 = vpop.eup %9138 }
 0x88d   :  { %v970_v26 = vmul.f32 %v9139_v25, %v9131_v63 }
 0x88f   :  { %8421 = vmatprep.mubr.msk.f32.mxu0 %vm157_vm1, %v970_v26 }
 0x890   :  { %8422 = vmatmul.mubr.msk.f32.vlgmr.msra.gmra.mxu0 %vm157_vm1, %v972_v27 }
 0x891   :  { %8428 = vmatpush3.xpose.msk.msra.mxu0 %vm267_vm2, %v1101_v55 }
 0x892   :  { %8429 = vmatprep.subr.msk.mxu0 %vm267_vm2, %v1099_v9 }
 0x895   :  { %8430 = vmatpush3.xpose.msk.msra.mxu0 %vm267_vm2, %v1099_v9 }
 0x896   :  { %8431 = vmatprep.subr.msk.mxu0 %vm267_vm2, %v1097_v28 }
 0x899   :  { %8432 = vmatpush3.xpose.msk.msra.mxu0 %vm267_vm2, %v1097_v28 }
 0x89a   :  { %8433 = vmatprep.subr.msk.mxu0 %vm267_vm2, %v1095_v29 }
 0x89d   :  { %8434 = vmatpush3.xpose.msk.msra.mxu0 %vm267_vm2, %v1095_v29 }
 0x8b1   :  { %v968_v30 = vpop.xlane.xlu0 %967 }
 0x8b2   :  { %9140 = vrcp.f32 %v968_v30 }
 0x8b3   :  { %v965_v31 = vpop.xlane.xlu1 %964 }
 0x8b4   :  { %9142 = vrcp.f32 %v965_v31 }
 0x8b5   :  { %v1087_v38 = vpop.permute.xlu0 %1086 }
 0x8b7   :  { %v1089_v40 = vpop.permute.xlu1 %1088 }
 0x8b9   :  { %v1091_v42 = vpop.permute.xlu0 %1090 }
 0x8bb   :  { %v1093_v43 = vpop.permute.xlu1 %1092 }
 0x8bf   :  { %v9141_v33 = vpop.eup %9140 }
 0x8c0   :  { %v976_v39 = vmul.f32 %v9141_v33, %v9133_v5 }
 0x8c1   :  { %v9143_v36 = vpop.eup %9142 }
 0x8c2   :  { %v974_v37 = vmul.f32 %v9143_v36, %v9135_v6 }
 0x8c4   :  { %8424 = vmatprep.mubr.msk.f32.mxu0 %vm157_vm1, %v974_v37 }
 0x8c5   :  { %8425 = vmatmul.mubr.msk.f32.gmra.mxu0 %vm157_vm1, %v976_v39 }
 0x8c6   :  { %8435 = vmatprep.mubr.msk.f32.mxu0 %vm267_vm2, %v1087_v38 }
 0x8c9   :  { %8436 = vmatmul.mubr.msk.f32.vlgmr.msra.gmra.mxu0 %vm267_vm2, %v1089_v40 }
 0x8ca   :  { %8438 = vmatprep.mubr.msk.f32.mxu0 %vm267_vm2, %v1091_v42 }
 0x8cd   :  { %8439 = vmatmul.mubr.msk.f32.gmra.mxu0 %vm267_vm2, %v1093_v43 }
 0x950   :  { %v9776_v44 = vpop.f32.mrf.mxu0 }
 0x952   :  { %v1067_v46 = vpop.f32.mrf.mxu0 }
 0x985   :  { %v9778_v47 = vpop.f32.mrf.mxu0 }
 0x987   :  { %v1077_v48 = vpop.f32.mrf.mxu0 }
 0x989   :  { %v8437_v50 = vpop.f32.mrf.mxu0 }
 0x98a   :  { %v1204_v51 = vmul.f32 0.35355338, %v8437_v50 }
 0x98b   :  { %v1184_v52 = vpop.f32.mrf.mxu0 }
 0x98c   :  { %v1203_v53 = vmul.f32 0.35355338, %v1184_v52  ;;  %v1208_v54 = vadd.f32 %v1204_v51, %v9598_v41 }
 0x98d   :  { %v8440_v55 = vpop.f32.mrf.mxu0 }
 0x98e   :  { %v1214_v56 = vsel %vm157_vm1, %v1208_v54, -inf  ;;  %v1207_v62 = vadd.f32 %v1203_v53, %v9603_v45  ;;  %v1206_v0 = vmul.f32 0.35355338, %v8440_v55  ;;  %v143_v53 = vld [vmem:[%s11452_s1 + $0x78] sm:$0xff]  ;;  %v141_v55 = vld [vmem:[%s11452_s1 + $0x68] sm:$0xff] }
 0x98f   :  { %1215 = vmax.xlane.f32.xlu1 %v1214_v56  ;;  %v1194_v63 = vpop.f32.mrf.mxu0  ;;  %v140_v56 = vld [vmem:[%s11452_s1 + $0x60] sm:$0xff] }
 0x990   :  { %v1205_v1 = vmul.f32 0.35355338, %v1194_v63  ;;  %v1211_v2 = vsel %vm157_vm1, %v1207_v62, -inf  ;;  %v1210_v5 = vadd.f32 %v1206_v0, %v9606_v49 }
 0x991   :  { %1212 = vmax.xlane.f32.xlu0 %v1211_v2 }
 0x992   :  { %v1209_v3 = vadd.f32 %v1205_v1, %v9615_v59  ;;  %v1220_v6 = vsel %vm157_vm1, %v1210_v5, -inf }
 0x994   :  { %v1217_v4 = vsel %vm157_vm1, %v1209_v3, -inf }
 0x995   :  { %1218 = vmax.xlane.f32.xlu0 %v1217_v4 }
 0x999   :  { %1221 = vmax.xlane.f32.xlu0 %v1220_v6 }
 0x9a0   :  { %1261 = vrot.lane.b32.xlu1 %v9550_v22, %s9451_s5 }
 0xa18   :  { %v1216_v7 = vpop.xlane.xlu1 %1215 }
 0xa19   :  { %v1224_v8 = vsub.f32 %v1208_v54, %v1216_v7  ;;  %v142_v54 = vld [vmem:[%s11452_s1 + $0x70] sm:$0xff] }
 0xa1a   :  { %v1213_v9 = vpop.xlane.xlu0 %1212 }
 0xa1b   :  { %v1229_v10 = vmul.f32 1.442695, %v1224_v8  ;;  %v1223_v11 = vsub.f32 %v1207_v62, %v1213_v9 }
 0xa1c   :  { %v1262_v12 = vpop.permute.xlu1 %1261 }
 0xa1d   :  { %9144 = vpow2.f32 %v1229_v10  ;;  %v1227_v25 = vmul.f32 1.442695, %v1223_v11  ;;  %8441 = vmatprep.subr.mxu1 %v1262_v12 }
 0xa1e   :  { %8442 = vmatpush3.msra.mxu1 %v1262_v12  ;;  %v1219_v26 = vpop.xlane.xlu0 %1218 }
 0xa1f   :  { %9146 = vpow2.f32 %v1227_v25  ;;  %v1225_v38 = vsub.f32 %v1209_v3, %v1219_v26 }
 0xa21   :  { %v1231_v39 = vmul.f32 1.442695, %v1225_v38 }
 0xa22   :  { %v1222_v27 = vpop.xlane.xlu0 %1221 }
 0xa23   :  { %v1226_v28 = vsub.f32 %v1210_v5, %v1222_v27 }
 0xa25   :  { %v1233_v29 = vmul.f32 1.442695, %v1226_v28 }
 0xa27   :  { %9148 = vpow2.f32 %v1233_v29 }
 0xa28   :  { %9150 = vpow2.f32 %v1231_v39 }
 0xa2a   :  { %v9145_v30 = vpop.eup %9144 }
 0xa2b   :  { %v1238_v31 = vsel %vm157_vm1, %v9145_v30, 0.0 }
 0xa2c   :  { %v9147_v22 = vpop.eup %9146  ;;  %1239 = vadd.xlane.f32.xlu0 %v1238_v31 }
 0xa2d   :  { %v1235_v33 = vsel %vm157_vm1, %v9147_v22, 0.0 }
 0xa2e   :  { %1236 = vadd.xlane.f32.xlu1 %v1235_v33 }
 0xa34   :  { %v9149_v36 = vpop.eup %9148 }
 0xa35   :  { %v1244_v37 = vsel %vm157_vm1, %v9149_v36, 0.0  ;;  %v9151_v40 = vpop.eup %9150 }
 0xa36   :  { %1245 = vadd.xlane.f32.xlu0 %v1244_v37 }
 0xa3f   :  { %1257 = vrot.lane.b32.xlu1 %v9542_v20, %s9451_s5  ;;  %v1241_v20 = vsel %vm157_vm1, %v9151_v40, 0.0 }
 0xa4c   :  { %1259 = vrot.lane.b32.xlu0 %v9556_v23, %s9451_s5 }
 0xa50   :  { %1368 = vrot.lane.b32.xlu0 %v9726_v14, %s9452_s6 }
 0xa54   :  { %1384 = vrot.lane.b32.xlu0 %v1067_v46, %s9453_s7 }
 0xa58   :  { %1372 = vrot.lane.b32.xlu0 %v9730_v24, %s9452_s6 }
 0xa5c   :  { %1388 = vrot.lane.b32.xlu0 %v1077_v48, %s9453_s7 }
 0xa63   :  { %1242 = vadd.xlane.f32.xlu1 %v1241_v20 }
 0xa74   :  { %1255 = vrot.lane.b32.xlu1 %v9546_v21, %s9451_s5 }
 0xa78   :  { %1370 = vrot.lane.b32.xlu1 %v9724_v13, %s9452_s6 }
 0xa7c   :  { %1386 = vrot.lane.b32.xlu1 %v9776_v44, %s9453_s7 }
 0xa80   :  { %1374 = vrot.lane.b32.xlu1 %v9728_v15, %s9452_s6 }
 0xa84   :  { %1390 = vrot.lane.b32.xlu1 %v9778_v47, %s9453_s7 }
 0xab5   :  { %v1240_v14 = vpop.xlane.xlu0 %1239 }
 0xab7   :  { %v1237_v23 = vpop.xlane.xlu1 %1236 }
 0xab8   :  { %9152 = vrcp.f32 %v1237_v23 }
 0xab9   :  { %9154 = vrcp.f32 %v1240_v14 }
 0xabb   :  { %v1258_v21 = vpop.permute.xlu1 %1257 }
 0xabf   :  { %v1246_v24 = vpop.xlane.xlu0 %1245 }
 0xac0   :  { %9156 = vrcp.f32 %v1246_v24 }
 0xac3   :  { %v1260_v42 = vpop.permute.xlu0 %1259 }
 0xac4   :  { %8443 = vmatprep.subr.mxu1 %v1260_v42 }
 0xac5   :  { %v9153_v43 = vpop.eup %9152  ;;  %8444 = vmatpush3.msra.mxu1 %v1260_v42 }
 0xac6   :  { %8445 = vmatprep.subr.mxu1 %v1258_v21  ;;  %v1248_v13 = vmul.f32 %v9153_v43, %v9147_v22  ;;  %v9155_v44 = vpop.eup %9154 }
 0xac7   :  { %8446 = vmatpush3.msra.mxu1 %v1258_v21  ;;  %v1250_v47 = vmul.f32 %v9155_v44, %v9145_v30  ;;  %v1369_v3 = vpop.permute.xlu0 %1368 }
 0xac8   :  { %8449 = vmatprep.mubr.msk.f32.mxu1 %vm157_vm1, %v1248_v13  ;;  %v1412_v10 = vsel %vm267_vm2, %v9666_v58, %v1369_v3  ;;  %v145_v3 = vld [vmem:[%s11452_s1 + $0x88] sm:$0xff] }
 0xacb   :  { %v1385_v5 = vpop.permute.xlu0 %1384 }
 0xacc   :  { %v1417_v12 = vsel %vm1416_vm4, %v1412_v10, %v1385_v5  ;;  %v155_v5 = vld [vmem:[%s11452_s1 + $0xd8] sm:$0xff] }
 0xacd   :  { %v9157_v48 = vpop.eup %9156 }
 0xace   :  { %v1254_v52 = vmul.f32 %v9157_v48, %v9149_v36 }
 0xacf   :  { %v1373_v7 = vpop.permute.xlu0 %1372 }
 0xad0   :  { %v1414_v58 = vsel %vm267_vm2, %v9670_v61, %v1373_v7  ;;  %v153_v7 = vld [vmem:[%s11452_s1 + $0xc8] sm:$0xff] }
 0xad3   :  { %v1389_v9 = vpop.permute.xlu0 %1388 }
 0xad4   :  { %v1419_v31 = vsel %vm1416_vm4, %v1414_v58, %v1389_v9  ;;  %v9912_v58 = vld [vmem:[%s11452_s1 + $0xe0] sm:$0xff] }
 0xaec   :  { %v1243_v15 = vpop.xlane.xlu1 %1242 }
 0xaed   :  { %9158 = vrcp.f32 %v1243_v15 }
 0xaf0   :  { %v1256_v46 = vpop.permute.xlu1 %1255 }
 0xaf1   :  { %8447 = vmatprep.subr.mxu1 %v1256_v46 }
 0xaf2   :  { %8448 = vmatpush3.msra.mxu1 %v1256_v46 }
 0xaf3   :  { %8450 = vmatmul.mubr.msk.f32.vlgmr.msra.gmra.mxu1 %vm157_vm1, %v1250_v47  ;;  %8455 = vmatprep.subr.mxu1 %v143_v53 }
 0xaf4   :  { %8456 = vmatpush3.msra.mxu1 %v143_v53  ;;  %v1371_v2 = vpop.permute.xlu1 %1370 }
 0xaf5   :  { %8457 = vmatprep.subr.mxu1 %v142_v54  ;;  %v1413_v25 = vsel %vm267_vm2, %v9664_v57, %v1371_v2  ;;  %v146_v2 = vld [vmem:[%s11452_s1 + $0x90] sm:$0xff] }
 0xaf6   :  { %8458 = vmatpush3.msra.mxu1 %v142_v54 }
 0xaf7   :  { %8459 = vmatprep.subr.mxu1 %v141_v55 }
 0xaf8   :  { %8460 = vmatpush3.msra.mxu1 %v141_v55  ;;  %v1387_v4 = vpop.permute.xlu1 %1386 }
 0xaf9   :  { %8461 = vmatprep.subr.mxu1 %v140_v56  ;;  %v1418_v27 = vsel %vm1416_vm4, %v1413_v25, %v1387_v4  ;;  %v144_v4 = vld [vmem:[%s11452_s1 + $0x80] sm:$0xff] }
 0xafa   :  { %v9159_v50 = vpop.eup %9158  ;;  %8462 = vmatpush3.msra.mxu1 %v140_v56 }
 0xafb   :  { %v1252_v51 = vmul.f32 %v9159_v50, %v9151_v40  ;;  %8483 = vmatprep.subr.mxu1 %v155_v5 }
 0xafc   :  { %v1375_v6 = vpop.permute.xlu1 %1374 }
 0xafd   :  { %8452 = vmatprep.mubr.msk.f32.mxu1 %vm157_vm1, %v1252_v51  ;;  %v1415_v57 = vsel %vm267_vm2, %v9668_v60, %v1375_v6  ;;  %v154_v6 = vld [vmem:[%s11452_s1 + $0xd0] sm:$0xff] }
 0xafe   :  { %8453 = vmatmul.mubr.msk.f32.gmra.mxu1 %vm157_vm1, %v1254_v52 }
 0xb00   :  { %v1391_v8 = vpop.permute.xlu1 %1390 }
 0xb01   :  { %v1420_v33 = vsel %vm1416_vm4, %v1415_v57, %v1391_v8  ;;  %v152_v8 = vld [vmem:[%s11452_s1 + $0xc0] sm:$0xff] }
 0xbb3   :  { %v8451_v62 = vpop.f32.mrf.mxu1 }
 0xbb4   :  { %1402 = vrot.lane.b32.xlu1 %v8451_v62, %s9454_s18 }
 0xbb5   :  { %v1345_v63 = vpop.f32.mrf.mxu1 }
 0xbb6   :  { %1400 = vrot.lane.b32.xlu0 %v1345_v63, %s9454_s18 }
 0xbbe   :  { %v8454_v0 = vpop.f32.mrf.mxu1 }
 0xbbf   :  { %1406 = vrot.lane.b32.xlu1 %v8454_v0, %s9454_s18 }
 0xbc0   :  { %v1355_v1 = vpop.f32.mrf.mxu1 }
 0xbc1   :  { %1404 = vrot.lane.b32.xlu0 %v1355_v1, %s9454_s18  ;;  %v147_v1 = vld [vmem:[%s11452_s1 + $0x98] sm:$0xff] }
 0xbc2   :  { %8469 = vmatprep.subr.mxu0 %v147_v1 }
 0xbc3   :  { %8470 = vmatpush3.msra.mxu0 %v147_v1 }
 0xbc4   :  { %8471 = vmatprep.subr.mxu0 %v146_v2 }
 0xbc5   :  { %8472 = vmatpush3.msra.mxu0 %v146_v2  ;;  %v9948_v2 = vsub.s32 1, %v9586_v34 }
 0xbc6   :  { %8473 = vmatprep.subr.mxu0 %v145_v3 }
 0xbc7   :  { %8474 = vmatpush3.msra.mxu0 %v145_v3  ;;  %v1704_v3 = vrot.slane %v9912_v58, %v9948_v2 }
 0xbc8   :  { %8475 = vmatprep.subr.mxu0 %v144_v4 }
 0xbc9   :  { %8476 = vmatpush3.msra.mxu0 %v144_v4 }
 0xc26   :  { %v1403_v11 = vpop.permute.xlu1 %1402 }
 0xc27   :  { %v1423_v29 = vsel %vm1421_vm5, %v1418_v27, %v1403_v11 }
 0xc28   :  { %v1401_v26 = vpop.permute.xlu0 %1400 }
 0xc29   :  { %v1422_v28 = vsel %vm1421_vm5, %v1417_v12, %v1401_v26 }
 0xc2a   :  { %8463 = vmatprep.mubr.msk.f32.mxu1 %vm157_vm1, %v1422_v28 }
 0xc2b   :  { %8464 = vmatmul.mubr.msk.f32.vlgmr.msra.gmra.mxu1 %vm157_vm1, %v1423_v29  ;;  %v9907_v29 = vsub.s32 2, %v9586_v34 }
 0xc2c   :  { %8484 = vmatpush3.msra.mxu1 %v155_v5 }
 0xc2d   :  { %8485 = vmatprep.subr.mxu1 %v154_v6 }
 0xc2e   :  { %8486 = vmatpush3.msra.mxu1 %v154_v6 }
 0xc2f   :  { %8487 = vmatprep.subr.mxu1 %v153_v7 }
 0xc30   :  { %8488 = vmatpush3.msra.mxu1 %v153_v7 }
 0xc31   :  { %v1407_v30 = vpop.permute.xlu1 %1406  ;;  %8489 = vmatprep.subr.mxu1 %v152_v8 }
 0xc32   :  { %v1425_v37 = vsel %vm1421_vm5, %v1420_v33, %v1407_v30  ;;  %8490 = vmatpush3.msra.mxu1 %v152_v8  ;;  %v1583_v33 = vrot.slane %v9912_v58, %v9907_v29 }
 0xc33   :  { %v1405_v22 = vpop.permute.xlu0 %1404 }
 0xc34   :  { %v1424_v36 = vsel %vm1421_vm5, %v1419_v31, %v1405_v22 }
 0xc35   :  { %8466 = vmatprep.mubr.msk.f32.mxu1 %vm157_vm1, %v1424_v36  ;;  %v9917_v36 = vsub.s32 3, %v9586_v34 }
 0xc36   :  { %8467 = vmatmul.mubr.msk.f32.gmra.mxu1 %vm157_vm1, %v1425_v37 }
 0xceb   :  { %v8465_v38 = vpop.f32.mrf.mxu1 }
 0xcec   :  { %v1524_v61 = vadd.f32 %v8465_v38, %v9526_v16 }
 0xced   :  { %v1504_v39 = vpop.f32.mrf.mxu1 }
 0xcee   :  { %v1523_v40 = vadd.f32 %v1504_v39, %v9528_v17  ;;  %v1530_v20 = vsel %vm157_vm1, %v1524_v61, 0.0 }
 0xcef   :  { %1531 = vadd.xlane.f32.xlu1 %v1530_v20 }
 0xcf0   :  { %v1527_v60 = vsel %vm157_vm1, %v1523_v40, 0.0 }
 0xcf1   :  { %1528 = vadd.xlane.f32.xlu0 %v1527_v60 }
 0xcf6   :  { %v8468_v23 = vpop.f32.mrf.mxu1 }
 0xcf7   :  { %v1526_v42 = vadd.f32 %v8468_v23, %v9532_v18 }
 0xcf8   :  { %v1514_v14 = vpop.f32.mrf.mxu1 }
 0xcf9   :  { %v1525_v24 = vadd.f32 %v1514_v14, %v9536_v19  ;;  %v1536_v16 = vsel %vm157_vm1, %v1526_v42, 0.0 }
 0xcfb   :  { %v1533_v43 = vsel %vm157_vm1, %v1525_v24, 0.0 }
 0xcfc   :  { %1534 = vadd.xlane.f32.xlu0 %v1533_v43 }
 0xd00   :  { %1537 = vadd.xlane.f32.xlu0 %v1536_v16 }
 0xd78   :  { %v1532_v21 = vpop.xlane.xlu1 %1531 }
 0xd79   :  { %v1541_v17 = vmul.f32 0.03125, %v1532_v21 }
 0xd7a   :  { %v1529_v13 = vpop.xlane.xlu0 %1528 }
 0xd7b   :  { %v9862_v15 = vsub.f32 %v1524_v61, %v1541_v17  ;;  %v1540_v44 = vmul.f32 0.03125, %v1529_v13 }
 0xd7d   :  { %v9864_v46 = vsub.f32 %v1523_v40, %v1540_v44  ;;  %v1549_v47 = vmul.f32 %v9862_v15, %v9862_v15  ;;  %v1591_v40 = vrot.slane %v9912_v58, %v9917_v36  ;;  %v151_v44 = vld [vmem:[%s11452_s1 + $0xb8] sm:$0xff] }
 0xd7e   :  { %8491 = vmatprep.subr.mxu1 %v151_v44 }
 0xd7f   :  { %v1555_v19 = vsel %vm157_vm1, %v1549_v47, 0.0  ;;  %v1548_v18 = vmul.f32 %v9864_v46, %v9864_v46  ;;  %8492 = vmatpush3.msra.mxu1 %v151_v44  ;;  %v149_v47 = vld [vmem:[%s11452_s1 + $0xa8] sm:$0xff] }
 0xd80   :  { %1556 = vadd.xlane.f32.xlu0 %v1555_v19  ;;  %v148_v19 = vld [vmem:[%s11452_s1 + $0xa0] sm:$0xff] }
 0xd81   :  { %v1552_v48 = vsel %vm157_vm1, %v1548_v18, 0.0  ;;  %v1599_v18 = vrot.slane %v9912_v58, %v9589_v35 }
 0xd82   :  { %1553 = vadd.xlane.f32.xlu1 %v1552_v48 }
 0xd85   :  { %v1535_v50 = vpop.xlane.xlu0 %1534 }
 0xd86   :  { %v1542_v51 = vmul.f32 0.03125, %v1535_v50 }
 0xd88   :  { %v9872_v52 = vsub.f32 %v1525_v24, %v1542_v51 }
 0xd89   :  { %v1538_v53 = vpop.xlane.xlu0 %1537 }
 0xd8a   :  { %v1543_v54 = vmul.f32 0.03125, %v1538_v53  ;;  %v1550_v55 = vmul.f32 %v9872_v52, %v9872_v52 }
 0xd8c   :  { %v9876_v56 = vsub.f32 %v1526_v42, %v1543_v54  ;;  %v1558_v62 = vsel %vm157_vm1, %v1550_v55, 0.0 }
 0xd8d   :  { %1559 = vadd.xlane.f32.xlu1 %v1558_v62 }
 0xd8e   :  { %v1551_v63 = vmul.f32 %v9876_v56, %v9876_v56 }
 0xd90   :  { %v1561_v0 = vsel %vm157_vm1, %v1551_v63, 0.0 }
 0xd91   :  { %1562 = vadd.xlane.f32.xlu0 %v1561_v0 }
 0xe09   :  { %v1557_v9 = vpop.xlane.xlu0 %1556 }
 0xe0a   :  { %v1565_v10 = vmul.f32 0.03125, %v1557_v9 }
 0xe0b   :  { %v1554_v11 = vpop.xlane.xlu1 %1553 }
 0xe0c   :  { %v1569_v12 = vadd.f32 1e-05, %v1565_v10  ;;  %v1564_v25 = vmul.f32 0.03125, %v1554_v11 }
 0xe0e   :  { %9160 = vrsqrt.f32 %v1569_v12  ;;  %v1568_v26 = vadd.f32 1e-05, %v1564_v25 }
 0xe10   :  { %9162 = vrsqrt.f32 %v1568_v26 }
 0xe16   :  { %v1560_v27 = vpop.xlane.xlu1 %1559 }
 0xe17   :  { %v1566_v28 = vmul.f32 0.03125, %v1560_v27 }
 0xe19   :  { %v1570_v30 = vadd.f32 1e-05, %v1566_v28 }
 0xe1a   :  { %v1563_v31 = vpop.xlane.xlu0 %1562 }
 0xe1b   :  { %v9161_v57 = vpop.eup %9160  ;;  %9164 = vrsqrt.f32 %v1570_v30  ;;  %v1567_v22 = vmul.f32 0.03125, %v1563_v31 }
 0xe1c   :  { %v1577_v37 = vmul.f32 %v9161_v57, %v9862_v15 }
 0xe1d   :  { %v9163_v38 = vpop.eup %9162  ;;  %v1571_v61 = vadd.f32 1e-05, %v1567_v22 }
 0xe1e   :  { %v1576_v39 = vmul.f32 %v9163_v38, %v9864_v46  ;;  %v1585_v20 = vmul.f32 %v1583_v33, %v1577_v37  ;;  %v150_v46 = vld [vmem:[%s11452_s1 + $0xb0] sm:$0xff] }
 0xe1f   :  { %9166 = vrsqrt.f32 %v1571_v61  ;;  %8493 = vmatprep.subr.mxu1 %v150_v46 }
 0xe20   :  { %v1584_v60 = vmul.f32 %v1583_v33, %v1576_v39  ;;  %v1593_v14 = vadd.f32 %v1591_v40, %v1585_v20  ;;  %8494 = vmatpush3.msra.mxu1 %v150_v46  ;;  %v1877_v46 = vld [vmem:[%s11452_s1 + $0x100] sm:$0xff] }
 0xe21   :  { %8495 = vmatprep.subr.mxu1 %v149_v47  ;;  %8505 = vmatprep.subr.mxu0 %v1877_v46 }
 0xe22   :  { %v1592_v23 = vadd.f32 %v1591_v40, %v1584_v60  ;;  %8496 = vmatpush3.msra.mxu1 %v149_v47  ;;  %v1876_v47 = vld [vmem:[%s11452_s1 + $0xf8] sm:$0xff] }
 0xe23   :  { %8497 = vmatprep.subr.mxu1 %v148_v19 }
 0xe24   :  { %8477 = vmatprep.mubr.msk.f32.mxu0 %vm157_vm1, %v1592_v23  ;;  %8498 = vmatpush3.msra.mxu1 %v148_v19  ;;  %v1875_v19 = vld [vmem:[%s11452_s1 + $0xf0] sm:$0xff] }
 0xe25   :  { %8478 = vmatmul.mubr.msk.f32.vlgmr.msra.gmra.mxu0 %vm157_vm1, %v1593_v14 }
 0xe26   :  { %8506 = vmatpush3.msra.mxu0 %v1877_v46 }
 0xe27   :  { %8507 = vmatprep.subr.mxu0 %v1876_v47 }
 0xe28   :  { %v9165_v24 = vpop.eup %9164  ;;  %8508 = vmatpush3.msra.mxu0 %v1876_v47 }
 0xe29   :  { %v1578_v42 = vmul.f32 %v9165_v24, %v9872_v52  ;;  %8509 = vmatprep.subr.mxu0 %v1875_v19 }
 0xe2a   :  { %8510 = vmatpush3.msra.mxu0 %v1875_v19 }
 0xe2b   :  { %v1586_v43 = vmul.f32 %v1583_v33, %v1578_v42 }
 0xe2c   :  { %v9167_v16 = vpop.eup %9166 }
 0xe2d   :  { %v1594_v21 = vadd.f32 %v1591_v40, %v1586_v43  ;;  %v1579_v17 = vmul.f32 %v9167_v16, %v9876_v56 }
 0xe2f   :  { %8480 = vmatprep.mubr.msk.f32.mxu0 %vm157_vm1, %v1594_v21  ;;  %v1587_v13 = vmul.f32 %v1583_v33, %v1579_v17 }
 0xe31   :  { %v1595_v15 = vadd.f32 %v1591_v40, %v1587_v13 }
 0xe33   :  { %8481 = vmatmul.mubr.msk.f32.gmra.mxu0 %vm157_vm1, %v1595_v15 }
 0xee5   :  { %v8479_v48 = vpop.f32.mrf.mxu0 }
 0xee6   :  { %v1684_v50 = vadd.f32 %v8479_v48, %v1599_v18 }
 0xee7   :  { %v1678_v51 = vpop.f32.mrf.mxu0 }
 0xee8   :  { %v1679_v52 = vadd.f32 %v1678_v51, %v1599_v18  ;;  %v1698_v54 = vmax.f32 %v1684_v50, 0.0 }
 0xeea   :  { %v1697_v53 = vmax.f32 %v1679_v52, 0.0 }
 0xeec   :  { %8499 = vmatprep.mubr.msk.f32.mxu1 %vm23_vm0, %v1697_v53 }
 0xeed   :  { %8500 = vmatmul.mubr.msk.f32.vlgmr.msra.gmra.mxu1 %vm23_vm0, %v1698_v54 }
 0xef3   :  { %v8482_v55 = vpop.f32.mrf.mxu0 }
 0xef4   :  { %v1694_v56 = vadd.f32 %v8482_v55, %v1599_v18 }
 0xef5   :  { %v1688_v62 = vpop.f32.mrf.mxu0 }
 0xef6   :  { %v1689_v63 = vadd.f32 %v1688_v62, %v1599_v18  ;;  %v1700_v1 = vmax.f32 %v1694_v56, 0.0  ;;  %v1874_v18 = vld [vmem:[%s11452_s1 + $0xe8] sm:$0xff]  ;;  %v9973_v56 = vsub.s32 4, %v9586_v34 }
 0xef7   :  { %8511 = vmatprep.subr.mxu0 %v1874_v18 }
 0xef8   :  { %v1699_v0 = vmax.f32 %v1689_v63, 0.0  ;;  %8512 = vmatpush3.msra.mxu0 %v1874_v18 }
 0xefa   :  { %8502 = vmatprep.mubr.msk.f32.mxu1 %vm23_vm0, %v1699_v0 }
 0xefb   :  { %8503 = vmatmul.mubr.msk.f32.gmra.mxu1 %vm23_vm0, %v1700_v1 }
 0xfad   :  { %v8501_v4 = vpop.f32.mrf.mxu1 }
 0xfae   :  { %v1789_v5 = vadd.f32 %v8501_v4, %v1704_v3  ;;  %v1861_v4 = vrot.slane %v9912_v58, %v9973_v56 }
 0xfaf   :  { %v1783_v6 = vpop.f32.mrf.mxu1 }
 0xfb0   :  { %v1803_v7 = vadd.f32 %v1789_v5, %v1593_v14  ;;  %v1784_v8 = vadd.f32 %v1783_v6, %v1704_v3  ;;  %v9978_v5 = vsub.s32 5, %v9586_v34 }
 0xfb2   :  { %v1809_v9 = vsel %vm157_vm1, %v1803_v7, 0.0  ;;  %v1802_v10 = vadd.f32 %v1784_v8, %v1592_v23 }
 0xfb3   :  { %1810 = vadd.xlane.f32.xlu0 %v1809_v9 }
 0xfb4   :  { %v1806_v11 = vsel %vm157_vm1, %v1802_v10, 0.0 }
 0xfb5   :  { %1807 = vadd.xlane.f32.xlu1 %v1806_v11 }
 0xfbb   :  { %v8504_v12 = vpop.f32.mrf.mxu1 }
 0xfbc   :  { %v1799_v25 = vadd.f32 %v8504_v12, %v1704_v3 }
 0xfbd   :  { %v1793_v26 = vpop.f32.mrf.mxu1 }
 0xfbe   :  { %v1805_v27 = vadd.f32 %v1799_v25, %v1595_v15  ;;  %v1794_v28 = vadd.f32 %v1793_v26, %v1704_v3 }
 0xfc0   :  { %v1815_v30 = vsel %vm157_vm1, %v1805_v27, 0.0  ;;  %v1804_v31 = vadd.f32 %v1794_v28, %v1594_v21 }
 0xfc1   :  { %1816 = vadd.xlane.f32.xlu0 %v1815_v30 }
 0xfc2   :  { %v1812_v57 = vsel %vm157_vm1, %v1804_v31, 0.0 }
 0xfc3   :  { %1813 = vadd.xlane.f32.xlu1 %v1812_v57 }
0x103c   :  { %v1811_v22 = vpop.xlane.xlu0 %1810 }
0x103d   :  { %v1819_v33 = vmul.f32 0.03125, %v1811_v22 }
0x103e   :  { %v1808_v37 = vpop.xlane.xlu1 %1807 }
0x103f   :  { %v1823_v38 = vsub.f32 %v1803_v7, %v1819_v33  ;;  %v1818_v61 = vmul.f32 0.03125, %v1808_v37 }
0x1041   :  { %v1822_v39 = vsub.f32 %v1802_v10, %v1818_v61  ;;  %v1827_v40 = vmul.f32 %v1823_v38, %v1823_v38  ;;  %v1869_v10 = vrot.slane %v9912_v58, %v9978_v5 }
0x1043   :  { %v1833_v20 = vsel %vm157_vm1, %v1827_v40, 0.0  ;;  %v1826_v60 = vmul.f32 %v1822_v39, %v1822_v39 }
0x1044   :  { %1834 = vadd.xlane.f32.xlu0 %v1833_v20 }
0x1045   :  { %v1830_v23 = vsel %vm157_vm1, %v1826_v60, 0.0 }
0x1046   :  { %1831 = vadd.xlane.f32.xlu1 %v1830_v23 }
0x104a   :  { %v1817_v14 = vpop.xlane.xlu0 %1816 }
0x104b   :  { %v1821_v24 = vmul.f32 0.03125, %v1817_v14 }
0x104c   :  { %v1814_v42 = vpop.xlane.xlu1 %1813 }
0x104d   :  { %v1825_v43 = vsub.f32 %v1805_v27, %v1821_v24  ;;  %v1820_v16 = vmul.f32 0.03125, %v1814_v42 }
0x104f   :  { %v1824_v21 = vsub.f32 %v1804_v31, %v1820_v16  ;;  %v1829_v17 = vmul.f32 %v1825_v43, %v1825_v43 }
0x1051   :  { %v1839_v13 = vsel %vm157_vm1, %v1829_v17, 0.0  ;;  %v1828_v15 = vmul.f32 %v1824_v21, %v1824_v21 }
0x1052   :  { %1840 = vadd.xlane.f32.xlu0 %v1839_v13 }
0x1053   :  { %v1836_v44 = vsel %vm157_vm1, %v1828_v15, 0.0 }
0x1054   :  { %1837 = vadd.xlane.f32.xlu1 %v1836_v44 }
0x10cd   :  { %v1835_v48 = vpop.xlane.xlu0 %1834 }
0x10ce   :  { %v1843_v50 = vmul.f32 0.03125, %v1835_v48 }
0x10cf   :  { %v1832_v51 = vpop.xlane.xlu1 %1831 }
0x10d0   :  { %v1847_v52 = vadd.f32 1e-05, %v1843_v50  ;;  %v1842_v53 = vmul.f32 0.03125, %v1832_v51 }
0x10d2   :  { %9168 = vrsqrt.f32 %v1847_v52  ;;  %v1846_v54 = vadd.f32 1e-05, %v1842_v53 }
0x10d4   :  { %9170 = vrsqrt.f32 %v1846_v54 }
0x10db   :  { %v1841_v55 = vpop.xlane.xlu0 %1840 }
0x10dc   :  { %v1845_v62 = vmul.f32 0.03125, %v1841_v55 }
0x10dd   :  { %v1838_v63 = vpop.xlane.xlu1 %1837 }
0x10de   :  { %v1849_v0 = vadd.f32 1e-05, %v1845_v62  ;;  %v1844_v1 = vmul.f32 0.03125, %v1838_v63 }
0x10df   :  { %v9169_v3 = vpop.eup %9168 }
0x10e0   :  { %v1855_v6 = vmul.f32 %v9169_v3, %v1823_v38  ;;  %9172 = vrsqrt.f32 %v1849_v0  ;;  %v1848_v7 = vadd.f32 1e-05, %v1844_v1 }
0x10e1   :  { %v9171_v8 = vpop.eup %9170 }
0x10e2   :  { %9174 = vrsqrt.f32 %v1848_v7  ;;  %v1854_v9 = vmul.f32 %v9171_v8, %v1822_v39  ;;  %v1863_v11 = vmul.f32 %v1861_v4, %v1855_v6 }
0x10e4   :  { %v1862_v12 = vmul.f32 %v1861_v4, %v1854_v9  ;;  %v9984_v26 = vadd.f32 %v1869_v10, %v1863_v11 }
0x10e6   :  { %v9982_v25 = vadd.f32 %v1869_v10, %v1862_v12 }
0x10e8   :  { %8513 = vmatprep.mubr.msk.f32.mxu0 %vm157_vm1, %v9982_v25 }
0x10e9   :  { %8514 = vmatmul.mubr.msk.f32.vlgmr.msra.gmra.mxu0 %vm157_vm1, %v9984_v26 }
0x10ed   :  { %v9173_v34 = vpop.eup %9172 }
0x10ee   :  { %v1857_v27 = vmul.f32 %v9173_v34, %v1825_v43 }
0x10ef   :  { %v9175_v28 = vpop.eup %9174 }
0x10f0   :  { %v1856_v30 = vmul.f32 %v9175_v28, %v1824_v21  ;;  %v1865_v31 = vmul.f32 %v1861_v4, %v1857_v27 }
0x10f2   :  { %v1864_v57 = vmul.f32 %v1861_v4, %v1856_v30  ;;  %v9992_v58 = vadd.f32 %v1869_v10, %v1865_v31 }
0x10f4   :  { %v9990_v22 = vadd.f32 %v1869_v10, %v1864_v57 }
0x10f6   :  { %8516 = vmatprep.mubr.msk.f32.mxu0 %vm157_vm1, %v9990_v22 }
0x10f7   :  { %8517 = vmatmul.mubr.msk.f32.gmra.mxu0 %vm157_vm1, %v9992_v58 }
0x11a9   :  { %v9998_v33 = vpop.f32.mrf.mxu0 }
0x11ab   :  { %v10000_v37 = vpop.f32.mrf.mxu0 }
0x11ac   :  { %8527 = vmatprep.mubr.msk.f32.mxu0 %vm267_vm2, %v10000_v37 }
0x11b7   :  { %v10004_v38 = vpop.f32.mrf.mxu0 }
0x11b8   :  { %2002 = vrot.lane.b32.xlu1 %v10004_v38, %s9440_s13 }
0x11b9   :  { %v10008_v61 = vpop.f32.mrf.mxu0 }
0x11ba   :  { %2000 = vrot.lane.b32.xlu0 %v10008_v61, %s9440_s13 }
0x11bc   :  { %1998 = vrot.lane.b32.xlu1 %v9998_v33, %s9440_s13 }
0x11be   :  { %2161 = vrot.lane.b32.xlu0 %v10008_v61, %s9441_s14 }
0x11c0   :  { %1996 = vrot.lane.b32.xlu1 %v10000_v37, %s9440_s13 }
0x11c4   :  { %2163 = vrot.lane.b32.xlu1 %v10004_v38, %s9441_s14 }
0x11c8   :  { %2159 = vrot.lane.b32.xlu1 %v9998_v33, %s9441_s14 }
0x11cc   :  { %2157 = vrot.lane.b32.xlu1 %v10000_v37, %s9441_s14 }
0x122a   :  { %v2003_v39 = vpop.permute.xlu1 %2002 }
0x122b   :  { %8519 = vmatprep.subr.msk.mxu0 %vm267_vm2, %v2003_v39 }
0x122c   :  { %8520 = vmatpush3.xpose.msk.msra.mxu0 %vm267_vm2, %v2003_v39  ;;  %v2001_v40 = vpop.permute.xlu0 %2000 }
0x122d   :  { %8521 = vmatprep.subr.msk.mxu0 %vm267_vm2, %v2001_v40 }
0x122e   :  { %v1999_v20 = vpop.permute.xlu1 %1998 }
0x1230   :  { %8522 = vmatpush3.xpose.msk.msra.mxu0 %vm267_vm2, %v2001_v40  ;;  %v2162_v14 = vpop.permute.xlu0 %2161 }
0x1231   :  { %8523 = vmatprep.subr.msk.mxu0 %vm267_vm2, %v1999_v20 }
0x1232   :  { %v1997_v60 = vpop.permute.xlu1 %1996 }
0x1234   :  { %8524 = vmatpush3.xpose.msk.msra.mxu0 %vm267_vm2, %v1999_v20 }
0x1235   :  { %8525 = vmatprep.subr.msk.mxu0 %vm267_vm2, %v1997_v60 }
0x1236   :  { %v2164_v23 = vpop.permute.xlu1 %2163 }
0x1237   :  { %8533 = vmatprep.subr.mxu1 %v2164_v23 }
0x1238   :  { %8526 = vmatpush3.xpose.msk.msra.mxu0 %vm267_vm2, %v1997_v60  ;;  %8534 = vmatpush3.msra.mxu1 %v2164_v23 }
0x1239   :  { %8535 = vmatprep.subr.mxu1 %v2162_v14 }
0x123a   :  { %v2160_v24 = vpop.permute.xlu1 %2159  ;;  %8536 = vmatpush3.msra.mxu1 %v2162_v14 }
0x123b   :  { %8528 = vmatmul.mubr.msk.f32.vlgmr.msra.gmra.mxu0 %vm267_vm2, %v9998_v33  ;;  %8537 = vmatprep.subr.mxu1 %v2160_v24 }
0x123c   :  { %8530 = vmatprep.mubr.msk.f32.mxu0 %vm267_vm2, %v10008_v61  ;;  %8538 = vmatpush3.msra.mxu1 %v2160_v24 }
0x123e   :  { %v2158_v42 = vpop.permute.xlu1 %2157 }
0x123f   :  { %8531 = vmatmul.mubr.msk.f32.gmra.mxu0 %vm267_vm2, %v10004_v38  ;;  %8539 = vmatprep.subr.mxu1 %v2158_v42 }
0x1240   :  { %8540 = vmatpush3.msra.mxu1 %v2158_v42 }
0x12fb   :  { %v8529_v43 = vpop.f32.mrf.mxu0 }
0x12fc   :  { %v2106_v16 = vmul.f32 0.35355338, %v8529_v43 }
0x12fd   :  { %v2086_v21 = vpop.f32.mrf.mxu0 }
0x12fe   :  { %v2110_v17 = vadd.f32 %v2106_v16, %v9598_v41  ;;  %v2105_v13 = vmul.f32 0.35355338, %v2086_v21 }
0x12ff   :  { %v8532_v15 = vpop.f32.mrf.mxu0 }
0x1300   :  { %v2109_v44 = vadd.f32 %v2105_v13, %v9603_v45  ;;  %v2108_v46 = vmul.f32 0.35355338, %v8532_v15  ;;  %v2116_v47 = vsel %vm157_vm1, %v2110_v17, -inf }
0x1301   :  { %2117 = vmax.xlane.f32.xlu1 %v2116_v47  ;;  %v2096_v19 = vpop.f32.mrf.mxu0 }
0x1302   :  { %v2112_v18 = vadd.f32 %v2108_v46, %v9606_v49  ;;  %v2107_v48 = vmul.f32 0.35355338, %v2096_v19  ;;  %v2113_v50 = vsel %vm157_vm1, %v2109_v44, -inf }
0x1303   :  { %2114 = vmax.xlane.f32.xlu0 %v2113_v50 }
0x1304   :  { %v2111_v51 = vadd.f32 %v2107_v48, %v9615_v59  ;;  %v2122_v52 = vsel %vm157_vm1, %v2112_v18, -inf }
0x1306   :  { %v2119_v53 = vsel %vm157_vm1, %v2111_v51, -inf }
0x1307   :  { %2123 = vmax.xlane.f32.xlu0 %v2122_v52 }
0x130b   :  { %2120 = vmax.xlane.f32.xlu0 %v2119_v53 }
0x1312   :  { %2278 = vrot.lane.b32.xlu1 %v10008_v61, %s9443_s25 }
0x1321   :  { %2280 = vrot.lane.b32.xlu0 %v10004_v38, %s9443_s25 }
0x138a   :  { %v2118_v54 = vpop.xlane.xlu1 %2117 }
0x138b   :  { %v2126_v55 = vsub.f32 %v2110_v17, %v2118_v54 }
0x138c   :  { %v2115_v62 = vpop.xlane.xlu0 %2114 }
0x138d   :  { %v2131_v63 = vmul.f32 1.442695, %v2126_v55  ;;  %v2125_v0 = vsub.f32 %v2109_v44, %v2115_v62 }
0x138e   :  { %v2279_v39 = vpop.permute.xlu1 %2278 }
0x138f   :  { %9176 = vpow2.f32 %v2131_v63  ;;  %v2129_v1 = vmul.f32 1.442695, %v2125_v0 }
0x1390   :  { %v2124_v3 = vpop.xlane.xlu0 %2123 }
0x1391   :  { %9178 = vpow2.f32 %v2129_v1  ;;  %v2128_v11 = vsub.f32 %v2112_v18, %v2124_v3 }
0x1393   :  { %v2135_v34 = vmul.f32 1.442695, %v2128_v11 }
0x1394   :  { %v2121_v4 = vpop.xlane.xlu0 %2120 }
0x1395   :  { %v2127_v12 = vsub.f32 %v2111_v51, %v2121_v4  ;;  %9180 = vpow2.f32 %v2135_v34 }
0x1397   :  { %v2133_v27 = vmul.f32 1.442695, %v2127_v12 }
0x1398   :  { %v2281_v6 = vpop.permute.xlu0 %2280 }
0x1399   :  { %8547 = vmatprep.subr.msk.mxu1 %vm267_vm2, %v2281_v6  ;;  %9182 = vpow2.f32 %v2133_v27 }
0x139c   :  { %v9177_v7 = vpop.eup %9176 }
0x139d   :  { %v2140_v8 = vsel %vm157_vm1, %v9177_v7, 0.0 }
0x139e   :  { %v9179_v9 = vpop.eup %9178  ;;  %2141 = vadd.xlane.f32.xlu0 %v2140_v8 }
0x139f   :  { %v2137_v10 = vsel %vm157_vm1, %v9179_v9, 0.0 }
0x13a0   :  { %2138 = vadd.xlane.f32.xlu1 %v2137_v10 }
0x13a2   :  { %v9181_v28 = vpop.eup %9180 }
0x13a3   :  { %v2146_v31 = vsel %vm157_vm1, %v9181_v28, 0.0 }
0x13a6   :  { %v9183_v30 = vpop.eup %9182 }
0x13a7   :  { %v2143_v57 = vsel %vm157_vm1, %v9183_v30, 0.0 }
0x13b1   :  { %2274 = vrot.lane.b32.xlu1 %v10000_v37, %s9443_s25 }
0x13b4   :  { %2276 = vrot.lane.b32.xlu0 %v9998_v33, %s9443_s25 }
0x13d3   :  { %2147 = vadd.xlane.f32.xlu0 %v2146_v31 }
0x13d5   :  { %2144 = vadd.xlane.f32.xlu1 %v2143_v57 }
0x13e6   :  { %2268 = vrot.lane.b32.xlu1 %v9998_v33, %s9444_s26 }
0x13e9   :  { %2266 = vrot.lane.b32.xlu0 %v10000_v37, %s9444_s26 }
0x13ea   :  { %2272 = vrot.lane.b32.xlu1 %v10004_v38, %s9444_s26 }
0x13ed   :  { %2270 = vrot.lane.b32.xlu0 %v10008_v61, %s9444_s26 }
0x13ee   :  { %2441 = vrot.lane.b32.xlu1 %v10004_v38, %s9445_s27 }
0x13f1   :  { %2439 = vrot.lane.b32.xlu0 %v10008_v61, %s9445_s27 }
0x13f2   :  { %2437 = vrot.lane.b32.xlu1 %v9998_v33, %s9445_s27 }
0x13f6   :  { %2435 = vrot.lane.b32.xlu1 %v10000_v37, %s9445_s27 }
0x1427   :  { %v2142_v40 = vpop.xlane.xlu0 %2141 }
0x1428   :  { %9184 = vrcp.f32 %v2142_v40 }
0x1429   :  { %v2139_v20 = vpop.xlane.xlu1 %2138 }
0x142a   :  { %9186 = vrcp.f32 %v2139_v20 }
0x142b   :  { %v2277_v42 = vpop.permute.xlu0 %2276 }
0x142d   :  { %v2275_v43 = vpop.permute.xlu1 %2274 }
0x1435   :  { %v9185_v60 = vpop.eup %9184 }
0x1436   :  { %v2152_v24 = vmul.f32 %v9185_v60, %v9177_v7 }
0x1437   :  { %v9187_v23 = vpop.eup %9186 }
0x1438   :  { %v2150_v14 = vmul.f32 %v9187_v23, %v9179_v9 }
0x143a   :  { %8541 = vmatprep.mubr.msk.f32.mxu1 %vm157_vm1, %v2150_v14 }
0x143b   :  { %8542 = vmatmul.mubr.msk.f32.vlgmr.msra.gmra.mxu1 %vm157_vm1, %v2152_v24 }
0x143c   :  { %8548 = vmatpush3.xpose.msk.msra.mxu1 %vm267_vm2, %v2281_v6 }
0x143d   :  { %8549 = vmatprep.subr.msk.mxu1 %vm267_vm2, %v2279_v39 }
0x1440   :  { %8550 = vmatpush3.xpose.msk.msra.mxu1 %vm267_vm2, %v2279_v39 }
0x1441   :  { %8551 = vmatprep.subr.msk.mxu1 %vm267_vm2, %v2277_v42 }
0x1444   :  { %8552 = vmatpush3.xpose.msk.msra.mxu1 %vm267_vm2, %v2277_v42 }
0x1445   :  { %8553 = vmatprep.subr.msk.mxu1 %vm267_vm2, %v2275_v43 }
0x1448   :  { %8554 = vmatpush3.xpose.msk.msra.mxu1 %vm267_vm2, %v2275_v43 }
0x145c   :  { %v2148_v16 = vpop.xlane.xlu0 %2147 }
0x145d   :  { %9188 = vrcp.f32 %v2148_v16 }
0x145e   :  { %v2145_v21 = vpop.xlane.xlu1 %2144 }
0x145f   :  { %9190 = vrcp.f32 %v2145_v21 }
0x1460   :  { %v2267_v17 = vpop.permute.xlu0 %2266 }
0x1462   :  { %v2269_v13 = vpop.permute.xlu1 %2268 }
0x1464   :  { %v2271_v15 = vpop.permute.xlu0 %2270 }
0x1466   :  { %v2273_v44 = vpop.permute.xlu1 %2272 }
0x1468   :  { %v2440_v18 = vpop.permute.xlu0 %2439 }
0x146a   :  { %v2442_v46 = vpop.permute.xlu1 %2441  ;;  %v9189_v47 = vpop.eup %9188 }
0x146b   :  { %8561 = vmatprep.subr.mxu0 %v2442_v46  ;;  %v2156_v51 = vmul.f32 %v9189_v47, %v9181_v28 }
0x146c   :  { %v9191_v19 = vpop.eup %9190  ;;  %8562 = vmatpush3.msra.mxu0 %v2442_v46 }
0x146d   :  { %8563 = vmatprep.subr.mxu0 %v2440_v18  ;;  %v2154_v48 = vmul.f32 %v9191_v19, %v9183_v30 }
0x146e   :  { %v2438_v50 = vpop.permute.xlu1 %2437  ;;  %8564 = vmatpush3.msra.mxu0 %v2440_v18 }
0x146f   :  { %8544 = vmatprep.mubr.msk.f32.mxu1 %vm157_vm1, %v2154_v48  ;;  %8565 = vmatprep.subr.mxu0 %v2438_v50 }
0x1470   :  { %8545 = vmatmul.mubr.msk.f32.gmra.mxu1 %vm157_vm1, %v2156_v51  ;;  %8566 = vmatpush3.msra.mxu0 %v2438_v50 }
0x1471   :  { %8555 = vmatprep.mubr.msk.f32.mxu1 %vm267_vm2, %v2267_v17 }
0x1472   :  { %v2436_v52 = vpop.permute.xlu1 %2435 }
0x1473   :  { %8567 = vmatprep.subr.mxu0 %v2436_v52 }
0x1474   :  { %8556 = vmatmul.mubr.msk.f32.vlgmr.msra.gmra.mxu1 %vm267_vm2, %v2269_v13  ;;  %8568 = vmatpush3.msra.mxu0 %v2436_v52 }
0x1475   :  { %8558 = vmatprep.mubr.msk.f32.mxu1 %vm267_vm2, %v2271_v15 }
0x1478   :  { %8559 = vmatmul.mubr.msk.f32.gmra.mxu1 %vm267_vm2, %v2273_v44 }
0x14fb   :  { %v10090_v53 = vpop.f32.mrf.mxu1 }
0x14fd   :  { %v10092_v54 = vpop.f32.mrf.mxu1 }
0x1530   :  { %v10094_v55 = vpop.f32.mrf.mxu1 }
0x1532   :  { %v10096_v62 = vpop.f32.mrf.mxu1 }
0x1534   :  { %v8557_v63 = vpop.f32.mrf.mxu1 }
0x1535   :  { %v2384_v0 = vmul.f32 0.35355338, %v8557_v63 }
0x1536   :  { %v2364_v1 = vpop.f32.mrf.mxu1 }
0x1537   :  { %v2388_v3 = vadd.f32 %v2384_v0, %v9598_v41  ;;  %v2383_v4 = vmul.f32 0.35355338, %v2364_v1 }
0x1538   :  { %v8560_v6 = vpop.f32.mrf.mxu1 }
0x1539   :  { %v2387_v7 = vadd.f32 %v2383_v4, %v9603_v45  ;;  %v2386_v8 = vmul.f32 0.35355338, %v8560_v6  ;;  %v2394_v9 = vsel %vm157_vm1, %v2388_v3, -inf }
0x153a   :  { %2395 = vmax.xlane.f32.xlu1 %v2394_v9  ;;  %v2374_v10 = vpop.f32.mrf.mxu1 }
0x153b   :  { %v2390_v11 = vadd.f32 %v2386_v8, %v9606_v49  ;;  %v2385_v12 = vmul.f32 0.35355338, %v2374_v10  ;;  %v2391_v34 = vsel %vm157_vm1, %v2387_v7, -inf }
0x153c   :  { %2392 = vmax.xlane.f32.xlu0 %v2391_v34 }
0x153d   :  { %v2389_v27 = vadd.f32 %v2385_v12, %v9615_v59  ;;  %v2400_v28 = vsel %vm157_vm1, %v2390_v11, -inf }
0x153f   :  { %v2397_v30 = vsel %vm157_vm1, %v2389_v27, -inf }
0x1540   :  { %2401 = vmax.xlane.f32.xlu0 %v2400_v28 }
0x1544   :  { %2398 = vmax.xlane.f32.xlu0 %v2397_v30 }
0x154b   :  { %2556 = vrot.lane.b32.xlu1 %v10008_v61, %s9446_s28 }
0x155a   :  { %2558 = vrot.lane.b32.xlu0 %v10004_v38, %s9446_s28 }
0x15c3   :  { %v2396_v31 = vpop.xlane.xlu1 %2395 }
0x15c4   :  { %v2404_v57 = vsub.f32 %v2388_v3, %v2396_v31 }
0x15c5   :  { %v2393_v39 = vpop.xlane.xlu0 %2392 }
0x15c6   :  { %v2409_v40 = vmul.f32 1.442695, %v2404_v57  ;;  %v2403_v20 = vsub.f32 %v2387_v7, %v2393_v39 }
0x15c7   :  { %v2557_v48 = vpop.permute.xlu1 %2556 }
0x15c8   :  { %9192 = vpow2.f32 %v2409_v40  ;;  %v2407_v60 = vmul.f32 1.442695, %v2403_v20 }
0x15c9   :  { %v2402_v23 = vpop.xlane.xlu0 %2401 }
0x15ca   :  { %9194 = vpow2.f32 %v2407_v60  ;;  %v2406_v17 = vsub.f32 %v2390_v11, %v2402_v23 }
0x15cc   :  { %v2413_v15 = vmul.f32 1.442695, %v2406_v17 }
0x15cd   :  { %v2399_v14 = vpop.xlane.xlu0 %2398 }
0x15ce   :  { %v2405_v13 = vsub.f32 %v2389_v27, %v2399_v14  ;;  %9196 = vpow2.f32 %v2413_v15 }
0x15d0   :  { %v2411_v44 = vmul.f32 1.442695, %v2405_v13 }
0x15d1   :  { %v2559_v24 = vpop.permute.xlu0 %2558 }
0x15d2   :  { %8575 = vmatprep.subr.msk.mxu0 %vm267_vm2, %v2559_v24  ;;  %9198 = vpow2.f32 %v2411_v44 }
0x15d5   :  { %v9193_v42 = vpop.eup %9192 }
0x15d6   :  { %v2418_v43 = vsel %vm157_vm1, %v9193_v42, 0.0 }
0x15d7   :  { %v9195_v16 = vpop.eup %9194  ;;  %2419 = vadd.xlane.f32.xlu0 %v2418_v43 }
0x15d8   :  { %v2415_v21 = vsel %vm157_vm1, %v9195_v16, 0.0 }
0x15d9   :  { %2416 = vadd.xlane.f32.xlu1 %v2415_v21 }
0x15db   :  { %v9197_v46 = vpop.eup %9196 }
0x15dc   :  { %v2424_v19 = vsel %vm157_vm1, %v9197_v46, 0.0 }
0x15df   :  { %v9199_v47 = vpop.eup %9198 }
0x15e0   :  { %v2421_v18 = vsel %vm157_vm1, %v9199_v47, 0.0 }
0x15ea   :  { %2552 = vrot.lane.b32.xlu1 %v10000_v37, %s9446_s28 }
0x15ed   :  { %2554 = vrot.lane.b32.xlu0 %v9998_v33, %s9446_s28 }
0x160c   :  { %2425 = vadd.xlane.f32.xlu0 %v2424_v19 }
0x160e   :  { %2422 = vadd.xlane.f32.xlu1 %v2421_v18 }
0x161f   :  { %2546 = vrot.lane.b32.xlu1 %v9998_v33, %s9447_s29 }
0x1622   :  { %2544 = vrot.lane.b32.xlu0 %v10000_v37, %s9447_s29 }
0x1623   :  { %2550 = vrot.lane.b32.xlu1 %v10004_v38, %s9447_s29 }
0x1626   :  { %2548 = vrot.lane.b32.xlu0 %v10008_v61, %s9447_s29 }
0x1627   :  { %2719 = vrot.lane.b32.xlu1 %v10004_v38, %s9448_s30 }
0x162a   :  { %2717 = vrot.lane.b32.xlu0 %v10008_v61, %s9448_s30 }
0x162b   :  { %2715 = vrot.lane.b32.xlu1 %v9998_v33, %s9448_s30 }
0x162f   :  { %2713 = vrot.lane.b32.xlu1 %v10000_v37, %s9448_s30 }
0x1660   :  { %v2420_v50 = vpop.xlane.xlu0 %2419 }
0x1661   :  { %9200 = vrcp.f32 %v2420_v50 }
0x1662   :  { %v2417_v51 = vpop.xlane.xlu1 %2416 }
0x1663   :  { %9202 = vrcp.f32 %v2417_v51 }
0x1664   :  { %v2555_v3 = vpop.permute.xlu0 %2554 }
0x1666   :  { %v2553_v4 = vpop.permute.xlu1 %2552 }
0x166e   :  { %v9201_v52 = vpop.eup %9200 }
0x166f   :  { %v2430_v1 = vmul.f32 %v9201_v52, %v9193_v42 }
0x1670   :  { %v9203_v63 = vpop.eup %9202 }
0x1671   :  { %v2428_v0 = vmul.f32 %v9203_v63, %v9195_v16 }
0x1673   :  { %8569 = vmatprep.mubr.msk.f32.mxu0 %vm157_vm1, %v2428_v0 }
0x1674   :  { %8570 = vmatmul.mubr.msk.f32.vlgmr.msra.gmra.mxu0 %vm157_vm1, %v2430_v1 }
0x1675   :  { %8576 = vmatpush3.xpose.msk.msra.mxu0 %vm267_vm2, %v2559_v24 }
0x1676   :  { %8577 = vmatprep.subr.msk.mxu0 %vm267_vm2, %v2557_v48 }
0x1679   :  { %8578 = vmatpush3.xpose.msk.msra.mxu0 %vm267_vm2, %v2557_v48 }
0x167a   :  { %8579 = vmatprep.subr.msk.mxu0 %vm267_vm2, %v2555_v3 }
0x167d   :  { %8580 = vmatpush3.xpose.msk.msra.mxu0 %vm267_vm2, %v2555_v3 }
0x167e   :  { %8581 = vmatprep.subr.msk.mxu0 %vm267_vm2, %v2553_v4 }
0x1681   :  { %8582 = vmatpush3.xpose.msk.msra.mxu0 %vm267_vm2, %v2553_v4 }
0x1695   :  { %v2426_v6 = vpop.xlane.xlu0 %2425 }
0x1696   :  { %9204 = vrcp.f32 %v2426_v6 }
0x1697   :  { %v2423_v7 = vpop.xlane.xlu1 %2422 }
0x1698   :  { %9206 = vrcp.f32 %v2423_v7 }
0x1699   :  { %v2545_v8 = vpop.permute.xlu0 %2544 }
0x169b   :  { %v2547_v9 = vpop.permute.xlu1 %2546 }
0x169d   :  { %v2549_v10 = vpop.permute.xlu0 %2548 }
0x169f   :  { %v2551_v11 = vpop.permute.xlu1 %2550 }
0x16a1   :  { %v2718_v28 = vpop.permute.xlu0 %2717 }
0x16a3   :  { %v2720_v12 = vpop.permute.xlu1 %2719  ;;  %v9205_v34 = vpop.eup %9204 }
0x16a4   :  { %8589 = vmatprep.subr.mxu1 %v2720_v12  ;;  %v2434_v57 = vmul.f32 %v9205_v34, %v9197_v46 }
0x16a5   :  { %v9207_v27 = vpop.eup %9206  ;;  %8590 = vmatpush3.msra.mxu1 %v2720_v12 }
0x16a6   :  { %8591 = vmatprep.subr.mxu1 %v2718_v28  ;;  %v2432_v30 = vmul.f32 %v9207_v27, %v9199_v47 }
0x16a7   :  { %v2716_v31 = vpop.permute.xlu1 %2715  ;;  %8592 = vmatpush3.msra.mxu1 %v2718_v28 }
0x16a8   :  { %8572 = vmatprep.mubr.msk.f32.mxu0 %vm157_vm1, %v2432_v30  ;;  %8593 = vmatprep.subr.mxu1 %v2716_v31 }
0x16a9   :  { %8573 = vmatmul.mubr.msk.f32.gmra.mxu0 %vm157_vm1, %v2434_v57  ;;  %8594 = vmatpush3.msra.mxu1 %v2716_v31 }
0x16aa   :  { %8583 = vmatprep.mubr.msk.f32.mxu0 %vm267_vm2, %v2545_v8 }
0x16ab   :  { %v2714_v39 = vpop.permute.xlu1 %2713 }
0x16ac   :  { %8595 = vmatprep.subr.mxu1 %v2714_v39 }
0x16ad   :  { %8584 = vmatmul.mubr.msk.f32.vlgmr.msra.gmra.mxu0 %vm267_vm2, %v2547_v9  ;;  %8596 = vmatpush3.msra.mxu1 %v2714_v39 }
0x16ae   :  { %8586 = vmatprep.mubr.msk.f32.mxu0 %vm267_vm2, %v2549_v10 }
0x16b1   :  { %8587 = vmatmul.mubr.msk.f32.gmra.mxu0 %vm267_vm2, %v2551_v11 }
0x1734   :  { %v10150_v40 = vpop.f32.mrf.mxu0 }
0x1736   :  { %v10152_v20 = vpop.f32.mrf.mxu0 }
0x1769   :  { %v10154_v60 = vpop.f32.mrf.mxu0 }
0x176b   :  { %v10156_v23 = vpop.f32.mrf.mxu0 }
0x176d   :  { %v8585_v14 = vpop.f32.mrf.mxu0 }
0x176e   :  { %v2662_v24 = vmul.f32 0.35355338, %v8585_v14 }
0x176f   :  { %v2642_v42 = vpop.f32.mrf.mxu0 }
0x1770   :  { %v2666_v43 = vadd.f32 %v2662_v24, %v9598_v41  ;;  %v2661_v16 = vmul.f32 0.35355338, %v2642_v42 }
0x1771   :  { %v8588_v21 = vpop.f32.mrf.mxu0 }
0x1772   :  { %v2665_v17 = vadd.f32 %v2661_v16, %v9603_v45  ;;  %v2664_v13 = vmul.f32 0.35355338, %v8588_v21  ;;  %v2672_v15 = vsel %vm157_vm1, %v2666_v43, -inf }
0x1773   :  { %2673 = vmax.xlane.f32.xlu1 %v2672_v15  ;;  %v2652_v44 = vpop.f32.mrf.mxu0 }
0x1774   :  { %v2668_v46 = vadd.f32 %v2664_v13, %v9606_v49  ;;  %v2663_v47 = vmul.f32 0.35355338, %v2652_v44  ;;  %v2669_v19 = vsel %vm157_vm1, %v2665_v17, -inf }
0x1775   :  { %2670 = vmax.xlane.f32.xlu0 %v2669_v19 }
0x1776   :  { %v2667_v18 = vadd.f32 %v2663_v47, %v9615_v59  ;;  %v2678_v48 = vsel %vm157_vm1, %v2668_v46, -inf }
0x1778   :  { %v2675_v50 = vsel %vm157_vm1, %v2667_v18, -inf }
0x1779   :  { %2679 = vmax.xlane.f32.xlu0 %v2678_v48 }
0x177d   :  { %2676 = vmax.xlane.f32.xlu0 %v2675_v50 }
0x1784   :  { %2834 = vrot.lane.b32.xlu1 %v10008_v61, %s9449_s3 }
0x1793   :  { %2836 = vrot.lane.b32.xlu0 %v10004_v38, %s9449_s3 }
0x17fc   :  { %v2674_v51 = vpop.xlane.xlu1 %2673 }
0x17fd   :  { %v2682_v52 = vsub.f32 %v2666_v43, %v2674_v51 }
0x17fe   :  { %v2671_v63 = vpop.xlane.xlu0 %2670 }
0x17ff   :  { %v2687_v0 = vmul.f32 1.442695, %v2682_v52  ;;  %v2681_v1 = vsub.f32 %v2665_v17, %v2671_v63 }
0x1800   :  { %v2835_v14 = vpop.permute.xlu1 %2834 }
0x1801   :  { %9208 = vpow2.f32 %v2687_v0  ;;  %v2685_v3 = vmul.f32 1.442695, %v2681_v1 }
0x1802   :  { %v2680_v4 = vpop.xlane.xlu0 %2679 }
0x1803   :  { %9210 = vpow2.f32 %v2685_v3  ;;  %v2684_v12 = vsub.f32 %v2668_v46, %v2680_v4 }
0x1805   :  { %v2691_v27 = vmul.f32 1.442695, %v2684_v12 }
0x1806   :  { %v2677_v6 = vpop.xlane.xlu0 %2676 }
0x1807   :  { %v2683_v34 = vsub.f32 %v2667_v18, %v2677_v6  ;;  %9212 = vpow2.f32 %v2691_v27 }
0x1809   :  { %v2689_v28 = vmul.f32 1.442695, %v2683_v34 }
0x180a   :  { %v2837_v7 = vpop.permute.xlu0 %2836 }
0x180b   :  { %8603 = vmatprep.subr.msk.mxu1 %vm267_vm2, %v2837_v7  ;;  %9214 = vpow2.f32 %v2689_v28 }
0x180e   :  { %v9209_v8 = vpop.eup %9208 }
0x180f   :  { %v2696_v9 = vsel %vm157_vm1, %v9209_v8, 0.0 }
0x1810   :  { %v9211_v10 = vpop.eup %9210  ;;  %2697 = vadd.xlane.f32.xlu0 %v2696_v9 }
0x1811   :  { %v2693_v11 = vsel %vm157_vm1, %v9211_v10, 0.0 }
0x1812   :  { %2694 = vadd.xlane.f32.xlu1 %v2693_v11 }
0x1814   :  { %v9213_v30 = vpop.eup %9212 }
0x1815   :  { %v2702_v57 = vsel %vm157_vm1, %v9213_v30, 0.0 }
0x1818   :  { %v9215_v31 = vpop.eup %9214 }
0x1819   :  { %v2699_v39 = vsel %vm157_vm1, %v9215_v31, 0.0 }
0x1823   :  { %2830 = vrot.lane.b32.xlu1 %v10000_v37, %s9449_s3 }
0x1826   :  { %2832 = vrot.lane.b32.xlu0 %v9998_v33, %s9449_s3 }
0x1845   :  { %2703 = vadd.xlane.f32.xlu0 %v2702_v57 }
0x1847   :  { %2700 = vadd.xlane.f32.xlu1 %v2699_v39 }
0x1858   :  { %2824 = vrot.lane.b32.xlu1 %v9998_v33, %s9450_s4 }
0x185b   :  { %2822 = vrot.lane.b32.xlu0 %v10000_v37, %s9450_s4 }
0x185c   :  { %2828 = vrot.lane.b32.xlu1 %v10004_v38, %s9450_s4 }
0x185f   :  { %2826 = vrot.lane.b32.xlu0 %v10008_v61, %s9450_s4 }
0x1899   :  { %v2698_v24 = vpop.xlane.xlu0 %2697 }
0x189a   :  { %9216 = vrcp.f32 %v2698_v24 }
0x189b   :  { %v2695_v42 = vpop.xlane.xlu1 %2694 }
0x189c   :  { %9218 = vrcp.f32 %v2695_v42 }
0x189d   :  { %v2833_v13 = vpop.permute.xlu0 %2832 }
0x189f   :  { %v2831_v15 = vpop.permute.xlu1 %2830 }
0x18a7   :  { %v9217_v43 = vpop.eup %9216 }
0x18a8   :  { %v2708_v17 = vmul.f32 %v9217_v43, %v9209_v8 }
0x18a9   :  { %v9219_v16 = vpop.eup %9218 }
0x18aa   :  { %v2706_v21 = vmul.f32 %v9219_v16, %v9211_v10 }
0x18ac   :  { %8597 = vmatprep.mubr.msk.f32.mxu1 %vm157_vm1, %v2706_v21 }
0x18ad   :  { %8598 = vmatmul.mubr.msk.f32.vlgmr.msra.gmra.mxu1 %vm157_vm1, %v2708_v17 }
0x18ae   :  { %8604 = vmatpush3.xpose.msk.msra.mxu1 %vm267_vm2, %v2837_v7 }
0x18af   :  { %8605 = vmatprep.subr.msk.mxu1 %vm267_vm2, %v2835_v14 }
0x18b2   :  { %8606 = vmatpush3.xpose.msk.msra.mxu1 %vm267_vm2, %v2835_v14 }
0x18b3   :  { %8607 = vmatprep.subr.msk.mxu1 %vm267_vm2, %v2833_v13 }
0x18b6   :  { %8608 = vmatpush3.xpose.msk.msra.mxu1 %vm267_vm2, %v2833_v13 }
0x18b7   :  { %8609 = vmatprep.subr.msk.mxu1 %vm267_vm2, %v2831_v15 }
0x18ba   :  { %8610 = vmatpush3.xpose.msk.msra.mxu1 %vm267_vm2, %v2831_v15 }
0x18ce   :  { %v2704_v44 = vpop.xlane.xlu0 %2703 }
0x18cf   :  { %9220 = vrcp.f32 %v2704_v44 }
0x18d0   :  { %v2701_v46 = vpop.xlane.xlu1 %2700 }
0x18d1   :  { %9222 = vrcp.f32 %v2701_v46 }
0x18d2   :  { %v2823_v48 = vpop.permute.xlu0 %2822 }
0x18d4   :  { %v2825_v51 = vpop.permute.xlu1 %2824 }
0x18d6   :  { %v2827_v52 = vpop.permute.xlu0 %2826 }
0x18d8   :  { %v2829_v63 = vpop.permute.xlu1 %2828 }
0x18dc   :  { %v9221_v47 = vpop.eup %9220 }
0x18dd   :  { %v2712_v50 = vmul.f32 %v9221_v47, %v9213_v30 }
0x18de   :  { %v9223_v19 = vpop.eup %9222 }
0x18df   :  { %v2710_v18 = vmul.f32 %v9223_v19, %v9215_v31 }
0x18e1   :  { %8600 = vmatprep.mubr.msk.f32.mxu1 %vm157_vm1, %v2710_v18 }
0x18e2   :  { %8601 = vmatmul.mubr.msk.f32.gmra.mxu1 %vm157_vm1, %v2712_v50 }
0x18e3   :  { %8611 = vmatprep.mubr.msk.f32.mxu1 %vm267_vm2, %v2823_v48 }
0x18e6   :  { %8612 = vmatmul.mubr.msk.f32.vlgmr.msra.gmra.mxu1 %vm267_vm2, %v2825_v51 }
0x18e7   :  { %8614 = vmatprep.mubr.msk.f32.mxu1 %vm267_vm2, %v2827_v52 }
0x18ea   :  { %8615 = vmatmul.mubr.msk.f32.gmra.mxu1 %vm267_vm2, %v2829_v63 }
0x196d   :  { %v10202_v0 = vpop.f32.mrf.mxu1 }
0x196f   :  { %v2803_v1 = vpop.f32.mrf.mxu1 }
0x19a2   :  { %v10204_v3 = vpop.f32.mrf.mxu1 }
0x19a4   :  { %v2813_v4 = vpop.f32.mrf.mxu1 }
0x19a6   :  { %v8613_v6 = vpop.f32.mrf.mxu1 }
0x19a7   :  { %v2940_v7 = vmul.f32 0.35355338, %v8613_v6 }
0x19a8   :  { %v2920_v8 = vpop.f32.mrf.mxu1 }
0x19a9   :  { %v2944_v9 = vadd.f32 %v2940_v7, %v9598_v41  ;;  %v2939_v10 = vmul.f32 0.35355338, %v2920_v8 }
0x19aa   :  { %v8616_v11 = vpop.f32.mrf.mxu1 }
0x19ab   :  { %v2943_v12 = vadd.f32 %v2939_v10, %v9603_v45  ;;  %v2950_v34 = vsel %vm157_vm1, %v2944_v9, -inf  ;;  %v2942_v28 = vmul.f32 0.35355338, %v8616_v11  ;;  %v1880_v10 = vld [vmem:[%s11452_s1 + $0x118] sm:$0xff]  ;;  %v1879_v11 = vld [vmem:[%s11452_s1 + $0x110] sm:$0xff] }
0x19ac   :  { %2951 = vmax.xlane.f32.xlu1 %v2950_v34  ;;  %v2930_v27 = vpop.f32.mrf.mxu1 }
0x19ad   :  { %v2941_v30 = vmul.f32 0.35355338, %v2930_v27  ;;  %v2947_v31 = vsel %vm157_vm1, %v2943_v12, -inf  ;;  %v2946_v39 = vadd.f32 %v2942_v28, %v9606_v49 }
0x19ae   :  { %2948 = vmax.xlane.f32.xlu0 %v2947_v31 }
0x19af   :  { %v2945_v57 = vadd.f32 %v2941_v30, %v9615_v59  ;;  %v2956_v41 = vsel %vm157_vm1, %v2946_v39, -inf }
0x19b1   :  { %v2953_v14 = vsel %vm157_vm1, %v2945_v57, -inf }
0x19b2   :  { %2954 = vmax.xlane.f32.xlu0 %v2953_v14 }
0x19b6   :  { %2957 = vmax.xlane.f32.xlu0 %v2956_v41 }
0x19bd   :  { %2997 = vrot.lane.b32.xlu1 %v10004_v38, %s9451_s5 }
0x1a35   :  { %v2952_v45 = vpop.xlane.xlu1 %2951 }
0x1a36   :  { %v2960_v24 = vsub.f32 %v2944_v9, %v2952_v45  ;;  %v1881_v9 = vld [vmem:[%s11452_s1 + $0x120] sm:$0xff] }
0x1a37   :  { %v2949_v42 = vpop.xlane.xlu0 %2948 }
0x1a38   :  { %v2965_v43 = vmul.f32 1.442695, %v2960_v24  ;;  %v2959_v16 = vsub.f32 %v2943_v12, %v2949_v42  ;;  %v1878_v12 = vld [vmem:[%s11452_s1 + $0x108] sm:$0xff] }
0x1a39   :  { %v2998_v21 = vpop.permute.xlu1 %2997 }
0x1a3a   :  { %9224 = vpow2.f32 %v2965_v43  ;;  %v2963_v17 = vmul.f32 1.442695, %v2959_v16  ;;  %8617 = vmatprep.subr.mxu0 %v2998_v21 }
0x1a3b   :  { %8618 = vmatpush3.msra.mxu0 %v2998_v21  ;;  %v2955_v49 = vpop.xlane.xlu0 %2954 }
0x1a3c   :  { %9226 = vpow2.f32 %v2963_v17  ;;  %v2961_v48 = vsub.f32 %v2945_v57, %v2955_v49 }
0x1a3e   :  { %v2967_v50 = vmul.f32 1.442695, %v2961_v48 }
0x1a3f   :  { %v2958_v59 = vpop.xlane.xlu0 %2957 }
0x1a40   :  { %v2962_v13 = vsub.f32 %v2946_v39, %v2958_v59 }
0x1a42   :  { %v2969_v15 = vmul.f32 1.442695, %v2962_v13 }
0x1a44   :  { %9228 = vpow2.f32 %v2969_v15 }
0x1a45   :  { %9230 = vpow2.f32 %v2967_v50 }
0x1a47   :  { %v9225_v44 = vpop.eup %9224 }
0x1a48   :  { %v2974_v46 = vsel %vm157_vm1, %v9225_v44, 0.0 }
0x1a49   :  { %v9227_v38 = vpop.eup %9226  ;;  %2975 = vadd.xlane.f32.xlu0 %v2974_v46 }
0x1a4a   :  { %v2971_v47 = vsel %vm157_vm1, %v9227_v38, 0.0 }
0x1a4b   :  { %2972 = vadd.xlane.f32.xlu1 %v2971_v47 }
0x1a51   :  { %v9229_v19 = vpop.eup %9228 }
0x1a52   :  { %v2980_v18 = vsel %vm157_vm1, %v9229_v19, 0.0  ;;  %v9231_v51 = vpop.eup %9230 }
0x1a53   :  { %2981 = vadd.xlane.f32.xlu0 %v2980_v18  ;;  %v2977_v52 = vsel %vm157_vm1, %v9231_v51, 0.0 }
0x1a5c   :  { %2993 = vrot.lane.b32.xlu1 %v9998_v33, %s9451_s5 }
0x1a69   :  { %2995 = vrot.lane.b32.xlu0 %v10008_v61, %s9451_s5 }
0x1a6d   :  { %3104 = vrot.lane.b32.xlu0 %v10152_v20, %s9452_s6 }
0x1a71   :  { %3120 = vrot.lane.b32.xlu0 %v2803_v1, %s9453_s7 }
0x1a75   :  { %3108 = vrot.lane.b32.xlu0 %v10156_v23, %s9452_s6 }
0x1a79   :  { %3124 = vrot.lane.b32.xlu0 %v2813_v4, %s9453_s7 }
0x1a80   :  { %2978 = vadd.xlane.f32.xlu1 %v2977_v52 }
0x1a91   :  { %2991 = vrot.lane.b32.xlu1 %v10000_v37, %s9451_s5 }
0x1a95   :  { %3106 = vrot.lane.b32.xlu1 %v10150_v40, %s9452_s6 }
0x1a99   :  { %3122 = vrot.lane.b32.xlu1 %v10202_v0, %s9453_s7 }
0x1a9d   :  { %3110 = vrot.lane.b32.xlu1 %v10154_v60, %s9452_s6 }
0x1aa1   :  { %3126 = vrot.lane.b32.xlu1 %v10204_v3, %s9453_s7 }
0x1ad2   :  { %v2976_v61 = vpop.xlane.xlu0 %2975 }
0x1ad4   :  { %v2973_v33 = vpop.xlane.xlu1 %2972 }
0x1ad5   :  { %9232 = vrcp.f32 %v2973_v33 }
0x1ad6   :  { %9234 = vrcp.f32 %v2976_v61 }
0x1ad8   :  { %v2994_v37 = vpop.permute.xlu1 %2993 }
0x1adc   :  { %v2982_v20 = vpop.xlane.xlu0 %2981 }
0x1add   :  { %9236 = vrcp.f32 %v2982_v20 }
0x1ae0   :  { %v2996_v23 = vpop.permute.xlu0 %2995 }
0x1ae1   :  { %8619 = vmatprep.subr.mxu0 %v2996_v23 }
0x1ae2   :  { %v9233_v63 = vpop.eup %9232  ;;  %8620 = vmatpush3.msra.mxu0 %v2996_v23 }
0x1ae3   :  { %8621 = vmatprep.subr.mxu0 %v2994_v37  ;;  %v2984_v40 = vmul.f32 %v9233_v63, %v9227_v38  ;;  %v9235_v0 = vpop.eup %9234 }
0x1ae4   :  { %8622 = vmatpush3.msra.mxu0 %v2994_v37  ;;  %v2986_v3 = vmul.f32 %v9235_v0, %v9225_v44  ;;  %v3105_v57 = vpop.permute.xlu0 %3104 }
0x1ae5   :  { %8625 = vmatprep.mubr.msk.f32.mxu0 %vm157_vm1, %v2984_v40  ;;  %v3148_v43 = vsel %vm267_vm2, %v10092_v54, %v3105_v57  ;;  %v1883_v57 = vld [vmem:[%s11452_s1 + $0x130] sm:$0xff] }
0x1ae8   :  { %v3121_v14 = vpop.permute.xlu0 %3120 }
0x1ae9   :  { %v3152_v21 = vsel %vm1416_vm4, %v3148_v43, %v3121_v14  ;;  %v1893_v14 = vld [vmem:[%s11452_s1 + $0x180] sm:$0xff] }
0x1aea   :  { %v9237_v4 = vpop.eup %9236 }
0x1aeb   :  { %v2990_v8 = vmul.f32 %v9237_v4, %v9229_v19 }
0x1aec   :  { %v3109_v45 = vpop.permute.xlu0 %3108 }
0x1aed   :  { %v3150_v54 = vsel %vm267_vm2, %v10096_v62, %v3109_v45  ;;  %v1891_v45 = vld [vmem:[%s11452_s1 + $0x170] sm:$0xff] }
0x1af0   :  { %v3125_v42 = vpop.permute.xlu0 %3124 }
0x1af1   :  { %v3154_v46 = vsel %vm1416_vm4, %v3150_v54, %v3125_v42 }
0x1b09   :  { %v2979_v60 = vpop.xlane.xlu1 %2978 }
0x1b0a   :  { %9238 = vrcp.f32 %v2979_v60 }
0x1b0d   :  { %v2992_v1 = vpop.permute.xlu1 %2991 }
0x1b0e   :  { %8623 = vmatprep.subr.mxu0 %v2992_v1 }
0x1b0f   :  { %8624 = vmatpush3.msra.mxu0 %v2992_v1 }
0x1b10   :  { %8626 = vmatmul.mubr.msk.f32.vlgmr.msra.gmra.mxu0 %vm157_vm1, %v2986_v3  ;;  %8631 = vmatprep.subr.mxu0 %v1881_v9 }
0x1b11   :  { %8632 = vmatpush3.msra.mxu0 %v1881_v9  ;;  %v3107_v31 = vpop.permute.xlu1 %3106 }
0x1b12   :  { %8633 = vmatprep.subr.mxu0 %v1880_v10  ;;  %v3149_v17 = vsel %vm267_vm2, %v10090_v53, %v3107_v31  ;;  %v1884_v31 = vld [vmem:[%s11452_s1 + $0x138] sm:$0xff] }
0x1b13   :  { %8634 = vmatpush3.msra.mxu0 %v1880_v10 }
0x1b14   :  { %8635 = vmatprep.subr.mxu0 %v1879_v11 }
0x1b15   :  { %8636 = vmatpush3.msra.mxu0 %v1879_v11  ;;  %v3123_v39 = vpop.permute.xlu1 %3122 }
0x1b16   :  { %8637 = vmatprep.subr.mxu0 %v1878_v12  ;;  %v3153_v59 = vsel %vm1416_vm4, %v3149_v17, %v3123_v39  ;;  %v1882_v39 = vld [vmem:[%s11452_s1 + $0x128] sm:$0xff] }
0x1b17   :  { %v9239_v6 = vpop.eup %9238  ;;  %8638 = vmatpush3.msra.mxu0 %v1878_v12 }
0x1b18   :  { %v2988_v7 = vmul.f32 %v9239_v6, %v9231_v51  ;;  %8659 = vmatprep.subr.mxu0 %v1893_v14 }
0x1b19   :  { %v3111_v41 = vpop.permute.xlu1 %3110 }
0x1b1a   :  { %8628 = vmatprep.mubr.msk.f32.mxu0 %vm157_vm1, %v2988_v7  ;;  %v3151_v53 = vsel %vm267_vm2, %v10094_v55, %v3111_v41  ;;  %v1892_v41 = vld [vmem:[%s11452_s1 + $0x178] sm:$0xff] }
0x1b1b   :  { %8629 = vmatmul.mubr.msk.f32.gmra.mxu0 %vm157_vm1, %v2990_v8 }
0x1b1d   :  { %v3127_v24 = vpop.permute.xlu1 %3126 }
0x1b1e   :  { %v3155_v47 = vsel %vm1416_vm4, %v3151_v53, %v3127_v24  ;;  %v1890_v24 = vld [vmem:[%s11452_s1 + $0x168] sm:$0xff] }
0x1bd0   :  { %v8627_v34 = vpop.f32.mrf.mxu0 }
0x1bd1   :  { %3138 = vrot.lane.b32.xlu1 %v8627_v34, %s9454_s18 }
0x1bd2   :  { %v3081_v27 = vpop.f32.mrf.mxu0 }
0x1bd3   :  { %3136 = vrot.lane.b32.xlu0 %v3081_v27, %s9454_s18 }
0x1bdb   :  { %v8630_v28 = vpop.f32.mrf.mxu0 }
0x1bdc   :  { %3142 = vrot.lane.b32.xlu1 %v8630_v28, %s9454_s18 }
0x1bdd   :  { %v3091_v30 = vpop.f32.mrf.mxu0 }
0x1bde   :  { %3140 = vrot.lane.b32.xlu0 %v3091_v30, %s9454_s18  ;;  %v1885_v30 = vld [vmem:[%s11452_s1 + $0x140] sm:$0xff] }
0x1bdf   :  { %8645 = vmatprep.subr.mxu1 %v1885_v30 }
0x1be0   :  { %8646 = vmatpush3.msra.mxu1 %v1885_v30 }
0x1be1   :  { %8647 = vmatprep.subr.mxu1 %v1884_v31 }
0x1be2   :  { %8648 = vmatpush3.msra.mxu1 %v1884_v31 }
0x1be3   :  { %8649 = vmatprep.subr.mxu1 %v1883_v57 }
0x1be4   :  { %8650 = vmatpush3.msra.mxu1 %v1883_v57 }
0x1be5   :  { %8651 = vmatprep.subr.mxu1 %v1882_v39 }
0x1be6   :  { %8652 = vmatpush3.msra.mxu1 %v1882_v39 }
0x1c43   :  { %v3139_v16 = vpop.permute.xlu1 %3138 }
0x1c44   :  { %v3157_v15 = vsel %vm1421_vm5, %v3153_v59, %v3139_v16 }
0x1c45   :  { %v3137_v49 = vpop.permute.xlu0 %3136 }
0x1c46   :  { %v3156_v13 = vsel %vm1421_vm5, %v3152_v21, %v3137_v49 }
0x1c47   :  { %8639 = vmatprep.mubr.msk.f32.mxu0 %vm157_vm1, %v3156_v13 }
0x1c48   :  { %8640 = vmatmul.mubr.msk.f32.vlgmr.msra.gmra.mxu0 %vm157_vm1, %v3157_v15  ;;  %v10331_v15 = vld [vmem:[%s11452_s1 + $0x188] sm:$0xff] }
0x1c49   :  { %8660 = vmatpush3.msra.mxu0 %v1893_v14  ;;  %v3437_v30 = vrot.slane %v10331_v15, %v9948_v2 }
0x1c4a   :  { %8661 = vmatprep.subr.mxu0 %v1892_v41 }
0x1c4b   :  { %8662 = vmatpush3.msra.mxu0 %v1892_v41 }
0x1c4c   :  { %8663 = vmatprep.subr.mxu0 %v1891_v45 }
0x1c4d   :  { %8664 = vmatpush3.msra.mxu0 %v1891_v45 }
0x1c4e   :  { %v3143_v44 = vpop.permute.xlu1 %3142  ;;  %8665 = vmatprep.subr.mxu0 %v1890_v24 }
0x1c4f   :  { %v3159_v18 = vsel %vm1421_vm5, %v3155_v47, %v3143_v44  ;;  %8666 = vmatpush3.msra.mxu0 %v1890_v24 }
0x1c50   :  { %v3141_v38 = vpop.permute.xlu0 %3140 }
0x1c51   :  { %v3158_v19 = vsel %vm1421_vm5, %v3154_v46, %v3141_v38  ;;  %v3316_v38 = vrot.slane %v10331_v15, %v9907_v29 }
0x1c52   :  { %8642 = vmatprep.mubr.msk.f32.mxu0 %vm157_vm1, %v3158_v19 }
0x1c53   :  { %8643 = vmatmul.mubr.msk.f32.gmra.mxu0 %vm157_vm1, %v3159_v18 }
0x1d08   :  { %v8641_v48 = vpop.f32.mrf.mxu0 }
0x1d09   :  { %v3258_v62 = vadd.f32 %v8641_v48, %v9984_v26 }
0x1d0a   :  { %v3238_v50 = vpop.f32.mrf.mxu0 }
0x1d0b   :  { %v3257_v51 = vadd.f32 %v3238_v50, %v9982_v25  ;;  %v3264_v52 = vsel %vm157_vm1, %v3258_v62, 0.0 }
0x1d0c   :  { %3265 = vadd.xlane.f32.xlu1 %v3264_v52 }
0x1d0d   :  { %v3261_v55 = vsel %vm157_vm1, %v3257_v51, 0.0 }
0x1d0e   :  { %3262 = vadd.xlane.f32.xlu0 %v3261_v55 }
0x1d13   :  { %v8644_v33 = vpop.f32.mrf.mxu0 }
0x1d14   :  { %v3260_v23 = vadd.f32 %v8644_v33, %v9992_v58 }
0x1d15   :  { %v3248_v61 = vpop.f32.mrf.mxu0 }
0x1d16   :  { %v3259_v20 = vadd.f32 %v3248_v61, %v9990_v22  ;;  %v3270_v26 = vsel %vm157_vm1, %v3260_v23, 0.0 }
0x1d18   :  { %v3267_v63 = vsel %vm157_vm1, %v3259_v20, 0.0 }
0x1d19   :  { %3268 = vadd.xlane.f32.xlu0 %v3267_v63 }
0x1d1d   :  { %3271 = vadd.xlane.f32.xlu0 %v3270_v26 }
0x1d95   :  { %v3266_v37 = vpop.xlane.xlu1 %3265 }
0x1d96   :  { %v3274_v25 = vmul.f32 0.03125, %v3266_v37 }
0x1d97   :  { %v3263_v40 = vpop.xlane.xlu0 %3262 }
0x1d98   :  { %v3278_v60 = vsub.f32 %v3258_v62, %v3274_v25  ;;  %v3273_v0 = vmul.f32 0.03125, %v3263_v40  ;;  %v3324_v62 = vrot.slane %v10331_v15, %v9917_v36  ;;  %v1889_v40 = vld [vmem:[%s11452_s1 + $0x160] sm:$0xff] }
0x1d99   :  { %8667 = vmatprep.subr.mxu0 %v1889_v40 }
0x1d9a   :  { %v10288_v1 = vsub.f32 %v3257_v51, %v3273_v0  ;;  %v3282_v3 = vmul.f32 %v3278_v60, %v3278_v60  ;;  %8668 = vmatpush3.msra.mxu0 %v1889_v40  ;;  %v1887_v0 = vld [vmem:[%s11452_s1 + $0x150] sm:$0xff] }
0x1d9c   :  { %v3288_v4 = vsel %vm157_vm1, %v3282_v3, 0.0  ;;  %v3281_v22 = vmul.f32 %v10288_v1, %v10288_v1  ;;  %v3332_v3 = vrot.slane %v10331_v15, %v9589_v35 }
0x1d9d   :  { %3289 = vadd.xlane.f32.xlu0 %v3288_v4 }
0x1d9e   :  { %v3285_v58 = vsel %vm157_vm1, %v3281_v22, 0.0 }
0x1d9f   :  { %3286 = vadd.xlane.f32.xlu1 %v3285_v58 }
0x1da2   :  { %v3269_v6 = vpop.xlane.xlu0 %3268 }
0x1da3   :  { %v3275_v7 = vmul.f32 0.03125, %v3269_v6 }
0x1da5   :  { %v10294_v8 = vsub.f32 %v3259_v20, %v3275_v7 }
0x1da6   :  { %v3272_v9 = vpop.xlane.xlu0 %3271 }
0x1da7   :  { %v3276_v10 = vmul.f32 0.03125, %v3272_v9  ;;  %v3283_v11 = vmul.f32 %v10294_v8, %v10294_v8 }
0x1da9   :  { %v10298_v12 = vsub.f32 %v3260_v23, %v3276_v10  ;;  %v3291_v34 = vsel %vm157_vm1, %v3283_v11, 0.0 }
0x1daa   :  { %3292 = vadd.xlane.f32.xlu1 %v3291_v34 }
0x1dab   :  { %v3284_v27 = vmul.f32 %v10298_v12, %v10298_v12 }
0x1dad   :  { %v3294_v28 = vsel %vm157_vm1, %v3284_v27, 0.0 }
0x1dae   :  { %3295 = vadd.xlane.f32.xlu0 %v3294_v28 }
0x1e26   :  { %v3290_v42 = vpop.xlane.xlu0 %3289 }
0x1e27   :  { %v3298_v43 = vmul.f32 0.03125, %v3290_v42 }
0x1e28   :  { %v3287_v16 = vpop.xlane.xlu1 %3286 }
0x1e29   :  { %v3302_v21 = vadd.f32 1e-05, %v3298_v43  ;;  %v3297_v17 = vmul.f32 0.03125, %v3287_v16 }
0x1e2b   :  { %9240 = vrsqrt.f32 %v3302_v21  ;;  %v3301_v49 = vadd.f32 1e-05, %v3297_v17 }
0x1e2d   :  { %9242 = vrsqrt.f32 %v3301_v49 }
0x1e33   :  { %v3293_v59 = vpop.xlane.xlu1 %3292 }
0x1e34   :  { %v3299_v13 = vmul.f32 0.03125, %v3293_v59 }
0x1e36   :  { %v3303_v54 = vadd.f32 1e-05, %v3299_v13 }
0x1e37   :  { %v3296_v44 = vpop.xlane.xlu0 %3295 }
0x1e38   :  { %v9241_v46 = vpop.eup %9240  ;;  %9244 = vrsqrt.f32 %v3303_v54  ;;  %v3300_v53 = vmul.f32 0.03125, %v3296_v44 }
0x1e39   :  { %v3310_v47 = vmul.f32 %v9241_v46, %v3278_v60  ;;  %v1888_v60 = vld [vmem:[%s11452_s1 + $0x158] sm:$0xff] }
0x1e3a   :  { %v9243_v19 = vpop.eup %9242  ;;  %v3304_v18 = vadd.f32 1e-05, %v3300_v53  ;;  %8669 = vmatprep.subr.mxu0 %v1888_v60 }
0x1e3b   :  { %v3309_v48 = vmul.f32 %v9243_v19, %v10288_v1  ;;  %v3318_v50 = vmul.f32 %v3316_v38, %v3310_v47  ;;  %8670 = vmatpush3.msra.mxu0 %v1888_v60  ;;  %v1886_v1 = vld [vmem:[%s11452_s1 + $0x148] sm:$0xff] }
0x1e3c   :  { %9246 = vrsqrt.f32 %v3304_v18  ;;  %8671 = vmatprep.subr.mxu0 %v1887_v0 }
0x1e3d   :  { %v3317_v51 = vmul.f32 %v3316_v38, %v3309_v48  ;;  %v3326_v55 = vadd.f32 %v3324_v62, %v3318_v50  ;;  %8672 = vmatpush3.msra.mxu0 %v1887_v0 }
0x1e3e   :  { %8673 = vmatprep.subr.mxu0 %v1886_v1 }
0x1e3f   :  { %v3325_v52 = vadd.f32 %v3324_v62, %v3317_v51  ;;  %8674 = vmatpush3.msra.mxu0 %v1886_v1 }
0x1e41   :  { %8653 = vmatprep.mubr.msk.f32.mxu1 %vm157_vm1, %v3325_v52 }
0x1e42   :  { %8654 = vmatmul.mubr.msk.f32.vlgmr.msra.gmra.mxu1 %vm157_vm1, %v3326_v55 }
0x1e45   :  { %v9245_v33 = vpop.eup %9244 }
0x1e46   :  { %v3311_v61 = vmul.f32 %v9245_v33, %v10294_v8 }
0x1e48   :  { %v3319_v20 = vmul.f32 %v3316_v38, %v3311_v61 }
0x1e49   :  { %v9247_v23 = vpop.eup %9246 }
0x1e4a   :  { %v3327_v63 = vadd.f32 %v3324_v62, %v3319_v20  ;;  %v3312_v26 = vmul.f32 %v9247_v23, %v10298_v12 }
0x1e4c   :  { %8656 = vmatprep.mubr.msk.f32.mxu1 %vm157_vm1, %v3327_v63  ;;  %v3320_v37 = vmul.f32 %v3316_v38, %v3312_v26 }
0x1e4e   :  { %v3328_v25 = vadd.f32 %v3324_v62, %v3320_v37  ;;  %v3607_v37 = vld [vmem:[%s11453_s0 + $0x40] sm:$0xff] }
0x1e50   :  { %8657 = vmatmul.mubr.msk.f32.gmra.mxu1 %vm157_vm1, %v3328_v25 }
0x1e51   :  { %8689 = vmatprep.mubr.msk.f32.mxu1 %vm157_vm1, %v3607_v37 }
0x1f02   :  { %v8655_v4 = vpop.f32.mrf.mxu1 }
0x1f03   :  { %v3417_v22 = vadd.f32 %v8655_v4, %v3332_v3 }
0x1f04   :  { %v3411_v58 = vpop.f32.mrf.mxu1 }
0x1f05   :  { %v3412_v6 = vadd.f32 %v3411_v58, %v3332_v3  ;;  %v3431_v8 = vmax.f32 %v3417_v22, 0.0 }
0x1f07   :  { %v3430_v7 = vmax.f32 %v3412_v6, 0.0 }
0x1f09   :  { %8675 = vmatprep.mubr.msk.f32.mxu0 %vm23_vm0, %v3430_v7 }
0x1f0a   :  { %8676 = vmatmul.mubr.msk.f32.vlgmr.msra.gmra.mxu0 %vm23_vm0, %v3431_v8 }
0x1f10   :  { %v8658_v9 = vpop.f32.mrf.mxu1 }
0x1f11   :  { %v3427_v10 = vadd.f32 %v8658_v9, %v3332_v3  ;;  %v3594_v9 = vrot.slane %v10331_v15, %v9973_v56 }
0x1f12   :  { %v3421_v11 = vpop.f32.mrf.mxu1 }
0x1f13   :  { %v3422_v12 = vadd.f32 %v3421_v11, %v3332_v3  ;;  %v3433_v27 = vmax.f32 %v3427_v10, 0.0 }
0x1f15   :  { %v3432_v34 = vmax.f32 %v3422_v12, 0.0  ;;  %v3602_v12 = vrot.slane %v10331_v15, %v9978_v5  ;;  %v3608_v15 = vld [vmem:[%s11453_s0 + $0x48] sm:$0xff] }
0x1f17   :  { %8678 = vmatprep.mubr.msk.f32.mxu0 %vm23_vm0, %v3432_v34 }
0x1f18   :  { %8679 = vmatmul.mubr.msk.f32.gmra.mxu0 %vm23_vm0, %v3433_v27 }
0x1fca   :  { %v8677_v28 = vpop.f32.mrf.mxu0 }
0x1fcb   :  { %v3522_v39 = vadd.f32 %v8677_v28, %v3437_v30 }
0x1fcc   :  { %v3516_v31 = vpop.f32.mrf.mxu0 }
0x1fcd   :  { %v3517_v45 = vadd.f32 %v3516_v31, %v3437_v30  ;;  %v3536_v43 = vadd.f32 %v3522_v39, %v3326_v55 }
0x1fcf   :  { %v3535_v17 = vadd.f32 %v3517_v45, %v3325_v52  ;;  %v3542_v59 = vsel %vm157_vm1, %v3536_v43, 0.0 }
0x1fd1   :  { %v3539_v13 = vsel %vm157_vm1, %v3535_v17, 0.0 }
0x1fd8   :  { %v8680_v57 = vpop.f32.mrf.mxu0 }
0x1fd9   :  { %v3532_v14 = vadd.f32 %v8680_v57, %v3437_v30 }
0x1fda   :  { %v3526_v41 = vpop.f32.mrf.mxu0 }
0x1fdb   :  { %v3538_v24 = vadd.f32 %v3532_v14, %v3328_v25  ;;  %v3527_v42 = vadd.f32 %v3526_v41, %v3437_v30 }
0x1fdd   :  { %v3537_v16 = vadd.f32 %v3527_v42, %v3327_v63  ;;  %v3548_v21 = vsel %vm157_vm1, %v3538_v24, 0.0 }
0x1fde   :  { %3549 = vadd.xlane.f32.xlu1 %v3548_v21  ;;  %v3723_v21 = vld [vmem:[%s11452_s1 + $0x1a8] sm:$0xff] }
0x1fdf   :  { %v3545_v49 = vsel %vm157_vm1, %v3537_v16, 0.0 }
0x1fe0   :  { %3546 = vadd.xlane.f32.xlu0 %v3545_v49  ;;  %v3610_v49 = vld [vmem:[%s11453_s0 + $0x58] sm:$0xff] }
0x1fe2   :  { %3543 = vadd.xlane.f32.xlu1 %v3542_v59  ;;  %v3722_v59 = vld [vmem:[%s11452_s1 + $0x1a0] sm:$0xff] }
0x1fe4   :  { %3540 = vadd.xlane.f32.xlu0 %v3539_v13  ;;  %v3721_v13 = vld [vmem:[%s11452_s1 + $0x198] sm:$0xff] }
0x2067   :  { %v3550_v54 = vpop.xlane.xlu1 %3549 }
0x2068   :  { %v3554_v44 = vmul.f32 0.03125, %v3550_v54  ;;  %v3720_v54 = vld [vmem:[%s11452_s1 + $0x190] sm:$0xff] }
0x2069   :  { %v3547_v46 = vpop.xlane.xlu0 %3546 }
0x206a   :  { %v3558_v53 = vsub.f32 %v3538_v24, %v3554_v44  ;;  %v3553_v38 = vmul.f32 0.03125, %v3547_v46  ;;  %v3708_v46 = vld [vmem:[%s11453_s0 + $0x20] sm:$0xff] }
0x206b   :  { %v3544_v47 = vpop.xlane.xlu1 %3543 }
0x206c   :  { %v3557_v19 = vsub.f32 %v3537_v16, %v3553_v38  ;;  %v3552_v18 = vmul.f32 0.03125, %v3544_v47  ;;  %v3562_v48 = vmul.f32 %v3558_v53, %v3558_v53 }
0x206d   :  { %v3541_v62 = vpop.xlane.xlu0 %3540 }
0x206e   :  { %v3556_v50 = vsub.f32 %v3536_v43, %v3552_v18  ;;  %v3551_v51 = vmul.f32 0.03125, %v3541_v62  ;;  %v3572_v52 = vsel %vm157_vm1, %v3562_v48, 0.0  ;;  %v3561_v55 = vmul.f32 %v3557_v19, %v3557_v19  ;;  %v3710_v48 = vld [vmem:[%s11453_s0 + $0x30] sm:$0xff]  ;;  %v3711_v62 = vld [vmem:[%s11453_s0 + $0x38] sm:$0xff] }
0x206f   :  { %3573 = vadd.xlane.f32.xlu1 %v3572_v52 }
0x2070   :  { %v3555_v33 = vsub.f32 %v3535_v17, %v3551_v51  ;;  %v3569_v61 = vsel %vm157_vm1, %v3561_v55, 0.0  ;;  %v3560_v20 = vmul.f32 %v3556_v50, %v3556_v50  ;;  %v3609_v17 = vld [vmem:[%s11453_s0 + $0x50] sm:$0xff] }
0x2071   :  { %3570 = vadd.xlane.f32.xlu0 %v3569_v61 }
0x2072   :  { %v3566_v23 = vsel %vm157_vm1, %v3560_v20, 0.0  ;;  %v3559_v63 = vmul.f32 %v3555_v33, %v3555_v33 }
0x2073   :  { %3567 = vadd.xlane.f32.xlu1 %v3566_v23 }
0x2074   :  { %v3563_v26 = vsel %vm157_vm1, %v3559_v63, 0.0 }
0x2075   :  { %3564 = vadd.xlane.f32.xlu0 %v3563_v26 }
0x20f8   :  { %v3574_v25 = vpop.xlane.xlu1 %3573 }
0x20f9   :  { %v3578_v40 = vmul.f32 0.03125, %v3574_v25 }
0x20fa   :  { %v3571_v60 = vpop.xlane.xlu0 %3570 }
0x20fb   :  { %v3582_v0 = vadd.f32 1e-05, %v3578_v40  ;;  %v3577_v1 = vmul.f32 0.03125, %v3571_v60 }
0x20fc   :  { %v3568_v3 = vpop.xlane.xlu1 %3567 }
0x20fd   :  { %9248 = vrsqrt.f32 %v3582_v0  ;;  %v3581_v4 = vadd.f32 1e-05, %v3577_v1  ;;  %v3576_v22 = vmul.f32 0.03125, %v3568_v3  ;;  %v10475_v1 = vld [vmem:[%s11452_s1 + $0x330] sm:$0xff] }
0x20fe   :  { %v3565_v58 = vpop.xlane.xlu0 %3564 }
0x20ff   :  { %9250 = vrsqrt.f32 %v3581_v4  ;;  %v3580_v6 = vadd.f32 1e-05, %v3576_v22  ;;  %v3575_v7 = vmul.f32 0.03125, %v3565_v58  ;;  %v10480_v22 = vld [vmem:[%s11452_s1 + $0x328] sm:$0xff] }
0x2101   :  { %9252 = vrsqrt.f32 %v3580_v6  ;;  %v3579_v8 = vadd.f32 1e-05, %v3575_v7 }
0x2103   :  { %9254 = vrsqrt.f32 %v3579_v8  ;;  %v10486_v8 = vld [vmem:[%s11452_s1 + $0x340] sm:$0xff] }
0x210a   :  { %v9249_v10 = vpop.eup %9248 }
0x210b   :  { %v3590_v11 = vmul.f32 %v9249_v10, %v3558_v53  ;;  %v3709_v53 = vld [vmem:[%s11453_s0 + $0x28] sm:$0xff] }
0x210c   :  { %v9251_v34 = vpop.eup %9250 }
0x210d   :  { %v3598_v27 = vmul.f32 %v3594_v9, %v3590_v11  ;;  %v3589_v28 = vmul.f32 %v9251_v34, %v3557_v19 }
0x210e   :  { %v9253_v30 = vpop.eup %9252 }
0x210f   :  { %v3606_v31 = vadd.f32 %v3602_v12, %v3598_v27  ;;  %v3597_v57 = vmul.f32 %v3594_v9, %v3589_v28  ;;  %v3588_v39 = vmul.f32 %v9253_v30, %v3556_v50 }
0x2110   :  { %v9255_v14 = vpop.eup %9254 }
0x2111   :  { %8681 = vmatprep.subr.mxu1 %v3606_v31  ;;  %v3605_v41 = vadd.f32 %v3602_v12, %v3597_v57  ;;  %v3596_v45 = vmul.f32 %v3594_v9, %v3588_v39  ;;  %v3587_v24 = vmul.f32 %v9255_v14, %v3555_v33 }
0x2112   :  { %8682 = vmatpush3.msra.mxu1 %v3606_v31  ;;  %v10495_v31 = vld [vmem:[%s11452_s1 + $0x338] sm:$0xff] }
0x2113   :  { %8683 = vmatprep.subr.mxu1 %v3605_v41  ;;  %v3604_v42 = vadd.f32 %v3602_v12, %v3596_v45  ;;  %v3595_v43 = vmul.f32 %v3594_v9, %v3587_v24 }
0x2114   :  { %8684 = vmatpush3.msra.mxu1 %v3605_v41 }
0x2115   :  { %8685 = vmatprep.subr.mxu1 %v3604_v42  ;;  %v3603_v16 = vadd.f32 %v3602_v12, %v3595_v43 }
0x2116   :  { %8686 = vmatpush3.msra.mxu1 %v3604_v42 }
0x2117   :  { %8687 = vmatprep.subr.mxu1 %v3603_v16 }
0x2118   :  { %8688 = vmatpush3.msra.mxu1 %v3603_v16 }
0x2119   :  { %8690 = vmatmul.mubr.msk.f32.vlgmr.msra.gmra.mxu1 %vm157_vm1, %v3608_v15  ;;  %8695 = vmatprep.subr.mxu1 %v3723_v21 }
0x211a   :  { %8692 = vmatprep.mubr.msk.f32.mxu1 %vm157_vm1, %v3609_v17  ;;  %8696 = vmatpush3.msra.mxu1 %v3723_v21 }
0x211b   :  { %8697 = vmatprep.subr.mxu1 %v3722_v59 }
0x211c   :  { %8698 = vmatpush3.msra.mxu1 %v3722_v59 }
0x211d   :  { %8693 = vmatmul.mubr.msk.f32.gmra.mxu1 %vm157_vm1, %v3610_v49  ;;  %8699 = vmatprep.subr.mxu1 %v3721_v13 }
0x211e   :  { %8700 = vmatpush3.msra.mxu1 %v3721_v13 }
0x211f   :  { %8701 = vmatprep.subr.mxu1 %v3720_v54 }
0x2120   :  { %8702 = vmatpush3.msra.mxu1 %v3720_v54 }
0x21d9   :  { %v8691_v44 = vpop.f32.mrf.mxu1 }
0x21da   :  { %v10412_v19 = vadd.f32 %v8691_v44, %v3709_v53 }
0x21db   :  { %v3689_v38 = vpop.f32.mrf.mxu1 }
0x21dc   :  { %v10410_v47 = vadd.f32 %v3708_v46, %v3689_v38 }
0x21dd   :  { %v8694_v18 = vpop.f32.mrf.mxu1 }
0x21de   :  { %8703 = vmatprep.mubr.msk.f32.mxu1 %vm157_vm1, %v10410_v47  ;;  %v10426_v52 = vadd.f32 %v8694_v18, %v3711_v62 }
0x21df   :  { %v3699_v50 = vpop.f32.mrf.mxu1  ;;  %8704 = vmatmul.mubr.msk.f32.vlgmr.msra.gmra.mxu1 %vm157_vm1, %v10412_v19 }
0x21e0   :  { %v10424_v51 = vadd.f32 %v3710_v48, %v3699_v50 }
0x21e2   :  { %8706 = vmatprep.mubr.msk.f32.mxu1 %vm157_vm1, %v10424_v51 }
0x21e3   :  { %8707 = vmatmul.mubr.msk.f32.gmra.mxu1 %vm157_vm1, %v10426_v52 }
0x229f   :  { %v10432_v55 = vpop.f32.mrf.mxu1 }
0x22a1   :  { %v10434_v33 = vpop.f32.mrf.mxu1 }
0x22a2   :  { %8717 = vmatprep.mubr.msk.f32.mxu0 %vm267_vm2, %v10434_v33 }
0x22a3   :  { %v10438_v61 = vpop.f32.mrf.mxu1 }
0x22a4   :  { %3848 = vrot.lane.b32.xlu1 %v10438_v61, %s9440_s13 }
0x22a5   :  { %v10442_v20 = vpop.f32.mrf.mxu1 }
0x22a6   :  { %3846 = vrot.lane.b32.xlu0 %v10442_v20, %s9440_s13 }
0x22a8   :  { %3844 = vrot.lane.b32.xlu1 %v10432_v55, %s9440_s13 }
0x22aa   :  { %4007 = vrot.lane.b32.xlu0 %v10442_v20, %s9441_s14 }
0x22ac   :  { %3842 = vrot.lane.b32.xlu1 %v10434_v33, %s9440_s13 }
0x22b0   :  { %4009 = vrot.lane.b32.xlu1 %v10438_v61, %s9441_s14 }
0x22b4   :  { %4005 = vrot.lane.b32.xlu1 %v10432_v55, %s9441_s14 }
0x22b8   :  { %4003 = vrot.lane.b32.xlu1 %v10434_v33, %s9441_s14 }
0x2316   :  { %v3849_v23 = vpop.permute.xlu1 %3848 }
0x2317   :  { %8709 = vmatprep.subr.msk.mxu0 %vm267_vm2, %v3849_v23 }
0x2318   :  { %8710 = vmatpush3.xpose.msk.msra.mxu0 %vm267_vm2, %v3849_v23  ;;  %v3847_v63 = vpop.permute.xlu0 %3846 }
0x2319   :  { %8711 = vmatprep.subr.msk.mxu0 %vm267_vm2, %v3847_v63 }
0x231a   :  { %v3845_v26 = vpop.permute.xlu1 %3844 }
0x231c   :  { %8712 = vmatpush3.xpose.msk.msra.mxu0 %vm267_vm2, %v3847_v63  ;;  %v4008_v40 = vpop.permute.xlu0 %4007 }
0x231d   :  { %8713 = vmatprep.subr.msk.mxu0 %vm267_vm2, %v3845_v26 }
0x231e   :  { %v3843_v37 = vpop.permute.xlu1 %3842 }
0x2320   :  { %8714 = vmatpush3.xpose.msk.msra.mxu0 %vm267_vm2, %v3845_v26 }
0x2321   :  { %8715 = vmatprep.subr.msk.mxu0 %vm267_vm2, %v3843_v37 }
0x2322   :  { %v4010_v25 = vpop.permute.xlu1 %4009 }
0x2323   :  { %8723 = vmatprep.subr.mxu1 %v4010_v25 }
0x2324   :  { %8716 = vmatpush3.xpose.msk.msra.mxu0 %vm267_vm2, %v3843_v37  ;;  %8724 = vmatpush3.msra.mxu1 %v4010_v25 }
0x2325   :  { %8725 = vmatprep.subr.mxu1 %v4008_v40 }
0x2326   :  { %v4006_v60 = vpop.permute.xlu1 %4005  ;;  %8726 = vmatpush3.msra.mxu1 %v4008_v40 }
0x2327   :  { %8718 = vmatmul.mubr.msk.f32.vlgmr.msra.gmra.mxu0 %vm267_vm2, %v10432_v55  ;;  %8727 = vmatprep.subr.mxu1 %v4006_v60 }
0x2328   :  { %8720 = vmatprep.mubr.msk.f32.mxu0 %vm267_vm2, %v10442_v20  ;;  %8728 = vmatpush3.msra.mxu1 %v4006_v60 }
0x232a   :  { %v4004_v0 = vpop.permute.xlu1 %4003 }
0x232b   :  { %8721 = vmatmul.mubr.msk.f32.gmra.mxu0 %vm267_vm2, %v10438_v61  ;;  %8729 = vmatprep.subr.mxu1 %v4004_v0 }
0x232c   :  { %8730 = vmatpush3.msra.mxu1 %v4004_v0 }
0x23e7   :  { %v8719_v3 = vpop.f32.mrf.mxu0 }
0x23e8   :  { %v3952_v4 = vmul.f32 0.35355338, %v8719_v3 }
0x23e9   :  { %v3932_v58 = vpop.f32.mrf.mxu0 }
0x23ea   :  { %v3956_v6 = vadd.f32 %v3952_v4, %v10475_v1  ;;  %v3951_v7 = vmul.f32 0.35355338, %v3932_v58 }
0x23eb   :  { %v8722_v9 = vpop.f32.mrf.mxu0 }
0x23ec   :  { %v3955_v10 = vadd.f32 %v3951_v7, %v10480_v22  ;;  %v3954_v11 = vmul.f32 0.35355338, %v8722_v9  ;;  %v3962_v12 = vsel %vm157_vm1, %v3956_v6, -inf }
0x23ed   :  { %3963 = vmax.xlane.f32.xlu1 %v3962_v12  ;;  %v3942_v34 = vpop.f32.mrf.mxu0 }
0x23ee   :  { %v3958_v27 = vadd.f32 %v3954_v11, %v10486_v8  ;;  %v3953_v28 = vmul.f32 0.35355338, %v3942_v34  ;;  %v3959_v30 = vsel %vm157_vm1, %v3955_v10, -inf }
0x23ef   :  { %3960 = vmax.xlane.f32.xlu0 %v3959_v30 }
0x23f0   :  { %v3957_v57 = vadd.f32 %v3953_v28, %v10495_v31  ;;  %v3968_v39 = vsel %vm157_vm1, %v3958_v27, -inf }
0x23f2   :  { %v3965_v14 = vsel %vm157_vm1, %v3957_v57, -inf }
0x23f3   :  { %3969 = vmax.xlane.f32.xlu0 %v3968_v39 }
0x23f7   :  { %3966 = vmax.xlane.f32.xlu0 %v3965_v14 }
0x23fe   :  { %4124 = vrot.lane.b32.xlu1 %v10442_v20, %s9443_s25 }
0x240d   :  { %4126 = vrot.lane.b32.xlu0 %v10438_v61, %s9443_s25 }
0x2476   :  { %v3964_v41 = vpop.xlane.xlu1 %3963 }
0x2477   :  { %v3972_v45 = vsub.f32 %v3956_v6, %v3964_v41 }
0x2478   :  { %v3961_v24 = vpop.xlane.xlu0 %3960 }
0x2479   :  { %v3977_v42 = vmul.f32 1.442695, %v3972_v45  ;;  %v3971_v43 = vsub.f32 %v3955_v10, %v3961_v24 }
0x247a   :  { %v4125_v23 = vpop.permute.xlu1 %4124 }
0x247b   :  { %9256 = vpow2.f32 %v3977_v42  ;;  %v3975_v16 = vmul.f32 1.442695, %v3971_v43 }
0x247c   :  { %v3970_v15 = vpop.xlane.xlu0 %3969 }
0x247d   :  { %9258 = vpow2.f32 %v3975_v16  ;;  %v3974_v44 = vsub.f32 %v3958_v27, %v3970_v15 }
0x247f   :  { %v3981_v53 = vmul.f32 1.442695, %v3974_v44 }
0x2480   :  { %v3967_v21 = vpop.xlane.xlu0 %3966 }
0x2481   :  { %v3973_v46 = vsub.f32 %v3957_v57, %v3967_v21  ;;  %9260 = vpow2.f32 %v3981_v53 }
0x2483   :  { %v3979_v38 = vmul.f32 1.442695, %v3973_v46 }
0x2484   :  { %v4127_v17 = vpop.permute.xlu0 %4126 }
0x2485   :  { %8737 = vmatprep.subr.msk.mxu1 %vm267_vm2, %v4127_v17  ;;  %9262 = vpow2.f32 %v3979_v38 }
0x2488   :  { %v9257_v49 = vpop.eup %9256 }
0x2489   :  { %v3986_v59 = vsel %vm157_vm1, %v9257_v49, 0.0 }
0x248a   :  { %v9259_v13 = vpop.eup %9258  ;;  %3987 = vadd.xlane.f32.xlu0 %v3986_v59 }
0x248b   :  { %v3983_v54 = vsel %vm157_vm1, %v9259_v13, 0.0 }
0x248c   :  { %3984 = vadd.xlane.f32.xlu1 %v3983_v54 }
0x248e   :  { %v9261_v18 = vpop.eup %9260 }
0x248f   :  { %v3992_v62 = vsel %vm157_vm1, %v9261_v18, 0.0 }
0x2492   :  { %v9263_v48 = vpop.eup %9262 }
0x2493   :  { %v3989_v50 = vsel %vm157_vm1, %v9263_v48, 0.0 }
0x249d   :  { %4120 = vrot.lane.b32.xlu1 %v10434_v33, %s9443_s25 }
0x24a0   :  { %4122 = vrot.lane.b32.xlu0 %v10432_v55, %s9443_s25 }
0x24bf   :  { %3993 = vadd.xlane.f32.xlu0 %v3992_v62 }
0x24c1   :  { %3990 = vadd.xlane.f32.xlu1 %v3989_v50 }
0x24d2   :  { %4114 = vrot.lane.b32.xlu1 %v10432_v55, %s9444_s26 }
0x24d5   :  { %4112 = vrot.lane.b32.xlu0 %v10434_v33, %s9444_s26 }
0x24d6   :  { %4118 = vrot.lane.b32.xlu1 %v10438_v61, %s9444_s26 }
0x24d9   :  { %4116 = vrot.lane.b32.xlu0 %v10442_v20, %s9444_s26 }
0x24da   :  { %4287 = vrot.lane.b32.xlu1 %v10438_v61, %s9445_s27 }
0x24dd   :  { %4285 = vrot.lane.b32.xlu0 %v10442_v20, %s9445_s27 }
0x24de   :  { %4283 = vrot.lane.b32.xlu1 %v10432_v55, %s9445_s27 }
0x24e2   :  { %4281 = vrot.lane.b32.xlu1 %v10434_v33, %s9445_s27 }
0x2513   :  { %v3988_v63 = vpop.xlane.xlu0 %3987 }
0x2514   :  { %9264 = vrcp.f32 %v3988_v63 }
0x2515   :  { %v3985_v26 = vpop.xlane.xlu1 %3984 }
0x2516   :  { %9266 = vrcp.f32 %v3985_v26 }
0x2517   :  { %v4123_v0 = vpop.permute.xlu0 %4122 }
0x2519   :  { %v4121_v3 = vpop.permute.xlu1 %4120 }
0x2521   :  { %v9265_v37 = vpop.eup %9264 }
0x2522   :  { %v3998_v60 = vmul.f32 %v9265_v37, %v9257_v49 }
0x2523   :  { %v9267_v25 = vpop.eup %9266 }
0x2524   :  { %v3996_v40 = vmul.f32 %v9267_v25, %v9259_v13 }
0x2526   :  { %8731 = vmatprep.mubr.msk.f32.mxu1 %vm157_vm1, %v3996_v40 }
0x2527   :  { %8732 = vmatmul.mubr.msk.f32.vlgmr.msra.gmra.mxu1 %vm157_vm1, %v3998_v60 }
0x2528   :  { %8738 = vmatpush3.xpose.msk.msra.mxu1 %vm267_vm2, %v4127_v17 }
0x2529   :  { %8739 = vmatprep.subr.msk.mxu1 %vm267_vm2, %v4125_v23 }
0x252c   :  { %8740 = vmatpush3.xpose.msk.msra.mxu1 %vm267_vm2, %v4125_v23 }
0x252d   :  { %8741 = vmatprep.subr.msk.mxu1 %vm267_vm2, %v4123_v0 }
0x2530   :  { %8742 = vmatpush3.xpose.msk.msra.mxu1 %vm267_vm2, %v4123_v0 }
0x2531   :  { %8743 = vmatprep.subr.msk.mxu1 %vm267_vm2, %v4121_v3 }
0x2534   :  { %8744 = vmatpush3.xpose.msk.msra.mxu1 %vm267_vm2, %v4121_v3 }
0x2548   :  { %v3994_v4 = vpop.xlane.xlu0 %3993 }
0x2549   :  { %9268 = vrcp.f32 %v3994_v4 }
0x254a   :  { %v3991_v58 = vpop.xlane.xlu1 %3990 }
0x254b   :  { %9270 = vrcp.f32 %v3991_v58 }
0x254c   :  { %v4113_v6 = vpop.permute.xlu0 %4112 }
0x254e   :  { %v4115_v7 = vpop.permute.xlu1 %4114 }
0x2550   :  { %v4117_v9 = vpop.permute.xlu0 %4116 }
0x2552   :  { %v4119_v10 = vpop.permute.xlu1 %4118 }
0x2554   :  { %v4286_v27 = vpop.permute.xlu0 %4285 }
0x2556   :  { %v4288_v11 = vpop.permute.xlu1 %4287  ;;  %v9269_v12 = vpop.eup %9268 }
0x2557   :  { %8751 = vmatprep.subr.mxu0 %v4288_v11  ;;  %v4002_v57 = vmul.f32 %v9269_v12, %v9261_v18 }
0x2558   :  { %v9271_v34 = vpop.eup %9270  ;;  %8752 = vmatpush3.msra.mxu0 %v4288_v11 }
0x2559   :  { %8753 = vmatprep.subr.mxu0 %v4286_v27  ;;  %v4000_v28 = vmul.f32 %v9271_v34, %v9263_v48 }
0x255a   :  { %v4284_v30 = vpop.permute.xlu1 %4283  ;;  %8754 = vmatpush3.msra.mxu0 %v4286_v27 }
0x255b   :  { %8734 = vmatprep.mubr.msk.f32.mxu1 %vm157_vm1, %v4000_v28  ;;  %8755 = vmatprep.subr.mxu0 %v4284_v30 }
0x255c   :  { %8735 = vmatmul.mubr.msk.f32.gmra.mxu1 %vm157_vm1, %v4002_v57  ;;  %8756 = vmatpush3.msra.mxu0 %v4284_v30 }
0x255d   :  { %8745 = vmatprep.mubr.msk.f32.mxu1 %vm267_vm2, %v4113_v6 }
0x255e   :  { %v4282_v39 = vpop.permute.xlu1 %4281 }
0x255f   :  { %8757 = vmatprep.subr.mxu0 %v4282_v39 }
0x2560   :  { %8746 = vmatmul.mubr.msk.f32.vlgmr.msra.gmra.mxu1 %vm267_vm2, %v4115_v7  ;;  %8758 = vmatpush3.msra.mxu0 %v4282_v39 }
0x2561   :  { %8748 = vmatprep.mubr.msk.f32.mxu1 %vm267_vm2, %v4117_v9 }
0x2564   :  { %8749 = vmatmul.mubr.msk.f32.gmra.mxu1 %vm267_vm2, %v4119_v10 }
0x25e7   :  { %v10544_v14 = vpop.f32.mrf.mxu1 }
0x25e9   :  { %v10546_v41 = vpop.f32.mrf.mxu1 }
0x261c   :  { %v10548_v45 = vpop.f32.mrf.mxu1 }
0x261e   :  { %v10550_v24 = vpop.f32.mrf.mxu1 }
0x2620   :  { %v8747_v42 = vpop.f32.mrf.mxu1 }
0x2621   :  { %v4230_v43 = vmul.f32 0.35355338, %v8747_v42 }
0x2622   :  { %v4210_v16 = vpop.f32.mrf.mxu1 }
0x2623   :  { %v4234_v15 = vadd.f32 %v4230_v43, %v10475_v1  ;;  %v4229_v21 = vmul.f32 0.35355338, %v4210_v16 }
0x2624   :  { %v8750_v17 = vpop.f32.mrf.mxu1 }
0x2625   :  { %v4233_v49 = vadd.f32 %v4229_v21, %v10480_v22  ;;  %v4232_v59 = vmul.f32 0.35355338, %v8750_v17  ;;  %v4240_v13 = vsel %vm157_vm1, %v4234_v15, -inf }
0x2626   :  { %4241 = vmax.xlane.f32.xlu1 %v4240_v13  ;;  %v4220_v54 = vpop.f32.mrf.mxu1 }
0x2627   :  { %v4236_v44 = vadd.f32 %v4232_v59, %v10486_v8  ;;  %v4231_v46 = vmul.f32 0.35355338, %v4220_v54  ;;  %v4237_v53 = vsel %vm157_vm1, %v4233_v49, -inf }
0x2628   :  { %4238 = vmax.xlane.f32.xlu0 %v4237_v53 }
0x2629   :  { %v4235_v38 = vadd.f32 %v4231_v46, %v10495_v31  ;;  %v4246_v18 = vsel %vm157_vm1, %v4236_v44, -inf }
0x262b   :  { %v4243_v48 = vsel %vm157_vm1, %v4235_v38, -inf }
0x262c   :  { %4247 = vmax.xlane.f32.xlu0 %v4246_v18 }
0x2630   :  { %4244 = vmax.xlane.f32.xlu0 %v4243_v48 }
0x2637   :  { %4402 = vrot.lane.b32.xlu1 %v10442_v20, %s9446_s28 }
0x2646   :  { %4404 = vrot.lane.b32.xlu0 %v10438_v61, %s9446_s28 }
0x26af   :  { %v4242_v62 = vpop.xlane.xlu1 %4241 }
0x26b0   :  { %v4250_v50 = vsub.f32 %v4234_v15, %v4242_v62 }
0x26b1   :  { %v4239_v23 = vpop.xlane.xlu0 %4238 }
0x26b2   :  { %v4255_v63 = vmul.f32 1.442695, %v4250_v50  ;;  %v4249_v26 = vsub.f32 %v4233_v49, %v4239_v23 }
0x26b3   :  { %v4403_v28 = vpop.permute.xlu1 %4402 }
0x26b4   :  { %9272 = vpow2.f32 %v4255_v63  ;;  %v4253_v37 = vmul.f32 1.442695, %v4249_v26 }
0x26b5   :  { %v4248_v25 = vpop.xlane.xlu0 %4247 }
0x26b6   :  { %9274 = vpow2.f32 %v4253_v37  ;;  %v4252_v6 = vsub.f32 %v4236_v44, %v4248_v25 }
0x26b8   :  { %v4259_v9 = vmul.f32 1.442695, %v4252_v6 }
0x26b9   :  { %v4245_v40 = vpop.xlane.xlu0 %4244 }
0x26ba   :  { %v4251_v7 = vsub.f32 %v4235_v38, %v4245_v40  ;;  %9276 = vpow2.f32 %v4259_v9 }
0x26bc   :  { %v4257_v10 = vmul.f32 1.442695, %v4251_v7 }
0x26bd   :  { %v4405_v60 = vpop.permute.xlu0 %4404 }
0x26be   :  { %8765 = vmatprep.subr.msk.mxu0 %vm267_vm2, %v4405_v60  ;;  %9278 = vpow2.f32 %v4257_v10 }
0x26c1   :  { %v9273_v0 = vpop.eup %9272 }
0x26c2   :  { %v4264_v3 = vsel %vm157_vm1, %v9273_v0, 0.0 }
0x26c3   :  { %v9275_v4 = vpop.eup %9274  ;;  %4265 = vadd.xlane.f32.xlu0 %v4264_v3 }
0x26c4   :  { %v4261_v58 = vsel %vm157_vm1, %v9275_v4, 0.0 }
0x26c5   :  { %4262 = vadd.xlane.f32.xlu1 %v4261_v58 }
0x26c7   :  { %v9277_v11 = vpop.eup %9276 }
0x26c8   :  { %v4270_v34 = vsel %vm157_vm1, %v9277_v11, 0.0 }
0x26cb   :  { %v9279_v12 = vpop.eup %9278 }
0x26cc   :  { %v4267_v27 = vsel %vm157_vm1, %v9279_v12, 0.0 }
0x26d6   :  { %4398 = vrot.lane.b32.xlu1 %v10434_v33, %s9446_s28 }
0x26d9   :  { %4400 = vrot.lane.b32.xlu0 %v10432_v55, %s9446_s28 }
0x26f8   :  { %4271 = vadd.xlane.f32.xlu0 %v4270_v34 }
0x26fa   :  { %4268 = vadd.xlane.f32.xlu1 %v4267_v27 }
0x270b   :  { %4392 = vrot.lane.b32.xlu1 %v10432_v55, %s9447_s29 }
0x270e   :  { %4390 = vrot.lane.b32.xlu0 %v10434_v33, %s9447_s29 }
0x270f   :  { %4396 = vrot.lane.b32.xlu1 %v10438_v61, %s9447_s29 }
0x2712   :  { %4394 = vrot.lane.b32.xlu0 %v10442_v20, %s9447_s29 }
0x2713   :  { %4565 = vrot.lane.b32.xlu1 %v10438_v61, %s9448_s30 }
0x2716   :  { %4563 = vrot.lane.b32.xlu0 %v10442_v20, %s9448_s30 }
0x2717   :  { %4561 = vrot.lane.b32.xlu1 %v10432_v55, %s9448_s30 }
0x271b   :  { %4559 = vrot.lane.b32.xlu1 %v10434_v33, %s9448_s30 }
0x274c   :  { %v4266_v30 = vpop.xlane.xlu0 %4265 }
0x274d   :  { %9280 = vrcp.f32 %v4266_v30 }
0x274e   :  { %v4263_v57 = vpop.xlane.xlu1 %4262 }
0x274f   :  { %9282 = vrcp.f32 %v4263_v57 }
0x2750   :  { %v4401_v15 = vpop.permute.xlu0 %4400 }
0x2752   :  { %v4399_v21 = vpop.permute.xlu1 %4398 }
0x275a   :  { %v9281_v39 = vpop.eup %9280 }
0x275b   :  { %v4276_v16 = vmul.f32 %v9281_v39, %v9273_v0 }
0x275c   :  { %v9283_v42 = vpop.eup %9282 }
0x275d   :  { %v4274_v43 = vmul.f32 %v9283_v42, %v9275_v4 }
0x275f   :  { %8759 = vmatprep.mubr.msk.f32.mxu0 %vm157_vm1, %v4274_v43 }
0x2760   :  { %8760 = vmatmul.mubr.msk.f32.vlgmr.msra.gmra.mxu0 %vm157_vm1, %v4276_v16 }
0x2761   :  { %8766 = vmatpush3.xpose.msk.msra.mxu0 %vm267_vm2, %v4405_v60 }
0x2762   :  { %8767 = vmatprep.subr.msk.mxu0 %vm267_vm2, %v4403_v28 }
0x2765   :  { %8768 = vmatpush3.xpose.msk.msra.mxu0 %vm267_vm2, %v4403_v28 }
0x2766   :  { %8769 = vmatprep.subr.msk.mxu0 %vm267_vm2, %v4401_v15 }
0x2769   :  { %8770 = vmatpush3.xpose.msk.msra.mxu0 %vm267_vm2, %v4401_v15 }
0x276a   :  { %8771 = vmatprep.subr.msk.mxu0 %vm267_vm2, %v4399_v21 }
0x276d   :  { %8772 = vmatpush3.xpose.msk.msra.mxu0 %vm267_vm2, %v4399_v21 }
0x2781   :  { %v4272_v17 = vpop.xlane.xlu0 %4271 }
0x2782   :  { %9284 = vrcp.f32 %v4272_v17 }
0x2783   :  { %v4269_v49 = vpop.xlane.xlu1 %4268 }
0x2784   :  { %9286 = vrcp.f32 %v4269_v49 }
0x2785   :  { %v4391_v59 = vpop.permute.xlu0 %4390 }
0x2787   :  { %v4393_v13 = vpop.permute.xlu1 %4392 }
0x2789   :  { %v4395_v54 = vpop.permute.xlu0 %4394 }
0x278b   :  { %v4397_v44 = vpop.permute.xlu1 %4396 }
0x278d   :  { %v4564_v18 = vpop.permute.xlu0 %4563 }
0x278f   :  { %v4566_v46 = vpop.permute.xlu1 %4565  ;;  %v9285_v53 = vpop.eup %9284 }
0x2790   :  { %8779 = vmatprep.subr.mxu1 %v4566_v46  ;;  %v4280_v50 = vmul.f32 %v9285_v53, %v9277_v11 }
0x2791   :  { %v9287_v38 = vpop.eup %9286  ;;  %8780 = vmatpush3.msra.mxu1 %v4566_v46 }
0x2792   :  { %8781 = vmatprep.subr.mxu1 %v4564_v18  ;;  %v4278_v48 = vmul.f32 %v9287_v38, %v9279_v12 }
0x2793   :  { %v4562_v62 = vpop.permute.xlu1 %4561  ;;  %8782 = vmatpush3.msra.mxu1 %v4564_v18 }
0x2794   :  { %8762 = vmatprep.mubr.msk.f32.mxu0 %vm157_vm1, %v4278_v48  ;;  %8783 = vmatprep.subr.mxu1 %v4562_v62 }
0x2795   :  { %8763 = vmatmul.mubr.msk.f32.gmra.mxu0 %vm157_vm1, %v4280_v50  ;;  %8784 = vmatpush3.msra.mxu1 %v4562_v62 }
0x2796   :  { %8773 = vmatprep.mubr.msk.f32.mxu0 %vm267_vm2, %v4391_v59 }
0x2797   :  { %v4560_v23 = vpop.permute.xlu1 %4559 }
0x2798   :  { %8785 = vmatprep.subr.mxu1 %v4560_v23 }
0x2799   :  { %8774 = vmatmul.mubr.msk.f32.vlgmr.msra.gmra.mxu0 %vm267_vm2, %v4393_v13  ;;  %8786 = vmatpush3.msra.mxu1 %v4560_v23 }
0x279a   :  { %8776 = vmatprep.mubr.msk.f32.mxu0 %vm267_vm2, %v4395_v54 }
0x279d   :  { %8777 = vmatmul.mubr.msk.f32.gmra.mxu0 %vm267_vm2, %v4397_v44 }
0x2820   :  { %v10604_v63 = vpop.f32.mrf.mxu0 }
0x2822   :  { %v10606_v26 = vpop.f32.mrf.mxu0 }
0x2855   :  { %v10608_v37 = vpop.f32.mrf.mxu0 }
0x2857   :  { %v10610_v25 = vpop.f32.mrf.mxu0 }
0x2859   :  { %v8775_v40 = vpop.f32.mrf.mxu0 }
0x285a   :  { %v4508_v60 = vmul.f32 0.35355338, %v8775_v40 }
0x285b   :  { %v4488_v0 = vpop.f32.mrf.mxu0 }
0x285c   :  { %v4512_v3 = vadd.f32 %v4508_v60, %v10475_v1  ;;  %v4507_v4 = vmul.f32 0.35355338, %v4488_v0 }
0x285d   :  { %v8778_v58 = vpop.f32.mrf.mxu0 }
0x285e   :  { %v4511_v6 = vadd.f32 %v4507_v4, %v10480_v22  ;;  %v4510_v7 = vmul.f32 0.35355338, %v8778_v58  ;;  %v4518_v9 = vsel %vm157_vm1, %v4512_v3, -inf }
0x285f   :  { %4519 = vmax.xlane.f32.xlu1 %v4518_v9  ;;  %v4498_v10 = vpop.f32.mrf.mxu0 }
0x2860   :  { %v4514_v11 = vadd.f32 %v4510_v7, %v10486_v8  ;;  %v4509_v12 = vmul.f32 0.35355338, %v4498_v10  ;;  %v4515_v34 = vsel %vm157_vm1, %v4511_v6, -inf }
0x2861   :  { %4516 = vmax.xlane.f32.xlu0 %v4515_v34 }
0x2862   :  { %v4513_v27 = vadd.f32 %v4509_v12, %v10495_v31  ;;  %v4524_v28 = vsel %vm157_vm1, %v4514_v11, -inf }
0x2864   :  { %v4521_v30 = vsel %vm157_vm1, %v4513_v27, -inf }
0x2865   :  { %4525 = vmax.xlane.f32.xlu0 %v4524_v28 }
0x2869   :  { %4522 = vmax.xlane.f32.xlu0 %v4521_v30 }
0x2870   :  { %4680 = vrot.lane.b32.xlu1 %v10442_v20, %s9449_s3 }
0x287f   :  { %4682 = vrot.lane.b32.xlu0 %v10438_v61, %s9449_s3 }
0x28e8   :  { %v4520_v57 = vpop.xlane.xlu1 %4519 }
0x28e9   :  { %v4528_v39 = vsub.f32 %v4512_v3, %v4520_v57 }
0x28ea   :  { %v4517_v42 = vpop.xlane.xlu0 %4516 }
0x28eb   :  { %v4533_v43 = vmul.f32 1.442695, %v4528_v39  ;;  %v4527_v16 = vsub.f32 %v4511_v6, %v4517_v42 }
0x28ec   :  { %v4681_v40 = vpop.permute.xlu1 %4680 }
0x28ed   :  { %9288 = vpow2.f32 %v4533_v43  ;;  %v4531_v15 = vmul.f32 1.442695, %v4527_v16 }
0x28ee   :  { %v4526_v21 = vpop.xlane.xlu0 %4525 }
0x28ef   :  { %9290 = vpow2.f32 %v4531_v15  ;;  %v4530_v46 = vsub.f32 %v4514_v11, %v4526_v21 }
0x28f1   :  { %v4537_v38 = vmul.f32 1.442695, %v4530_v46 }
0x28f2   :  { %v4523_v17 = vpop.xlane.xlu0 %4522 }
0x28f3   :  { %v4529_v53 = vsub.f32 %v4513_v27, %v4523_v17  ;;  %9292 = vpow2.f32 %v4537_v38 }
0x28f5   :  { %v4535_v18 = vmul.f32 1.442695, %v4529_v53 }
0x28f6   :  { %v4683_v49 = vpop.permute.xlu0 %4682 }
0x28f7   :  { %8793 = vmatprep.subr.msk.mxu1 %vm267_vm2, %v4683_v49  ;;  %9294 = vpow2.f32 %v4535_v18 }
0x28fa   :  { %v9289_v59 = vpop.eup %9288 }
0x28fb   :  { %v4542_v13 = vsel %vm157_vm1, %v9289_v59, 0.0 }
0x28fc   :  { %v9291_v54 = vpop.eup %9290  ;;  %4543 = vadd.xlane.f32.xlu0 %v4542_v13 }
0x28fd   :  { %v4539_v44 = vsel %vm157_vm1, %v9291_v54, 0.0 }
0x28fe   :  { %4540 = vadd.xlane.f32.xlu1 %v4539_v44 }
0x2900   :  { %v9293_v48 = vpop.eup %9292 }
0x2901   :  { %v4548_v50 = vsel %vm157_vm1, %v9293_v48, 0.0 }
0x2904   :  { %v9295_v62 = vpop.eup %9294 }
0x2905   :  { %v4545_v23 = vsel %vm157_vm1, %v9295_v62, 0.0 }
0x290f   :  { %4676 = vrot.lane.b32.xlu1 %v10434_v33, %s9449_s3 }
0x2912   :  { %4678 = vrot.lane.b32.xlu0 %v10432_v55, %s9449_s3 }
0x2931   :  { %4549 = vadd.xlane.f32.xlu0 %v4548_v50 }
0x2933   :  { %4546 = vadd.xlane.f32.xlu1 %v4545_v23 }
0x2944   :  { %4670 = vrot.lane.b32.xlu1 %v10432_v55, %s9450_s4 }
0x2947   :  { %4668 = vrot.lane.b32.xlu0 %v10434_v33, %s9450_s4 }
0x2948   :  { %4674 = vrot.lane.b32.xlu1 %v10438_v61, %s9450_s4 }
0x294b   :  { %4672 = vrot.lane.b32.xlu0 %v10442_v20, %s9450_s4 }
0x2985   :  { %v4544_v60 = vpop.xlane.xlu0 %4543 }
0x2986   :  { %9296 = vrcp.f32 %v4544_v60 }
0x2987   :  { %v4541_v0 = vpop.xlane.xlu1 %4540 }
0x2988   :  { %9298 = vrcp.f32 %v4541_v0 }
0x2989   :  { %v4679_v7 = vpop.permute.xlu0 %4678 }
0x298b   :  { %v4677_v9 = vpop.permute.xlu1 %4676 }
0x2993   :  { %v9297_v3 = vpop.eup %9296 }
0x2994   :  { %v4554_v6 = vmul.f32 %v9297_v3, %v9289_v59 }
0x2995   :  { %v9299_v4 = vpop.eup %9298 }
0x2996   :  { %v4552_v58 = vmul.f32 %v9299_v4, %v9291_v54 }
0x2998   :  { %8787 = vmatprep.mubr.msk.f32.mxu1 %vm157_vm1, %v4552_v58 }
0x2999   :  { %8788 = vmatmul.mubr.msk.f32.vlgmr.msra.gmra.mxu1 %vm157_vm1, %v4554_v6 }
0x299a   :  { %8794 = vmatpush3.xpose.msk.msra.mxu1 %vm267_vm2, %v4683_v49 }
0x299b   :  { %8795 = vmatprep.subr.msk.mxu1 %vm267_vm2, %v4681_v40 }
0x299e   :  { %8796 = vmatpush3.xpose.msk.msra.mxu1 %vm267_vm2, %v4681_v40 }
0x299f   :  { %8797 = vmatprep.subr.msk.mxu1 %vm267_vm2, %v4679_v7 }
0x29a2   :  { %8798 = vmatpush3.xpose.msk.msra.mxu1 %vm267_vm2, %v4679_v7 }
0x29a3   :  { %8799 = vmatprep.subr.msk.mxu1 %vm267_vm2, %v4677_v9 }
0x29a6   :  { %8800 = vmatpush3.xpose.msk.msra.mxu1 %vm267_vm2, %v4677_v9 }
0x29ba   :  { %v4550_v10 = vpop.xlane.xlu0 %4549 }
0x29bb   :  { %9300 = vrcp.f32 %v4550_v10 }
0x29bc   :  { %v4547_v11 = vpop.xlane.xlu1 %4546 }
0x29bd   :  { %9302 = vrcp.f32 %v4547_v11 }
0x29be   :  { %v4669_v28 = vpop.permute.xlu0 %4668 }
0x29c0   :  { %v4671_v57 = vpop.permute.xlu1 %4670 }
0x29c2   :  { %v4673_v39 = vpop.permute.xlu0 %4672 }
0x29c4   :  { %v4675_v42 = vpop.permute.xlu1 %4674 }
0x29c8   :  { %v9301_v12 = vpop.eup %9300 }
0x29c9   :  { %v4558_v30 = vmul.f32 %v9301_v12, %v9293_v48 }
0x29ca   :  { %v9303_v34 = vpop.eup %9302 }
0x29cb   :  { %v4556_v27 = vmul.f32 %v9303_v34, %v9295_v62 }
0x29cd   :  { %8790 = vmatprep.mubr.msk.f32.mxu1 %vm157_vm1, %v4556_v27 }
0x29ce   :  { %8791 = vmatmul.mubr.msk.f32.gmra.mxu1 %vm157_vm1, %v4558_v30 }
0x29cf   :  { %8801 = vmatprep.mubr.msk.f32.mxu1 %vm267_vm2, %v4669_v28 }
0x29d2   :  { %8802 = vmatmul.mubr.msk.f32.vlgmr.msra.gmra.mxu1 %vm267_vm2, %v4671_v57 }
0x29d3   :  { %8804 = vmatprep.mubr.msk.f32.mxu1 %vm267_vm2, %v4673_v39 }
0x29d6   :  { %8805 = vmatmul.mubr.msk.f32.gmra.mxu1 %vm267_vm2, %v4675_v42 }
0x2a59   :  { %v10656_v43 = vpop.f32.mrf.mxu1 }
0x2a5b   :  { %v4649_v16 = vpop.f32.mrf.mxu1 }
0x2a8e   :  { %v10658_v15 = vpop.f32.mrf.mxu1 }
0x2a90   :  { %v4659_v21 = vpop.f32.mrf.mxu1 }
0x2a92   :  { %v8803_v17 = vpop.f32.mrf.mxu1 }
0x2a93   :  { %v4786_v49 = vmul.f32 0.35355338, %v8803_v17 }
0x2a94   :  { %v4766_v59 = vpop.f32.mrf.mxu1 }
0x2a95   :  { %v4790_v13 = vadd.f32 %v4786_v49, %v10475_v1  ;;  %v4785_v54 = vmul.f32 0.35355338, %v4766_v59 }
0x2a96   :  { %v8806_v44 = vpop.f32.mrf.mxu1 }
0x2a97   :  { %v4789_v46 = vadd.f32 %v4785_v54, %v10480_v22  ;;  %v4796_v53 = vsel %vm157_vm1, %v4790_v13, -inf  ;;  %v4788_v18 = vmul.f32 0.35355338, %v8806_v44  ;;  %v3726_v54 = vld [vmem:[%s11452_s1 + $0x1c0] sm:$0xff]  ;;  %v3725_v44 = vld [vmem:[%s11452_s1 + $0x1b8] sm:$0xff] }
0x2a98   :  { %4797 = vmax.xlane.f32.xlu1 %v4796_v53  ;;  %v4776_v38 = vpop.f32.mrf.mxu1 }
0x2a99   :  { %v4787_v48 = vmul.f32 0.35355338, %v4776_v38  ;;  %v4793_v62 = vsel %vm157_vm1, %v4789_v46, -inf  ;;  %v4792_v23 = vadd.f32 %v4788_v18, %v10486_v8 }
0x2a9a   :  { %4794 = vmax.xlane.f32.xlu0 %v4793_v62 }
0x2a9b   :  { %v4791_v50 = vadd.f32 %v4787_v48, %v10495_v31  ;;  %v4802_v1 = vsel %vm157_vm1, %v4792_v23, -inf }
0x2a9d   :  { %v4799_v40 = vsel %vm157_vm1, %v4791_v50, -inf }
0x2a9e   :  { %4800 = vmax.xlane.f32.xlu0 %v4799_v40 }
0x2aa2   :  { %4803 = vmax.xlane.f32.xlu0 %v4802_v1 }
0x2aa9   :  { %4843 = vrot.lane.b32.xlu1 %v10438_v61, %s9451_s5 }
0x2b21   :  { %v4798_v22 = vpop.xlane.xlu1 %4797 }
0x2b22   :  { %v4806_v60 = vsub.f32 %v4790_v13, %v4798_v22  ;;  %v3727_v13 = vld [vmem:[%s11452_s1 + $0x1c8] sm:$0xff] }
0x2b23   :  { %v4795_v0 = vpop.xlane.xlu0 %4794 }
0x2b24   :  { %v4811_v3 = vmul.f32 1.442695, %v4806_v60  ;;  %v4805_v4 = vsub.f32 %v4789_v46, %v4795_v0  ;;  %v3724_v46 = vld [vmem:[%s11452_s1 + $0x1b0] sm:$0xff] }
0x2b25   :  { %v4844_v58 = vpop.permute.xlu1 %4843 }
0x2b26   :  { %9304 = vpow2.f32 %v4811_v3  ;;  %v4809_v6 = vmul.f32 1.442695, %v4805_v4  ;;  %8807 = vmatprep.subr.mxu0 %v4844_v58 }
0x2b27   :  { %8808 = vmatpush3.msra.mxu0 %v4844_v58  ;;  %v4801_v8 = vpop.xlane.xlu0 %4800 }
0x2b28   :  { %9306 = vpow2.f32 %v4809_v6  ;;  %v4807_v28 = vsub.f32 %v4791_v50, %v4801_v8 }
0x2b2a   :  { %v4813_v30 = vmul.f32 1.442695, %v4807_v28 }
0x2b2b   :  { %v4804_v31 = vpop.xlane.xlu0 %4803 }
0x2b2c   :  { %v4808_v7 = vsub.f32 %v4792_v23, %v4804_v31 }
0x2b2e   :  { %v4815_v9 = vmul.f32 1.442695, %v4808_v7 }
0x2b30   :  { %9308 = vpow2.f32 %v4815_v9 }
0x2b31   :  { %9310 = vpow2.f32 %v4813_v30 }
0x2b33   :  { %v9305_v10 = vpop.eup %9304 }
0x2b34   :  { %v4820_v11 = vsel %vm157_vm1, %v9305_v10, 0.0 }
0x2b35   :  { %v9307_v61 = vpop.eup %9306  ;;  %4821 = vadd.xlane.f32.xlu0 %v4820_v11 }
0x2b36   :  { %v4817_v12 = vsel %vm157_vm1, %v9307_v61, 0.0 }
0x2b37   :  { %4818 = vadd.xlane.f32.xlu1 %v4817_v12 }
0x2b3d   :  { %v9309_v34 = vpop.eup %9308 }
0x2b3e   :  { %v4826_v27 = vsel %vm157_vm1, %v9309_v34, 0.0  ;;  %v9311_v57 = vpop.eup %9310 }
0x2b3f   :  { %4827 = vadd.xlane.f32.xlu0 %v4826_v27  ;;  %v4823_v39 = vsel %vm157_vm1, %v9311_v57, 0.0 }
0x2b48   :  { %4839 = vrot.lane.b32.xlu1 %v10432_v55, %s9451_s5 }
0x2b55   :  { %4841 = vrot.lane.b32.xlu0 %v10442_v20, %s9451_s5 }
0x2b59   :  { %4950 = vrot.lane.b32.xlu0 %v10606_v26, %s9452_s6 }
0x2b5d   :  { %4966 = vrot.lane.b32.xlu0 %v4649_v16, %s9453_s7 }
0x2b61   :  { %4954 = vrot.lane.b32.xlu0 %v10610_v25, %s9452_s6 }
0x2b65   :  { %4970 = vrot.lane.b32.xlu0 %v4659_v21, %s9453_s7 }
0x2b6c   :  { %4824 = vadd.xlane.f32.xlu1 %v4823_v39 }
0x2b7d   :  { %4837 = vrot.lane.b32.xlu1 %v10434_v33, %s9451_s5 }
0x2b81   :  { %4952 = vrot.lane.b32.xlu1 %v10604_v63, %s9452_s6 }
0x2b85   :  { %4968 = vrot.lane.b32.xlu1 %v10656_v43, %s9453_s7 }
0x2b89   :  { %4956 = vrot.lane.b32.xlu1 %v10608_v37, %s9452_s6 }
0x2b8d   :  { %4972 = vrot.lane.b32.xlu1 %v10658_v15, %s9453_s7 }
0x2bbe   :  { %v4822_v20 = vpop.xlane.xlu0 %4821 }
0x2bc0   :  { %v4819_v55 = vpop.xlane.xlu1 %4818 }
0x2bc1   :  { %9312 = vrcp.f32 %v4819_v55 }
0x2bc2   :  { %9314 = vrcp.f32 %v4822_v20 }
0x2bc4   :  { %v4840_v33 = vpop.permute.xlu1 %4839 }
0x2bc8   :  { %v4828_v26 = vpop.xlane.xlu0 %4827 }
0x2bc9   :  { %9316 = vrcp.f32 %v4828_v26 }
0x2bcc   :  { %v4842_v25 = vpop.permute.xlu0 %4841 }
0x2bcd   :  { %8809 = vmatprep.subr.mxu0 %v4842_v25 }
0x2bce   :  { %v9313_v42 = vpop.eup %9312  ;;  %8810 = vmatpush3.msra.mxu0 %v4842_v25 }
0x2bcf   :  { %8811 = vmatprep.subr.mxu0 %v4840_v33  ;;  %v4830_v63 = vmul.f32 %v9313_v42, %v9307_v61  ;;  %v9315_v43 = vpop.eup %9314 }
0x2bd0   :  { %8812 = vmatpush3.msra.mxu0 %v4840_v33  ;;  %v4832_v15 = vmul.f32 %v9315_v43, %v9305_v10  ;;  %v4951_v50 = vpop.permute.xlu0 %4950 }
0x2bd1   :  { %8815 = vmatprep.mubr.msk.f32.mxu0 %vm157_vm1, %v4830_v63  ;;  %v4994_v3 = vsel %vm267_vm2, %v10546_v41, %v4951_v50  ;;  %v3729_v50 = vld [vmem:[%s11452_s1 + $0x1d8] sm:$0xff] }
0x2bd4   :  { %v4967_v40 = vpop.permute.xlu0 %4966 }
0x2bd5   :  { %v4998_v58 = vsel %vm1416_vm4, %v4994_v3, %v4967_v40  ;;  %v3739_v40 = vld [vmem:[%s11452_s1 + $0x228] sm:$0xff] }
0x2bd6   :  { %v9317_v21 = vpop.eup %9316 }
0x2bd7   :  { %v4836_v59 = vmul.f32 %v9317_v21, %v9309_v34 }
0x2bd8   :  { %v4955_v22 = vpop.permute.xlu0 %4954 }
0x2bd9   :  { %v4996_v41 = vsel %vm267_vm2, %v10550_v24, %v4955_v22  ;;  %v3737_v22 = vld [vmem:[%s11452_s1 + $0x218] sm:$0xff] }
0x2bdc   :  { %v4971_v0 = vpop.permute.xlu0 %4970 }
0x2bdd   :  { %v5000_v11 = vsel %vm1416_vm4, %v4996_v41, %v4971_v0 }
0x2bf5   :  { %v4825_v37 = vpop.xlane.xlu1 %4824 }
0x2bf6   :  { %9318 = vrcp.f32 %v4825_v37 }
0x2bf9   :  { %v4838_v16 = vpop.permute.xlu1 %4837 }
0x2bfa   :  { %8813 = vmatprep.subr.mxu0 %v4838_v16 }
0x2bfb   :  { %8814 = vmatpush3.msra.mxu0 %v4838_v16 }
0x2bfc   :  { %8816 = vmatmul.mubr.msk.f32.vlgmr.msra.gmra.mxu0 %vm157_vm1, %v4832_v15  ;;  %8821 = vmatprep.subr.mxu0 %v3727_v13 }
0x2bfd   :  { %8822 = vmatpush3.msra.mxu0 %v3727_v13  ;;  %v4953_v62 = vpop.permute.xlu1 %4952 }
0x2bfe   :  { %8823 = vmatprep.subr.mxu0 %v3726_v54  ;;  %v4995_v6 = vsel %vm267_vm2, %v10544_v14, %v4953_v62  ;;  %v3730_v62 = vld [vmem:[%s11452_s1 + $0x1e0] sm:$0xff] }
0x2bff   :  { %8824 = vmatpush3.msra.mxu0 %v3726_v54 }
0x2c00   :  { %8825 = vmatprep.subr.mxu0 %v3725_v44 }
0x2c01   :  { %8826 = vmatpush3.msra.mxu0 %v3725_v44  ;;  %v4969_v23 = vpop.permute.xlu1 %4968 }
0x2c02   :  { %8827 = vmatprep.subr.mxu0 %v3724_v46  ;;  %v4999_v31 = vsel %vm1416_vm4, %v4995_v6, %v4969_v23  ;;  %v3728_v23 = vld [vmem:[%s11452_s1 + $0x1d0] sm:$0xff] }
0x2c03   :  { %v9319_v17 = vpop.eup %9318  ;;  %8828 = vmatpush3.msra.mxu0 %v3724_v46 }
0x2c04   :  { %v4834_v49 = vmul.f32 %v9319_v17, %v9311_v57  ;;  %8849 = vmatprep.subr.mxu0 %v3739_v40 }
0x2c05   :  { %v4957_v1 = vpop.permute.xlu1 %4956 }
0x2c06   :  { %8818 = vmatprep.mubr.msk.f32.mxu0 %vm157_vm1, %v4834_v49  ;;  %v4997_v14 = vsel %vm267_vm2, %v10548_v45, %v4957_v1  ;;  %v3738_v1 = vld [vmem:[%s11452_s1 + $0x220] sm:$0xff] }
0x2c07   :  { %8819 = vmatmul.mubr.msk.f32.gmra.mxu0 %vm157_vm1, %v4836_v59 }
0x2c09   :  { %v4973_v60 = vpop.permute.xlu1 %4972 }
0x2c0a   :  { %v5001_v12 = vsel %vm1416_vm4, %v4997_v14, %v4973_v60  ;;  %v3736_v60 = vld [vmem:[%s11452_s1 + $0x210] sm:$0xff] }
0x2cbc   :  { %v8817_v53 = vpop.f32.mrf.mxu0 }
0x2cbd   :  { %4984 = vrot.lane.b32.xlu1 %v8817_v53, %s9454_s18 }
0x2cbe   :  { %v4927_v38 = vpop.f32.mrf.mxu0 }
0x2cbf   :  { %4982 = vrot.lane.b32.xlu0 %v4927_v38, %s9454_s18 }
0x2cc7   :  { %v8820_v18 = vpop.f32.mrf.mxu0 }
0x2cc8   :  { %4988 = vrot.lane.b32.xlu1 %v8820_v18, %s9454_s18 }
0x2cc9   :  { %v4937_v48 = vpop.f32.mrf.mxu0 }
0x2cca   :  { %4986 = vrot.lane.b32.xlu0 %v4937_v48, %s9454_s18  ;;  %v3731_v48 = vld [vmem:[%s11452_s1 + $0x1e8] sm:$0xff] }
0x2ccb   :  { %8835 = vmatprep.subr.mxu1 %v3731_v48 }
0x2ccc   :  { %8836 = vmatpush3.msra.mxu1 %v3731_v48 }
0x2ccd   :  { %8837 = vmatprep.subr.mxu1 %v3730_v62 }
0x2cce   :  { %8838 = vmatpush3.msra.mxu1 %v3730_v62 }
0x2ccf   :  { %8839 = vmatprep.subr.mxu1 %v3729_v50 }
0x2cd0   :  { %8840 = vmatpush3.msra.mxu1 %v3729_v50 }
0x2cd1   :  { %8841 = vmatprep.subr.mxu1 %v3728_v23 }
0x2cd2   :  { %8842 = vmatpush3.msra.mxu1 %v3728_v23 }
0x2d2f   :  { %v4985_v4 = vpop.permute.xlu1 %4984 }
0x2d30   :  { %v5003_v9 = vsel %vm1421_vm5, %v4999_v31, %v4985_v4 }
0x2d31   :  { %v4983_v8 = vpop.permute.xlu0 %4982 }
0x2d32   :  { %v5002_v7 = vsel %vm1421_vm5, %v4998_v58, %v4983_v8 }
0x2d33   :  { %8829 = vmatprep.mubr.msk.f32.mxu0 %vm157_vm1, %v5002_v7 }
0x2d34   :  { %8830 = vmatmul.mubr.msk.f32.vlgmr.msra.gmra.mxu0 %vm157_vm1, %v5003_v9  ;;  %v10785_v9 = vld [vmem:[%s11452_s1 + $0x230] sm:$0xff] }
0x2d35   :  { %8850 = vmatpush3.msra.mxu0 %v3739_v40 }
0x2d36   :  { %8851 = vmatprep.subr.mxu0 %v3738_v1 }
0x2d37   :  { %8852 = vmatpush3.msra.mxu0 %v3738_v1 }
0x2d38   :  { %8853 = vmatprep.subr.mxu0 %v3737_v22 }
0x2d39   :  { %8854 = vmatpush3.msra.mxu0 %v3737_v22 }
0x2d3a   :  { %v4989_v10 = vpop.permute.xlu1 %4988  ;;  %8855 = vmatprep.subr.mxu0 %v3736_v60 }
0x2d3b   :  { %v5005_v27 = vsel %vm1421_vm5, %v5001_v12, %v4989_v10  ;;  %8856 = vmatpush3.msra.mxu0 %v3736_v60 }
0x2d3c   :  { %v4987_v61 = vpop.permute.xlu0 %4986 }
0x2d3d   :  { %v5004_v34 = vsel %vm1421_vm5, %v5000_v11, %v4987_v61  ;;  %v5162_v61 = vrot.slane %v10785_v9, %v9907_v29 }
0x2d3e   :  { %8832 = vmatprep.mubr.msk.f32.mxu0 %vm157_vm1, %v5004_v34 }
0x2d3f   :  { %8833 = vmatmul.mubr.msk.f32.gmra.mxu0 %vm157_vm1, %v5005_v27 }
0x2df4   :  { %v8831_v28 = vpop.f32.mrf.mxu0 }
0x2df5   :  { %v5104_v24 = vadd.f32 %v8831_v28, %v10412_v19 }
0x2df6   :  { %v5084_v30 = vpop.f32.mrf.mxu0 }
0x2df7   :  { %v5103_v57 = vadd.f32 %v5084_v30, %v10410_v47  ;;  %v5110_v39 = vsel %vm157_vm1, %v5104_v24, 0.0 }
0x2df8   :  { %5111 = vadd.xlane.f32.xlu1 %v5110_v39 }
0x2df9   :  { %v5107_v45 = vsel %vm157_vm1, %v5103_v57, 0.0 }
0x2dfa   :  { %5108 = vadd.xlane.f32.xlu0 %v5107_v45 }
0x2dff   :  { %v8834_v55 = vpop.f32.mrf.mxu0 }
0x2e00   :  { %v5106_v25 = vadd.f32 %v8834_v55, %v10426_v52 }
0x2e01   :  { %v5094_v20 = vpop.f32.mrf.mxu0 }
0x2e02   :  { %v5105_v26 = vadd.f32 %v5094_v20, %v10424_v51  ;;  %v5116_v19 = vsel %vm157_vm1, %v5106_v25, 0.0 }
0x2e04   :  { %v5113_v42 = vsel %vm157_vm1, %v5105_v26, 0.0 }
0x2e05   :  { %5114 = vadd.xlane.f32.xlu0 %v5113_v42 }
0x2e09   :  { %5117 = vadd.xlane.f32.xlu0 %v5116_v19 }
0x2e81   :  { %v5112_v33 = vpop.xlane.xlu1 %5111 }
0x2e82   :  { %v5120_v47 = vmul.f32 0.03125, %v5112_v33 }
0x2e83   :  { %v5109_v63 = vpop.xlane.xlu0 %5108 }
0x2e84   :  { %v5124_v37 = vsub.f32 %v5104_v24, %v5120_v47  ;;  %v5119_v43 = vmul.f32 0.03125, %v5109_v63  ;;  %v5170_v24 = vrot.slane %v10785_v9, %v9917_v36  ;;  %v3735_v63 = vld [vmem:[%s11452_s1 + $0x208] sm:$0xff] }
0x2e85   :  { %8857 = vmatprep.subr.mxu0 %v3735_v63 }
0x2e86   :  { %v10742_v16 = vsub.f32 %v5103_v57, %v5119_v43  ;;  %v5128_v15 = vmul.f32 %v5124_v37, %v5124_v37  ;;  %8858 = vmatpush3.msra.mxu0 %v3735_v63  ;;  %v3733_v43 = vld [vmem:[%s11452_s1 + $0x1f8] sm:$0xff]  ;;  %v5454_v63 = vld [vmem:[%s11452_s1 + $0x240] sm:$0xff] }
0x2e88   :  { %v5134_v21 = vsel %vm157_vm1, %v5128_v15, 0.0  ;;  %v5127_v51 = vmul.f32 %v10742_v16, %v10742_v16  ;;  %v5178_v15 = vrot.slane %v10785_v9, %v9589_v35 }
0x2e89   :  { %5135 = vadd.xlane.f32.xlu0 %v5134_v21 }
0x2e8a   :  { %v5131_v52 = vsel %vm157_vm1, %v5127_v51, 0.0 }
0x2e8b   :  { %5132 = vadd.xlane.f32.xlu1 %v5131_v52 }
0x2e8e   :  { %v5115_v17 = vpop.xlane.xlu0 %5114 }
0x2e8f   :  { %v5121_v49 = vmul.f32 0.03125, %v5115_v17 }
0x2e91   :  { %v10748_v59 = vsub.f32 %v5105_v26, %v5121_v49 }
0x2e92   :  { %v5118_v13 = vpop.xlane.xlu0 %5117 }
0x2e93   :  { %v5122_v54 = vmul.f32 0.03125, %v5118_v13  ;;  %v5129_v44 = vmul.f32 %v10748_v59, %v10748_v59 }
0x2e95   :  { %v10752_v46 = vsub.f32 %v5106_v25, %v5122_v54  ;;  %v5137_v53 = vsel %vm157_vm1, %v5129_v44, 0.0 }
0x2e96   :  { %5138 = vadd.xlane.f32.xlu1 %v5137_v53 }
0x2e97   :  { %v5130_v38 = vmul.f32 %v10752_v46, %v10752_v46 }
0x2e99   :  { %v5140_v18 = vsel %vm157_vm1, %v5130_v38, 0.0 }
0x2e9a   :  { %5141 = vadd.xlane.f32.xlu0 %v5140_v18  ;;  %v5283_v18 = vrot.slane %v10785_v9, %v9948_v2 }
0x2f12   :  { %v5136_v0 = vpop.xlane.xlu0 %5135 }
0x2f13   :  { %v5144_v3 = vmul.f32 0.03125, %v5136_v0 }
0x2f14   :  { %v5133_v4 = vpop.xlane.xlu1 %5132 }
0x2f15   :  { %v5148_v58 = vadd.f32 1e-05, %v5144_v3  ;;  %v5143_v6 = vmul.f32 0.03125, %v5133_v4 }
0x2f17   :  { %9320 = vrsqrt.f32 %v5148_v58  ;;  %v5147_v8 = vadd.f32 1e-05, %v5143_v6 }
0x2f19   :  { %9322 = vrsqrt.f32 %v5147_v8 }
0x2f1f   :  { %v5139_v31 = vpop.xlane.xlu1 %5138 }
0x2f20   :  { %v5145_v7 = vmul.f32 0.03125, %v5139_v31 }
0x2f22   :  { %v5149_v41 = vadd.f32 1e-05, %v5145_v7 }
0x2f23   :  { %v5142_v10 = vpop.xlane.xlu0 %5141 }
0x2f24   :  { %v9321_v11 = vpop.eup %9320  ;;  %9324 = vrsqrt.f32 %v5149_v41  ;;  %v5146_v14 = vmul.f32 0.03125, %v5142_v10 }
0x2f25   :  { %v5156_v12 = vmul.f32 %v9321_v11, %v5124_v37  ;;  %v3734_v37 = vld [vmem:[%s11452_s1 + $0x200] sm:$0xff] }
0x2f26   :  { %v9323_v34 = vpop.eup %9322  ;;  %v5150_v27 = vadd.f32 1e-05, %v5146_v14  ;;  %8859 = vmatprep.subr.mxu0 %v3734_v37 }
0x2f27   :  { %v5155_v28 = vmul.f32 %v9323_v34, %v10742_v16  ;;  %v5164_v30 = vmul.f32 %v5162_v61, %v5156_v12  ;;  %8860 = vmatpush3.msra.mxu0 %v3734_v37  ;;  %v3732_v16 = vld [vmem:[%s11452_s1 + $0x1f0] sm:$0xff]  ;;  %v5453_v37 = vld [vmem:[%s11452_s1 + $0x238] sm:$0xff] }
0x2f28   :  { %9326 = vrsqrt.f32 %v5150_v27  ;;  %8861 = vmatprep.subr.mxu0 %v3733_v43 }
0x2f29   :  { %v5163_v57 = vmul.f32 %v5162_v61, %v5155_v28  ;;  %v5172_v45 = vadd.f32 %v5170_v24, %v5164_v30  ;;  %8862 = vmatpush3.msra.mxu0 %v3733_v43 }
0x2f2a   :  { %8863 = vmatprep.subr.mxu0 %v3732_v16 }
0x2f2b   :  { %v5171_v39 = vadd.f32 %v5170_v24, %v5163_v57  ;;  %8864 = vmatpush3.msra.mxu0 %v3732_v16 }
0x2f2d   :  { %8843 = vmatprep.mubr.msk.f32.mxu1 %vm157_vm1, %v5171_v39 }
0x2f2e   :  { %8844 = vmatmul.mubr.msk.f32.vlgmr.msra.gmra.mxu1 %vm157_vm1, %v5172_v45 }
0x2f31   :  { %v9325_v55 = vpop.eup %9324 }
0x2f32   :  { %v5157_v20 = vmul.f32 %v9325_v55, %v10748_v59 }
0x2f34   :  { %v5165_v26 = vmul.f32 %v5162_v61, %v5157_v20 }
0x2f35   :  { %v9327_v25 = vpop.eup %9326 }
0x2f36   :  { %v5173_v42 = vadd.f32 %v5170_v24, %v5165_v26  ;;  %v5158_v19 = vmul.f32 %v9327_v25, %v10752_v46 }
0x2f38   :  { %8846 = vmatprep.mubr.msk.f32.mxu1 %vm157_vm1, %v5173_v42  ;;  %v5166_v33 = vmul.f32 %v5162_v61, %v5158_v19 }
0x2f3a   :  { %v5174_v47 = vadd.f32 %v5170_v24, %v5166_v33  ;;  %v5456_v33 = vld [vmem:[%s11452_s1 + $0x250] sm:$0xff] }
0x2f3b   :  { %8871 = vmatprep.subr.mxu1 %v5456_v33 }
0x2f3c   :  { %8847 = vmatmul.mubr.msk.f32.gmra.mxu1 %vm157_vm1, %v5174_v47 }
0x2f3d   :  { %8872 = vmatpush3.msra.mxu1 %v5456_v33 }
0x2fee   :  { %v8845_v21 = vpop.f32.mrf.mxu1 }
0x2fef   :  { %v5263_v51 = vadd.f32 %v8845_v21, %v5178_v15 }
0x2ff0   :  { %v5257_v52 = vpop.f32.mrf.mxu1 }
0x2ff1   :  { %v5258_v17 = vadd.f32 %v5257_v52, %v5178_v15  ;;  %v5277_v59 = vmax.f32 %v5263_v51, 0.0 }
0x2ff3   :  { %v5276_v49 = vmax.f32 %v5258_v17, 0.0 }
0x2ff5   :  { %8865 = vmatprep.mubr.msk.f32.mxu0 %vm23_vm0, %v5276_v49 }
0x2ff6   :  { %8866 = vmatmul.mubr.msk.f32.vlgmr.msra.gmra.mxu0 %vm23_vm0, %v5277_v59 }
0x2ffc   :  { %v8848_v13 = vpop.f32.mrf.mxu1 }
0x2ffd   :  { %v5273_v54 = vadd.f32 %v8848_v13, %v5178_v15 }
0x2ffe   :  { %v5267_v44 = vpop.f32.mrf.mxu1 }
0x2fff   :  { %v5268_v46 = vadd.f32 %v5267_v44, %v5178_v15  ;;  %v5279_v38 = vmax.f32 %v5273_v54, 0.0 }
0x3001   :  { %v5278_v53 = vmax.f32 %v5268_v46, 0.0  ;;  %v5440_v46 = vrot.slane %v10785_v9, %v9973_v56 }
0x3003   :  { %8868 = vmatprep.mubr.msk.f32.mxu0 %vm23_vm0, %v5278_v53 }
0x3004   :  { %8869 = vmatmul.mubr.msk.f32.gmra.mxu0 %vm23_vm0, %v5279_v38 }
0x30b6   :  { %v8867_v48 = vpop.f32.mrf.mxu0 }
0x30b7   :  { %v5368_v62 = vadd.f32 %v8867_v48, %v5283_v18 }
0x30b8   :  { %v5362_v50 = vpop.f32.mrf.mxu0 }
0x30b9   :  { %v5382_v23 = vadd.f32 %v5368_v62, %v5172_v45  ;;  %v5363_v40 = vadd.f32 %v5362_v50, %v5283_v18  ;;  %v5448_v62 = vrot.slane %v10785_v9, %v9978_v5 }
0x30bb   :  { %v5381_v1 = vadd.f32 %v5363_v40, %v5171_v39  ;;  %v5388_v22 = vsel %vm157_vm1, %v5382_v23, 0.0 }
0x30bc   :  { %5389 = vadd.xlane.f32.xlu0 %v5388_v22 }
0x30bd   :  { %v5385_v60 = vsel %vm157_vm1, %v5381_v1, 0.0 }
0x30be   :  { %5386 = vadd.xlane.f32.xlu1 %v5385_v60 }
0x30c4   :  { %v8870_v0 = vpop.f32.mrf.mxu0 }
0x30c5   :  { %v5378_v3 = vadd.f32 %v8870_v0, %v5283_v18 }
0x30c6   :  { %v5372_v4 = vpop.f32.mrf.mxu0 }
0x30c7   :  { %v5384_v58 = vadd.f32 %v5378_v3, %v5174_v47  ;;  %v5373_v6 = vadd.f32 %v5372_v4, %v5283_v18  ;;  %v5455_v47 = vld [vmem:[%s11452_s1 + $0x248] sm:$0xff] }
0x30c8   :  { %8873 = vmatprep.subr.mxu1 %v5455_v47 }
0x30c9   :  { %v5383_v8 = vadd.f32 %v5373_v6, %v5173_v42  ;;  %v5394_v31 = vsel %vm157_vm1, %v5384_v58, 0.0  ;;  %8874 = vmatpush3.msra.mxu1 %v5455_v47  ;;  %v10914_v47 = vld [vmem:[%s11452_s1 + $0x340] sm:$0xff] }
0x30ca   :  { %5395 = vadd.xlane.f32.xlu0 %v5394_v31  ;;  %8875 = vmatprep.subr.mxu1 %v5454_v63 }
0x30cb   :  { %v5391_v7 = vsel %vm157_vm1, %v5383_v8, 0.0  ;;  %8876 = vmatpush3.msra.mxu1 %v5454_v63 }
0x30cc   :  { %5392 = vadd.xlane.f32.xlu1 %v5391_v7  ;;  %8877 = vmatprep.subr.mxu1 %v5453_v37 }
0x30cd   :  { %8878 = vmatpush3.msra.mxu1 %v5453_v37 }
0x3145   :  { %v5390_v41 = vpop.xlane.xlu0 %5389 }
0x3146   :  { %v5398_v10 = vmul.f32 0.03125, %v5390_v41 }
0x3147   :  { %v5387_v11 = vpop.xlane.xlu1 %5386 }
0x3148   :  { %v5402_v14 = vsub.f32 %v5382_v23, %v5398_v10  ;;  %v5397_v61 = vmul.f32 0.03125, %v5387_v11 }
0x314a   :  { %v5401_v12 = vsub.f32 %v5381_v1, %v5397_v61  ;;  %v5406_v34 = vmul.f32 %v5402_v14, %v5402_v14 }
0x314c   :  { %v5412_v27 = vsel %vm157_vm1, %v5406_v34, 0.0  ;;  %v5405_v28 = vmul.f32 %v5401_v12, %v5401_v12 }
0x314d   :  { %5413 = vadd.xlane.f32.xlu0 %v5412_v27 }
0x314e   :  { %v5409_v24 = vsel %vm157_vm1, %v5405_v28, 0.0 }
0x314f   :  { %5410 = vadd.xlane.f32.xlu1 %v5409_v24 }
0x3153   :  { %v5396_v30 = vpop.xlane.xlu0 %5395 }
0x3154   :  { %v5400_v57 = vmul.f32 0.03125, %v5396_v30 }
0x3155   :  { %v5393_v39 = vpop.xlane.xlu1 %5392 }
0x3156   :  { %v5404_v45 = vsub.f32 %v5384_v58, %v5400_v57  ;;  %v5399_v55 = vmul.f32 0.03125, %v5393_v39  ;;  %v10901_v39 = vld [vmem:[%s11452_s1 + $0x330] sm:$0xff] }
0x3158   :  { %v5403_v20 = vsub.f32 %v5383_v8, %v5399_v55  ;;  %v5408_v26 = vmul.f32 %v5404_v45, %v5404_v45 }
0x315a   :  { %v5418_v25 = vsel %vm157_vm1, %v5408_v26, 0.0  ;;  %v5407_v42 = vmul.f32 %v5403_v20, %v5403_v20  ;;  %v10907_v26 = vld [vmem:[%s11452_s1 + $0x328] sm:$0xff] }
0x315b   :  { %5419 = vadd.xlane.f32.xlu0 %v5418_v25 }
0x315c   :  { %v5415_v19 = vsel %vm157_vm1, %v5407_v42, 0.0 }
0x315d   :  { %5416 = vadd.xlane.f32.xlu1 %v5415_v19 }
0x31d6   :  { %v5414_v43 = vpop.xlane.xlu0 %5413 }
0x31d7   :  { %v5422_v16 = vmul.f32 0.03125, %v5414_v43 }
0x31d8   :  { %v5411_v15 = vpop.xlane.xlu1 %5410 }
0x31d9   :  { %v5426_v21 = vadd.f32 1e-05, %v5422_v16  ;;  %v5421_v51 = vmul.f32 0.03125, %v5411_v15  ;;  %v10921_v16 = vld [vmem:[%s11452_s1 + $0x338] sm:$0xff] }
0x31db   :  { %9328 = vrsqrt.f32 %v5426_v21  ;;  %v5425_v52 = vadd.f32 1e-05, %v5421_v51 }
0x31dd   :  { %9330 = vrsqrt.f32 %v5425_v52 }
0x31e4   :  { %v5420_v17 = vpop.xlane.xlu0 %5419 }
0x31e5   :  { %v5424_v49 = vmul.f32 0.03125, %v5420_v17 }
0x31e6   :  { %v5417_v59 = vpop.xlane.xlu1 %5416 }
0x31e7   :  { %v5428_v13 = vadd.f32 1e-05, %v5424_v49  ;;  %v5423_v54 = vmul.f32 0.03125, %v5417_v59 }
0x31e8   :  { %v9329_v44 = vpop.eup %9328 }
0x31e9   :  { %v5434_v53 = vmul.f32 %v9329_v44, %v5402_v14  ;;  %9332 = vrsqrt.f32 %v5428_v13  ;;  %v5427_v38 = vadd.f32 1e-05, %v5423_v54 }
0x31ea   :  { %v9331_v18 = vpop.eup %9330 }
0x31eb   :  { %9334 = vrsqrt.f32 %v5427_v38  ;;  %v5433_v48 = vmul.f32 %v9331_v18, %v5401_v12  ;;  %v5442_v50 = vmul.f32 %v5440_v46, %v5434_v53 }
0x31ed   :  { %v5441_v23 = vmul.f32 %v5440_v46, %v5433_v48  ;;  %v10844_v1 = vadd.f32 %v5448_v62, %v5442_v50 }
0x31ef   :  { %v10842_v40 = vadd.f32 %v5448_v62, %v5441_v23 }
0x31f1   :  { %8879 = vmatprep.mubr.msk.f32.mxu1 %vm157_vm1, %v10842_v40 }
0x31f2   :  { %8880 = vmatmul.mubr.msk.f32.vlgmr.msra.gmra.mxu1 %vm157_vm1, %v10844_v1 }
0x31f6   :  { %v9333_v22 = vpop.eup %9332 }
0x31f7   :  { %v5436_v60 = vmul.f32 %v9333_v22, %v5404_v45 }
0x31f8   :  { %v9335_v0 = vpop.eup %9334 }
0x31f9   :  { %v5435_v3 = vmul.f32 %v9335_v0, %v5403_v20  ;;  %v5444_v4 = vmul.f32 %v5440_v46, %v5436_v60 }
0x31fb   :  { %v5443_v58 = vmul.f32 %v5440_v46, %v5435_v3  ;;  %v10852_v9 = vadd.f32 %v5448_v62, %v5444_v4 }
0x31fd   :  { %v10850_v6 = vadd.f32 %v5448_v62, %v5443_v58 }
0x31ff   :  { %8882 = vmatprep.mubr.msk.f32.mxu1 %vm157_vm1, %v10850_v6 }
0x3200   :  { %8883 = vmatmul.mubr.msk.f32.gmra.mxu1 %vm157_vm1, %v10852_v9 }
0x32b2   :  { %v10858_v8 = vpop.f32.mrf.mxu1 }
0x32b4   :  { %v10860_v31 = vpop.f32.mrf.mxu1 }
0x32b5   :  { %8893 = vmatprep.mubr.msk.f32.mxu1 %vm267_vm2, %v10860_v31 }
0x32c0   :  { %v10864_v7 = vpop.f32.mrf.mxu1 }
0x32c1   :  { %5581 = vrot.lane.b32.xlu1 %v10864_v7, %s9440_s13 }
0x32c2   :  { %v10868_v41 = vpop.f32.mrf.mxu1 }
0x32c3   :  { %5579 = vrot.lane.b32.xlu0 %v10868_v41, %s9440_s13 }
0x32c5   :  { %5577 = vrot.lane.b32.xlu1 %v10858_v8, %s9440_s13 }
0x32c7   :  { %5740 = vrot.lane.b32.xlu0 %v10868_v41, %s9441_s14 }
0x32c9   :  { %5575 = vrot.lane.b32.xlu1 %v10860_v31, %s9440_s13 }
0x32cd   :  { %5742 = vrot.lane.b32.xlu1 %v10864_v7, %s9441_s14 }
0x32d1   :  { %5738 = vrot.lane.b32.xlu1 %v10858_v8, %s9441_s14 }
0x32d5   :  { %5736 = vrot.lane.b32.xlu1 %v10860_v31, %s9441_s14 }
0x3333   :  { %v5582_v10 = vpop.permute.xlu1 %5581 }
0x3334   :  { %8885 = vmatprep.subr.msk.mxu1 %vm267_vm2, %v5582_v10 }
0x3335   :  { %8886 = vmatpush3.xpose.msk.msra.mxu1 %vm267_vm2, %v5582_v10  ;;  %v5580_v11 = vpop.permute.xlu0 %5579 }
0x3336   :  { %8887 = vmatprep.subr.msk.mxu1 %vm267_vm2, %v5580_v11 }
0x3337   :  { %v5578_v14 = vpop.permute.xlu1 %5577 }
0x3339   :  { %8888 = vmatpush3.xpose.msk.msra.mxu1 %vm267_vm2, %v5580_v11  ;;  %v5741_v34 = vpop.permute.xlu0 %5740 }
0x333a   :  { %8889 = vmatprep.subr.msk.mxu1 %vm267_vm2, %v5578_v14 }
0x333b   :  { %v5576_v61 = vpop.permute.xlu1 %5575 }
0x333d   :  { %8890 = vmatpush3.xpose.msk.msra.mxu1 %vm267_vm2, %v5578_v14 }
0x333e   :  { %8891 = vmatprep.subr.msk.mxu1 %vm267_vm2, %v5576_v61 }
0x333f   :  { %v5743_v12 = vpop.permute.xlu1 %5742 }
0x3340   :  { %8899 = vmatprep.subr.mxu0 %v5743_v12 }
0x3341   :  { %8892 = vmatpush3.xpose.msk.msra.mxu1 %vm267_vm2, %v5576_v61  ;;  %8900 = vmatpush3.msra.mxu0 %v5743_v12 }
0x3342   :  { %8901 = vmatprep.subr.mxu0 %v5741_v34 }
0x3343   :  { %v5739_v27 = vpop.permute.xlu1 %5738  ;;  %8902 = vmatpush3.msra.mxu0 %v5741_v34 }
0x3344   :  { %8894 = vmatmul.mubr.msk.f32.vlgmr.msra.gmra.mxu1 %vm267_vm2, %v10858_v8  ;;  %8903 = vmatprep.subr.mxu0 %v5739_v27 }
0x3345   :  { %8896 = vmatprep.mubr.msk.f32.mxu1 %vm267_vm2, %v10868_v41  ;;  %8904 = vmatpush3.msra.mxu0 %v5739_v27 }
0x3347   :  { %v5737_v28 = vpop.permute.xlu1 %5736 }
0x3348   :  { %8897 = vmatmul.mubr.msk.f32.gmra.mxu1 %vm267_vm2, %v10864_v7  ;;  %8905 = vmatprep.subr.mxu0 %v5737_v28 }
0x3349   :  { %8906 = vmatpush3.msra.mxu0 %v5737_v28 }
0x3404   :  { %v8895_v24 = vpop.f32.mrf.mxu1 }
0x3405   :  { %v5685_v30 = vmul.f32 0.35355338, %v8895_v24 }
0x3406   :  { %v5665_v57 = vpop.f32.mrf.mxu1 }
0x3407   :  { %v5689_v45 = vadd.f32 %v10901_v39, %v5685_v30  ;;  %v5684_v55 = vmul.f32 0.35355338, %v5665_v57 }
0x3408   :  { %v8898_v20 = vpop.f32.mrf.mxu1 }
0x3409   :  { %v5688_v25 = vadd.f32 %v10907_v26, %v5684_v55  ;;  %v5687_v42 = vmul.f32 0.35355338, %v8898_v20  ;;  %v5695_v19 = vsel %vm157_vm1, %v5689_v45, -inf }
0x340a   :  { %5696 = vmax.xlane.f32.xlu1 %v5695_v19  ;;  %v5675_v33 = vpop.f32.mrf.mxu1 }
0x340b   :  { %v5691_v63 = vadd.f32 %v10914_v47, %v5687_v42  ;;  %v5686_v37 = vmul.f32 0.35355338, %v5675_v33  ;;  %v5692_v43 = vsel %vm157_vm1, %v5688_v25, -inf }
0x340c   :  { %5693 = vmax.xlane.f32.xlu0 %v5692_v43 }
0x340d   :  { %v5690_v15 = vadd.f32 %v10921_v16, %v5686_v37  ;;  %v5701_v21 = vsel %vm157_vm1, %v5691_v63, -inf }
0x340f   :  { %v5698_v51 = vsel %vm157_vm1, %v5690_v15, -inf }
0x3410   :  { %5702 = vmax.xlane.f32.xlu0 %v5701_v21 }
0x3414   :  { %5699 = vmax.xlane.f32.xlu0 %v5698_v51 }
0x341b   :  { %5857 = vrot.lane.b32.xlu1 %v10868_v41, %s9443_s25 }
0x342a   :  { %5859 = vrot.lane.b32.xlu0 %v10864_v7, %s9443_s25 }
0x3493   :  { %v5697_v52 = vpop.xlane.xlu1 %5696 }
0x3494   :  { %v5705_v17 = vsub.f32 %v5689_v45, %v5697_v52 }
0x3495   :  { %v5694_v49 = vpop.xlane.xlu0 %5693 }
0x3496   :  { %v5710_v59 = vmul.f32 1.442695, %v5705_v17  ;;  %v5704_v13 = vsub.f32 %v5688_v25, %v5694_v49 }
0x3497   :  { %v5858_v10 = vpop.permute.xlu1 %5857 }
0x3498   :  { %9336 = vpow2.f32 %v5710_v59  ;;  %v5708_v54 = vmul.f32 1.442695, %v5704_v13 }
0x3499   :  { %v5703_v44 = vpop.xlane.xlu0 %5702 }
0x349a   :  { %9338 = vpow2.f32 %v5708_v54  ;;  %v5707_v50 = vsub.f32 %v5691_v63, %v5703_v44 }
0x349c   :  { %v5714_v22 = vmul.f32 1.442695, %v5707_v50 }
0x349d   :  { %v5700_v46 = vpop.xlane.xlu0 %5699 }
0x349e   :  { %v5706_v23 = vsub.f32 %v5690_v15, %v5700_v46  ;;  %9340 = vpow2.f32 %v5714_v22 }
0x34a0   :  { %v5712_v60 = vmul.f32 1.442695, %v5706_v23 }
0x34a1   :  { %v5860_v53 = vpop.permute.xlu0 %5859 }
0x34a2   :  { %8913 = vmatprep.subr.msk.mxu0 %vm267_vm2, %v5860_v53  ;;  %9342 = vpow2.f32 %v5712_v60 }
0x34a5   :  { %v9337_v38 = vpop.eup %9336 }
0x34a6   :  { %v5719_v18 = vsel %vm157_vm1, %v9337_v38, 0.0 }
0x34a7   :  { %v9339_v48 = vpop.eup %9338  ;;  %5720 = vadd.xlane.f32.xlu0 %v5719_v18 }
0x34a8   :  { %v5716_v62 = vsel %vm157_vm1, %v9339_v48, 0.0 }
0x34a9   :  { %5717 = vadd.xlane.f32.xlu1 %v5716_v62 }
0x34ab   :  { %v9341_v0 = vpop.eup %9340 }
0x34ac   :  { %v5725_v4 = vsel %vm157_vm1, %v9341_v0, 0.0 }
0x34af   :  { %v9343_v3 = vpop.eup %9342 }
0x34b0   :  { %v5722_v58 = vsel %vm157_vm1, %v9343_v3, 0.0 }
0x34ba   :  { %5853 = vrot.lane.b32.xlu1 %v10860_v31, %s9443_s25 }
0x34bd   :  { %5855 = vrot.lane.b32.xlu0 %v10858_v8, %s9443_s25 }
0x34dc   :  { %5726 = vadd.xlane.f32.xlu0 %v5725_v4 }
0x34de   :  { %5723 = vadd.xlane.f32.xlu1 %v5722_v58 }
0x34ef   :  { %5847 = vrot.lane.b32.xlu1 %v10858_v8, %s9444_s26 }
0x34f2   :  { %5845 = vrot.lane.b32.xlu0 %v10860_v31, %s9444_s26 }
0x34f3   :  { %5851 = vrot.lane.b32.xlu1 %v10864_v7, %s9444_s26 }
0x34f6   :  { %5849 = vrot.lane.b32.xlu0 %v10868_v41, %s9444_s26 }
0x34f7   :  { %6020 = vrot.lane.b32.xlu1 %v10864_v7, %s9445_s27 }
0x34fa   :  { %6018 = vrot.lane.b32.xlu0 %v10868_v41, %s9445_s27 }
0x34fb   :  { %6016 = vrot.lane.b32.xlu1 %v10858_v8, %s9445_s27 }
0x34ff   :  { %6014 = vrot.lane.b32.xlu1 %v10860_v31, %s9445_s27 }
0x3530   :  { %v5721_v11 = vpop.xlane.xlu0 %5720 }
0x3531   :  { %9344 = vrcp.f32 %v5721_v11 }
0x3532   :  { %v5718_v14 = vpop.xlane.xlu1 %5717 }
0x3533   :  { %9346 = vrcp.f32 %v5718_v14 }
0x3534   :  { %v5856_v28 = vpop.permute.xlu0 %5855 }
0x3536   :  { %v5854_v24 = vpop.permute.xlu1 %5853 }
0x353e   :  { %v9345_v61 = vpop.eup %9344 }
0x353f   :  { %v5731_v27 = vmul.f32 %v9345_v61, %v9337_v38 }
0x3540   :  { %v9347_v12 = vpop.eup %9346 }
0x3541   :  { %v5729_v34 = vmul.f32 %v9347_v12, %v9339_v48 }
0x3543   :  { %8907 = vmatprep.mubr.msk.f32.mxu0 %vm157_vm1, %v5729_v34 }
0x3544   :  { %8908 = vmatmul.mubr.msk.f32.vlgmr.msra.gmra.mxu0 %vm157_vm1, %v5731_v27 }
0x3545   :  { %8914 = vmatpush3.xpose.msk.msra.mxu0 %vm267_vm2, %v5860_v53 }
0x3546   :  { %8915 = vmatprep.subr.msk.mxu0 %vm267_vm2, %v5858_v10 }
0x3549   :  { %8916 = vmatpush3.xpose.msk.msra.mxu0 %vm267_vm2, %v5858_v10 }
0x354a   :  { %8917 = vmatprep.subr.msk.mxu0 %vm267_vm2, %v5856_v28 }
0x354d   :  { %8918 = vmatpush3.xpose.msk.msra.mxu0 %vm267_vm2, %v5856_v28 }
0x354e   :  { %8919 = vmatprep.subr.msk.mxu0 %vm267_vm2, %v5854_v24 }
0x3551   :  { %8920 = vmatpush3.xpose.msk.msra.mxu0 %vm267_vm2, %v5854_v24 }
0x3565   :  { %v5727_v30 = vpop.xlane.xlu0 %5726 }
0x3566   :  { %9348 = vrcp.f32 %v5727_v30 }
0x3567   :  { %v5724_v57 = vpop.xlane.xlu1 %5723 }
0x3568   :  { %9350 = vrcp.f32 %v5724_v57 }
0x3569   :  { %v5846_v45 = vpop.permute.xlu0 %5845 }
0x356b   :  { %v5848_v55 = vpop.permute.xlu1 %5847 }
0x356d   :  { %v5850_v20 = vpop.permute.xlu0 %5849 }
0x356f   :  { %v5852_v25 = vpop.permute.xlu1 %5851 }
0x3571   :  { %v6019_v63 = vpop.permute.xlu0 %6018 }
0x3573   :  { %v6021_v42 = vpop.permute.xlu1 %6020  ;;  %v9349_v19 = vpop.eup %9348 }
0x3574   :  { %8927 = vmatprep.subr.mxu1 %v6021_v42  ;;  %v5735_v15 = vmul.f32 %v9349_v19, %v9341_v0 }
0x3575   :  { %v9351_v33 = vpop.eup %9350  ;;  %8928 = vmatpush3.msra.mxu1 %v6021_v42 }
0x3576   :  { %8929 = vmatprep.subr.mxu1 %v6019_v63  ;;  %v5733_v37 = vmul.f32 %v9351_v33, %v9343_v3 }
0x3577   :  { %v6017_v43 = vpop.permute.xlu1 %6016  ;;  %8930 = vmatpush3.msra.mxu1 %v6019_v63 }
0x3578   :  { %8910 = vmatprep.mubr.msk.f32.mxu0 %vm157_vm1, %v5733_v37  ;;  %8931 = vmatprep.subr.mxu1 %v6017_v43 }
0x3579   :  { %8911 = vmatmul.mubr.msk.f32.gmra.mxu0 %vm157_vm1, %v5735_v15  ;;  %8932 = vmatpush3.msra.mxu1 %v6017_v43 }
0x357a   :  { %8921 = vmatprep.mubr.msk.f32.mxu0 %vm267_vm2, %v5846_v45 }
0x357b   :  { %v6015_v21 = vpop.permute.xlu1 %6014 }
0x357c   :  { %8933 = vmatprep.subr.mxu1 %v6015_v21 }
0x357d   :  { %8922 = vmatmul.mubr.msk.f32.vlgmr.msra.gmra.mxu0 %vm267_vm2, %v5848_v55  ;;  %8934 = vmatpush3.msra.mxu1 %v6015_v21 }
0x357e   :  { %8924 = vmatprep.mubr.msk.f32.mxu0 %vm267_vm2, %v5850_v20 }
0x3581   :  { %8925 = vmatmul.mubr.msk.f32.gmra.mxu0 %vm267_vm2, %v5852_v25 }
0x3604   :  { %v10970_v51 = vpop.f32.mrf.mxu0 }
0x3606   :  { %v10972_v52 = vpop.f32.mrf.mxu0 }
0x3639   :  { %v10974_v17 = vpop.f32.mrf.mxu0 }
0x363b   :  { %v10976_v49 = vpop.f32.mrf.mxu0 }
0x363d   :  { %v8923_v59 = vpop.f32.mrf.mxu0 }
0x363e   :  { %v5963_v13 = vmul.f32 0.35355338, %v8923_v59 }
0x363f   :  { %v5943_v54 = vpop.f32.mrf.mxu0 }
0x3640   :  { %v5967_v44 = vadd.f32 %v10901_v39, %v5963_v13  ;;  %v5962_v46 = vmul.f32 0.35355338, %v5943_v54 }
0x3641   :  { %v8926_v53 = vpop.f32.mrf.mxu0 }
0x3642   :  { %v5966_v38 = vadd.f32 %v10907_v26, %v5962_v46  ;;  %v5965_v18 = vmul.f32 0.35355338, %v8926_v53  ;;  %v5973_v48 = vsel %vm157_vm1, %v5967_v44, -inf }
0x3643   :  { %5974 = vmax.xlane.f32.xlu1 %v5973_v48  ;;  %v5953_v62 = vpop.f32.mrf.mxu0 }
0x3644   :  { %v5969_v50 = vadd.f32 %v10914_v47, %v5965_v18  ;;  %v5964_v23 = vmul.f32 0.35355338, %v5953_v62  ;;  %v5970_v22 = vsel %vm157_vm1, %v5966_v38, -inf }
0x3645   :  { %5971 = vmax.xlane.f32.xlu0 %v5970_v22 }
0x3646   :  { %v5968_v60 = vadd.f32 %v10921_v16, %v5964_v23  ;;  %v5979_v0 = vsel %vm157_vm1, %v5969_v50, -inf }
0x3648   :  { %v5976_v3 = vsel %vm157_vm1, %v5968_v60, -inf }
0x3649   :  { %5980 = vmax.xlane.f32.xlu0 %v5979_v0 }
0x364d   :  { %5977 = vmax.xlane.f32.xlu0 %v5976_v3 }
0x3654   :  { %6135 = vrot.lane.b32.xlu1 %v10868_v41, %s9446_s28 }
0x3663   :  { %6137 = vrot.lane.b32.xlu0 %v10864_v7, %s9446_s28 }
0x36cc   :  { %v5975_v4 = vpop.xlane.xlu1 %5974 }
0x36cd   :  { %v5983_v58 = vsub.f32 %v5967_v44, %v5975_v4 }
0x36ce   :  { %v5972_v10 = vpop.xlane.xlu0 %5971 }
0x36cf   :  { %v5988_v11 = vmul.f32 1.442695, %v5983_v58  ;;  %v5982_v14 = vsub.f32 %v5966_v38, %v5972_v10 }
0x36d0   :  { %v6136_v37 = vpop.permute.xlu1 %6135 }
0x36d1   :  { %9352 = vpow2.f32 %v5988_v11  ;;  %v5986_v61 = vmul.f32 1.442695, %v5982_v14 }
0x36d2   :  { %v5981_v12 = vpop.xlane.xlu0 %5980 }
0x36d3   :  { %9354 = vpow2.f32 %v5986_v61  ;;  %v5985_v45 = vsub.f32 %v5969_v50, %v5981_v12 }
0x36d5   :  { %v5992_v20 = vmul.f32 1.442695, %v5985_v45 }
0x36d6   :  { %v5978_v34 = vpop.xlane.xlu0 %5977 }
0x36d7   :  { %v5984_v55 = vsub.f32 %v5968_v60, %v5978_v34  ;;  %9356 = vpow2.f32 %v5992_v20 }
0x36d9   :  { %v5990_v25 = vmul.f32 1.442695, %v5984_v55 }
0x36da   :  { %v6138_v27 = vpop.permute.xlu0 %6137 }
0x36db   :  { %8941 = vmatprep.subr.msk.mxu1 %vm267_vm2, %v6138_v27  ;;  %9358 = vpow2.f32 %v5990_v25 }
0x36de   :  { %v9353_v28 = vpop.eup %9352 }
0x36df   :  { %v5997_v24 = vsel %vm157_vm1, %v9353_v28, 0.0 }
0x36e0   :  { %v9355_v30 = vpop.eup %9354  ;;  %5998 = vadd.xlane.f32.xlu0 %v5997_v24 }
0x36e1   :  { %v5994_v57 = vsel %vm157_vm1, %v9355_v30, 0.0 }
0x36e2   :  { %5995 = vadd.xlane.f32.xlu1 %v5994_v57 }
0x36e4   :  { %v9357_v42 = vpop.eup %9356 }
0x36e5   :  { %v6003_v33 = vsel %vm157_vm1, %v9357_v42, 0.0 }
0x36e8   :  { %v9359_v19 = vpop.eup %9358 }
0x36e9   :  { %v6000_v63 = vsel %vm157_vm1, %v9359_v19, 0.0 }
0x36f3   :  { %6131 = vrot.lane.b32.xlu1 %v10860_v31, %s9446_s28 }
0x36f6   :  { %6133 = vrot.lane.b32.xlu0 %v10858_v8, %s9446_s28 }
0x3715   :  { %6004 = vadd.xlane.f32.xlu0 %v6003_v33 }
0x3717   :  { %6001 = vadd.xlane.f32.xlu1 %v6000_v63 }
0x3728   :  { %6125 = vrot.lane.b32.xlu1 %v10858_v8, %s9447_s29 }
0x372b   :  { %6123 = vrot.lane.b32.xlu0 %v10860_v31, %s9447_s29 }
0x372c   :  { %6129 = vrot.lane.b32.xlu1 %v10864_v7, %s9447_s29 }
0x372f   :  { %6127 = vrot.lane.b32.xlu0 %v10868_v41, %s9447_s29 }
0x3730   :  { %6298 = vrot.lane.b32.xlu1 %v10864_v7, %s9448_s30 }
0x3733   :  { %6296 = vrot.lane.b32.xlu0 %v10868_v41, %s9448_s30 }
0x3734   :  { %6294 = vrot.lane.b32.xlu1 %v10858_v8, %s9448_s30 }
0x3738   :  { %6292 = vrot.lane.b32.xlu1 %v10860_v31, %s9448_s30 }
0x3769   :  { %v5999_v43 = vpop.xlane.xlu0 %5998 }
0x376a   :  { %9360 = vrcp.f32 %v5999_v43 }
0x376b   :  { %v5996_v15 = vpop.xlane.xlu1 %5995 }
0x376c   :  { %9362 = vrcp.f32 %v5996_v15 }
0x376d   :  { %v6134_v44 = vpop.permute.xlu0 %6133 }
0x376f   :  { %v6132_v46 = vpop.permute.xlu1 %6131 }
0x3777   :  { %v9361_v21 = vpop.eup %9360 }
0x3778   :  { %v6009_v54 = vmul.f32 %v9361_v21, %v9353_v28 }
0x3779   :  { %v9363_v59 = vpop.eup %9362 }
0x377a   :  { %v6007_v13 = vmul.f32 %v9363_v59, %v9355_v30 }
0x377c   :  { %8935 = vmatprep.mubr.msk.f32.mxu1 %vm157_vm1, %v6007_v13 }
0x377d   :  { %8936 = vmatmul.mubr.msk.f32.vlgmr.msra.gmra.mxu1 %vm157_vm1, %v6009_v54 }
0x377e   :  { %8942 = vmatpush3.xpose.msk.msra.mxu1 %vm267_vm2, %v6138_v27 }
0x377f   :  { %8943 = vmatprep.subr.msk.mxu1 %vm267_vm2, %v6136_v37 }
0x3782   :  { %8944 = vmatpush3.xpose.msk.msra.mxu1 %vm267_vm2, %v6136_v37 }
0x3783   :  { %8945 = vmatprep.subr.msk.mxu1 %vm267_vm2, %v6134_v44 }
0x3786   :  { %8946 = vmatpush3.xpose.msk.msra.mxu1 %vm267_vm2, %v6134_v44 }
0x3787   :  { %8947 = vmatprep.subr.msk.mxu1 %vm267_vm2, %v6132_v46 }
0x378a   :  { %8948 = vmatpush3.xpose.msk.msra.mxu1 %vm267_vm2, %v6132_v46 }
0x379e   :  { %v6005_v53 = vpop.xlane.xlu0 %6004 }
0x379f   :  { %9364 = vrcp.f32 %v6005_v53 }
0x37a0   :  { %v6002_v38 = vpop.xlane.xlu1 %6001 }
0x37a1   :  { %9366 = vrcp.f32 %v6002_v38 }
0x37a2   :  { %v6124_v18 = vpop.permute.xlu0 %6123 }
0x37a4   :  { %v6126_v48 = vpop.permute.xlu1 %6125 }
0x37a6   :  { %v6128_v62 = vpop.permute.xlu0 %6127 }
0x37a8   :  { %v6130_v50 = vpop.permute.xlu1 %6129 }
0x37aa   :  { %v6297_v0 = vpop.permute.xlu0 %6296 }
0x37ac   :  { %v6299_v23 = vpop.permute.xlu1 %6298  ;;  %v9365_v22 = vpop.eup %9364 }
0x37ad   :  { %8955 = vmatprep.subr.mxu0 %v6299_v23  ;;  %v6013_v58 = vmul.f32 %v9365_v22, %v9357_v42 }
0x37ae   :  { %v9367_v60 = vpop.eup %9366  ;;  %8956 = vmatpush3.msra.mxu0 %v6299_v23 }
0x37af   :  { %8957 = vmatprep.subr.mxu0 %v6297_v0  ;;  %v6011_v3 = vmul.f32 %v9367_v60, %v9359_v19 }
0x37b0   :  { %v6295_v4 = vpop.permute.xlu1 %6294  ;;  %8958 = vmatpush3.msra.mxu0 %v6297_v0 }
0x37b1   :  { %8938 = vmatprep.mubr.msk.f32.mxu1 %vm157_vm1, %v6011_v3  ;;  %8959 = vmatprep.subr.mxu0 %v6295_v4 }
0x37b2   :  { %8939 = vmatmul.mubr.msk.f32.gmra.mxu1 %vm157_vm1, %v6013_v58  ;;  %8960 = vmatpush3.msra.mxu0 %v6295_v4 }
0x37b3   :  { %8949 = vmatprep.mubr.msk.f32.mxu1 %vm267_vm2, %v6124_v18 }
0x37b4   :  { %v6293_v10 = vpop.permute.xlu1 %6292 }
0x37b5   :  { %8961 = vmatprep.subr.mxu0 %v6293_v10 }
0x37b6   :  { %8950 = vmatmul.mubr.msk.f32.vlgmr.msra.gmra.mxu1 %vm267_vm2, %v6126_v48  ;;  %8962 = vmatpush3.msra.mxu0 %v6293_v10 }
0x37b7   :  { %8952 = vmatprep.mubr.msk.f32.mxu1 %vm267_vm2, %v6128_v62 }
0x37ba   :  { %8953 = vmatmul.mubr.msk.f32.gmra.mxu1 %vm267_vm2, %v6130_v50 }
0x383d   :  { %v11030_v11 = vpop.f32.mrf.mxu1 }
0x383f   :  { %v11032_v14 = vpop.f32.mrf.mxu1 }
0x3872   :  { %v11034_v61 = vpop.f32.mrf.mxu1 }
0x3874   :  { %v11036_v12 = vpop.f32.mrf.mxu1 }
0x3876   :  { %v8951_v34 = vpop.f32.mrf.mxu1 }
0x3877   :  { %v6241_v27 = vmul.f32 0.35355338, %v8951_v34 }
0x3878   :  { %v6221_v28 = vpop.f32.mrf.mxu1 }
0x3879   :  { %v6245_v24 = vadd.f32 %v10901_v39, %v6241_v27  ;;  %v6240_v30 = vmul.f32 0.35355338, %v6221_v28 }
0x387a   :  { %v8954_v57 = vpop.f32.mrf.mxu1 }
0x387b   :  { %v6244_v45 = vadd.f32 %v10907_v26, %v6240_v30  ;;  %v6243_v55 = vmul.f32 0.35355338, %v8954_v57  ;;  %v6251_v20 = vsel %vm157_vm1, %v6245_v24, -inf }
0x387c   :  { %6252 = vmax.xlane.f32.xlu1 %v6251_v20  ;;  %v6231_v25 = vpop.f32.mrf.mxu1 }
0x387d   :  { %v6247_v42 = vadd.f32 %v10914_v47, %v6243_v55  ;;  %v6242_v19 = vmul.f32 0.35355338, %v6231_v25  ;;  %v6248_v33 = vsel %vm157_vm1, %v6244_v45, -inf }
0x387e   :  { %6249 = vmax.xlane.f32.xlu0 %v6248_v33 }
0x387f   :  { %v6246_v63 = vadd.f32 %v10921_v16, %v6242_v19  ;;  %v6257_v37 = vsel %vm157_vm1, %v6247_v42, -inf }
0x3881   :  { %v6254_v43 = vsel %vm157_vm1, %v6246_v63, -inf }
0x3882   :  { %6258 = vmax.xlane.f32.xlu0 %v6257_v37 }
0x3886   :  { %6255 = vmax.xlane.f32.xlu0 %v6254_v43 }
0x388d   :  { %6413 = vrot.lane.b32.xlu1 %v10868_v41, %s9449_s3 }
0x389c   :  { %6415 = vrot.lane.b32.xlu0 %v10864_v7, %s9449_s3 }
0x3905   :  { %v6253_v15 = vpop.xlane.xlu1 %6252 }
0x3906   :  { %v6261_v21 = vsub.f32 %v6245_v24, %v6253_v15 }
0x3907   :  { %v6250_v59 = vpop.xlane.xlu0 %6249 }
0x3908   :  { %v6266_v13 = vmul.f32 1.442695, %v6261_v21  ;;  %v6260_v54 = vsub.f32 %v6244_v45, %v6250_v59 }
0x3909   :  { %v6414_v34 = vpop.permute.xlu1 %6413 }
0x390a   :  { %9368 = vpow2.f32 %v6266_v13  ;;  %v6264_v44 = vmul.f32 1.442695, %v6260_v54 }
0x390b   :  { %v6259_v46 = vpop.xlane.xlu0 %6258 }
0x390c   :  { %9370 = vpow2.f32 %v6264_v44  ;;  %v6263_v23 = vsub.f32 %v6247_v42, %v6259_v46 }
0x390e   :  { %v6270_v60 = vmul.f32 1.442695, %v6263_v23 }
0x390f   :  { %v6256_v53 = vpop.xlane.xlu0 %6255 }
0x3910   :  { %v6262_v22 = vsub.f32 %v6246_v63, %v6256_v53  ;;  %9372 = vpow2.f32 %v6270_v60 }
0x3912   :  { %v6268_v0 = vmul.f32 1.442695, %v6262_v22 }
0x3913   :  { %v6416_v38 = vpop.permute.xlu0 %6415 }
0x3914   :  { %8969 = vmatprep.subr.msk.mxu0 %vm267_vm2, %v6416_v38  ;;  %9374 = vpow2.f32 %v6268_v0 }
0x3917   :  { %v9369_v18 = vpop.eup %9368 }
0x3918   :  { %v6275_v48 = vsel %vm157_vm1, %v9369_v18, 0.0 }
0x3919   :  { %v9371_v62 = vpop.eup %9370  ;;  %6276 = vadd.xlane.f32.xlu0 %v6275_v48 }
0x391a   :  { %v6272_v50 = vsel %vm157_vm1, %v9371_v62, 0.0 }
0x391b   :  { %6273 = vadd.xlane.f32.xlu1 %v6272_v50 }
0x391d   :  { %v9373_v3 = vpop.eup %9372 }
0x391e   :  { %v6281_v58 = vsel %vm157_vm1, %v9373_v3, 0.0 }
0x3921   :  { %v9375_v4 = vpop.eup %9374 }
0x3922   :  { %v6278_v10 = vsel %vm157_vm1, %v9375_v4, 0.0 }
0x392c   :  { %6409 = vrot.lane.b32.xlu1 %v10860_v31, %s9449_s3 }
0x392f   :  { %6411 = vrot.lane.b32.xlu0 %v10858_v8, %s9449_s3 }
0x394e   :  { %6282 = vadd.xlane.f32.xlu0 %v6281_v58 }
0x3950   :  { %6279 = vadd.xlane.f32.xlu1 %v6278_v10 }
0x3961   :  { %6403 = vrot.lane.b32.xlu1 %v10858_v8, %s9450_s4 }
0x3964   :  { %6401 = vrot.lane.b32.xlu0 %v10860_v31, %s9450_s4 }
0x3965   :  { %6407 = vrot.lane.b32.xlu1 %v10864_v7, %s9450_s4 }
0x3968   :  { %6405 = vrot.lane.b32.xlu0 %v10868_v41, %s9450_s4 }
0x39a2   :  { %v6277_v27 = vpop.xlane.xlu0 %6276 }
0x39a3   :  { %9376 = vrcp.f32 %v6277_v27 }
0x39a4   :  { %v6274_v28 = vpop.xlane.xlu1 %6273 }
0x39a5   :  { %9378 = vrcp.f32 %v6274_v28 }
0x39a6   :  { %v6412_v55 = vpop.permute.xlu0 %6411 }
0x39a8   :  { %v6410_v20 = vpop.permute.xlu1 %6409 }
0x39b0   :  { %v9377_v24 = vpop.eup %9376 }
0x39b1   :  { %v6287_v45 = vmul.f32 %v9377_v24, %v9369_v18 }
0x39b2   :  { %v9379_v30 = vpop.eup %9378 }
0x39b3   :  { %v6285_v57 = vmul.f32 %v9379_v30, %v9371_v62 }
0x39b5   :  { %8963 = vmatprep.mubr.msk.f32.mxu0 %vm157_vm1, %v6285_v57 }
0x39b6   :  { %8964 = vmatmul.mubr.msk.f32.vlgmr.msra.gmra.mxu0 %vm157_vm1, %v6287_v45 }
0x39b7   :  { %8970 = vmatpush3.xpose.msk.msra.mxu0 %vm267_vm2, %v6416_v38 }
0x39b8   :  { %8971 = vmatprep.subr.msk.mxu0 %vm267_vm2, %v6414_v34 }
0x39bb   :  { %8972 = vmatpush3.xpose.msk.msra.mxu0 %vm267_vm2, %v6414_v34 }
0x39bc   :  { %8973 = vmatprep.subr.msk.mxu0 %vm267_vm2, %v6412_v55 }
0x39bf   :  { %8974 = vmatpush3.xpose.msk.msra.mxu0 %vm267_vm2, %v6412_v55 }
0x39c0   :  { %8975 = vmatprep.subr.msk.mxu0 %vm267_vm2, %v6410_v20 }
0x39c3   :  { %8976 = vmatpush3.xpose.msk.msra.mxu0 %vm267_vm2, %v6410_v20 }
0x39d7   :  { %v6283_v25 = vpop.xlane.xlu0 %6282 }
0x39d8   :  { %9380 = vrcp.f32 %v6283_v25 }
0x39d9   :  { %v6280_v42 = vpop.xlane.xlu1 %6279 }
0x39da   :  { %9382 = vrcp.f32 %v6280_v42 }
0x39db   :  { %v6402_v37 = vpop.permute.xlu0 %6401 }
0x39dd   :  { %v6404_v15 = vpop.permute.xlu1 %6403 }
0x39df   :  { %v6406_v21 = vpop.permute.xlu0 %6405 }
0x39e1   :  { %v6408_v59 = vpop.permute.xlu1 %6407 }
0x39e5   :  { %v9381_v19 = vpop.eup %9380 }
0x39e6   :  { %v6291_v43 = vmul.f32 %v9381_v19, %v9373_v3 }
0x39e7   :  { %v9383_v33 = vpop.eup %9382 }
0x39e8   :  { %v6289_v63 = vmul.f32 %v9383_v33, %v9375_v4 }
0x39ea   :  { %8966 = vmatprep.mubr.msk.f32.mxu0 %vm157_vm1, %v6289_v63 }
0x39eb   :  { %8967 = vmatmul.mubr.msk.f32.gmra.mxu0 %vm157_vm1, %v6291_v43 }
0x39ec   :  { %8977 = vmatprep.mubr.msk.f32.mxu0 %vm267_vm2, %v6402_v37 }
0x39ef   :  { %8978 = vmatmul.mubr.msk.f32.vlgmr.msra.gmra.mxu0 %vm267_vm2, %v6404_v15 }
0x39f0   :  { %8980 = vmatprep.mubr.msk.f32.mxu0 %vm267_vm2, %v6406_v21 }
0x39f3   :  { %8981 = vmatmul.mubr.msk.f32.gmra.mxu0 %vm267_vm2, %v6408_v59 }
0x3a76   :  { %v11082_v13 = vpop.f32.mrf.mxu0 }
0x3a78   :  { %v6382_v54 = vpop.f32.mrf.mxu0 }
0x3aab   :  { %v11084_v44 = vpop.f32.mrf.mxu0 }
0x3aad   :  { %v6392_v46 = vpop.f32.mrf.mxu0 }
0x3aaf   :  { %v8979_v53 = vpop.f32.mrf.mxu0 }
0x3ab0   :  { %v6519_v38 = vmul.f32 0.35355338, %v8979_v53 }
0x3ab1   :  { %v6499_v18 = vpop.f32.mrf.mxu0 }
0x3ab2   :  { %v6523_v48 = vadd.f32 %v10901_v39, %v6519_v38  ;;  %v6518_v62 = vmul.f32 0.35355338, %v6499_v18 }
0x3ab3   :  { %v8982_v50 = vpop.f32.mrf.mxu0 }
0x3ab4   :  { %v6522_v23 = vadd.f32 %v10907_v26, %v6518_v62  ;;  %v6529_v22 = vsel %vm157_vm1, %v6523_v48, -inf  ;;  %v6521_v0 = vmul.f32 0.35355338, %v8982_v50  ;;  %v5459_v62 = vld [vmem:[%s11452_s1 + $0x268] sm:$0xff]  ;;  %v5458_v50 = vld [vmem:[%s11452_s1 + $0x260] sm:$0xff] }
0x3ab5   :  { %6530 = vmax.xlane.f32.xlu1 %v6529_v22  ;;  %v6509_v60 = vpop.f32.mrf.mxu0 }
0x3ab6   :  { %v6520_v3 = vmul.f32 0.35355338, %v6509_v60  ;;  %v6526_v4 = vsel %vm157_vm1, %v6522_v23, -inf  ;;  %v6525_v10 = vadd.f32 %v10914_v47, %v6521_v0 }
0x3ab7   :  { %6527 = vmax.xlane.f32.xlu0 %v6526_v4 }
0x3ab8   :  { %v6524_v58 = vadd.f32 %v10921_v16, %v6520_v3  ;;  %v6535_v39 = vsel %vm157_vm1, %v6525_v10, -inf }
0x3aba   :  { %v6532_v34 = vsel %vm157_vm1, %v6524_v58, -inf }
0x3abb   :  { %6533 = vmax.xlane.f32.xlu0 %v6532_v34 }
0x3abf   :  { %6536 = vmax.xlane.f32.xlu0 %v6535_v39 }
0x3ac6   :  { %6576 = vrot.lane.b32.xlu1 %v10864_v7, %s9451_s5 }
0x3b3e   :  { %v6531_v26 = vpop.xlane.xlu1 %6530 }
0x3b3f   :  { %v6539_v27 = vsub.f32 %v6523_v48, %v6531_v26  ;;  %v5460_v48 = vld [vmem:[%s11452_s1 + $0x270] sm:$0xff] }
0x3b40   :  { %v6528_v28 = vpop.xlane.xlu0 %6527 }
0x3b41   :  { %v6544_v24 = vmul.f32 1.442695, %v6539_v27  ;;  %v6538_v30 = vsub.f32 %v6522_v23, %v6528_v28  ;;  %v5457_v23 = vld [vmem:[%s11452_s1 + $0x258] sm:$0xff] }
0x3b42   :  { %v6577_v57 = vpop.permute.xlu1 %6576 }
0x3b43   :  { %9384 = vpow2.f32 %v6544_v24  ;;  %v6542_v45 = vmul.f32 1.442695, %v6538_v30  ;;  %8983 = vmatprep.subr.mxu1 %v6577_v57 }
0x3b44   :  { %8984 = vmatpush3.msra.mxu1 %v6577_v57  ;;  %v6534_v47 = vpop.xlane.xlu0 %6533 }
0x3b45   :  { %9386 = vpow2.f32 %v6542_v45  ;;  %v6540_v37 = vsub.f32 %v6524_v58, %v6534_v47 }
0x3b47   :  { %v6546_v43 = vmul.f32 1.442695, %v6540_v37 }
0x3b48   :  { %v6537_v16 = vpop.xlane.xlu0 %6536 }
0x3b49   :  { %v6541_v55 = vsub.f32 %v6525_v10, %v6537_v16 }
0x3b4b   :  { %v6548_v20 = vmul.f32 1.442695, %v6541_v55 }
0x3b4d   :  { %9388 = vpow2.f32 %v6548_v20 }
0x3b4e   :  { %9390 = vpow2.f32 %v6546_v43 }
0x3b50   :  { %v9385_v25 = vpop.eup %9384 }
0x3b51   :  { %v6553_v42 = vsel %vm157_vm1, %v9385_v25, 0.0 }
0x3b52   :  { %v9387_v7 = vpop.eup %9386  ;;  %6554 = vadd.xlane.f32.xlu0 %v6553_v42 }
0x3b53   :  { %v6550_v19 = vsel %vm157_vm1, %v9387_v7, 0.0 }
0x3b54   :  { %6551 = vadd.xlane.f32.xlu1 %v6550_v19 }
0x3b5a   :  { %v9389_v33 = vpop.eup %9388 }
0x3b5b   :  { %v6559_v63 = vsel %vm157_vm1, %v9389_v33, 0.0  ;;  %v9391_v15 = vpop.eup %9390 }
0x3b5c   :  { %6560 = vadd.xlane.f32.xlu0 %v6559_v63  ;;  %v6556_v21 = vsel %vm157_vm1, %v9391_v15, 0.0 }
0x3b65   :  { %6572 = vrot.lane.b32.xlu1 %v10858_v8, %s9451_s5 }
0x3b72   :  { %6574 = vrot.lane.b32.xlu0 %v10868_v41, %s9451_s5 }
0x3b76   :  { %6683 = vrot.lane.b32.xlu0 %v11032_v14, %s9452_s6 }
0x3b7a   :  { %6699 = vrot.lane.b32.xlu0 %v6382_v54, %s9453_s7 }
0x3b7e   :  { %6687 = vrot.lane.b32.xlu0 %v11036_v12, %s9452_s6 }
0x3b82   :  { %6703 = vrot.lane.b32.xlu0 %v6392_v46, %s9453_s7 }
0x3b89   :  { %6557 = vadd.xlane.f32.xlu1 %v6556_v21 }
0x3b9a   :  { %6570 = vrot.lane.b32.xlu1 %v10860_v31, %s9451_s5 }
0x3b9e   :  { %6685 = vrot.lane.b32.xlu1 %v11030_v11, %s9452_s6 }
0x3ba2   :  { %6701 = vrot.lane.b32.xlu1 %v11082_v13, %s9453_s7 }
0x3ba6   :  { %6689 = vrot.lane.b32.xlu1 %v11034_v61, %s9452_s6 }
0x3baa   :  { %6705 = vrot.lane.b32.xlu1 %v11084_v44, %s9453_s7 }
0x3bdb   :  { %v6555_v41 = vpop.xlane.xlu0 %6554 }
0x3bdd   :  { %v6552_v8 = vpop.xlane.xlu1 %6551 }
0x3bde   :  { %9392 = vrcp.f32 %v6552_v8 }
0x3bdf   :  { %9394 = vrcp.f32 %v6555_v41 }
0x3be1   :  { %v6573_v31 = vpop.permute.xlu1 %6572 }
0x3be5   :  { %v6561_v14 = vpop.xlane.xlu0 %6560 }
0x3be6   :  { %9396 = vrcp.f32 %v6561_v14 }
0x3be9   :  { %v6575_v12 = vpop.permute.xlu0 %6574 }
0x3bea   :  { %8985 = vmatprep.subr.mxu1 %v6575_v12 }
0x3beb   :  { %v9393_v59 = vpop.eup %9392  ;;  %8986 = vmatpush3.msra.mxu1 %v6575_v12 }
0x3bec   :  { %8987 = vmatprep.subr.mxu1 %v6573_v31  ;;  %v6563_v11 = vmul.f32 %v9393_v59, %v9387_v7  ;;  %v9395_v13 = vpop.eup %9394 }
0x3bed   :  { %8988 = vmatpush3.msra.mxu1 %v6573_v31  ;;  %v6565_v44 = vmul.f32 %v9395_v13, %v9385_v25  ;;  %v6684_v58 = vpop.permute.xlu0 %6683 }
0x3bee   :  { %8991 = vmatprep.mubr.msk.f32.mxu1 %vm157_vm1, %v6563_v11  ;;  %v6727_v24 = vsel %vm267_vm2, %v10972_v52, %v6684_v58  ;;  %v5462_v58 = vld [vmem:[%s11452_s1 + $0x280] sm:$0xff] }
0x3bf1   :  { %v6700_v34 = vpop.permute.xlu0 %6699 }
0x3bf2   :  { %v6731_v57 = vsel %vm1416_vm4, %v6727_v24, %v6700_v34  ;;  %v5472_v34 = vld [vmem:[%s11452_s1 + $0x2d0] sm:$0xff] }
0x3bf3   :  { %v9397_v46 = vpop.eup %9396 }
0x3bf4   :  { %v6569_v18 = vmul.f32 %v9397_v46, %v9389_v33 }
0x3bf5   :  { %v6688_v26 = vpop.permute.xlu0 %6687 }
0x3bf6   :  { %v6729_v52 = vsel %vm267_vm2, %v10976_v49, %v6688_v26  ;;  %v5470_v26 = vld [vmem:[%s11452_s1 + $0x2c0] sm:$0xff] }
0x3bf9   :  { %v6704_v28 = vpop.permute.xlu0 %6703 }
0x3bfa   :  { %v6733_v42 = vsel %vm1416_vm4, %v6729_v52, %v6704_v28 }
0x3c12   :  { %v6558_v61 = vpop.xlane.xlu1 %6557 }
0x3c13   :  { %9398 = vrcp.f32 %v6558_v61 }
0x3c16   :  { %v6571_v54 = vpop.permute.xlu1 %6570 }
0x3c17   :  { %8989 = vmatprep.subr.mxu1 %v6571_v54 }
0x3c18   :  { %8990 = vmatpush3.msra.mxu1 %v6571_v54 }
0x3c19   :  { %8992 = vmatmul.mubr.msk.f32.vlgmr.msra.gmra.mxu1 %vm157_vm1, %v6565_v44  ;;  %8997 = vmatprep.subr.mxu1 %v5460_v48 }
0x3c1a   :  { %8998 = vmatpush3.msra.mxu1 %v5460_v48  ;;  %v6686_v4 = vpop.permute.xlu1 %6685 }
0x3c1b   :  { %8999 = vmatprep.subr.mxu1 %v5459_v62  ;;  %v6728_v45 = vsel %vm267_vm2, %v10970_v51, %v6686_v4  ;;  %v5463_v4 = vld [vmem:[%s11452_s1 + $0x288] sm:$0xff] }
0x3c1c   :  { %9000 = vmatpush3.msra.mxu1 %v5459_v62 }
0x3c1d   :  { %9001 = vmatprep.subr.mxu1 %v5458_v50 }
0x3c1e   :  { %9002 = vmatpush3.msra.mxu1 %v5458_v50  ;;  %v6702_v10 = vpop.permute.xlu1 %6701 }
0x3c1f   :  { %9003 = vmatprep.subr.mxu1 %v5457_v23  ;;  %v6732_v16 = vsel %vm1416_vm4, %v6728_v45, %v6702_v10  ;;  %v5461_v10 = vld [vmem:[%s11452_s1 + $0x278] sm:$0xff] }
0x3c20   :  { %v9399_v53 = vpop.eup %9398  ;;  %9004 = vmatpush3.msra.mxu1 %v5457_v23 }
0x3c21   :  { %v6567_v38 = vmul.f32 %v9399_v53, %v9391_v15  ;;  %9025 = vmatprep.subr.mxu1 %v5472_v34 }
0x3c22   :  { %v6690_v39 = vpop.permute.xlu1 %6689 }
0x3c23   :  { %8994 = vmatprep.mubr.msk.f32.mxu1 %vm157_vm1, %v6567_v38  ;;  %v6730_v51 = vsel %vm267_vm2, %v10974_v17, %v6690_v39  ;;  %v5471_v39 = vld [vmem:[%s11452_s1 + $0x2c8] sm:$0xff] }
0x3c24   :  { %8995 = vmatmul.mubr.msk.f32.gmra.mxu1 %vm157_vm1, %v6569_v18 }
0x3c26   :  { %v6706_v27 = vpop.permute.xlu1 %6705 }
0x3c27   :  { %v6734_v19 = vsel %vm1416_vm4, %v6730_v51, %v6706_v27  ;;  %v5469_v27 = vld [vmem:[%s11452_s1 + $0x2b8] sm:$0xff] }
0x3cd9   :  { %v8993_v22 = vpop.f32.mrf.mxu1 }
0x3cda   :  { %6717 = vrot.lane.b32.xlu1 %v8993_v22, %s9454_s18 }
0x3cdb   :  { %v6660_v60 = vpop.f32.mrf.mxu1 }
0x3cdc   :  { %6715 = vrot.lane.b32.xlu0 %v6660_v60, %s9454_s18 }
0x3ce4   :  { %v8996_v0 = vpop.f32.mrf.mxu1 }
0x3ce5   :  { %6721 = vrot.lane.b32.xlu1 %v8996_v0, %s9454_s18 }
0x3ce6   :  { %v6670_v3 = vpop.f32.mrf.mxu1 }
0x3ce7   :  { %6719 = vrot.lane.b32.xlu0 %v6670_v3, %s9454_s18  ;;  %v5464_v3 = vld [vmem:[%s11452_s1 + $0x290] sm:$0xff] }
0x3ce8   :  { %9011 = vmatprep.subr.mxu0 %v5464_v3 }
0x3ce9   :  { %9012 = vmatpush3.msra.mxu0 %v5464_v3 }
0x3cea   :  { %9013 = vmatprep.subr.mxu0 %v5463_v4 }
0x3ceb   :  { %9014 = vmatpush3.msra.mxu0 %v5463_v4 }
0x3cec   :  { %9015 = vmatprep.subr.mxu0 %v5462_v58 }
0x3ced   :  { %9016 = vmatpush3.msra.mxu0 %v5462_v58 }
0x3cee   :  { %9017 = vmatprep.subr.mxu0 %v5461_v10 }
0x3cef   :  { %9018 = vmatpush3.msra.mxu0 %v5461_v10 }
0x3d4c   :  { %v6718_v30 = vpop.permute.xlu1 %6717 }
0x3d4d   :  { %v6736_v20 = vsel %vm1421_vm5, %v6732_v16, %v6718_v30 }
0x3d4e   :  { %v6716_v47 = vpop.permute.xlu0 %6715 }
0x3d4f   :  { %v6735_v55 = vsel %vm1421_vm5, %v6731_v57, %v6716_v47 }
0x3d50   :  { %9005 = vmatprep.mubr.msk.f32.mxu1 %vm157_vm1, %v6735_v55 }
0x3d51   :  { %9006 = vmatmul.mubr.msk.f32.vlgmr.msra.gmra.mxu1 %vm157_vm1, %v6736_v20  ;;  %v11211_v20 = vld [vmem:[%s11452_s1 + $0x2d8] sm:$0xff] }
0x3d52   :  { %9026 = vmatpush3.msra.mxu1 %v5472_v34  ;;  %v6895_v51 = vrot.slane %v11211_v20, %v9907_v29 }
0x3d53   :  { %9027 = vmatprep.subr.mxu1 %v5471_v39 }
0x3d54   :  { %9028 = vmatpush3.msra.mxu1 %v5471_v39 }
0x3d55   :  { %9029 = vmatprep.subr.mxu1 %v5470_v26 }
0x3d56   :  { %9030 = vmatpush3.msra.mxu1 %v5470_v26 }
0x3d57   :  { %v6722_v25 = vpop.permute.xlu1 %6721  ;;  %9031 = vmatprep.subr.mxu1 %v5469_v27 }
0x3d58   :  { %v6738_v63 = vsel %vm1421_vm5, %v6734_v19, %v6722_v25  ;;  %9032 = vmatpush3.msra.mxu1 %v5469_v27 }
0x3d59   :  { %v6720_v7 = vpop.permute.xlu0 %6719 }
0x3d5a   :  { %v6737_v33 = vsel %vm1421_vm5, %v6733_v42, %v6720_v7 }
0x3d5b   :  { %9008 = vmatprep.mubr.msk.f32.mxu1 %vm157_vm1, %v6737_v33 }
0x3d5c   :  { %9009 = vmatmul.mubr.msk.f32.gmra.mxu1 %vm157_vm1, %v6738_v63 }
0x3e11   :  { %v9007_v37 = vpop.f32.mrf.mxu1 }
0x3e12   :  { %v6837_v49 = vadd.f32 %v9007_v37, %v10844_v1 }
0x3e13   :  { %v6817_v43 = vpop.f32.mrf.mxu1 }
0x3e14   :  { %v6836_v15 = vadd.f32 %v6817_v43, %v10842_v40  ;;  %v6843_v21 = vsel %vm157_vm1, %v6837_v49, 0.0  ;;  %v6903_v43 = vrot.slane %v11211_v20, %v9917_v36  ;;  %v5468_v36 = vld [vmem:[%s11452_s1 + $0x2b0] sm:$0xff] }
0x3e15   :  { %6844 = vadd.xlane.f32.xlu1 %v6843_v21  ;;  %9033 = vmatprep.subr.mxu1 %v5468_v36 }
0x3e16   :  { %v6840_v17 = vsel %vm157_vm1, %v6836_v15, 0.0  ;;  %9034 = vmatpush3.msra.mxu1 %v5468_v36 }
0x3e17   :  { %6841 = vadd.xlane.f32.xlu0 %v6840_v17 }
0x3e1c   :  { %v9010_v8 = vpop.f32.mrf.mxu1 }
0x3e1d   :  { %v6839_v12 = vadd.f32 %v9010_v8, %v10852_v9 }
0x3e1e   :  { %v6827_v41 = vpop.f32.mrf.mxu1 }
0x3e1f   :  { %v6838_v14 = vadd.f32 %v6827_v41, %v10850_v6  ;;  %v6849_v1 = vsel %vm157_vm1, %v6839_v12, 0.0 }
0x3e21   :  { %v6846_v59 = vsel %vm157_vm1, %v6838_v14, 0.0 }
0x3e22   :  { %6847 = vadd.xlane.f32.xlu0 %v6846_v59 }
0x3e26   :  { %6850 = vadd.xlane.f32.xlu0 %v6849_v1 }
0x3e9e   :  { %v6845_v31 = vpop.xlane.xlu1 %6844 }
0x3e9f   :  { %v6853_v40 = vmul.f32 0.03125, %v6845_v31 }
0x3ea0   :  { %v6842_v11 = vpop.xlane.xlu0 %6841 }
0x3ea1   :  { %v6857_v61 = vsub.f32 %v6837_v49, %v6853_v40  ;;  %v6852_v13 = vmul.f32 0.03125, %v6842_v11  ;;  %v5467_v40 = vld [vmem:[%s11452_s1 + $0x2a8] sm:$0xff]  ;;  %v5466_v11 = vld [vmem:[%s11452_s1 + $0x2a0] sm:$0xff] }
0x3ea2   :  { %9035 = vmatprep.subr.mxu1 %v5467_v40 }
0x3ea3   :  { %v11168_v54 = vsub.f32 %v6836_v15, %v6852_v13  ;;  %v6861_v44 = vmul.f32 %v6857_v61, %v6857_v61  ;;  %9036 = vmatpush3.msra.mxu1 %v5467_v40  ;;  %v6911_v13 = vrot.slane %v11211_v20, %v9589_v35 }
0x3ea4   :  { %9037 = vmatprep.subr.mxu1 %v5466_v11 }
0x3ea5   :  { %v6867_v46 = vsel %vm157_vm1, %v6861_v44, 0.0  ;;  %v6860_v6 = vmul.f32 %v11168_v54, %v11168_v54  ;;  %9038 = vmatpush3.msra.mxu1 %v5466_v11 }
0x3ea6   :  { %6868 = vadd.xlane.f32.xlu0 %v6867_v46 }
0x3ea7   :  { %v6864_v9 = vsel %vm157_vm1, %v6860_v6, 0.0 }
0x3ea8   :  { %6865 = vadd.xlane.f32.xlu1 %v6864_v9 }
0x3eab   :  { %v6848_v53 = vpop.xlane.xlu0 %6847 }
0x3eac   :  { %v6854_v38 = vmul.f32 0.03125, %v6848_v53 }
0x3eae   :  { %v11174_v18 = vsub.f32 %v6838_v14, %v6854_v38 }
0x3eaf   :  { %v6851_v48 = vpop.xlane.xlu0 %6850 }
0x3eb0   :  { %v6855_v62 = vmul.f32 0.03125, %v6851_v48  ;;  %v6862_v50 = vmul.f32 %v11174_v18, %v11174_v18 }
0x3eb2   :  { %v11178_v23 = vsub.f32 %v6839_v12, %v6855_v62  ;;  %v6870_v22 = vsel %vm157_vm1, %v6862_v50, 0.0 }
0x3eb3   :  { %6871 = vadd.xlane.f32.xlu1 %v6870_v22  ;;  %v7016_v22 = vrot.slane %v11211_v20, %v9948_v2 }
0x3eb4   :  { %v6863_v60 = vmul.f32 %v11178_v23, %v11178_v23 }
0x3eb6   :  { %v6873_v0 = vsel %vm157_vm1, %v6863_v60, 0.0 }
0x3eb7   :  { %6874 = vadd.xlane.f32.xlu0 %v6873_v0 }
0x3f2f   :  { %v6869_v28 = vpop.xlane.xlu0 %6868 }
0x3f30   :  { %v6877_v24 = vmul.f32 0.03125, %v6869_v28 }
0x3f31   :  { %v6866_v30 = vpop.xlane.xlu1 %6865 }
0x3f32   :  { %v6881_v57 = vadd.f32 1e-05, %v6877_v24  ;;  %v6876_v45 = vmul.f32 0.03125, %v6866_v30 }
0x3f34   :  { %9400 = vrsqrt.f32 %v6881_v57  ;;  %v6880_v47 = vadd.f32 1e-05, %v6876_v45 }
0x3f36   :  { %9402 = vrsqrt.f32 %v6880_v47 }
0x3f3c   :  { %v6872_v16 = vpop.xlane.xlu1 %6871 }
0x3f3d   :  { %v6878_v55 = vmul.f32 0.03125, %v6872_v16 }
0x3f3f   :  { %v6882_v52 = vadd.f32 1e-05, %v6878_v55 }
0x3f40   :  { %v6875_v25 = vpop.xlane.xlu0 %6874 }
0x3f41   :  { %v9401_v42 = vpop.eup %9400  ;;  %9404 = vrsqrt.f32 %v6882_v52  ;;  %v6879_v7 = vmul.f32 0.03125, %v6875_v25 }
0x3f42   :  { %v6889_v19 = vmul.f32 %v9401_v42, %v6857_v61  ;;  %v5465_v61 = vld [vmem:[%s11452_s1 + $0x298] sm:$0xff] }
0x3f43   :  { %v9403_v33 = vpop.eup %9402  ;;  %v6883_v63 = vadd.f32 1e-05, %v6879_v7  ;;  %9039 = vmatprep.subr.mxu1 %v5465_v61 }
0x3f44   :  { %v6888_v37 = vmul.f32 %v9403_v33, %v11168_v54  ;;  %v6897_v49 = vmul.f32 %v6895_v51, %v6889_v19  ;;  %9040 = vmatpush3.msra.mxu1 %v5465_v61 }
0x3f45   :  { %9406 = vrsqrt.f32 %v6883_v63 }
0x3f46   :  { %v6896_v15 = vmul.f32 %v6895_v51, %v6888_v37  ;;  %v6905_v17 = vadd.f32 %v6903_v43, %v6897_v49 }
0x3f48   :  { %v6904_v21 = vadd.f32 %v6903_v43, %v6896_v15 }
0x3f4a   :  { %9019 = vmatprep.mubr.msk.f32.mxu0 %vm157_vm1, %v6904_v21 }
0x3f4b   :  { %9020 = vmatmul.mubr.msk.f32.vlgmr.msra.gmra.mxu0 %vm157_vm1, %v6905_v17 }
0x3f4e   :  { %v9405_v29 = vpop.eup %9404 }
0x3f4f   :  { %v6890_v8 = vmul.f32 %v9405_v29, %v11174_v18 }
0x3f51   :  { %v6898_v41 = vmul.f32 %v6895_v51, %v6890_v8 }
0x3f52   :  { %v9407_v14 = vpop.eup %9406 }
0x3f53   :  { %v6906_v12 = vadd.f32 %v6903_v43, %v6898_v41  ;;  %v6891_v59 = vmul.f32 %v9407_v14, %v11178_v23  ;;  %v7189_v14 = vld [vmem:[%s11452_s1 + $0x2f8] sm:$0xff] }
0x3f54   :  { %9047 = vmatprep.subr.mxu0 %v7189_v14 }
0x3f55   :  { %9022 = vmatprep.mubr.msk.f32.mxu0 %vm157_vm1, %v6906_v12  ;;  %v6899_v1 = vmul.f32 %v6895_v51, %v6891_v59  ;;  %9048 = vmatpush3.msra.mxu0 %v7189_v14  ;;  %v7187_v59 = vld [vmem:[%s11452_s1 + $0x2e8] sm:$0xff] }
0x3f57   :  { %v6907_v31 = vadd.f32 %v6903_v43, %v6899_v1  ;;  %v7186_v1 = vld [vmem:[%s11452_s1 + $0x2e0] sm:$0xff] }
0x3f59   :  { %9023 = vmatmul.mubr.msk.f32.gmra.mxu0 %vm157_vm1, %v6907_v31 }
0x400b   :  { %v9021_v54 = vpop.f32.mrf.mxu0 }
0x400c   :  { %v6996_v44 = vadd.f32 %v9021_v54, %v6911_v13 }
0x400d   :  { %v6990_v46 = vpop.f32.mrf.mxu0 }
0x400e   :  { %v6991_v6 = vadd.f32 %v6990_v46, %v6911_v13  ;;  %v7010_v53 = vmax.f32 %v6996_v44, 0.0 }
0x4010   :  { %v7009_v9 = vmax.f32 %v6991_v6, 0.0 }
0x4012   :  { %9041 = vmatprep.mubr.msk.f32.mxu1 %vm23_vm0, %v7009_v9 }
0x4013   :  { %9042 = vmatmul.mubr.msk.f32.vlgmr.msra.gmra.mxu1 %vm23_vm0, %v7010_v53 }
0x4019   :  { %v9024_v38 = vpop.f32.mrf.mxu0 }
0x401a   :  { %v7006_v18 = vadd.f32 %v9024_v38, %v6911_v13  ;;  %v7173_v38 = vrot.slane %v11211_v20, %v9973_v56 }
0x401b   :  { %v7000_v48 = vpop.f32.mrf.mxu0 }
0x401c   :  { %v7001_v62 = vadd.f32 %v7000_v48, %v6911_v13  ;;  %v7012_v23 = vmax.f32 %v7006_v18, 0.0 }
0x401e   :  { %v7011_v50 = vmax.f32 %v7001_v62, 0.0 }
0x4020   :  { %9044 = vmatprep.mubr.msk.f32.mxu1 %vm23_vm0, %v7011_v50 }
0x4021   :  { %9045 = vmatmul.mubr.msk.f32.gmra.mxu1 %vm23_vm0, %v7012_v23 }
0x40d3   :  { %v9043_v60 = vpop.f32.mrf.mxu1 }
0x40d4   :  { %v7101_v0 = vadd.f32 %v9043_v60, %v7016_v22 }
0x40d5   :  { %v7095_v3 = vpop.f32.mrf.mxu1 }
0x40d6   :  { %v7115_v4 = vadd.f32 %v7101_v0, %v6905_v17  ;;  %v7096_v58 = vadd.f32 %v7095_v3, %v7016_v22 }
0x40d8   :  { %v7114_v10 = vadd.f32 %v7096_v58, %v6904_v21  ;;  %v7121_v34 = vsel %vm157_vm1, %v7115_v4, 0.0 }
0x40d9   :  { %7122 = vadd.xlane.f32.xlu0 %v7121_v34 }
0x40da   :  { %v7118_v39 = vsel %vm157_vm1, %v7114_v10, 0.0 }
0x40db   :  { %7119 = vadd.xlane.f32.xlu1 %v7118_v39 }
0x40e1   :  { %v9046_v26 = vpop.f32.mrf.mxu1 }
0x40e2   :  { %v7111_v27 = vadd.f32 %v9046_v26, %v7016_v22 }
0x40e3   :  { %v7105_v28 = vpop.f32.mrf.mxu1 }
0x40e4   :  { %v7117_v24 = vadd.f32 %v7111_v27, %v6907_v31  ;;  %v7106_v30 = vadd.f32 %v7105_v28, %v7016_v22  ;;  %v7181_v22 = vrot.slane %v11211_v20, %v9978_v5  ;;  %v9455_v5 = vmov 32   ;;  %v7190_v20 = vld [vmem:[%s11452_s1 + $0x300] sm:$0xff] }
0x40e5   :  { %9094 = vset.pattern.permute.xlu1 %v9455_v5  ;;  %9095 = vset.pattern.permute.xlu0 %v9455_v5  ;;  %v7194_v28 = vrot.slane %v7190_v20, %v9589_v35  ;;  %v11289_v35 = vld [vmem:[%s11453_s0 + $0x20] sm:$0xff] }
0x40e6   :  { %v7116_v57 = vadd.f32 %v7106_v30, %v6906_v12  ;;  %v7127_v2 = vsel %vm157_vm1, %v7117_v24, 0.0  ;;  %v7188_v12 = vld [vmem:[%s11452_s1 + $0x2f0] sm:$0xff] }
0x40e7   :  { %7128 = vadd.xlane.f32.xlu0 %v7127_v2  ;;  %9049 = vmatprep.subr.mxu0 %v7188_v12 }
0x40e8   :  { %v7124_v45 = vsel %vm157_vm1, %v7116_v57, 0.0  ;;  %9050 = vmatpush3.msra.mxu0 %v7188_v12 }
0x40e9   :  { %7125 = vadd.xlane.f32.xlu1 %v7124_v45  ;;  %9051 = vmatprep.subr.mxu0 %v7187_v59 }
0x40ea   :  { %9052 = vmatpush3.msra.mxu0 %v7187_v59 }
0x40eb   :  { %9053 = vmatprep.subr.mxu0 %v7186_v1 }
0x40ec   :  { %9054 = vmatpush3.msra.mxu0 %v7186_v1  ;;  %v11325_v1 = vld [vmem:[%s11453_s0 + $0x30] sm:$0xff] }
0x4162   :  { %v7123_v47 = vpop.xlane.xlu0 %7122 }
0x4163   :  { %v7131_v16 = vmul.f32 0.03125, %v7123_v47 }
0x4164   :  { %v7120_v55 = vpop.xlane.xlu1 %7119 }
0x4165   :  { %v7135_v52 = vsub.f32 %v7115_v4, %v7131_v16  ;;  %v7130_v25 = vmul.f32 0.03125, %v7120_v55 }
0x4167   :  { %v7134_v42 = vsub.f32 %v7114_v10, %v7130_v25  ;;  %v7139_v51 = vmul.f32 %v7135_v52, %v7135_v52 }
0x4169   :  { %v7145_v7 = vsel %vm157_vm1, %v7139_v51, 0.0  ;;  %v7138_v19 = vmul.f32 %v7134_v42, %v7134_v42 }
0x416a   :  { %7146 = vadd.xlane.f32.xlu0 %v7145_v7 }
0x416b   :  { %v7142_v33 = vsel %vm157_vm1, %v7138_v19, 0.0 }
0x416c   :  { %7143 = vadd.xlane.f32.xlu1 %v7142_v33  ;;  %v11302_v33 = vand.u32 127, %v128_v32 }
0x4170   :  { %v7129_v63 = vpop.xlane.xlu0 %7128 }
0x4171   :  { %v7133_v37 = vmul.f32 0.03125, %v7129_v63 }
0x4172   :  { %v7126_v49 = vpop.xlane.xlu1 %7125 }
0x4173   :  { %v7137_v43 = vsub.f32 %v7117_v24, %v7133_v37  ;;  %v7132_v15 = vmul.f32 0.03125, %v7126_v49 }
0x4175   :  { %v7136_v21 = vsub.f32 %v7116_v57, %v7132_v15  ;;  %v7141_v17 = vmul.f32 %v7137_v43, %v7137_v43 }
0x4177   :  { %v7151_v29 = vsel %vm157_vm1, %v7141_v17, 0.0  ;;  %v7140_v8 = vmul.f32 %v7136_v21, %v7136_v21 }
0x4178   :  { %7152 = vadd.xlane.f32.xlu0 %v7151_v29 }
0x4179   :  { %v7148_v41 = vsel %vm157_vm1, %v7140_v8, 0.0 }
0x417a   :  { %7149 = vadd.xlane.f32.xlu1 %v7148_v41 }
0x41f3   :  { %v7147_v31 = vpop.xlane.xlu0 %7146 }
0x41f4   :  { %v7155_v36 = vmul.f32 0.03125, %v7147_v31  ;;  %v9065_v31 = vtrunc.f32 %v11325_v1 }
0x41f5   :  { %v7144_v40 = vpop.xlane.xlu1 %7143 }
0x41f6   :  { %v7159_v11 = vadd.f32 1e-05, %v7155_v36  ;;  %v7154_v61 = vmul.f32 0.03125, %v7144_v40  ;;  %v11328_v40 = vcvt.f32.s32 %v9065_v31 }
0x41f8   :  { %9408 = vrsqrt.f32 %v7159_v11  ;;  %v7158_v13 = vadd.f32 1e-05, %v7154_v61  ;;  %v11333_v11 = vld [vmem:[%s11453_s0 + $0x38] sm:$0xff] }
0x41f9   :  { %v9067_v61 = vtrunc.f32 %v11333_v11 }
0x41fa   :  { %9410 = vrsqrt.f32 %v7158_v13 }
0x41fb   :  { %v11337_v13 = vcvt.f32.s32 %v9067_v61 }
0x4201   :  { %v7153_v54 = vpop.xlane.xlu0 %7152 }
0x4202   :  { %v7157_v44 = vmul.f32 0.03125, %v7153_v54  ;;  %v11343_v54 = vld [vmem:[%s11453_s0 + $0x28] sm:$0xff]  ;;  %s9457_s0 = smov 127  }
0x4203   :  { %v7150_v46 = vpop.xlane.xlu1 %7149 }
0x4204   :  { %v7161_v6 = vadd.f32 1e-05, %v7157_v44  ;;  %v7156_v9 = vmul.f32 0.03125, %v7150_v46  ;;  %v9063_v44 = vtrunc.f32 %v11343_v54 }
0x4205   :  { %v9409_v53 = vpop.eup %9408 }
0x4206   :  { %v7167_v18 = vmul.f32 %v9409_v53, %v7135_v52  ;;  %9412 = vrsqrt.f32 %v7161_v6  ;;  %v7160_v48 = vadd.f32 1e-05, %v7156_v9  ;;  %v9061_v52 = vtrunc.f32 %v11289_v35 }
0x4207   :  { %v9411_v62 = vpop.eup %9410  ;;  %v11346_v46 = vcvt.f32.s32 %v9063_v44  ;;  %v9456_v9 = vmov 0.0  }
0x4208   :  { %9414 = vrsqrt.f32 %v7160_v48  ;;  %v7166_v50 = vmul.f32 %v9411_v62, %v7134_v42  ;;  %v7175_v23 = vmul.f32 %v7173_v38, %v7167_v18  ;;  %v11294_v42 = vcvt.f32.s32 %v9061_v52 }
0x420a   :  { %v7174_v60 = vmul.f32 %v7173_v38, %v7166_v50  ;;  %v7183_v3 = vadd.f32 %v7181_v22, %v7175_v23 }
0x420c   :  { %v7182_v0 = vadd.f32 %v7181_v22, %v7174_v60 }
0x420e   :  { %9055 = vmatprep.mubr.msk.f32.mxu0 %vm157_vm1, %v7182_v0 }
0x420f   :  { %9056 = vmatmul.mubr.msk.f32.vlgmr.msra.gmra.mxu0 %vm157_vm1, %v7183_v3 }
0x4213   :  { %v9413_v4 = vpop.eup %9412 }
0x4214   :  { %v7169_v58 = vmul.f32 %v9413_v4, %v7137_v43 }
0x4215   :  { %v9415_v56 = vpop.eup %9414 }
0x4216   :  { %v7168_v10 = vmul.f32 %v9415_v56, %v7136_v21  ;;  %v7177_v34 = vmul.f32 %v7173_v38, %v7169_v58 }
0x4218   :  { %v7176_v39 = vmul.f32 %v7173_v38, %v7168_v10  ;;  %v7185_v27 = vadd.f32 %v7181_v22, %v7177_v34 }
0x421a   :  { %v7184_v26 = vadd.f32 %v7181_v22, %v7176_v39 }
0x421c   :  { %9058 = vmatprep.mubr.msk.f32.mxu0 %vm157_vm1, %v7184_v26 }
0x421d   :  { %9059 = vmatmul.mubr.msk.f32.gmra.mxu0 %vm157_vm1, %v7185_v27 }
0x42cf   :  { %v9057_v24 = vpop.f32.mrf.mxu0 }
0x42d0   :  { %v11276_v30 = vadd.f32 %v9057_v24, %v7194_v28 }
0x42d1   :  { %v7273_v57 = vpop.f32.mrf.mxu0 }
0x42d2   :  { %v11278_v2 = vadd.f32 %v7273_v57, %v7194_v28  ;;  %v7299_v45 = vsel %vm157_vm1, %v11276_v30, -inf }
0x42d3   :  { %7300 = vmax.xlane.f32.xlu0 %v7299_v45 }
0x42d4   :  { %v7296_v47 = vsel %vm157_vm1, %v11278_v2, -inf }
0x42d5   :  { %7297 = vmax.xlane.f32.xlu1 %v7296_v47 }
0x42dd   :  { %v9060_v16 = vpop.f32.mrf.mxu0 }
0x42de   :  { %v11284_v55 = vadd.f32 %v9060_v16, %v7194_v28 }
0x42df   :  { %v7283_v51 = vpop.f32.mrf.mxu0 }
0x42e0   :  { %v7305_v25 = vsel %vm157_vm1, %v11284_v55, -inf  ;;  %v11297_v7 = vadd.f32 %v7283_v51, %v7194_v28 }
0x42e1   :  { %7306 = vmax.xlane.f32.xlu0 %v7305_v25 }
0x42e2   :  { %v7302_v19 = vsel %vm157_vm1, %v11297_v7, -inf }
0x42e6   :  { %7347 = vperm.xlu1 %9094, %v11294_v42  }
0x430a   :  { %7303 = vmax.xlane.f32.xlu1 %v7302_v19 }
0x435c   :  { %v11304_v63 = vpop.xlane.xlu0 %7300 }
0x435d   :  { %vm7391_vm6 = vcmp.eq.f32.partialorder %v11276_v30, %v11304_v63  ;;  %v7309_v48 = vsub.f32 %v11276_v30, %v11304_v63 }
0x435e   :  { %v7395_v37 = vsel %vm7391_vm6, %v11302_v33, 32  ;;  %v11309_v49 = vpop.xlane.xlu1 %7297  ;;  %vm7490_vm6 = vcmask 7168  }
0x435f   :  { %vm7390_vm7 = vcmp.eq.f32.partialorder %v11278_v2, %v11309_v49  ;;  %v7413_v43 = vsel %vm157_vm1, %v7395_v37, 2147483647  ;;  %v7314_v22 = vmul.f32 1.442695, %v7309_v48 }
0x4360   :  { %v7394_v15 = vsel %vm7390_vm7, %v11302_v33, 32  ;;  %v7415_v21 = vshra.s32 %v7413_v43, 16  ;;  %v7414_v62 = vand.u32 65535, %v7413_v43  ;;  %v7308_v43 = vsub.f32 %v11278_v2, %v11309_v49 }
0x4361   :  { %v7398_v32 = vsel %vm157_vm1, %v7394_v15, 2147483647  ;;  %9416 = vpow2.f32 %v7314_v22  ;;  %vm7587_vm7 = vcmp.eq.s32.totalorder %v11302_v33, 0 }
0x4362   :  { %v7417_v17 = vcvt.s32.f32 %v7415_v21  ;;  %v7400_v29 = vshra.s32 %v7398_v32, 16  ;;  %v7348_v6 = vpop.permute.xlu1 %7347  ;;  %v7399_v23 = vand.u32 65535, %v7398_v32  ;;  %v7416_v0 = vcvt.s32.f32 %v7414_v62 }
0x4363   :  { %vm7358_vm9 = vcmp.eq.s32.totalorder %v11302_v33, %v7348_v6  ;;  %v7312_v15 = vmul.f32 1.442695, %v7308_v43 }
0x4364   :  { %7418 = vmin.xlane.f32.xlu0 %v7417_v17  ;;  %v7402_v8 = vcvt.s32.f32 %v7400_v29  ;;  %v7871_v53 = vsel %vm7358_vm9, 1.0, %v9456_v9  ;;  %v7401_v58 = vcvt.s32.f32 %v7399_v23  ;;  %vm7594_vm9 = vcmp.eq.s32.totalorder %v11302_v33, 2 }
0x4365   :  { %v7370_v38 = vmul.f32 %v7871_v53, %v11278_v2  ;;  %9418 = vpow2.f32 %v7312_v15 }
0x4366   :  { %7403 = vmin.xlane.f32.xlu1 %v7402_v8 }
0x4367   :  { %v7374_v18 = vsel %vm157_vm1, %v7370_v38, 0.0 }
0x436a   :  { %v11316_v41 = vpop.xlane.xlu0 %7306 }
0x436b   :  { %vm7393_vm8 = vcmp.eq.f32.partialorder %v11284_v55, %v11316_v41 }
0x436c   :  { %v7397_v14 = vsel %vm7393_vm8, %v11302_v33, 32  ;;  %vm7590_vm8 = vcmp.eq.s32.totalorder %v11302_v33, 1 }
0x436d   :  { %v7443_v12 = vsel %vm157_vm1, %v7397_v14, 2147483647 }
0x436e   :  { %v7445_v59 = vshra.s32 %v7443_v12, 16  ;;  %v9417_v5 = vpop.eup %9416  ;;  %v7444_v28 = vand.u32 65535, %v7443_v12 }
0x436f   :  { %v7323_v24 = vsel %vm157_vm1, %v9417_v5, 0.0 }
0x4370   :  { %v7447_v36 = vcvt.s32.f32 %v7445_v59  ;;  %v7446_v57 = vcvt.s32.f32 %v7444_v28 }
0x4372   :  { %7448 = vmin.xlane.f32.xlu0 %v7447_v36  ;;  %v9419_v12 = vpop.eup %9418 }
0x4377   :  { %7353 = vperm.xlu1 %9094, %v11328_v40  }
0x437b   :  { %7356 = vperm.xlu1 %9094, %v11337_v13  }
0x4388   :  { %7350 = vperm.xlu0 %9095, %v11346_v46  }
0x4393   :  { %v11355_v50 = vpop.xlane.xlu1 %7303 }
0x4394   :  { %vm7392_vm0 = vcmp.eq.f32.partialorder %v11297_v7, %v11355_v50  ;;  %v7310_v32 = vsub.f32 %v11297_v7, %v11355_v50 }
0x4396   :  { %v7316_v29 = vmul.f32 1.442695, %v7310_v32 }
0x43a7   :  { %7375 = vadd.xlane.f32.xlu0 %v7374_v18 }
0x43ed   :  { %v11357_v60 = vpop.xlane.xlu0 %7418 }
0x43ee   :  { %vm7420_vm10 = vcmp.eq.f32.partialorder %v7417_v17, %v11357_v60  ;;  %v7396_v17 = vsel %vm7392_vm0, %v11302_v33, 32  ;;  %v7425_v5 = vcvt.f32.s32 %v11357_v60 }
0x43ef   :  { %v11360_v3 = vpop.xlane.xlu1 %7403  ;;  %v7421_v4 = vsel %vm7420_vm10, %v7416_v0, inf }
0x43f0   :  { %vm7405_vm11 = vcmp.eq.f32.partialorder %v7402_v8, %v11360_v3  ;;  %v7428_v8 = vsel %vm157_vm1, %v7396_v17, 2147483647 }
0x43f1   :  { %v7406_v56 = vsel %vm7405_vm11, %v7401_v58, inf  ;;  %v7430_v14 = vshra.s32 %v7428_v8, 16 }
0x43f3   :  { %v7354_v10 = vpop.permute.xlu1 %7353  ;;  %v7432_v2 = vcvt.s32.f32 %v7430_v14 }
0x43f4   :  { %vm7360_vm14 = vcmp.eq.s32.totalorder %v11302_v33, %v7354_v10 }
0x43f5   :  { %v7873_v16 = vsel %vm7360_vm14, 1.0, %v9456_v9 }
0x43f6   :  { %v7372_v51 = vmul.f32 %v7873_v16, %v11297_v7 }
0x43f7   :  { %v7357_v34 = vpop.permute.xlu1 %7356 }
0x43f8   :  { %vm7361_vm12 = vcmp.eq.s32.totalorder %v11302_v33, %v7357_v34  ;;  %v7380_v37 = vsel %vm157_vm1, %v7372_v51, 0.0  ;;  %v7410_v51 = vcvt.f32.s32 %v11360_v3 }
0x43f9   :  { %v7874_v39 = vsel %vm7361_vm12, 1.0, %v9456_v9 }
0x43fa   :  { %v7373_v26 = vmul.f32 %v7874_v39, %v11284_v55 }
0x43fb   :  { %v7449_v20 = vpop.xlane.xlu0 %7448 }
0x43fc   :  { %v7383_v27 = vsel %vm157_vm1, %v7373_v26, 0.0  ;;  %vm7450_vm13 = vcmp.eq.f32.partialorder %v7447_v36, %v7449_v20  ;;  %v7455_v53 = vcvt.f32.s32 %v7449_v20 }
0x43fd   :  { %7384 = vadd.xlane.f32.xlu0 %v7383_v27  ;;  %v7451_v47 = vsel %vm7450_vm13, %v7446_v57, inf }
0x43fe   :  { %v7456_v18 = vshll.u32 %v7455_v53, 16 }
0x4401   :  { %7324 = vadd.xlane.f32.xlu0 %v7323_v24 }
0x4403   :  { %v7351_v45 = vpop.permute.xlu0 %7350 }
0x4404   :  { %vm7359_vm15 = vcmp.eq.s32.totalorder %v11302_v33, %v7351_v45  ;;  %v7426_v45 = vshll.u32 %v7425_v5, 16 }
0x4405   :  { %v7872_v52 = vsel %vm7359_vm15, 1.0, %v9456_v9  ;;  %7452 = vmin.xlane.f32.xlu0 %v7451_v47 }
0x4406   :  { %v7371_v25 = vmul.f32 %v7872_v52, %v11276_v30  ;;  %v7311_v30 = vsub.f32 %v11284_v55, %v11316_v41  ;;  %v7320_v55 = vsel %vm157_vm1, %v9419_v12, 0.0 }
0x4408   :  { %v7377_v19 = vsel %vm157_vm1, %v7371_v25, 0.0  ;;  %v7318_v21 = vmul.f32 1.442695, %v7311_v30 }
0x4409   :  { %7378 = vadd.xlane.f32.xlu1 %v7377_v19 }
0x440a   :  { %9420 = vpow2.f32 %v7318_v21 }
0x440b   :  { %9422 = vpow2.f32 %v7316_v29 }
0x440d   :  { %7381 = vadd.xlane.f32.xlu1 %v7380_v37 }
0x4417   :  { %v9421_v59 = vpop.eup %9420 }
0x4418   :  { %v7329_v31 = vsel %vm157_vm1, %v9421_v59, 0.0  ;;  %v9423_v36 = vpop.eup %9422 }
0x4419   :  { %v7326_v7 = vsel %vm157_vm1, %v9423_v36, 0.0 }
0x441b   :  { %7513 = vrot.lane.b32.xlu0 %v11343_v54, %s9457_s0 }
0x441e   :  { %7511 = vrot.lane.b32.xlu1 %v11289_v35, %s9457_s0 }
0x441f   :  { %7559 = vrot.lane.b32.xlu0 %v11289_v35, %s9458_s8 }
0x4430   :  { %v7376_v61 = vpop.xlane.xlu0 %7375 }
0x4442   :  { %7433 = vmin.xlane.f32.xlu1 %v7432_v2 }
0x4446   :  { %7321 = vadd.xlane.f32.xlu1 %v7320_v55 }
0x444a   :  { %7330 = vadd.xlane.f32.xlu1 %v7329_v31 }
0x444e   :  { %7327 = vadd.xlane.f32.xlu1 %v7326_v7 }
0x4452   :  { %7422 = vmin.xlane.f32.xlu1 %v7421_v4  ;;  %v7429_v4 = vand.u32 65535, %v7428_v8 }
0x4456   :  { %7407 = vmin.xlane.f32.xlu1 %v7406_v56  ;;  %v7431_v56 = vcvt.s32.f32 %v7429_v4 }
0x4467   :  { %7515 = vrot.lane.b32.xlu1 %v11325_v1, %s9457_s0 }
0x4486   :  { %v7385_v44 = vpop.xlane.xlu0 %7384 }
0x448a   :  { %v7325_v6 = vpop.xlane.xlu0 %7324 }
0x448b   :  { %9424 = vlog2.f32 %v7325_v6 }
0x448e   :  { %v7453_v38 = vpop.xlane.xlu0 %7452 }
0x448f   :  { %v7454_v48 = vcvt.f32.s32 %v7453_v38 }
0x4491   :  { %v11397_v62 = vadd.s32 %v7456_v18, %v7454_v48 }
0x4492   :  { %v7379_v23 = vpop.xlane.xlu1 %7378 }
0x4493   :  { %vm7461_vm4 = vcmp.eq.s32.totalorder %v11397_v62, %v11337_v13 }
0x4494   :  { %v7878_v38 = vsel %vm7461_vm4, 1.0, %v9456_v9 }
0x4496   :  { %v7382_v22 = vpop.xlane.xlu1 %7381 }
0x4498   :  { %v9425_v26 = vpop.eup %9424 }
0x4499   :  { %v7335_v20 = vmul.f32 0.6931472, %v9425_v26 }
0x449a   :  { %v7512_v0 = vpop.permute.xlu1 %7511 }
0x449b   :  { %v7341_v47 = vadd.f32 %v7335_v20, %v11304_v63  ;;  %v7411_v63 = vshll.u32 %v7410_v51, 16 }
0x449d   :  { %v7387_v43 = vsub.f32 %v7341_v47, %v7379_v23 }
0x449f   :  { %v7471_v3 = vmul.f32 %v11343_v54, %v7387_v43 }
0x44cb   :  { %v7434_v58 = vpop.xlane.xlu1 %7433 }
0x44cc   :  { %vm7435_vm1 = vcmp.eq.f32.partialorder %v7432_v2, %v7434_v58  ;;  %v7514_v2 = vpop.permute.xlu0 %7513  ;;  %v7440_v36 = vcvt.f32.s32 %v7434_v58 }
0x44cd   :  { %v7436_v10 = vsel %vm7435_vm1, %v7431_v56, inf }
0x44ce   :  { %7437 = vmin.xlane.f32.xlu1 %v7436_v10  ;;  %v7441_v7 = vshll.u32 %v7440_v36, 16 }
0x44cf   :  { %v7322_v34 = vpop.xlane.xlu1 %7321 }
0x44d0   :  { %9426 = vlog2.f32 %v7322_v34 }
0x44d3   :  { %v7331_v39 = vpop.xlane.xlu1 %7330 }
0x44d4   :  { %9428 = vlog2.f32 %v7331_v39 }
0x44d7   :  { %v7328_v27 = vpop.xlane.xlu1 %7327 }
0x44d8   :  { %9430 = vlog2.f32 %v7328_v27 }
0x44db   :  { %v7423_v28 = vpop.xlane.xlu1 %7422 }
0x44dc   :  { %v7424_v24 = vcvt.f32.s32 %v7423_v28 }
0x44dd   :  { %v9427_v57 = vpop.eup %9426 }
0x44de   :  { %v7333_v16 = vmul.f32 0.6931472, %v9427_v57  ;;  %v7427_v52 = vadd.s32 %v7426_v45, %v7424_v24 }
0x44df   :  { %7517 = vrot.lane.b32.xlu1 %v11333_v11, %s9457_s0  ;;  %v7408_v25 = vpop.xlane.xlu1 %7407 }
0x44e0   :  { %v7340_v19 = vadd.f32 %v7333_v16, %v11309_v49  ;;  %v7409_v30 = vcvt.f32.s32 %v7408_v25  ;;  %vm7459_vm2 = vcmp.eq.s32.totalorder %v7427_v52, %v11346_v46 }
0x44e1   :  { %v9429_v37 = vpop.eup %9428  ;;  %v7876_v14 = vsel %vm7459_vm2, 1.0, %v9456_v9 }
0x44e2   :  { %v7386_v60 = vsub.f32 %v7340_v19, %v7376_v61  ;;  %v7339_v15 = vmul.f32 0.6931472, %v9429_v37  ;;  %v7412_v8 = vadd.s32 %v7411_v63, %v7409_v30 }
0x44e3   :  { %7561 = vrot.lane.b32.xlu1 %v11343_v54, %s9458_s8  ;;  %v7516_v31 = vpop.permute.xlu1 %7515 }
0x44e4   :  { %v7343_v21 = vadd.f32 %v7339_v15, %v11316_v41  ;;  %v7470_v32 = vmul.f32 %v11289_v35, %v7386_v60  ;;  %v7524_v41 = vmul.f32 %v7876_v14, %v7514_v2  ;;  %vm7458_vm3 = vcmp.eq.s32.totalorder %v7412_v8, %v11294_v42 }
0x44e5   :  { %v9431_v17 = vpop.eup %9430  ;;  %v7875_v54 = vsel %vm7458_vm3, 1.0, %v9456_v9 }
0x44e6   :  { %v7389_v29 = vsub.f32 %v7343_v21, %v7385_v44  ;;  %v7337_v49 = vmul.f32 0.6931472, %v9431_v17  ;;  %7478 = vrot.lane.b32.xlu0 %v7470_v32, %s9458_s8  ;;  %v7523_v59 = vmul.f32 %v7875_v54, %v7512_v0 }
0x44e7   :  { %7480 = vrot.lane.b32.xlu1 %v7471_v3, %s9458_s8 }
0x44e8   :  { %v7342_v46 = vadd.f32 %v7337_v49, %v11355_v50  ;;  %v7473_v12 = vmul.f32 %v11333_v11, %v7389_v29  ;;  %v7560_v50 = vpop.permute.xlu0 %7559 }
0x44e9   :  { %v7571_v27 = vsel %vm7490_vm6, %v7560_v50, 0.0 }
0x44ea   :  { %v7388_v55 = vsub.f32 %v7342_v46, %v7382_v22  ;;  %7484 = vrot.lane.b32.xlu0 %v7473_v12, %s9458_s8 }
0x44eb   :  { %7533 = vrot.lane.b32.xlu1 %v7524_v41, %s9440_s13 }
0x44ec   :  { %v7472_v35 = vmul.f32 %v11325_v1, %v7388_v55 }
0x44ee   :  { %7482 = vrot.lane.b32.xlu0 %v7472_v35, %s9458_s8 }
0x44f2   :  { %7531 = vrot.lane.b32.xlu0 %v7523_v59, %s9440_s13 }
0x44f6   :  { %7563 = vrot.lane.b32.xlu0 %v11325_v1, %s9458_s8 }
0x4557   :  { %v7438_v42 = vpop.xlane.xlu1 %7437 }
0x4558   :  { %v7439_v61 = vcvt.f32.s32 %v7438_v42  ;;  %v7479_v44 = vpop.permute.xlu0 %7478 }
0x4559   :  { %v7491_v13 = vsel %vm7490_vm6, %v7479_v44, 0.0 }
0x455a   :  { %v7442_v6 = vadd.s32 %v7441_v7, %v7439_v61 }
0x455b   :  { %v7518_v53 = vpop.permute.xlu1 %7517 }
0x455c   :  { %vm7460_vm5 = vcmp.eq.s32.totalorder %v7442_v6, %v11328_v40  ;;  %v7526_v18 = vmul.f32 %v7878_v38, %v7518_v53  ;;  %v7485_v1 = vpop.permute.xlu0 %7484 }
0x455d   :  { %v7877_v48 = vsel %vm7460_vm5, 1.0, %v9456_v9  ;;  %v7496_v56 = vsel %vm7490_vm6, %v7485_v1, 0.0 }
0x455e   :  { %7537 = vrot.lane.b32.xlu1 %v7526_v18, %s9440_s13  ;;  %v7525_v22 = vmul.f32 %v7877_v48, %v7516_v31 }
0x455f   :  { %v7562_v23 = vpop.permute.xlu1 %7561 }
0x4560   :  { %v7483_v0 = vpop.permute.xlu0 %7482  ;;  %v7572_v5 = vsel %vm7490_vm6, %v7562_v23, 0.0 }
0x4561   :  { %v7494_v40 = vsel %vm7490_vm6, %v7483_v0, 0.0  ;;  %v7573_v57 = vadd.f32 %v7572_v5, %v7571_v27 }
0x4562   :  { %7535 = vrot.lane.b32.xlu1 %v7525_v22, %s9440_s13 }
0x4563   :  { %v7481_v4 = vpop.permute.xlu1 %7480 }
0x4564   :  { %v7492_v62 = vsel %vm7490_vm6, %v7481_v4, 0.0  ;;  %v7532_v39 = vpop.permute.xlu0 %7531 }
0x4565   :  { %v7493_v58 = vadd.f32 %v7492_v62, %v7491_v13  ;;  %v7543_v24 = vsel %vm7490_vm6, %v7532_v39, 0.0 }
0x4566   :  { %7565 = vrot.lane.b32.xlu1 %v11333_v11, %s9458_s8 }
0x4567   :  { %v7495_v9 = vadd.f32 %v7494_v40, %v7493_v58  ;;  %v7534_v34 = vpop.permute.xlu1 %7533 }
0x4568   :  { %v7544_v20 = vsel %vm7490_vm6, %v7534_v34, 0.0  ;;  %v7564_v28 = vpop.permute.xlu0 %7563 }
0x4569   :  { %v7497_v10 = vadd.f32 %v7496_v56, %v7495_v9  ;;  %v7545_v45 = vadd.f32 %v7544_v20, %v7543_v24  ;;  %v7574_v47 = vsel %vm7490_vm6, %v7564_v28, 0.0 }
0x456a   :  { %v7575_v51 = vadd.f32 %v7574_v47, %v7573_v57 }
0x456b   :  { %7498 = vadd.xlane.f32.xlu0 %v7497_v10 }
0x45d0   :  { %v7538_v26 = vpop.permute.xlu1 %7537 }
0x45d1   :  { %v7548_v25 = vsel %vm7490_vm6, %v7538_v26, 0.0 }
0x45d4   :  { %v7536_v11 = vpop.permute.xlu1 %7535 }
0x45d5   :  { %v7546_v16 = vsel %vm7490_vm6, %v7536_v11, 0.0 }
0x45d6   :  { %v7547_v52 = vadd.f32 %v7546_v16, %v7545_v45 }
0x45d8   :  { %v7549_v19 = vadd.f32 %v7548_v25, %v7547_v52  ;;  %v7566_v37 = vpop.permute.xlu1 %7565 }
0x45d9   :  { %v7576_v43 = vsel %vm7490_vm6, %v7566_v37, 0.0 }
0x45da   :  { %v7577_v60 = vadd.f32 %v7576_v43, %v7575_v51  ;;  %7550 = vadd.xlane.f32.xlu1 %v7549_v19 }
0x45dc   :  { %7578 = vadd.xlane.f32.xlu0 %v7577_v60 }
0x45f4   :  { %v7499_v15 = vpop.xlane.xlu0 %7498 }
0x45f5   :  { %v7500_v30 = vrot.slane %v7499_v15, 4 }
0x45f7   :  { %v7501_v63 = vadd.f32 %v7500_v30, %v7499_v15 }
0x45f9   :  { %v7502_v21 = vrot.slane %v7501_v63, 2 }
0x45fb   :  { %v7503_v32 = vadd.f32 %v7502_v21, %v7501_v63 }
0x45fd   :  { %v7504_v17 = vrot.slane %v7503_v32, 1 }
0x45ff   :  { %v7505_v3 = vadd.f32 %v7504_v17, %v7503_v32 }
0x4601   :  { %9069 = vpush %v7505_v3 }
0x4632   :  { %s9070_s13 = spop %9069 }
0x4633   :  { %v7588_v36 = vstv %s9070_s13 }
0x4634   :  { %v7589_v7 = vsel %vm7587_vm7, %v7588_v36, 0.0 }
0x4663   :  { %v7551_v29 = vpop.xlane.xlu1 %7550 }
0x4664   :  { %v7552_v49 = vrot.slane %v7551_v29, 4 }
0x4665   :  { %v7579_v8 = vpop.xlane.xlu0 %7578 }
0x4666   :  { %v7553_v14 = vadd.f32 %v7552_v49, %v7551_v29  ;;  %v7580_v2 = vrot.slane %v7579_v8, 4 }
0x4668   :  { %v7554_v46 = vrot.slane %v7553_v14, 2  ;;  %v7581_v12 = vadd.f32 %v7580_v2, %v7579_v8 }
0x466a   :  { %v7555_v41 = vadd.f32 %v7554_v46, %v7553_v14  ;;  %v7582_v55 = vrot.slane %v7581_v12, 2 }
0x466c   :  { %v7583_v35 = vadd.f32 %v7582_v55, %v7581_v12  ;;  %v7556_v54 = vrot.slane %v7555_v41, 1 }
0x466e   :  { %v7557_v59 = vadd.f32 %v7556_v54, %v7555_v41  ;;  %v7584_v50 = vrot.slane %v7583_v35, 1 }
0x4670   :  { %9071 = vpush %v7557_v59  ;;  %v7585_v31 = vadd.f32 %v7584_v50, %v7583_v35 }
0x4672   :  { %9073 = vpush %v7585_v31 }
0x46a1   :  { %s9072_s9 = spop %9071 }
0x46a2   :  { %v7591_v42 = vstv %s9072_s9 }
0x46a3   :  { %v7592_v61 = vsel %vm7590_vm8, %v7591_v42, 0.0  ;;  %s9074_s10 = spop %9073 }
0x46a4   :  { %v7593_v44 = vadd.f32 %v7592_v61, %v7589_v7  ;;  %v7595_v6 = vstv %s9074_s10 }
0x46a5   :  { %v7596_v53 = vsel %vm7594_vm9, %v7595_v6, 0.0 }
0x46a6   :  { %v7597_v38 = vadd.f32 %v7596_v53, %v7593_v44 }
0x46a8   :  { %7598 = vst [vmem:[%s11454_s2] sm:$0x1] %v7597_v38 }

</bundles_post_ra>
